<compile_context>
chip_gen: v5e
topology: v5e:2x2
jax: 0.10.0
libtpu: 0.0.40
codegen_flags: <defaults>
</compile_context>

<pallas_src>
import functools

import numpy as np
import jax
import jax.numpy as jnp
from jax.experimental import pallas as pl
from jax.experimental.pallas import tpu as pltpu


# --------------------------------------------------------------------------- #
# Fused LeNet forward kernel: one grid step = one block of `nb` images.
# --------------------------------------------------------------------------- #
def _lenet_kernel(x_ref, w1_ref, b1_ref, s1_ref, t1_ref,
                  w2_ref, b2_ref, s2_ref, t2_ref,
                  fw1_ref, fb1_ref, fw2_ref, fb2_ref, fw3_ref, fb3_ref,
                  out_ref,
                  p1_ref, x2_ref, p2_ref, flat_ref, *, nb):
    f32 = jnp.float32

    # ---- stage 1 im2col: 8x8 super-window (pool quadrants + output parity are
    #      folded into the weights).  64 aligned (56, 8) VMEM->VMEM copies/image.
    for i in range(nb):
        for u in range(8):
            for v in range(8):
                ro = (u // 4) * 8 + (v // 4)            # source row offset (s2d-by-4)
                gc = ((u % 4) * 4 + (v % 4)) * 8        # source channel-group column
                tc = (u * 8 + v) * 8                    # dest tap column
                p1_ref[pl.ds(i * 56, 56), pl.ds(tc, 8)] = (
                    x_ref[i, pl.ds(ro, 56), pl.ds(gc, 8)])

    # ---- conv1 + bias + ReLU + 2x2 maxpool + BN1 (incremental quadrant max:
    #      pool(relu(conv+b)) == relu(max_q(conv)+b) since ReLU is monotone).
    p1 = p1_ref[...]
    acc = jnp.dot(p1, w1_ref[0], preferred_element_type=f32)
    for q in range(1, 4):
        acc = jnp.maximum(acc, jnp.dot(p1, w1_ref[q], preferred_element_type=f32))
    y1 = jnp.maximum(acc + b1_ref[...], 0.0) * s1_ref[...] + t1_ref[...]

    # y1 row (i*56 + a*8 + b), col (parity*8 + ch) already IS the space-to-depth
    # layout of the 14x14x6 stage-2 input: just add 8 zero pad rows per image.
    for i in range(nb):
        x2_ref[pl.ds(i * 64, 56), :] = y1[i * 56:(i + 1) * 56, :]
        x2_ref[pl.ds(i * 64 + 56, 8), :] = jnp.zeros((8, 128), f32)

    # ---- stage 2 im2col: 6x6 window (pool quadrants folded into the weights).
    for i in range(nb):
        for u in range(6):
            for v in range(6):
                ro = (u // 2) * 8 + (v // 2)
                gc = ((u % 2) * 2 + (v % 2)) * 8
                tc = (u * 6 + v) * 8
                p2_ref[pl.ds(i * 40, 40), pl.ds(tc, 8)] = (
                    x2_ref[pl.ds(i * 64 + ro, 40), pl.ds(gc, 8)])

    # ---- conv2 + bias + ReLU + 2x2 maxpool + BN2.
    p2 = p2_ref[...]
    acc2 = jnp.dot(p2, w2_ref[0], preferred_element_type=f32)
    for q in range(1, 4):
        acc2 = jnp.maximum(acc2, jnp.dot(p2, w2_ref[q], preferred_element_type=f32))
    y2 = jnp.maximum(acc2 + b2_ref[...], 0.0) * s2_ref[...] + t2_ref[...]

    # ---- flatten: per-image (40, 128) -> one 640-wide row (16 ch per position).
    #      fc1's weight rows are pre-permuted (and zeroed for garbage positions).
    for i in range(nb):
        for r in range(40):
            flat_ref[pl.ds(i, 1), pl.ds(r * 16, 16)] = (
                y2[i * 40 + r:i * 40 + r + 1, 0:16])

    # ---- fc1 + ReLU -> fc2 + ReLU -> fc3.   Dropout = identity (eval mode).
    h = jnp.dot(flat_ref[...], fw1_ref[...], preferred_element_type=f32)
    h = jnp.maximum(h + fb1_ref[...], 0.0)
    h = jnp.dot(h, fw2_ref[...], preferred_element_type=f32)
    h = jnp.maximum(h + fb2_ref[...], 0.0)
    out_ref[...] = (jnp.dot(h, fw3_ref[...], preferred_element_type=f32)
                    + fb3_ref[...])


def _pick_block(batch):
    """Images per grid step: <= 8, divides batch, prefer >= 2 grid steps (v7x)."""
    if batch <= 1:
        return 1
    best = 1
    for d in range(1, min(8, batch // 2) + 1):
        if batch % d == 0:
            best = d
    return best


def lenet_pallas_call(xs, pp, nb):
    batch = xs.shape[0]
    steps = batch // nb
    kernel = functools.partial(_lenet_kernel, nb=nb)

    flops = 2 * batch * (4 * 56 * 512 * 128 + 4 * 40 * 288 * 128
                         + 640 * 128 + 128 * 128 + 128 * 128)
    weight_bytes = 4 * (4 * 512 * 128 + 4 * 288 * 128 + 640 * 128
                        + 2 * 128 * 128 + 9 * 128)
    bytes_accessed = 4 * (xs.size + batch * 128) + weight_bytes

    const2 = lambda b: (0, 0)
    const3 = lambda b: (0, 0, 0)

    out = pl.pallas_call(
        kernel,
        out_shape=jax.ShapeDtypeStruct((steps, nb, 128), jnp.float32),
        grid=(steps,),
        in_specs=[
            pl.BlockSpec((nb, 72, 128), lambda b: (b, 0, 0)),   # s2d-by-4 input
            pl.BlockSpec((4, 512, 128), const3),                # conv1 quadrant weights
            pl.BlockSpec((1, 128), const2),                     # conv1 bias
            pl.BlockSpec((1, 128), const2),                     # bn1 scale
            pl.BlockSpec((1, 128), const2),                     # bn1 shift
            pl.BlockSpec((4, 288, 128), const3),                # conv2 quadrant weights
            pl.BlockSpec((1, 128), const2),                     # conv2 bias
            pl.BlockSpec((1, 128), const2),                     # bn2 scale
            pl.BlockSpec((1, 128), const2),                     # bn2 shift
            pl.BlockSpec((640, 128), const2),                   # fc1 (permuted rows)
            pl.BlockSpec((1, 128), const2),                     # fc1 bias
            pl.BlockSpec((128, 128), const2),                   # fc2
            pl.BlockSpec((1, 128), const2),                     # fc2 bias
            pl.BlockSpec((128, 128), const2),                   # fc3
            pl.BlockSpec((1, 128), const2),                     # fc3 bias
        ],
        out_specs=pl.BlockSpec((None, nb, 128), lambda b: (b, 0, 0)),
        scratch_shapes=[
            pltpu.VMEM((nb * 56, 512), jnp.float32),   # stage-1 im2col patches
            pltpu.VMEM((nb * 64, 128), jnp.float32),   # stage-1 out / stage-2 s2d input
            pltpu.VMEM((nb * 40, 288), jnp.float32),   # stage-2 im2col patches
            pltpu.VMEM((nb, 640), jnp.float32),        # flattened fc1 input
        ],
        compiler_params=pltpu.CompilerParams(dimension_semantics=("parallel",)),
        cost_estimate=pl.CostEstimate(flops=flops, transcendentals=0,
                                      bytes_accessed=bytes_accessed),
    )(xs, pp['w1q'], pp['b1v'], pp['s1v'], pp['t1v'],
      pp['w2q'], pp['b2v'], pp['s2v'], pp['t2v'],
      pp['w1p'], pp['b1p'], pp['w2p'], pp['b2p'], pp['w3p'], pp['b3p'])
    return out.reshape(batch, 128)


# ------------------------------- glue (JAX) --------------------------------- #
def _space_to_depth4(x_nchw):
    """(B, 3, 32, 32) NCHW -> (B, 72, 128): rows = (h//4)*8 + w//4 (padded to 72),
    cols = ((h%4)*4 + w%4)*8 + c  (channels zero-padded 3 -> 8)."""
    b = x_nchw.shape[0]
    x = jnp.transpose(x_nchw, (0, 2, 3, 1)).astype(jnp.float32)        # NHWC
    x = x.reshape(b, 8, 4, 8, 4, 3).transpose(0, 1, 3, 2, 4, 5)        # (B,8,8,4,4,3)
    x = jnp.pad(x, ((0, 0), (0, 0), (0, 0), (0, 0), (0, 0), (0, 5)))   # c: 3 -> 8
    x = x.reshape(b, 64, 128)
    return jnp.pad(x, ((0, 0), (0, 8), (0, 0)))                        # rows: 64 -> 72


def lenet_forward(x_nchw, pp):
    """(B, 3, 32, 32) NCHW -> logits (B, 10).  Matches LeNet.forward in eval mode."""
    batch = x_nchw.shape[0]
    nb = _pick_block(batch)
    xs = _space_to_depth4(x_nchw)
    logits = lenet_pallas_call(xs, pp, nb)
    return logits[:, :10]


# ------------------------- one-time parameter prep --------------------------- #
def _bn_fold(gamma, beta, mean, var, eps=1e-5):
    scale = np.asarray(gamma, np.float32) / np.sqrt(np.asarray(var, np.float32) + eps)
    shift = np.asarray(beta, np.float32) - np.asarray(mean, np.float32) * scale
    return scale, shift


def prepare_params(p):
    """Host-side, one-time: embed pool-quadrant/output-parity offsets into the conv
    weights, fold inference BatchNorm, permute fc1 rows to the kernel layout, and
    zero-pad everything to 8-lane channel slots / 128 output lanes."""
    f32 = np.float32

    # conv1: quadrant + output-parity folded weight set (4, 8*8*8, 128).
    w1 = np.asarray(p['conv1_w'], f32)                       # (6, 3, 5, 5) OIHW
    W1 = np.zeros((4, 512, 128), f32)
    for dy in range(2):
        for dx in range(2):
            q = dy * 2 + dx
            for py in range(2):
                for px in range(2):
                    col0 = (py * 2 + px) * 8
                    for kh in range(5):
                        for kw in range(5):
                            u, v = 2 * py + dy + kh, 2 * px + dx + kw
                            row0 = (u * 8 + v) * 8
                            W1[q, row0:row0 + 3, col0:col0 + 6] = w1[:, :, kh, kw].T
    s1, t1 = _bn_fold(p['bn1_gamma'], p['bn1_beta'], p['bn1_mean'], p['bn1_var'])
    b1 = np.asarray(p['conv1_b'], f32)
    b1v = np.zeros((1, 128), f32); s1v = np.zeros((1, 128), f32); t1v = np.zeros((1, 128), f32)
    for g in range(4):
        b1v[0, g * 8:g * 8 + 6] = b1
        s1v[0, g * 8:g * 8 + 6] = s1
        t1v[0, g * 8:g * 8 + 6] = t1

    # conv2: quadrant-folded weight set (4, 6*6*8, 128).
    w2 = np.asarray(p['conv2_w'], f32)                       # (16, 6, 5, 5)
    W2 = np.zeros((4, 288, 128), f32)
    for dy in range(2):
        for dx in range(2):
            q = dy * 2 + dx
            for kh in range(5):
                for kw in range(5):
                    u, v = dy + kh, dx + kw
                    row0 = (u * 6 + v) * 8
                    W2[q, row0:row0 + 6, 0:16] = w2[:, :, kh, kw].T
    s2, t2 = _bn_fold(p['bn2_gamma'], p['bn2_beta'], p['bn2_mean'], p['bn2_var'])
    b2v = np.zeros((1, 128), f32); s2v = np.zeros((1, 128), f32); t2v = np.zeros((1, 128), f32)
    b2v[0, :16] = np.asarray(p['conv2_b'], f32); s2v[0, :16] = s2; t2v[0, :16] = t2

    # fc1: rows permuted to the kernel's y2 layout (row r = oy*8+ox, 16 ch each);
    # garbage positions (ox >= 5) keep zero rows.  Stored convention: (in, out).
    fw1 = np.asarray(p['fc1_w'], f32)                        # (400, 120)
    W1p = np.zeros((640, 128), f32)
    for oy in range(5):
        for ox in range(5):
            for c in range(16):
                W1p[(oy * 8 + ox) * 16 + c, :120] = fw1[c * 25 + oy * 5 + ox]
    b1p = np.zeros((1, 128), f32); b1p[0, :120] = np.asarray(p['fc1_b'], f32)
    W2p = np.zeros((128, 128), f32); W2p[:120, :84] = np.asarray(p['fc2_w'], f32)
    b2p = np.zeros((1, 128), f32); b2p[0, :84] = np.asarray(p['fc2_b'], f32)
    W3p = np.zeros((128, 128), f32); W3p[:84, :10] = np.asarray(p['fc3_w'], f32)
    b3p = np.zeros((1, 128), f32); b3p[0, :10] = np.asarray(p['fc3_b'], f32)

    j = jnp.asarray
    return dict(w1q=j(W1), b1v=j(b1v), s1v=j(s1v), t1v=j(t1v),
                w2q=j(W2), b2v=j(b2v), s2v=j(s2v), t2v=j(t2v),
                w1p=j(W1p), b1p=j(b1p), w2p=j(W2p), b2p=j(b2p),
                w3p=j(W3p), b3p=j(b3p))


# ------------------------------ param init ---------------------------------- #
def init_params(key):
    ks = jax.random.split(key, 15)

    def n(k, shape, scale=0.1):
        return scale * jax.random.normal(k, shape, dtype=jnp.float32)

    p = {
        'conv1_w': n(ks[0], (6, 3, 5, 5)),        # OIHW like nn.Conv2d
        'conv1_b': n(ks[1], (6,)),
        'bn1_gamma': 1.0 + n(ks[2], (6,)),
        'bn1_beta': n(ks[3], (6,)),
        'bn1_mean': n(ks[4], (6,)),
        'bn1_var': 0.5 + jnp.abs(n(ks[5], (6,), 1.0)),
        'conv2_w': n(ks[6], (16, 6, 5, 5)),
        'conv2_b': n(ks[7], (16,)),
        'bn2_gamma': 1.0 + n(ks[8], (16,)),
        'bn2_beta': n(ks[9], (16,)),
        'bn2_mean': n(ks[10], (16,)),
        'bn2_var': 0.5 + jnp.abs(n(ks[11], (16,), 1.0)),
        'fc1_w': n(ks[12], (16 * 5 * 5, 120)),    # stored (in, out)
        'fc1_b': jnp.zeros((120,), jnp.float32),
        'fc2_w': n(ks[13], (120, 84)),
        'fc2_b': jnp.zeros((84,), jnp.float32),
        'fc3_w': n(ks[14], (84, 10)),
        'fc3_b': jnp.zeros((10,), jnp.float32),
    }
    return {k: v.astype(jnp.float32) for k, v in p.items()}


# --------------------------------- main -------------------------------------- #
if __name__ == "__main__":
    key = jax.random.PRNGKey(0)
    k_x, k_p = jax.random.split(key)

    x = jax.random.normal(k_x, (2, 3, 32, 32), dtype=jnp.float32)   # NCHW, batch=2
    params = init_params(k_p)
    prepared = prepare_params(params)          # one-time host-side weight prep

    fwd = jax.jit(lenet_forward)
    out = jax.block_until_ready(fwd(x, prepared))

    assert out.shape == (2, 10), out.shape
    assert out.dtype == jnp.float32
    assert bool(jnp.all(jnp.isfinite(out)))
    print("KERNEL_OK")
</pallas_src>

<mosaic_0001>
module attributes {stable_mosaic.version = 11 : i64} {
  func.func @_lenet_kernel(%arg0: i32, %arg1: memref<1x72x128xf32, #tpu.memory_space<vmem>>, %arg2: memref<4x512x128xf32, #tpu.memory_space<vmem>>, %arg3: memref<1x128xf32, #tpu.memory_space<vmem>>, %arg4: memref<1x128xf32, #tpu.memory_space<vmem>>, %arg5: memref<1x128xf32, #tpu.memory_space<vmem>>, %arg6: memref<4x288x128xf32, #tpu.memory_space<vmem>>, %arg7: memref<1x128xf32, #tpu.memory_space<vmem>>, %arg8: memref<1x128xf32, #tpu.memory_space<vmem>>, %arg9: memref<1x128xf32, #tpu.memory_space<vmem>>, %arg10: memref<640x128xf32, #tpu.memory_space<vmem>>, %arg11: memref<1x128xf32, #tpu.memory_space<vmem>>, %arg12: memref<128x128xf32, #tpu.memory_space<vmem>>, %arg13: memref<1x128xf32, #tpu.memory_space<vmem>>, %arg14: memref<128x128xf32, #tpu.memory_space<vmem>>, %arg15: memref<1x128xf32, #tpu.memory_space<vmem>>, %arg16: memref<1x1x128xf32, #tpu.memory_space<vmem>>, %arg17: memref<56x512xf32, #tpu.memory_space<vmem>>, %arg18: memref<64x128xf32, #tpu.memory_space<vmem>>, %arg19: memref<40x288xf32, #tpu.memory_space<vmem>>, %arg20: memref<1x640xf32, #tpu.memory_space<vmem>>) attributes {dimension_semantics = [#tpu.dimension_semantics<parallel>], iteration_bounds = array<i64: 2>, scalar_prefetch = 0 : i64, scratch_operands = 4 : i64, tpu.core_type = #tpu.core_type<tc>, window_params = [{transform_indices = @transform_0, window_bounds = array<i64: 1, 72, 128>}, {pipeline_mode = #tpu.pipeline_mode<synchronous>, transform_indices = @transform_1, window_bounds = array<i64: 4, 512, 128>}, {pipeline_mode = #tpu.pipeline_mode<synchronous>, transform_indices = @transform_2, window_bounds = array<i64: 1, 128>}, {pipeline_mode = #tpu.pipeline_mode<synchronous>, transform_indices = @transform_3, window_bounds = array<i64: 1, 128>}, {pipeline_mode = #tpu.pipeline_mode<synchronous>, transform_indices = @transform_4, window_bounds = array<i64: 1, 128>}, {pipeline_mode = #tpu.pipeline_mode<synchronous>, transform_indices = @transform_5, window_bounds = array<i64: 4, 288, 128>}, {pipeline_mode = #tpu.pipeline_mode<synchronous>, transform_indices = @transform_6, window_bounds = array<i64: 1, 128>}, {pipeline_mode = #tpu.pipeline_mode<synchronous>, transform_indices = @transform_7, window_bounds = array<i64: 1, 128>}, {pipeline_mode = #tpu.pipeline_mode<synchronous>, transform_indices = @transform_8, window_bounds = array<i64: 1, 128>}, {pipeline_mode = #tpu.pipeline_mode<synchronous>, transform_indices = @transform_9, window_bounds = array<i64: 640, 128>}, {pipeline_mode = #tpu.pipeline_mode<synchronous>, transform_indices = @transform_10, window_bounds = array<i64: 1, 128>}, {pipeline_mode = #tpu.pipeline_mode<synchronous>, transform_indices = @transform_11, window_bounds = array<i64: 128, 128>}, {pipeline_mode = #tpu.pipeline_mode<synchronous>, transform_indices = @transform_12, window_bounds = array<i64: 1, 128>}, {pipeline_mode = #tpu.pipeline_mode<synchronous>, transform_indices = @transform_13, window_bounds = array<i64: 128, 128>}, {pipeline_mode = #tpu.pipeline_mode<synchronous>, transform_indices = @transform_14, window_bounds = array<i64: 1, 128>}, {transform_indices = @transform_15, window_bounds = array<i64: 1, 1, 128>}]} {
    %c0 = arith.constant 0 : index
    %c0_0 = arith.constant 0 : index
    %c0_1 = arith.constant 0 : index
    %0 = vector.load %arg1[%c0, %c0_0, %c0_1] : memref<1x72x128xf32, #tpu.memory_space<vmem>>, vector<1x56x8xf32>
    %1 = vector.shape_cast %0 : vector<1x56x8xf32> to vector<56x8xf32>
    %c0_2 = arith.constant 0 : index
    %c0_3 = arith.constant 0 : index
    %2 = vector.load %arg17[%c0_2, %c0_3] : memref<56x512xf32, #tpu.memory_space<vmem>>, vector<56x8xf32>
    tpu.vector_store %arg17[%c0_2, %c0_3], %1 {strides = array<i32>} : memref<56x512xf32, #tpu.memory_space<vmem>>, vector<56x8xf32>,
    %c0_4 = arith.constant 0 : index
    %c0_5 = arith.constant 0 : index
    %c8 = arith.constant 8 : index
    %3 = vector.load %arg1[%c0_4, %c0_5, %c8] : memref<1x72x128xf32, #tpu.memory_space<vmem>>, vector<1x56x8xf32>
    %4 = vector.shape_cast %3 : vector<1x56x8xf32> to vector<56x8xf32>
    %c0_6 = arith.constant 0 : index
    %c8_7 = arith.constant 8 : index
    %5 = vector.load %arg17[%c0_6, %c8_7] : memref<56x512xf32, #tpu.memory_space<vmem>>, vector<56x8xf32>
    tpu.vector_store %arg17[%c0_6, %c8_7], %4 {strides = array<i32>} : memref<56x512xf32, #tpu.memory_space<vmem>>, vector<56x8xf32>,
    %c0_8 = arith.constant 0 : index
    %c0_9 = arith.constant 0 : index
    %c16 = arith.constant 16 : index
    %6 = vector.load %arg1[%c0_8, %c0_9, %c16] : memref<1x72x128xf32, #tpu.memory_space<vmem>>, vector<1x56x8xf32>
    %7 = vector.shape_cast %6 : vector<1x56x8xf32> to vector<56x8xf32>
    %c0_10 = arith.constant 0 : index
    %c16_11 = arith.constant 16 : index
    %8 = vector.load %arg17[%c0_10, %c16_11] : memref<56x512xf32, #tpu.memory_space<vmem>>, vector<56x8xf32>
    tpu.vector_store %arg17[%c0_10, %c16_11], %7 {strides = array<i32>} : memref<56x512xf32, #tpu.memory_space<vmem>>, vector<56x8xf32>,
    %c0_12 = arith.constant 0 : index
    %c0_13 = arith.constant 0 : index
    %c24 = arith.constant 24 : index
    %9 = vector.load %arg1[%c0_12, %c0_13, %c24] : memref<1x72x128xf32, #tpu.memory_space<vmem>>, vector<1x56x8xf32>
    %10 = vector.shape_cast %9 : vector<1x56x8xf32> to vector<56x8xf32>
    %c0_14 = arith.constant 0 : index
    %c24_15 = arith.constant 24 : index
    %11 = vector.load %arg17[%c0_14, %c24_15] : memref<56x512xf32, #tpu.memory_space<vmem>>, vector<56x8xf32>
    tpu.vector_store %arg17[%c0_14, %c24_15], %10 {strides = array<i32>} : memref<56x512xf32, #tpu.memory_space<vmem>>, vector<56x8xf32>,
    %c0_16 = arith.constant 0 : index
    %c1 = arith.constant 1 : index
    %c0_17 = arith.constant 0 : index
    %12 = vector.load %arg1[%c0_16, %c1, %c0_17] : memref<1x72x128xf32, #tpu.memory_space<vmem>>, vector<1x56x8xf32>
    %13 = vector.shape_cast %12 : vector<1x56x8xf32> to vector<56x8xf32>
    %c0_18 = arith.constant 0 : index
    %c32 = arith.constant 32 : index
    %14 = vector.load %arg17[%c0_18, %c32] : memref<56x512xf32, #tpu.memory_space<vmem>>, vector<56x8xf32>
    tpu.vector_store %arg17[%c0_18, %c32], %13 {strides = array<i32>} : memref<56x512xf32, #tpu.memory_space<vmem>>, vector<56x8xf32>,
    %c0_19 = arith.constant 0 : index
    %c1_20 = arith.constant 1 : index
    %c8_21 = arith.constant 8 : index
    %15 = vector.load %arg1[%c0_19, %c1_20, %c8_21] : memref<1x72x128xf32, #tpu.memory_space<vmem>>, vector<1x56x8xf32>
    %16 = vector.shape_cast %15 : vector<1x56x8xf32> to vector<56x8xf32>
    %c0_22 = arith.constant 0 : index
    %c40 = arith.constant 40 : index
    %17 = vector.load %arg17[%c0_22, %c40] : memref<56x512xf32, #tpu.memory_space<vmem>>, vector<56x8xf32>
    tpu.vector_store %arg17[%c0_22, %c40], %16 {strides = array<i32>} : memref<56x512xf32, #tpu.memory_space<vmem>>, vector<56x8xf32>,
    %c0_23 = arith.constant 0 : index
    %c1_24 = arith.constant 1 : index
    %c16_25 = arith.constant 16 : index
    %18 = vector.load %arg1[%c0_23, %c1_24, %c16_25] : memref<1x72x128xf32, #tpu.memory_space<vmem>>, vector<1x56x8xf32>
    %19 = vector.shape_cast %18 : vector<1x56x8xf32> to vector<56x8xf32>
    %c0_26 = arith.constant 0 : index
    %c48 = arith.constant 48 : index
    %20 = vector.load %arg17[%c0_26, %c48] : memref<56x512xf32, #tpu.memory_space<vmem>>, vector<56x8xf32>
    tpu.vector_store %arg17[%c0_26, %c48], %19 {strides = array<i32>} : memref<56x512xf32, #tpu.memory_space<vmem>>, vector<56x8xf32>,
    %c0_27 = arith.constant 0 : index
    %c1_28 = arith.constant 1 : index
    %c24_29 = arith.constant 24 : index
    %21 = vector.load %arg1[%c0_27, %c1_28, %c24_29] : memref<1x72x128xf32, #tpu.memory_space<vmem>>, vector<1x56x8xf32>
    %22 = vector.shape_cast %21 : vector<1x56x8xf32> to vector<56x8xf32>
    %c0_30 = arith.constant 0 : index
    %c56 = arith.constant 56 : index
    %23 = vector.load %arg17[%c0_30, %c56] : memref<56x512xf32, #tpu.memory_space<vmem>>, vector<56x8xf32>
    tpu.vector_store %arg17[%c0_30, %c56], %22 {strides = array<i32>} : memref<56x512xf32, #tpu.memory_space<vmem>>, vector<56x8xf32>,
    %c0_31 = arith.constant 0 : index
    %c0_32 = arith.constant 0 : index
    %c32_33 = arith.constant 32 : index
    %24 = vector.load %arg1[%c0_31, %c0_32, %c32_33] : memref<1x72x128xf32, #tpu.memory_space<vmem>>, vector<1x56x8xf32>
    %25 = vector.shape_cast %24 : vector<1x56x8xf32> to vector<56x8xf32>
    %c0_34 = arith.constant 0 : index
    %c64 = arith.constant 64 : index
    %26 = vector.load %arg17[%c0_34, %c64] : memref<56x512xf32, #tpu.memory_space<vmem>>, vector<56x8xf32>
    tpu.vector_store %arg17[%c0_34, %c64], %25 {strides = array<i32>} : memref<56x512xf32, #tpu.memory_space<vmem>>, vector<56x8xf32>,
    %c0_35 = arith.constant 0 : index
    %c0_36 = arith.constant 0 : index
    %c40_37 = arith.constant 40 : index
    %27 = vector.load %arg1[%c0_35, %c0_36, %c40_37] : memref<1x72x128xf32, #tpu.memory_space<vmem>>, vector<1x56x8xf32>
    %28 = vector.shape_cast %27 : vector<1x56x8xf32> to vector<56x8xf32>
    %c0_38 = arith.constant 0 : index
    %c72 = arith.constant 72 : index
    %29 = vector.load %arg17[%c0_38, %c72] : memref<56x512xf32, #tpu.memory_space<vmem>>, vector<56x8xf32>
    tpu.vector_store %arg17[%c0_38, %c72], %28 {strides = array<i32>} : memref<56x512xf32, #tpu.memory_space<vmem>>, vector<56x8xf32>,
    %c0_39 = arith.constant 0 : index
    %c0_40 = arith.constant 0 : index
    %c48_41 = arith.constant 48 : index
    %30 = vector.load %arg1[%c0_39, %c0_40, %c48_41] : memref<1x72x128xf32, #tpu.memory_space<vmem>>, vector<1x56x8xf32>
    %31 = vector.shape_cast %30 : vector<1x56x8xf32> to vector<56x8xf32>
    %c0_42 = arith.constant 0 : index
    %c80 = arith.constant 80 : index
    %32 = vector.load %arg17[%c0_42, %c80] : memref<56x512xf32, #tpu.memory_space<vmem>>, vector<56x8xf32>
    tpu.vector_store %arg17[%c0_42, %c80], %31 {strides = array<i32>} : memref<56x512xf32, #tpu.memory_space<vmem>>, vector<56x8xf32>,
    %c0_43 = arith.constant 0 : index
    %c0_44 = arith.constant 0 : index
    %c56_45 = arith.constant 56 : index
    %33 = vector.load %arg1[%c0_43, %c0_44, %c56_45] : memref<1x72x128xf32, #tpu.memory_space<vmem>>, vector<1x56x8xf32>
    %34 = vector.shape_cast %33 : vector<1x56x8xf32> to vector<56x8xf32>
    %c0_46 = arith.constant 0 : index
    %c88 = arith.constant 88 : index
    %35 = vector.load %arg17[%c0_46, %c88] : memref<56x512xf32, #tpu.memory_space<vmem>>, vector<56x8xf32>
    tpu.vector_store %arg17[%c0_46, %c88], %34 {strides = array<i32>} : memref<56x512xf32, #tpu.memory_space<vmem>>, vector<56x8xf32>,
    %c0_47 = arith.constant 0 : index
    %c1_48 = arith.constant 1 : index
    %c32_49 = arith.constant 32 : index
    %36 = vector.load %arg1[%c0_47, %c1_48, %c32_49] : memref<1x72x128xf32, #tpu.memory_space<vmem>>, vector<1x56x8xf32>
    %37 = vector.shape_cast %36 : vector<1x56x8xf32> to vector<56x8xf32>
    %c0_50 = arith.constant 0 : index
    %c96 = arith.constant 96 : index
    %38 = vector.load %arg17[%c0_50, %c96] : memref<56x512xf32, #tpu.memory_space<vmem>>, vector<56x8xf32>
    tpu.vector_store %arg17[%c0_50, %c96], %37 {strides = array<i32>} : memref<56x512xf32, #tpu.memory_space<vmem>>, vector<56x8xf32>,
    %c0_51 = arith.constant 0 : index
    %c1_52 = arith.constant 1 : index
    %c40_53 = arith.constant 40 : index
    %39 = vector.load %arg1[%c0_51, %c1_52, %c40_53] : memref<1x72x128xf32, #tpu.memory_space<vmem>>, vector<1x56x8xf32>
    %40 = vector.shape_cast %39 : vector<1x56x8xf32> to vector<56x8xf32>
    %c0_54 = arith.constant 0 : index
    %c104 = arith.constant 104 : index
    %41 = vector.load %arg17[%c0_54, %c104] : memref<56x512xf32, #tpu.memory_space<vmem>>, vector<56x8xf32>
    tpu.vector_store %arg17[%c0_54, %c104], %40 {strides = array<i32>} : memref<56x512xf32, #tpu.memory_space<vmem>>, vector<56x8xf32>,
    %c0_55 = arith.constant 0 : index
    %c1_56 = arith.constant 1 : index
    %c48_57 = arith.constant 48 : index
    %42 = vector.load %arg1[%c0_55, %c1_56, %c48_57] : memref<1x72x128xf32, #tpu.memory_space<vmem>>, vector<1x56x8xf32>
    %43 = vector.shape_cast %42 : vector<1x56x8xf32> to vector<56x8xf32>
    %c0_58 = arith.constant 0 : index
    %c112 = arith.constant 112 : index
    %44 = vector.load %arg17[%c0_58, %c112] : memref<56x512xf32, #tpu.memory_space<vmem>>, vector<56x8xf32>
    tpu.vector_store %arg17[%c0_58, %c112], %43 {strides = array<i32>} : memref<56x512xf32, #tpu.memory_space<vmem>>, vector<56x8xf32>,
    %c0_59 = arith.constant 0 : index
    %c1_60 = arith.constant 1 : index
    %c56_61 = arith.constant 56 : index
    %45 = vector.load %arg1[%c0_59, %c1_60, %c56_61] : memref<1x72x128xf32, #tpu.memory_space<vmem>>, vector<1x56x8xf32>
    %46 = vector.shape_cast %45 : vector<1x56x8xf32> to vector<56x8xf32>
    %c0_62 = arith.constant 0 : index
    %c120 = arith.constant 120 : index
    %47 = vector.load %arg17[%c0_62, %c120] : memref<56x512xf32, #tpu.memory_space<vmem>>, vector<56x8xf32>
    tpu.vector_store %arg17[%c0_62, %c120], %46 {strides = array<i32>} : memref<56x512xf32, #tpu.memory_space<vmem>>, vector<56x8xf32>,
    %c0_63 = arith.constant 0 : index
    %c0_64 = arith.constant 0 : index
    %c64_65 = arith.constant 64 : index
    %48 = vector.load %arg1[%c0_63, %c0_64, %c64_65] : memref<1x72x128xf32, #tpu.memory_space<vmem>>, vector<1x56x8xf32>
    %49 = vector.shape_cast %48 : vector<1x56x8xf32> to vector<56x8xf32>
    %c0_66 = arith.constant 0 : index
    %c128 = arith.constant 128 : index
    %50 = vector.load %arg17[%c0_66, %c128] : memref<56x512xf32, #tpu.memory_space<vmem>>, vector<56x8xf32>
    tpu.vector_store %arg17[%c0_66, %c128], %49 {strides = array<i32>} : memref<56x512xf32, #tpu.memory_space<vmem>>, vector<56x8xf32>,
    %c0_67 = arith.constant 0 : index
    %c0_68 = arith.constant 0 : index
    %c72_69 = arith.constant 72 : index
    %51 = vector.load %arg1[%c0_67, %c0_68, %c72_69] : memref<1x72x128xf32, #tpu.memory_space<vmem>>, vector<1x56x8xf32>
    %52 = vector.shape_cast %51 : vector<1x56x8xf32> to vector<56x8xf32>
    %c0_70 = arith.constant 0 : index
    %c136 = arith.constant 136 : index
    %53 = vector.load %arg17[%c0_70, %c136] : memref<56x512xf32, #tpu.memory_space<vmem>>, vector<56x8xf32>
    tpu.vector_store %arg17[%c0_70, %c136], %52 {strides = array<i32>} : memref<56x512xf32, #tpu.memory_space<vmem>>, vector<56x8xf32>,
    %c0_71 = arith.constant 0 : index
    %c0_72 = arith.constant 0 : index
    %c80_73 = arith.constant 80 : index
    %54 = vector.load %arg1[%c0_71, %c0_72, %c80_73] : memref<1x72x128xf32, #tpu.memory_space<vmem>>, vector<1x56x8xf32>
    %55 = vector.shape_cast %54 : vector<1x56x8xf32> to vector<56x8xf32>
    %c0_74 = arith.constant 0 : index
    %c144 = arith.constant 144 : index
    %56 = vector.load %arg17[%c0_74, %c144] : memref<56x512xf32, #tpu.memory_space<vmem>>, vector<56x8xf32>
    tpu.vector_store %arg17[%c0_74, %c144], %55 {strides = array<i32>} : memref<56x512xf32, #tpu.memory_space<vmem>>, vector<56x8xf32>,
    %c0_75 = arith.constant 0 : index
    %c0_76 = arith.constant 0 : index
    %c88_77 = arith.constant 88 : index
    %57 = vector.load %arg1[%c0_75, %c0_76, %c88_77] : memref<1x72x128xf32, #tpu.memory_space<vmem>>, vector<1x56x8xf32>
    %58 = vector.shape_cast %57 : vector<1x56x8xf32> to vector<56x8xf32>
    %c0_78 = arith.constant 0 : index
    %c152 = arith.constant 152 : index
    %59 = vector.load %arg17[%c0_78, %c152] : memref<56x512xf32, #tpu.memory_space<vmem>>, vector<56x8xf32>
    tpu.vector_store %arg17[%c0_78, %c152], %58 {strides = array<i32>} : memref<56x512xf32, #tpu.memory_space<vmem>>, vector<56x8xf32>,
    %c0_79 = arith.constant 0 : index
    %c1_80 = arith.constant 1 : index
    %c64_81 = arith.constant 64 : index
    %60 = vector.load %arg1[%c0_79, %c1_80, %c64_81] : memref<1x72x128xf32, #tpu.memory_space<vmem>>, vector<1x56x8xf32>
    %61 = vector.shape_cast %60 : vector<1x56x8xf32> to vector<56x8xf32>
    %c0_82 = arith.constant 0 : index
    %c160 = arith.constant 160 : index
    %62 = vector.load %arg17[%c0_82, %c160] : memref<56x512xf32, #tpu.memory_space<vmem>>, vector<56x8xf32>
    tpu.vector_store %arg17[%c0_82, %c160], %61 {strides = array<i32>} : memref<56x512xf32, #tpu.memory_space<vmem>>, vector<56x8xf32>,
    %c0_83 = arith.constant 0 : index
    %c1_84 = arith.constant 1 : index
    %c72_85 = arith.constant 72 : index
    %63 = vector.load %arg1[%c0_83, %c1_84, %c72_85] : memref<1x72x128xf32, #tpu.memory_space<vmem>>, vector<1x56x8xf32>
    %64 = vector.shape_cast %63 : vector<1x56x8xf32> to vector<56x8xf32>
    %c0_86 = arith.constant 0 : index
    %c168 = arith.constant 168 : index
    %65 = vector.load %arg17[%c0_86, %c168] : memref<56x512xf32, #tpu.memory_space<vmem>>, vector<56x8xf32>
    tpu.vector_store %arg17[%c0_86, %c168], %64 {strides = array<i32>} : memref<56x512xf32, #tpu.memory_space<vmem>>, vector<56x8xf32>,
    %c0_87 = arith.constant 0 : index
    %c1_88 = arith.constant 1 : index
    %c80_89 = arith.constant 80 : index
    %66 = vector.load %arg1[%c0_87, %c1_88, %c80_89] : memref<1x72x128xf32, #tpu.memory_space<vmem>>, vector<1x56x8xf32>
    %67 = vector.shape_cast %66 : vector<1x56x8xf32> to vector<56x8xf32>
    %c0_90 = arith.constant 0 : index
    %c176 = arith.constant 176 : index
    %68 = vector.load %arg17[%c0_90, %c176] : memref<56x512xf32, #tpu.memory_space<vmem>>, vector<56x8xf32>
    tpu.vector_store %arg17[%c0_90, %c176], %67 {strides = array<i32>} : memref<56x512xf32, #tpu.memory_space<vmem>>, vector<56x8xf32>,
    %c0_91 = arith.constant 0 : index
    %c1_92 = arith.constant 1 : index
    %c88_93 = arith.constant 88 : index
    %69 = vector.load %arg1[%c0_91, %c1_92, %c88_93] : memref<1x72x128xf32, #tpu.memory_space<vmem>>, vector<1x56x8xf32>
    %70 = vector.shape_cast %69 : vector<1x56x8xf32> to vector<56x8xf32>
    %c0_94 = arith.constant 0 : index
    %c184 = arith.constant 184 : index
    %71 = vector.load %arg17[%c0_94, %c184] : memref<56x512xf32, #tpu.memory_space<vmem>>, vector<56x8xf32>
    tpu.vector_store %arg17[%c0_94, %c184], %70 {strides = array<i32>} : memref<56x512xf32, #tpu.memory_space<vmem>>, vector<56x8xf32>,
    %c0_95 = arith.constant 0 : index
    %c0_96 = arith.constant 0 : index
    %c96_97 = arith.constant 96 : index
    %72 = vector.load %arg1[%c0_95, %c0_96, %c96_97] : memref<1x72x128xf32, #tpu.memory_space<vmem>>, vector<1x56x8xf32>
    %73 = vector.shape_cast %72 : vector<1x56x8xf32> to vector<56x8xf32>
    %c0_98 = arith.constant 0 : index
    %c192 = arith.constant 192 : index
    %74 = vector.load %arg17[%c0_98, %c192] : memref<56x512xf32, #tpu.memory_space<vmem>>, vector<56x8xf32>
    tpu.vector_store %arg17[%c0_98, %c192], %73 {strides = array<i32>} : memref<56x512xf32, #tpu.memory_space<vmem>>, vector<56x8xf32>,
    %c0_99 = arith.constant 0 : index
    %c0_100 = arith.constant 0 : index
    %c104_101 = arith.constant 104 : index
    %75 = vector.load %arg1[%c0_99, %c0_100, %c104_101] : memref<1x72x128xf32, #tpu.memory_space<vmem>>, vector<1x56x8xf32>
    %76 = vector.shape_cast %75 : vector<1x56x8xf32> to vector<56x8xf32>
    %c0_102 = arith.constant 0 : index
    %c200 = arith.constant 200 : index
    %77 = vector.load %arg17[%c0_102, %c200] : memref<56x512xf32, #tpu.memory_space<vmem>>, vector<56x8xf32>
    tpu.vector_store %arg17[%c0_102, %c200], %76 {strides = array<i32>} : memref<56x512xf32, #tpu.memory_space<vmem>>, vector<56x8xf32>,
    %c0_103 = arith.constant 0 : index
    %c0_104 = arith.constant 0 : index
    %c112_105 = arith.constant 112 : index
    %78 = vector.load %arg1[%c0_103, %c0_104, %c112_105] : memref<1x72x128xf32, #tpu.memory_space<vmem>>, vector<1x56x8xf32>
    %79 = vector.shape_cast %78 : vector<1x56x8xf32> to vector<56x8xf32>
    %c0_106 = arith.constant 0 : index
    %c208 = arith.constant 208 : index
    %80 = vector.load %arg17[%c0_106, %c208] : memref<56x512xf32, #tpu.memory_space<vmem>>, vector<56x8xf32>
    tpu.vector_store %arg17[%c0_106, %c208], %79 {strides = array<i32>} : memref<56x512xf32, #tpu.memory_space<vmem>>, vector<56x8xf32>,
    %c0_107 = arith.constant 0 : index
    %c0_108 = arith.constant 0 : index
    %c120_109 = arith.constant 120 : index
    %81 = vector.load %arg1[%c0_107, %c0_108, %c120_109] : memref<1x72x128xf32, #tpu.memory_space<vmem>>, vector<1x56x8xf32>
    %82 = vector.shape_cast %81 : vector<1x56x8xf32> to vector<56x8xf32>
    %c0_110 = arith.constant 0 : index
    %c216 = arith.constant 216 : index
    %83 = vector.load %arg17[%c0_110, %c216] : memref<56x512xf32, #tpu.memory_space<vmem>>, vector<56x8xf32>
    tpu.vector_store %arg17[%c0_110, %c216], %82 {strides = array<i32>} : memref<56x512xf32, #tpu.memory_space<vmem>>, vector<56x8xf32>,
    %c0_111 = arith.constant 0 : index
    %c1_112 = arith.constant 1 : index
    %c96_113 = arith.constant 96 : index
    %84 = vector.load %arg1[%c0_111, %c1_112, %c96_113] : memref<1x72x128xf32, #tpu.memory_space<vmem>>, vector<1x56x8xf32>
    %85 = vector.shape_cast %84 : vector<1x56x8xf32> to vector<56x8xf32>
    %c0_114 = arith.constant 0 : index
    %c224 = arith.constant 224 : index
    %86 = vector.load %arg17[%c0_114, %c224] : memref<56x512xf32, #tpu.memory_space<vmem>>, vector<56x8xf32>
    tpu.vector_store %arg17[%c0_114, %c224], %85 {strides = array<i32>} : memref<56x512xf32, #tpu.memory_space<vmem>>, vector<56x8xf32>,
    %c0_115 = arith.constant 0 : index
    %c1_116 = arith.constant 1 : index
    %c104_117 = arith.constant 104 : index
    %87 = vector.load %arg1[%c0_115, %c1_116, %c104_117] : memref<1x72x128xf32, #tpu.memory_space<vmem>>, vector<1x56x8xf32>
    %88 = vector.shape_cast %87 : vector<1x56x8xf32> to vector<56x8xf32>
    %c0_118 = arith.constant 0 : index
    %c232 = arith.constant 232 : index
    %89 = vector.load %arg17[%c0_118, %c232] : memref<56x512xf32, #tpu.memory_space<vmem>>, vector<56x8xf32>
    tpu.vector_store %arg17[%c0_118, %c232], %88 {strides = array<i32>} : memref<56x512xf32, #tpu.memory_space<vmem>>, vector<56x8xf32>,
    %c0_119 = arith.constant 0 : index
    %c1_120 = arith.constant 1 : index
    %c112_121 = arith.constant 112 : index
    %90 = vector.load %arg1[%c0_119, %c1_120, %c112_121] : memref<1x72x128xf32, #tpu.memory_space<vmem>>, vector<1x56x8xf32>
    %91 = vector.shape_cast %90 : vector<1x56x8xf32> to vector<56x8xf32>
    %c0_122 = arith.constant 0 : index
    %c240 = arith.constant 240 : index
    %92 = vector.load %arg17[%c0_122, %c240] : memref<56x512xf32, #tpu.memory_space<vmem>>, vector<56x8xf32>
    tpu.vector_store %arg17[%c0_122, %c240], %91 {strides = array<i32>} : memref<56x512xf32, #tpu.memory_space<vmem>>, vector<56x8xf32>,
    %c0_123 = arith.constant 0 : index
    %c1_124 = arith.constant 1 : index
    %c120_125 = arith.constant 120 : index
    %93 = vector.load %arg1[%c0_123, %c1_124, %c120_125] : memref<1x72x128xf32, #tpu.memory_space<vmem>>, vector<1x56x8xf32>
    %94 = vector.shape_cast %93 : vector<1x56x8xf32> to vector<56x8xf32>
    %c0_126 = arith.constant 0 : index
    %c248 = arith.constant 248 : index
    %95 = vector.load %arg17[%c0_126, %c248] : memref<56x512xf32, #tpu.memory_space<vmem>>, vector<56x8xf32>
    tpu.vector_store %arg17[%c0_126, %c248], %94 {strides = array<i32>} : memref<56x512xf32, #tpu.memory_space<vmem>>, vector<56x8xf32>,
    %c0_127 = arith.constant 0 : index
    %c8_128 = arith.constant 8 : index
    %c0_129 = arith.constant 0 : index
    %96 = vector.load %arg1[%c0_127, %c8_128, %c0_129] : memref<1x72x128xf32, #tpu.memory_space<vmem>>, vector<1x56x8xf32>
    %97 = vector.shape_cast %96 : vector<1x56x8xf32> to vector<56x8xf32>
    %c0_130 = arith.constant 0 : index
    %c256 = arith.constant 256 : index
    %98 = vector.load %arg17[%c0_130, %c256] : memref<56x512xf32, #tpu.memory_space<vmem>>, vector<56x8xf32>
    tpu.vector_store %arg17[%c0_130, %c256], %97 {strides = array<i32>} : memref<56x512xf32, #tpu.memory_space<vmem>>, vector<56x8xf32>,
    %c0_131 = arith.constant 0 : index
    %c8_132 = arith.constant 8 : index
    %c8_133 = arith.constant 8 : index
    %99 = vector.load %arg1[%c0_131, %c8_132, %c8_133] : memref<1x72x128xf32, #tpu.memory_space<vmem>>, vector<1x56x8xf32>
    %100 = vector.shape_cast %99 : vector<1x56x8xf32> to vector<56x8xf32>
    %c0_134 = arith.constant 0 : index
    %c264 = arith.constant 264 : index
    %101 = vector.load %arg17[%c0_134, %c264] : memref<56x512xf32, #tpu.memory_space<vmem>>, vector<56x8xf32>
    tpu.vector_store %arg17[%c0_134, %c264], %100 {strides = array<i32>} : memref<56x512xf32, #tpu.memory_space<vmem>>, vector<56x8xf32>,
    %c0_135 = arith.constant 0 : index
    %c8_136 = arith.constant 8 : index
    %c16_137 = arith.constant 16 : index
    %102 = vector.load %arg1[%c0_135, %c8_136, %c16_137] : memref<1x72x128xf32, #tpu.memory_space<vmem>>, vector<1x56x8xf32>
    %103 = vector.shape_cast %102 : vector<1x56x8xf32> to vector<56x8xf32>
    %c0_138 = arith.constant 0 : index
    %c272 = arith.constant 272 : index
    %104 = vector.load %arg17[%c0_138, %c272] : memref<56x512xf32, #tpu.memory_space<vmem>>, vector<56x8xf32>
    tpu.vector_store %arg17[%c0_138, %c272], %103 {strides = array<i32>} : memref<56x512xf32, #tpu.memory_space<vmem>>, vector<56x8xf32>,
    %c0_139 = arith.constant 0 : index
    %c8_140 = arith.constant 8 : index
    %c24_141 = arith.constant 24 : index
    %105 = vector.load %arg1[%c0_139, %c8_140, %c24_141] : memref<1x72x128xf32, #tpu.memory_space<vmem>>, vector<1x56x8xf32>
    %106 = vector.shape_cast %105 : vector<1x56x8xf32> to vector<56x8xf32>
    %c0_142 = arith.constant 0 : index
    %c280 = arith.constant 280 : index
    %107 = vector.load %arg17[%c0_142, %c280] : memref<56x512xf32, #tpu.memory_space<vmem>>, vector<56x8xf32>
    tpu.vector_store %arg17[%c0_142, %c280], %106 {strides = array<i32>} : memref<56x512xf32, #tpu.memory_space<vmem>>, vector<56x8xf32>,
    %c0_143 = arith.constant 0 : index
    %c9 = arith.constant 9 : index
    %c0_144 = arith.constant 0 : index
    %108 = vector.load %arg1[%c0_143, %c9, %c0_144] : memref<1x72x128xf32, #tpu.memory_space<vmem>>, vector<1x56x8xf32>
    %109 = vector.shape_cast %108 : vector<1x56x8xf32> to vector<56x8xf32>
    %c0_145 = arith.constant 0 : index
    %c288 = arith.constant 288 : index
    %110 = vector.load %arg17[%c0_145, %c288] : memref<56x512xf32, #tpu.memory_space<vmem>>, vector<56x8xf32>
    tpu.vector_store %arg17[%c0_145, %c288], %109 {strides = array<i32>} : memref<56x512xf32, #tpu.memory_space<vmem>>, vector<56x8xf32>,
    %c0_146 = arith.constant 0 : index
    %c9_147 = arith.constant 9 : index
    %c8_148 = arith.constant 8 : index
    %111 = vector.load %arg1[%c0_146, %c9_147, %c8_148] : memref<1x72x128xf32, #tpu.memory_space<vmem>>, vector<1x56x8xf32>
    %112 = vector.shape_cast %111 : vector<1x56x8xf32> to vector<56x8xf32>
    %c0_149 = arith.constant 0 : index
    %c296 = arith.constant 296 : index
    %113 = vector.load %arg17[%c0_149, %c296] : memref<56x512xf32, #tpu.memory_space<vmem>>, vector<56x8xf32>
    tpu.vector_store %arg17[%c0_149, %c296], %112 {strides = array<i32>} : memref<56x512xf32, #tpu.memory_space<vmem>>, vector<56x8xf32>,
    %c0_150 = arith.constant 0 : index
    %c9_151 = arith.constant 9 : index
    %c16_152 = arith.constant 16 : index
    %114 = vector.load %arg1[%c0_150, %c9_151, %c16_152] : memref<1x72x128xf32, #tpu.memory_space<vmem>>, vector<1x56x8xf32>
    %115 = vector.shape_cast %114 : vector<1x56x8xf32> to vector<56x8xf32>
    %c0_153 = arith.constant 0 : index
    %c304 = arith.constant 304 : index
    %116 = vector.load %arg17[%c0_153, %c304] : memref<56x512xf32, #tpu.memory_space<vmem>>, vector<56x8xf32>
    tpu.vector_store %arg17[%c0_153, %c304], %115 {strides = array<i32>} : memref<56x512xf32, #tpu.memory_space<vmem>>, vector<56x8xf32>,
    %c0_154 = arith.constant 0 : index
    %c9_155 = arith.constant 9 : index
    %c24_156 = arith.constant 24 : index
    %117 = vector.load %arg1[%c0_154, %c9_155, %c24_156] : memref<1x72x128xf32, #tpu.memory_space<vmem>>, vector<1x56x8xf32>
    %118 = vector.shape_cast %117 : vector<1x56x8xf32> to vector<56x8xf32>
    %c0_157 = arith.constant 0 : index
    %c312 = arith.constant 312 : index
    %119 = vector.load %arg17[%c0_157, %c312] : memref<56x512xf32, #tpu.memory_space<vmem>>, vector<56x8xf32>
    tpu.vector_store %arg17[%c0_157, %c312], %118 {strides = array<i32>} : memref<56x512xf32, #tpu.memory_space<vmem>>, vector<56x8xf32>,
    %c0_158 = arith.constant 0 : index
    %c8_159 = arith.constant 8 : index
    %c32_160 = arith.constant 32 : index
    %120 = vector.load %arg1[%c0_158, %c8_159, %c32_160] : memref<1x72x128xf32, #tpu.memory_space<vmem>>, vector<1x56x8xf32>
    %121 = vector.shape_cast %120 : vector<1x56x8xf32> to vector<56x8xf32>
    %c0_161 = arith.constant 0 : index
    %c320 = arith.constant 320 : index
    %122 = vector.load %arg17[%c0_161, %c320] : memref<56x512xf32, #tpu.memory_space<vmem>>, vector<56x8xf32>
    tpu.vector_store %arg17[%c0_161, %c320], %121 {strides = array<i32>} : memref<56x512xf32, #tpu.memory_space<vmem>>, vector<56x8xf32>,
    %c0_162 = arith.constant 0 : index
    %c8_163 = arith.constant 8 : index
    %c40_164 = arith.constant 40 : index
    %123 = vector.load %arg1[%c0_162, %c8_163, %c40_164] : memref<1x72x128xf32, #tpu.memory_space<vmem>>, vector<1x56x8xf32>
    %124 = vector.shape_cast %123 : vector<1x56x8xf32> to vector<56x8xf32>
    %c0_165 = arith.constant 0 : index
    %c328 = arith.constant 328 : index
    %125 = vector.load %arg17[%c0_165, %c328] : memref<56x512xf32, #tpu.memory_space<vmem>>, vector<56x8xf32>
    tpu.vector_store %arg17[%c0_165, %c328], %124 {strides = array<i32>} : memref<56x512xf32, #tpu.memory_space<vmem>>, vector<56x8xf32>,
    %c0_166 = arith.constant 0 : index
    %c8_167 = arith.constant 8 : index
    %c48_168 = arith.constant 48 : index
    %126 = vector.load %arg1[%c0_166, %c8_167, %c48_168] : memref<1x72x128xf32, #tpu.memory_space<vmem>>, vector<1x56x8xf32>
    %127 = vector.shape_cast %126 : vector<1x56x8xf32> to vector<56x8xf32>
    %c0_169 = arith.constant 0 : index
    %c336 = arith.constant 336 : index
    %128 = vector.load %arg17[%c0_169, %c336] : memref<56x512xf32, #tpu.memory_space<vmem>>, vector<56x8xf32>
    tpu.vector_store %arg17[%c0_169, %c336], %127 {strides = array<i32>} : memref<56x512xf32, #tpu.memory_space<vmem>>, vector<56x8xf32>,
    %c0_170 = arith.constant 0 : index
    %c8_171 = arith.constant 8 : index
    %c56_172 = arith.constant 56 : index
    %129 = vector.load %arg1[%c0_170, %c8_171, %c56_172] : memref<1x72x128xf32, #tpu.memory_space<vmem>>, vector<1x56x8xf32>
    %130 = vector.shape_cast %129 : vector<1x56x8xf32> to vector<56x8xf32>
    %c0_173 = arith.constant 0 : index
    %c344 = arith.constant 344 : index
    %131 = vector.load %arg17[%c0_173, %c344] : memref<56x512xf32, #tpu.memory_space<vmem>>, vector<56x8xf32>
    tpu.vector_store %arg17[%c0_173, %c344], %130 {strides = array<i32>} : memref<56x512xf32, #tpu.memory_space<vmem>>, vector<56x8xf32>,
    %c0_174 = arith.constant 0 : index
    %c9_175 = arith.constant 9 : index
    %c32_176 = arith.constant 32 : index
    %132 = vector.load %arg1[%c0_174, %c9_175, %c32_176] : memref<1x72x128xf32, #tpu.memory_space<vmem>>, vector<1x56x8xf32>
    %133 = vector.shape_cast %132 : vector<1x56x8xf32> to vector<56x8xf32>
    %c0_177 = arith.constant 0 : index
    %c352 = arith.constant 352 : index
    %134 = vector.load %arg17[%c0_177, %c352] : memref<56x512xf32, #tpu.memory_space<vmem>>, vector<56x8xf32>
    tpu.vector_store %arg17[%c0_177, %c352], %133 {strides = array<i32>} : memref<56x512xf32, #tpu.memory_space<vmem>>, vector<56x8xf32>,
    %c0_178 = arith.constant 0 : index
    %c9_179 = arith.constant 9 : index
    %c40_180 = arith.constant 40 : index
    %135 = vector.load %arg1[%c0_178, %c9_179, %c40_180] : memref<1x72x128xf32, #tpu.memory_space<vmem>>, vector<1x56x8xf32>
    %136 = vector.shape_cast %135 : vector<1x56x8xf32> to vector<56x8xf32>
    %c0_181 = arith.constant 0 : index
    %c360 = arith.constant 360 : index
    %137 = vector.load %arg17[%c0_181, %c360] : memref<56x512xf32, #tpu.memory_space<vmem>>, vector<56x8xf32>
    tpu.vector_store %arg17[%c0_181, %c360], %136 {strides = array<i32>} : memref<56x512xf32, #tpu.memory_space<vmem>>, vector<56x8xf32>,
    %c0_182 = arith.constant 0 : index
    %c9_183 = arith.constant 9 : index
    %c48_184 = arith.constant 48 : index
    %138 = vector.load %arg1[%c0_182, %c9_183, %c48_184] : memref<1x72x128xf32, #tpu.memory_space<vmem>>, vector<1x56x8xf32>
    %139 = vector.shape_cast %138 : vector<1x56x8xf32> to vector<56x8xf32>
    %c0_185 = arith.constant 0 : index
    %c368 = arith.constant 368 : index
    %140 = vector.load %arg17[%c0_185, %c368] : memref<56x512xf32, #tpu.memory_space<vmem>>, vector<56x8xf32>
    tpu.vector_store %arg17[%c0_185, %c368], %139 {strides = array<i32>} : memref<56x512xf32, #tpu.memory_space<vmem>>, vector<56x8xf32>,
    %c0_186 = arith.constant 0 : index
    %c9_187 = arith.constant 9 : index
    %c56_188 = arith.constant 56 : index
    %141 = vector.load %arg1[%c0_186, %c9_187, %c56_188] : memref<1x72x128xf32, #tpu.memory_space<vmem>>, vector<1x56x8xf32>
    %142 = vector.shape_cast %141 : vector<1x56x8xf32> to vector<56x8xf32>
    %c0_189 = arith.constant 0 : index
    %c376 = arith.constant 376 : index
    %143 = vector.load %arg17[%c0_189, %c376] : memref<56x512xf32, #tpu.memory_space<vmem>>, vector<56x8xf32>
    tpu.vector_store %arg17[%c0_189, %c376], %142 {strides = array<i32>} : memref<56x512xf32, #tpu.memory_space<vmem>>, vector<56x8xf32>,
    %c0_190 = arith.constant 0 : index
    %c8_191 = arith.constant 8 : index
    %c64_192 = arith.constant 64 : index
    %144 = vector.load %arg1[%c0_190, %c8_191, %c64_192] : memref<1x72x128xf32, #tpu.memory_space<vmem>>, vector<1x56x8xf32>
    %145 = vector.shape_cast %144 : vector<1x56x8xf32> to vector<56x8xf32>
    %c0_193 = arith.constant 0 : index
    %c384 = arith.constant 384 : index
    %146 = vector.load %arg17[%c0_193, %c384] : memref<56x512xf32, #tpu.memory_space<vmem>>, vector<56x8xf32>
    tpu.vector_store %arg17[%c0_193, %c384], %145 {strides = array<i32>} : memref<56x512xf32, #tpu.memory_space<vmem>>, vector<56x8xf32>,
    %c0_194 = arith.constant 0 : index
    %c8_195 = arith.constant 8 : index
    %c72_196 = arith.constant 72 : index
    %147 = vector.load %arg1[%c0_194, %c8_195, %c72_196] : memref<1x72x128xf32, #tpu.memory_space<vmem>>, vector<1x56x8xf32>
    %148 = vector.shape_cast %147 : vector<1x56x8xf32> to vector<56x8xf32>
    %c0_197 = arith.constant 0 : index
    %c392 = arith.constant 392 : index
    %149 = vector.load %arg17[%c0_197, %c392] : memref<56x512xf32, #tpu.memory_space<vmem>>, vector<56x8xf32>
    tpu.vector_store %arg17[%c0_197, %c392], %148 {strides = array<i32>} : memref<56x512xf32, #tpu.memory_space<vmem>>, vector<56x8xf32>,
    %c0_198 = arith.constant 0 : index
    %c8_199 = arith.constant 8 : index
    %c80_200 = arith.constant 80 : index
    %150 = vector.load %arg1[%c0_198, %c8_199, %c80_200] : memref<1x72x128xf32, #tpu.memory_space<vmem>>, vector<1x56x8xf32>
    %151 = vector.shape_cast %150 : vector<1x56x8xf32> to vector<56x8xf32>
    %c0_201 = arith.constant 0 : index
    %c400 = arith.constant 400 : index
    %152 = vector.load %arg17[%c0_201, %c400] : memref<56x512xf32, #tpu.memory_space<vmem>>, vector<56x8xf32>
    tpu.vector_store %arg17[%c0_201, %c400], %151 {strides = array<i32>} : memref<56x512xf32, #tpu.memory_space<vmem>>, vector<56x8xf32>,
    %c0_202 = arith.constant 0 : index
    %c8_203 = arith.constant 8 : index
    %c88_204 = arith.constant 88 : index
    %153 = vector.load %arg1[%c0_202, %c8_203, %c88_204] : memref<1x72x128xf32, #tpu.memory_space<vmem>>, vector<1x56x8xf32>
    %154 = vector.shape_cast %153 : vector<1x56x8xf32> to vector<56x8xf32>
    %c0_205 = arith.constant 0 : index
    %c408 = arith.constant 408 : index
    %155 = vector.load %arg17[%c0_205, %c408] : memref<56x512xf32, #tpu.memory_space<vmem>>, vector<56x8xf32>
    tpu.vector_store %arg17[%c0_205, %c408], %154 {strides = array<i32>} : memref<56x512xf32, #tpu.memory_space<vmem>>, vector<56x8xf32>,
    %c0_206 = arith.constant 0 : index
    %c9_207 = arith.constant 9 : index
    %c64_208 = arith.constant 64 : index
    %156 = vector.load %arg1[%c0_206, %c9_207, %c64_208] : memref<1x72x128xf32, #tpu.memory_space<vmem>>, vector<1x56x8xf32>
    %157 = vector.shape_cast %156 : vector<1x56x8xf32> to vector<56x8xf32>
    %c0_209 = arith.constant 0 : index
    %c416 = arith.constant 416 : index
    %158 = vector.load %arg17[%c0_209, %c416] : memref<56x512xf32, #tpu.memory_space<vmem>>, vector<56x8xf32>
    tpu.vector_store %arg17[%c0_209, %c416], %157 {strides = array<i32>} : memref<56x512xf32, #tpu.memory_space<vmem>>, vector<56x8xf32>,
    %c0_210 = arith.constant 0 : index
    %c9_211 = arith.constant 9 : index
    %c72_212 = arith.constant 72 : index
    %159 = vector.load %arg1[%c0_210, %c9_211, %c72_212] : memref<1x72x128xf32, #tpu.memory_space<vmem>>, vector<1x56x8xf32>
    %160 = vector.shape_cast %159 : vector<1x56x8xf32> to vector<56x8xf32>
    %c0_213 = arith.constant 0 : index
    %c424 = arith.constant 424 : index
    %161 = vector.load %arg17[%c0_213, %c424] : memref<56x512xf32, #tpu.memory_space<vmem>>, vector<56x8xf32>
    tpu.vector_store %arg17[%c0_213, %c424], %160 {strides = array<i32>} : memref<56x512xf32, #tpu.memory_space<vmem>>, vector<56x8xf32>,
    %c0_214 = arith.constant 0 : index
    %c9_215 = arith.constant 9 : index
    %c80_216 = arith.constant 80 : index
    %162 = vector.load %arg1[%c0_214, %c9_215, %c80_216] : memref<1x72x128xf32, #tpu.memory_space<vmem>>, vector<1x56x8xf32>
    %163 = vector.shape_cast %162 : vector<1x56x8xf32> to vector<56x8xf32>
    %c0_217 = arith.constant 0 : index
    %c432 = arith.constant 432 : index
    %164 = vector.load %arg17[%c0_217, %c432] : memref<56x512xf32, #tpu.memory_space<vmem>>, vector<56x8xf32>
    tpu.vector_store %arg17[%c0_217, %c432], %163 {strides = array<i32>} : memref<56x512xf32, #tpu.memory_space<vmem>>, vector<56x8xf32>,
    %c0_218 = arith.constant 0 : index
    %c9_219 = arith.constant 9 : index
    %c88_220 = arith.constant 88 : index
    %165 = vector.load %arg1[%c0_218, %c9_219, %c88_220] : memref<1x72x128xf32, #tpu.memory_space<vmem>>, vector<1x56x8xf32>
    %166 = vector.shape_cast %165 : vector<1x56x8xf32> to vector<56x8xf32>
    %c0_221 = arith.constant 0 : index
    %c440 = arith.constant 440 : index
    %167 = vector.load %arg17[%c0_221, %c440] : memref<56x512xf32, #tpu.memory_space<vmem>>, vector<56x8xf32>
    tpu.vector_store %arg17[%c0_221, %c440], %166 {strides = array<i32>} : memref<56x512xf32, #tpu.memory_space<vmem>>, vector<56x8xf32>,
    %c0_222 = arith.constant 0 : index
    %c8_223 = arith.constant 8 : index
    %c96_224 = arith.constant 96 : index
    %168 = vector.load %arg1[%c0_222, %c8_223, %c96_224] : memref<1x72x128xf32, #tpu.memory_space<vmem>>, vector<1x56x8xf32>
    %169 = vector.shape_cast %168 : vector<1x56x8xf32> to vector<56x8xf32>
    %c0_225 = arith.constant 0 : index
    %c448 = arith.constant 448 : index
    %170 = vector.load %arg17[%c0_225, %c448] : memref<56x512xf32, #tpu.memory_space<vmem>>, vector<56x8xf32>
    tpu.vector_store %arg17[%c0_225, %c448], %169 {strides = array<i32>} : memref<56x512xf32, #tpu.memory_space<vmem>>, vector<56x8xf32>,
    %c0_226 = arith.constant 0 : index
    %c8_227 = arith.constant 8 : index
    %c104_228 = arith.constant 104 : index
    %171 = vector.load %arg1[%c0_226, %c8_227, %c104_228] : memref<1x72x128xf32, #tpu.memory_space<vmem>>, vector<1x56x8xf32>
    %172 = vector.shape_cast %171 : vector<1x56x8xf32> to vector<56x8xf32>
    %c0_229 = arith.constant 0 : index
    %c456 = arith.constant 456 : index
    %173 = vector.load %arg17[%c0_229, %c456] : memref<56x512xf32, #tpu.memory_space<vmem>>, vector<56x8xf32>
    tpu.vector_store %arg17[%c0_229, %c456], %172 {strides = array<i32>} : memref<56x512xf32, #tpu.memory_space<vmem>>, vector<56x8xf32>,
    %c0_230 = arith.constant 0 : index
    %c8_231 = arith.constant 8 : index
    %c112_232 = arith.constant 112 : index
    %174 = vector.load %arg1[%c0_230, %c8_231, %c112_232] : memref<1x72x128xf32, #tpu.memory_space<vmem>>, vector<1x56x8xf32>
    %175 = vector.shape_cast %174 : vector<1x56x8xf32> to vector<56x8xf32>
    %c0_233 = arith.constant 0 : index
    %c464 = arith.constant 464 : index
    %176 = vector.load %arg17[%c0_233, %c464] : memref<56x512xf32, #tpu.memory_space<vmem>>, vector<56x8xf32>
    tpu.vector_store %arg17[%c0_233, %c464], %175 {strides = array<i32>} : memref<56x512xf32, #tpu.memory_space<vmem>>, vector<56x8xf32>,
    %c0_234 = arith.constant 0 : index
    %c8_235 = arith.constant 8 : index
    %c120_236 = arith.constant 120 : index
    %177 = vector.load %arg1[%c0_234, %c8_235, %c120_236] : memref<1x72x128xf32, #tpu.memory_space<vmem>>, vector<1x56x8xf32>
    %178 = vector.shape_cast %177 : vector<1x56x8xf32> to vector<56x8xf32>
    %c0_237 = arith.constant 0 : index
    %c472 = arith.constant 472 : index
    %179 = vector.load %arg17[%c0_237, %c472] : memref<56x512xf32, #tpu.memory_space<vmem>>, vector<56x8xf32>
    tpu.vector_store %arg17[%c0_237, %c472], %178 {strides = array<i32>} : memref<56x512xf32, #tpu.memory_space<vmem>>, vector<56x8xf32>,
    %c0_238 = arith.constant 0 : index
    %c9_239 = arith.constant 9 : index
    %c96_240 = arith.constant 96 : index
    %180 = vector.load %arg1[%c0_238, %c9_239, %c96_240] : memref<1x72x128xf32, #tpu.memory_space<vmem>>, vector<1x56x8xf32>
    %181 = vector.shape_cast %180 : vector<1x56x8xf32> to vector<56x8xf32>
    %c0_241 = arith.constant 0 : index
    %c480 = arith.constant 480 : index
    %182 = vector.load %arg17[%c0_241, %c480] : memref<56x512xf32, #tpu.memory_space<vmem>>, vector<56x8xf32>
    tpu.vector_store %arg17[%c0_241, %c480], %181 {strides = array<i32>} : memref<56x512xf32, #tpu.memory_space<vmem>>, vector<56x8xf32>,
    %c0_242 = arith.constant 0 : index
    %c9_243 = arith.constant 9 : index
    %c104_244 = arith.constant 104 : index
    %183 = vector.load %arg1[%c0_242, %c9_243, %c104_244] : memref<1x72x128xf32, #tpu.memory_space<vmem>>, vector<1x56x8xf32>
    %184 = vector.shape_cast %183 : vector<1x56x8xf32> to vector<56x8xf32>
    %c0_245 = arith.constant 0 : index
    %c488 = arith.constant 488 : index
    %185 = vector.load %arg17[%c0_245, %c488] : memref<56x512xf32, #tpu.memory_space<vmem>>, vector<56x8xf32>
    tpu.vector_store %arg17[%c0_245, %c488], %184 {strides = array<i32>} : memref<56x512xf32, #tpu.memory_space<vmem>>, vector<56x8xf32>,
    %c0_246 = arith.constant 0 : index
    %c9_247 = arith.constant 9 : index
    %c112_248 = arith.constant 112 : index
    %186 = vector.load %arg1[%c0_246, %c9_247, %c112_248] : memref<1x72x128xf32, #tpu.memory_space<vmem>>, vector<1x56x8xf32>
    %187 = vector.shape_cast %186 : vector<1x56x8xf32> to vector<56x8xf32>
    %c0_249 = arith.constant 0 : index
    %c496 = arith.constant 496 : index
    %188 = vector.load %arg17[%c0_249, %c496] : memref<56x512xf32, #tpu.memory_space<vmem>>, vector<56x8xf32>
    tpu.vector_store %arg17[%c0_249, %c496], %187 {strides = array<i32>} : memref<56x512xf32, #tpu.memory_space<vmem>>, vector<56x8xf32>,
    %c0_250 = arith.constant 0 : index
    %c9_251 = arith.constant 9 : index
    %c120_252 = arith.constant 120 : index
    %189 = vector.load %arg1[%c0_250, %c9_251, %c120_252] : memref<1x72x128xf32, #tpu.memory_space<vmem>>, vector<1x56x8xf32>
    %190 = vector.shape_cast %189 : vector<1x56x8xf32> to vector<56x8xf32>
    %c0_253 = arith.constant 0 : index
    %c504 = arith.constant 504 : index
    %191 = vector.load %arg17[%c0_253, %c504] : memref<56x512xf32, #tpu.memory_space<vmem>>, vector<56x8xf32>
    tpu.vector_store %arg17[%c0_253, %c504], %190 {strides = array<i32>} : memref<56x512xf32, #tpu.memory_space<vmem>>, vector<56x8xf32>,
    %c0_254 = arith.constant 0 : index
    %c0_255 = arith.constant 0 : index
    %192 = vector.load %arg17[%c0_254, %c0_255] : memref<56x512xf32, #tpu.memory_space<vmem>>, vector<56x512xf32>
    %c0_256 = arith.constant 0 : index
    %c0_257 = arith.constant 0 : index
    %c0_258 = arith.constant 0 : index
    %193 = vector.load %arg2[%c0_256, %c0_257, %c0_258] : memref<4x512x128xf32, #tpu.memory_space<vmem>>, vector<1x512x128xf32>
    %194 = vector.shape_cast %193 : vector<1x512x128xf32> to vector<512x128xf32>
    %cst = arith.constant dense<0.000000e+00> : vector<56x128xf32>
    %195 = tpu.matmul %192, %194, %cst {dimension_numbers = #tpu.dot_dimension_numbers<[1], [0], [0], [1], [0, 0, 1, 1], [], []>} : vector<56x512xf32>, vector<512x128xf32>, vector<56x128xf32> -> vector<56x128xf32>
    %c1_259 = arith.constant 1 : index
    %c0_260 = arith.constant 0 : index
    %c0_261 = arith.constant 0 : index
    %196 = vector.load %arg2[%c1_259, %c0_260, %c0_261] : memref<4x512x128xf32, #tpu.memory_space<vmem>>, vector<1x512x128xf32>
    %197 = vector.shape_cast %196 : vector<1x512x128xf32> to vector<512x128xf32>
    %cst_262 = arith.constant dense<0.000000e+00> : vector<56x128xf32>
    %198 = tpu.matmul %192, %197, %cst_262 {dimension_numbers = #tpu.dot_dimension_numbers<[1], [0], [0], [1], [0, 0, 1, 1], [], []>} : vector<56x512xf32>, vector<512x128xf32>, vector<56x128xf32> -> vector<56x128xf32>
    %199 = arith.maximumf %195, %198 : vector<56x128xf32>
    %c2 = arith.constant 2 : index
    %c0_263 = arith.constant 0 : index
    %c0_264 = arith.constant 0 : index
    %200 = vector.load %arg2[%c2, %c0_263, %c0_264] : memref<4x512x128xf32, #tpu.memory_space<vmem>>, vector<1x512x128xf32>
    %201 = vector.shape_cast %200 : vector<1x512x128xf32> to vector<512x128xf32>
    %cst_265 = arith.constant dense<0.000000e+00> : vector<56x128xf32>
    %202 = tpu.matmul %192, %201, %cst_265 {dimension_numbers = #tpu.dot_dimension_numbers<[1], [0], [0], [1], [0, 0, 1, 1], [], []>} : vector<56x512xf32>, vector<512x128xf32>, vector<56x128xf32> -> vector<56x128xf32>
    %203 = arith.maximumf %199, %202 : vector<56x128xf32>
    %c3 = arith.constant 3 : index
    %c0_266 = arith.constant 0 : index
    %c0_267 = arith.constant 0 : index
    %204 = vector.load %arg2[%c3, %c0_266, %c0_267] : memref<4x512x128xf32, #tpu.memory_space<vmem>>, vector<1x512x128xf32>
    %205 = vector.shape_cast %204 : vector<1x512x128xf32> to vector<512x128xf32>
    %cst_268 = arith.constant dense<0.000000e+00> : vector<56x128xf32>
    %206 = tpu.matmul %192, %205, %cst_268 {dimension_numbers = #tpu.dot_dimension_numbers<[1], [0], [0], [1], [0, 0, 1, 1], [], []>} : vector<56x512xf32>, vector<512x128xf32>, vector<56x128xf32> -> vector<56x128xf32>
    %207 = arith.maximumf %203, %206 : vector<56x128xf32>
    %c0_269 = arith.constant 0 : index
    %c0_270 = arith.constant 0 : index
    %208 = vector.load %arg3[%c0_269, %c0_270] : memref<1x128xf32, #tpu.memory_space<vmem>>, vector<1x128xf32>
    %209 = vector.broadcast %208 : vector<1x128xf32> to vector<56x128xf32>
    %210 = arith.addf %207, %209 : vector<56x128xf32>
    %cst_271 = arith.constant 0.000000e+00 : f32
    %211 = vector.broadcast %cst_271 : f32 to vector<56x128xf32>
    %212 = arith.maximumf %210, %211 : vector<56x128xf32>
    %c0_272 = arith.constant 0 : index
    %c0_273 = arith.constant 0 : index
    %213 = vector.load %arg4[%c0_272, %c0_273] : memref<1x128xf32, #tpu.memory_space<vmem>>, vector<1x128xf32>
    %214 = vector.broadcast %213 : vector<1x128xf32> to vector<56x128xf32>
    %215 = arith.mulf %212, %214 : vector<56x128xf32>
    %c0_274 = arith.constant 0 : index
    %c0_275 = arith.constant 0 : index
    %216 = vector.load %arg5[%c0_274, %c0_275] : memref<1x128xf32, #tpu.memory_space<vmem>>, vector<1x128xf32>
    %217 = vector.broadcast %216 : vector<1x128xf32> to vector<56x128xf32>
    %218 = arith.addf %215, %217 : vector<56x128xf32>
    %c0_276 = arith.constant 0 : index
    %c0_277 = arith.constant 0 : index
    %219 = vector.load %arg18[%c0_276, %c0_277] : memref<64x128xf32, #tpu.memory_space<vmem>>, vector<56x128xf32>
    tpu.vector_store %arg18[%c0_276, %c0_277], %218 {strides = array<i32>} : memref<64x128xf32, #tpu.memory_space<vmem>>, vector<56x128xf32>,
    %cst_278 = arith.constant 0.000000e+00 : f32
    %220 = vector.broadcast %cst_278 : f32 to vector<8x128xf32>
    %c56_279 = arith.constant 56 : index
    %c0_280 = arith.constant 0 : index
    %221 = vector.load %arg18[%c56_279, %c0_280] : memref<64x128xf32, #tpu.memory_space<vmem>>, vector<8x128xf32>
    tpu.vector_store %arg18[%c56_279, %c0_280], %220 {strides = array<i32>} : memref<64x128xf32, #tpu.memory_space<vmem>>, vector<8x128xf32>,
    %c0_281 = arith.constant 0 : index
    %c0_282 = arith.constant 0 : index
    %222 = vector.load %arg18[%c0_281, %c0_282] : memref<64x128xf32, #tpu.memory_space<vmem>>, vector<40x8xf32>
    %c0_283 = arith.constant 0 : index
    %c0_284 = arith.constant 0 : index
    %223 = vector.load %arg19[%c0_283, %c0_284] : memref<40x288xf32, #tpu.memory_space<vmem>>, vector<40x8xf32>
    tpu.vector_store %arg19[%c0_283, %c0_284], %222 {strides = array<i32>} : memref<40x288xf32, #tpu.memory_space<vmem>>, vector<40x8xf32>,
    %c0_285 = arith.constant 0 : index
    %c8_286 = arith.constant 8 : index
    %224 = vector.load %arg18[%c0_285, %c8_286] : memref<64x128xf32, #tpu.memory_space<vmem>>, vector<40x8xf32>
    %c0_287 = arith.constant 0 : index
    %c8_288 = arith.constant 8 : index
    %225 = vector.load %arg19[%c0_287, %c8_288] : memref<40x288xf32, #tpu.memory_space<vmem>>, vector<40x8xf32>
    tpu.vector_store %arg19[%c0_287, %c8_288], %224 {strides = array<i32>} : memref<40x288xf32, #tpu.memory_space<vmem>>, vector<40x8xf32>,
    %c1_289 = arith.constant 1 : index
    %c0_290 = arith.constant 0 : index
    %226 = vector.load %arg18[%c1_289, %c0_290] : memref<64x128xf32, #tpu.memory_space<vmem>>, vector<40x8xf32>
    %c0_291 = arith.constant 0 : index
    %c16_292 = arith.constant 16 : index
    %227 = vector.load %arg19[%c0_291, %c16_292] : memref<40x288xf32, #tpu.memory_space<vmem>>, vector<40x8xf32>
    tpu.vector_store %arg19[%c0_291, %c16_292], %226 {strides = array<i32>} : memref<40x288xf32, #tpu.memory_space<vmem>>, vector<40x8xf32>,
    %c1_293 = arith.constant 1 : index
    %c8_294 = arith.constant 8 : index
    %228 = vector.load %arg18[%c1_293, %c8_294] : memref<64x128xf32, #tpu.memory_space<vmem>>, vector<40x8xf32>
    %c0_295 = arith.constant 0 : index
    %c24_296 = arith.constant 24 : index
    %229 = vector.load %arg19[%c0_295, %c24_296] : memref<40x288xf32, #tpu.memory_space<vmem>>, vector<40x8xf32>
    tpu.vector_store %arg19[%c0_295, %c24_296], %228 {strides = array<i32>} : memref<40x288xf32, #tpu.memory_space<vmem>>, vector<40x8xf32>,
    %c2_297 = arith.constant 2 : index
    %c0_298 = arith.constant 0 : index
    %230 = vector.load %arg18[%c2_297, %c0_298] : memref<64x128xf32, #tpu.memory_space<vmem>>, vector<40x8xf32>
    %c0_299 = arith.constant 0 : index
    %c32_300 = arith.constant 32 : index
    %231 = vector.load %arg19[%c0_299, %c32_300] : memref<40x288xf32, #tpu.memory_space<vmem>>, vector<40x8xf32>
    tpu.vector_store %arg19[%c0_299, %c32_300], %230 {strides = array<i32>} : memref<40x288xf32, #tpu.memory_space<vmem>>, vector<40x8xf32>,
    %c2_301 = arith.constant 2 : index
    %c8_302 = arith.constant 8 : index
    %232 = vector.load %arg18[%c2_301, %c8_302] : memref<64x128xf32, #tpu.memory_space<vmem>>, vector<40x8xf32>
    %c0_303 = arith.constant 0 : index
    %c40_304 = arith.constant 40 : index
    %233 = vector.load %arg19[%c0_303, %c40_304] : memref<40x288xf32, #tpu.memory_space<vmem>>, vector<40x8xf32>
    tpu.vector_store %arg19[%c0_303, %c40_304], %232 {strides = array<i32>} : memref<40x288xf32, #tpu.memory_space<vmem>>, vector<40x8xf32>,
    %c0_305 = arith.constant 0 : index
    %c16_306 = arith.constant 16 : index
    %234 = vector.load %arg18[%c0_305, %c16_306] : memref<64x128xf32, #tpu.memory_space<vmem>>, vector<40x8xf32>
    %c0_307 = arith.constant 0 : index
    %c48_308 = arith.constant 48 : index
    %235 = vector.load %arg19[%c0_307, %c48_308] : memref<40x288xf32, #tpu.memory_space<vmem>>, vector<40x8xf32>
    tpu.vector_store %arg19[%c0_307, %c48_308], %234 {strides = array<i32>} : memref<40x288xf32, #tpu.memory_space<vmem>>, vector<40x8xf32>,
    %c0_309 = arith.constant 0 : index
    %c24_310 = arith.constant 24 : index
    %236 = vector.load %arg18[%c0_309, %c24_310] : memref<64x128xf32, #tpu.memory_space<vmem>>, vector<40x8xf32>
    %c0_311 = arith.constant 0 : index
    %c56_312 = arith.constant 56 : index
    %237 = vector.load %arg19[%c0_311, %c56_312] : memref<40x288xf32, #tpu.memory_space<vmem>>, vector<40x8xf32>
    tpu.vector_store %arg19[%c0_311, %c56_312], %236 {strides = array<i32>} : memref<40x288xf32, #tpu.memory_space<vmem>>, vector<40x8xf32>,
    %c1_313 = arith.constant 1 : index
    %c16_314 = arith.constant 16 : index
    %238 = vector.load %arg18[%c1_313, %c16_314] : memref<64x128xf32, #tpu.memory_space<vmem>>, vector<40x8xf32>
    %c0_315 = arith.constant 0 : index
    %c64_316 = arith.constant 64 : index
    %239 = vector.load %arg19[%c0_315, %c64_316] : memref<40x288xf32, #tpu.memory_space<vmem>>, vector<40x8xf32>
    tpu.vector_store %arg19[%c0_315, %c64_316], %238 {strides = array<i32>} : memref<40x288xf32, #tpu.memory_space<vmem>>, vector<40x8xf32>,
    %c1_317 = arith.constant 1 : index
    %c24_318 = arith.constant 24 : index
    %240 = vector.load %arg18[%c1_317, %c24_318] : memref<64x128xf32, #tpu.memory_space<vmem>>, vector<40x8xf32>
    %c0_319 = arith.constant 0 : index
    %c72_320 = arith.constant 72 : index
    %241 = vector.load %arg19[%c0_319, %c72_320] : memref<40x288xf32, #tpu.memory_space<vmem>>, vector<40x8xf32>
    tpu.vector_store %arg19[%c0_319, %c72_320], %240 {strides = array<i32>} : memref<40x288xf32, #tpu.memory_space<vmem>>, vector<40x8xf32>,
    %c2_321 = arith.constant 2 : index
    %c16_322 = arith.constant 16 : index
    %242 = vector.load %arg18[%c2_321, %c16_322] : memref<64x128xf32, #tpu.memory_space<vmem>>, vector<40x8xf32>
    %c0_323 = arith.constant 0 : index
    %c80_324 = arith.constant 80 : index
    %243 = vector.load %arg19[%c0_323, %c80_324] : memref<40x288xf32, #tpu.memory_space<vmem>>, vector<40x8xf32>
    tpu.vector_store %arg19[%c0_323, %c80_324], %242 {strides = array<i32>} : memref<40x288xf32, #tpu.memory_space<vmem>>, vector<40x8xf32>,
    %c2_325 = arith.constant 2 : index
    %c24_326 = arith.constant 24 : index
    %244 = vector.load %arg18[%c2_325, %c24_326] : memref<64x128xf32, #tpu.memory_space<vmem>>, vector<40x8xf32>
    %c0_327 = arith.constant 0 : index
    %c88_328 = arith.constant 88 : index
    %245 = vector.load %arg19[%c0_327, %c88_328] : memref<40x288xf32, #tpu.memory_space<vmem>>, vector<40x8xf32>
    tpu.vector_store %arg19[%c0_327, %c88_328], %244 {strides = array<i32>} : memref<40x288xf32, #tpu.memory_space<vmem>>, vector<40x8xf32>,
    %c8_329 = arith.constant 8 : index
    %c0_330 = arith.constant 0 : index
    %246 = vector.load %arg18[%c8_329, %c0_330] : memref<64x128xf32, #tpu.memory_space<vmem>>, vector<40x8xf32>
    %c0_331 = arith.constant 0 : index
    %c96_332 = arith.constant 96 : index
    %247 = vector.load %arg19[%c0_331, %c96_332] : memref<40x288xf32, #tpu.memory_space<vmem>>, vector<40x8xf32>
    tpu.vector_store %arg19[%c0_331, %c96_332], %246 {strides = array<i32>} : memref<40x288xf32, #tpu.memory_space<vmem>>, vector<40x8xf32>,
    %c8_333 = arith.constant 8 : index
    %c8_334 = arith.constant 8 : index
    %248 = vector.load %arg18[%c8_333, %c8_334] : memref<64x128xf32, #tpu.memory_space<vmem>>, vector<40x8xf32>
    %c0_335 = arith.constant 0 : index
    %c104_336 = arith.constant 104 : index
    %249 = vector.load %arg19[%c0_335, %c104_336] : memref<40x288xf32, #tpu.memory_space<vmem>>, vector<40x8xf32>
    tpu.vector_store %arg19[%c0_335, %c104_336], %248 {strides = array<i32>} : memref<40x288xf32, #tpu.memory_space<vmem>>, vector<40x8xf32>,
    %c9_337 = arith.constant 9 : index
    %c0_338 = arith.constant 0 : index
    %250 = vector.load %arg18[%c9_337, %c0_338] : memref<64x128xf32, #tpu.memory_space<vmem>>, vector<40x8xf32>
    %c0_339 = arith.constant 0 : index
    %c112_340 = arith.constant 112 : index
    %251 = vector.load %arg19[%c0_339, %c112_340] : memref<40x288xf32, #tpu.memory_space<vmem>>, vector<40x8xf32>
    tpu.vector_store %arg19[%c0_339, %c112_340], %250 {strides = array<i32>} : memref<40x288xf32, #tpu.memory_space<vmem>>, vector<40x8xf32>,
    %c9_341 = arith.constant 9 : index
    %c8_342 = arith.constant 8 : index
    %252 = vector.load %arg18[%c9_341, %c8_342] : memref<64x128xf32, #tpu.memory_space<vmem>>, vector<40x8xf32>
    %c0_343 = arith.constant 0 : index
    %c120_344 = arith.constant 120 : index
    %253 = vector.load %arg19[%c0_343, %c120_344] : memref<40x288xf32, #tpu.memory_space<vmem>>, vector<40x8xf32>
    tpu.vector_store %arg19[%c0_343, %c120_344], %252 {strides = array<i32>} : memref<40x288xf32, #tpu.memory_space<vmem>>, vector<40x8xf32>,
    %c10 = arith.constant 10 : index
    %c0_345 = arith.constant 0 : index
    %254 = vector.load %arg18[%c10, %c0_345] : memref<64x128xf32, #tpu.memory_space<vmem>>, vector<40x8xf32>
    %c0_346 = arith.constant 0 : index
    %c128_347 = arith.constant 128 : index
    %255 = vector.load %arg19[%c0_346, %c128_347] : memref<40x288xf32, #tpu.memory_space<vmem>>, vector<40x8xf32>
    tpu.vector_store %arg19[%c0_346, %c128_347], %254 {strides = array<i32>} : memref<40x288xf32, #tpu.memory_space<vmem>>, vector<40x8xf32>,
    %c10_348 = arith.constant 10 : index
    %c8_349 = arith.constant 8 : index
    %256 = vector.load %arg18[%c10_348, %c8_349] : memref<64x128xf32, #tpu.memory_space<vmem>>, vector<40x8xf32>
    %c0_350 = arith.constant 0 : index
    %c136_351 = arith.constant 136 : index
    %257 = vector.load %arg19[%c0_350, %c136_351] : memref<40x288xf32, #tpu.memory_space<vmem>>, vector<40x8xf32>
    tpu.vector_store %arg19[%c0_350, %c136_351], %256 {strides = array<i32>} : memref<40x288xf32, #tpu.memory_space<vmem>>, vector<40x8xf32>,
    %c8_352 = arith.constant 8 : index
    %c16_353 = arith.constant 16 : index
    %258 = vector.load %arg18[%c8_352, %c16_353] : memref<64x128xf32, #tpu.memory_space<vmem>>, vector<40x8xf32>
    %c0_354 = arith.constant 0 : index
    %c144_355 = arith.constant 144 : index
    %259 = vector.load %arg19[%c0_354, %c144_355] : memref<40x288xf32, #tpu.memory_space<vmem>>, vector<40x8xf32>
    tpu.vector_store %arg19[%c0_354, %c144_355], %258 {strides = array<i32>} : memref<40x288xf32, #tpu.memory_space<vmem>>, vector<40x8xf32>,
    %c8_356 = arith.constant 8 : index
    %c24_357 = arith.constant 24 : index
    %260 = vector.load %arg18[%c8_356, %c24_357] : memref<64x128xf32, #tpu.memory_space<vmem>>, vector<40x8xf32>
    %c0_358 = arith.constant 0 : index
    %c152_359 = arith.constant 152 : index
    %261 = vector.load %arg19[%c0_358, %c152_359] : memref<40x288xf32, #tpu.memory_space<vmem>>, vector<40x8xf32>
    tpu.vector_store %arg19[%c0_358, %c152_359], %260 {strides = array<i32>} : memref<40x288xf32, #tpu.memory_space<vmem>>, vector<40x8xf32>,
    %c9_360 = arith.constant 9 : index
    %c16_361 = arith.constant 16 : index
    %262 = vector.load %arg18[%c9_360, %c16_361] : memref<64x128xf32, #tpu.memory_space<vmem>>, vector<40x8xf32>
    %c0_362 = arith.constant 0 : index
    %c160_363 = arith.constant 160 : index
    %263 = vector.load %arg19[%c0_362, %c160_363] : memref<40x288xf32, #tpu.memory_space<vmem>>, vector<40x8xf32>
    tpu.vector_store %arg19[%c0_362, %c160_363], %262 {strides = array<i32>} : memref<40x288xf32, #tpu.memory_space<vmem>>, vector<40x8xf32>,
    %c9_364 = arith.constant 9 : index
    %c24_365 = arith.constant 24 : index
    %264 = vector.load %arg18[%c9_364, %c24_365] : memref<64x128xf32, #tpu.memory_space<vmem>>, vector<40x8xf32>
    %c0_366 = arith.constant 0 : index
    %c168_367 = arith.constant 168 : index
    %265 = vector.load %arg19[%c0_366, %c168_367] : memref<40x288xf32, #tpu.memory_space<vmem>>, vector<40x8xf32>
    tpu.vector_store %arg19[%c0_366, %c168_367], %264 {strides = array<i32>} : memref<40x288xf32, #tpu.memory_space<vmem>>, vector<40x8xf32>,
    %c10_368 = arith.constant 10 : index
    %c16_369 = arith.constant 16 : index
    %266 = vector.load %arg18[%c10_368, %c16_369] : memref<64x128xf32, #tpu.memory_space<vmem>>, vector<40x8xf32>
    %c0_370 = arith.constant 0 : index
    %c176_371 = arith.constant 176 : index
    %267 = vector.load %arg19[%c0_370, %c176_371] : memref<40x288xf32, #tpu.memory_space<vmem>>, vector<40x8xf32>
    tpu.vector_store %arg19[%c0_370, %c176_371], %266 {strides = array<i32>} : memref<40x288xf32, #tpu.memory_space<vmem>>, vector<40x8xf32>,
    %c10_372 = arith.constant 10 : index
    %c24_373 = arith.constant 24 : index
    %268 = vector.load %arg18[%c10_372, %c24_373] : memref<64x128xf32, #tpu.memory_space<vmem>>, vector<40x8xf32>
    %c0_374 = arith.constant 0 : index
    %c184_375 = arith.constant 184 : index
    %269 = vector.load %arg19[%c0_374, %c184_375] : memref<40x288xf32, #tpu.memory_space<vmem>>, vector<40x8xf32>
    tpu.vector_store %arg19[%c0_374, %c184_375], %268 {strides = array<i32>} : memref<40x288xf32, #tpu.memory_space<vmem>>, vector<40x8xf32>,
    %c16_376 = arith.constant 16 : index
    %c0_377 = arith.constant 0 : index
    %270 = vector.load %arg18[%c16_376, %c0_377] : memref<64x128xf32, #tpu.memory_space<vmem>>, vector<40x8xf32>
    %c0_378 = arith.constant 0 : index
    %c192_379 = arith.constant 192 : index
    %271 = vector.load %arg19[%c0_378, %c192_379] : memref<40x288xf32, #tpu.memory_space<vmem>>, vector<40x8xf32>
    tpu.vector_store %arg19[%c0_378, %c192_379], %270 {strides = array<i32>} : memref<40x288xf32, #tpu.memory_space<vmem>>, vector<40x8xf32>,
    %c16_380 = arith.constant 16 : index
    %c8_381 = arith.constant 8 : index
    %272 = vector.load %arg18[%c16_380, %c8_381] : memref<64x128xf32, #tpu.memory_space<vmem>>, vector<40x8xf32>
    %c0_382 = arith.constant 0 : index
    %c200_383 = arith.constant 200 : index
    %273 = vector.load %arg19[%c0_382, %c200_383] : memref<40x288xf32, #tpu.memory_space<vmem>>, vector<40x8xf32>
    tpu.vector_store %arg19[%c0_382, %c200_383], %272 {strides = array<i32>} : memref<40x288xf32, #tpu.memory_space<vmem>>, vector<40x8xf32>,
    %c17 = arith.constant 17 : index
    %c0_384 = arith.constant 0 : index
    %274 = vector.load %arg18[%c17, %c0_384] : memref<64x128xf32, #tpu.memory_space<vmem>>, vector<40x8xf32>
    %c0_385 = arith.constant 0 : index
    %c208_386 = arith.constant 208 : index
    %275 = vector.load %arg19[%c0_385, %c208_386] : memref<40x288xf32, #tpu.memory_space<vmem>>, vector<40x8xf32>
    tpu.vector_store %arg19[%c0_385, %c208_386], %274 {strides = array<i32>} : memref<40x288xf32, #tpu.memory_space<vmem>>, vector<40x8xf32>,
    %c17_387 = arith.constant 17 : index
    %c8_388 = arith.constant 8 : index
    %276 = vector.load %arg18[%c17_387, %c8_388] : memref<64x128xf32, #tpu.memory_space<vmem>>, vector<40x8xf32>
    %c0_389 = arith.constant 0 : index
    %c216_390 = arith.constant 216 : index
    %277 = vector.load %arg19[%c0_389, %c216_390] : memref<40x288xf32, #tpu.memory_space<vmem>>, vector<40x8xf32>
    tpu.vector_store %arg19[%c0_389, %c216_390], %276 {strides = array<i32>} : memref<40x288xf32, #tpu.memory_space<vmem>>, vector<40x8xf32>,
    %c18 = arith.constant 18 : index
    %c0_391 = arith.constant 0 : index
    %278 = vector.load %arg18[%c18, %c0_391] : memref<64x128xf32, #tpu.memory_space<vmem>>, vector<40x8xf32>
    %c0_392 = arith.constant 0 : index
    %c224_393 = arith.constant 224 : index
    %279 = vector.load %arg19[%c0_392, %c224_393] : memref<40x288xf32, #tpu.memory_space<vmem>>, vector<40x8xf32>
    tpu.vector_store %arg19[%c0_392, %c224_393], %278 {strides = array<i32>} : memref<40x288xf32, #tpu.memory_space<vmem>>, vector<40x8xf32>,
    %c18_394 = arith.constant 18 : index
    %c8_395 = arith.constant 8 : index
    %280 = vector.load %arg18[%c18_394, %c8_395] : memref<64x128xf32, #tpu.memory_space<vmem>>, vector<40x8xf32>
    %c0_396 = arith.constant 0 : index
    %c232_397 = arith.constant 232 : index
    %281 = vector.load %arg19[%c0_396, %c232_397] : memref<40x288xf32, #tpu.memory_space<vmem>>, vector<40x8xf32>
    tpu.vector_store %arg19[%c0_396, %c232_397], %280 {strides = array<i32>} : memref<40x288xf32, #tpu.memory_space<vmem>>, vector<40x8xf32>,
    %c16_398 = arith.constant 16 : index
    %c16_399 = arith.constant 16 : index
    %282 = vector.load %arg18[%c16_398, %c16_399] : memref<64x128xf32, #tpu.memory_space<vmem>>, vector<40x8xf32>
    %c0_400 = arith.constant 0 : index
    %c240_401 = arith.constant 240 : index
    %283 = vector.load %arg19[%c0_400, %c240_401] : memref<40x288xf32, #tpu.memory_space<vmem>>, vector<40x8xf32>
    tpu.vector_store %arg19[%c0_400, %c240_401], %282 {strides = array<i32>} : memref<40x288xf32, #tpu.memory_space<vmem>>, vector<40x8xf32>,
    %c16_402 = arith.constant 16 : index
    %c24_403 = arith.constant 24 : index
    %284 = vector.load %arg18[%c16_402, %c24_403] : memref<64x128xf32, #tpu.memory_space<vmem>>, vector<40x8xf32>
    %c0_404 = arith.constant 0 : index
    %c248_405 = arith.constant 248 : index
    %285 = vector.load %arg19[%c0_404, %c248_405] : memref<40x288xf32, #tpu.memory_space<vmem>>, vector<40x8xf32>
    tpu.vector_store %arg19[%c0_404, %c248_405], %284 {strides = array<i32>} : memref<40x288xf32, #tpu.memory_space<vmem>>, vector<40x8xf32>,
    %c17_406 = arith.constant 17 : index
    %c16_407 = arith.constant 16 : index
    %286 = vector.load %arg18[%c17_406, %c16_407] : memref<64x128xf32, #tpu.memory_space<vmem>>, vector<40x8xf32>
    %c0_408 = arith.constant 0 : index
    %c256_409 = arith.constant 256 : index
    %287 = vector.load %arg19[%c0_408, %c256_409] : memref<40x288xf32, #tpu.memory_space<vmem>>, vector<40x8xf32>
    tpu.vector_store %arg19[%c0_408, %c256_409], %286 {strides = array<i32>} : memref<40x288xf32, #tpu.memory_space<vmem>>, vector<40x8xf32>,
    %c17_410 = arith.constant 17 : index
    %c24_411 = arith.constant 24 : index
    %288 = vector.load %arg18[%c17_410, %c24_411] : memref<64x128xf32, #tpu.memory_space<vmem>>, vector<40x8xf32>
    %c0_412 = arith.constant 0 : index
    %c264_413 = arith.constant 264 : index
    %289 = vector.load %arg19[%c0_412, %c264_413] : memref<40x288xf32, #tpu.memory_space<vmem>>, vector<40x8xf32>
    tpu.vector_store %arg19[%c0_412, %c264_413], %288 {strides = array<i32>} : memref<40x288xf32, #tpu.memory_space<vmem>>, vector<40x8xf32>,
    %c18_414 = arith.constant 18 : index
    %c16_415 = arith.constant 16 : index
    %290 = vector.load %arg18[%c18_414, %c16_415] : memref<64x128xf32, #tpu.memory_space<vmem>>, vector<40x8xf32>
    %c0_416 = arith.constant 0 : index
    %c272_417 = arith.constant 272 : index
    %291 = vector.load %arg19[%c0_416, %c272_417] : memref<40x288xf32, #tpu.memory_space<vmem>>, vector<40x8xf32>
    tpu.vector_store %arg19[%c0_416, %c272_417], %290 {strides = array<i32>} : memref<40x288xf32, #tpu.memory_space<vmem>>, vector<40x8xf32>,
    %c18_418 = arith.constant 18 : index
    %c24_419 = arith.constant 24 : index
    %292 = vector.load %arg18[%c18_418, %c24_419] : memref<64x128xf32, #tpu.memory_space<vmem>>, vector<40x8xf32>
    %c0_420 = arith.constant 0 : index
    %c280_421 = arith.constant 280 : index
    %293 = vector.load %arg19[%c0_420, %c280_421] : memref<40x288xf32, #tpu.memory_space<vmem>>, vector<40x8xf32>
    tpu.vector_store %arg19[%c0_420, %c280_421], %292 {strides = array<i32>} : memref<40x288xf32, #tpu.memory_space<vmem>>, vector<40x8xf32>,
    %c0_422 = arith.constant 0 : index
    %c0_423 = arith.constant 0 : index
    %294 = vector.load %arg19[%c0_422, %c0_423] : memref<40x288xf32, #tpu.memory_space<vmem>>, vector<40x288xf32>
    %c0_424 = arith.constant 0 : index
    %c0_425 = arith.constant 0 : index
    %c0_426 = arith.constant 0 : index
    %295 = vector.load %arg6[%c0_424, %c0_425, %c0_426] : memref<4x288x128xf32, #tpu.memory_space<vmem>>, vector<1x288x128xf32>
    %296 = vector.shape_cast %295 : vector<1x288x128xf32> to vector<288x128xf32>
    %cst_427 = arith.constant dense<0.000000e+00> : vector<40x128xf32>
    %297 = tpu.matmul %294, %296, %cst_427 {dimension_numbers = #tpu.dot_dimension_numbers<[1], [0], [0], [1], [0, 0, 1, 1], [], []>} : vector<40x288xf32>, vector<288x128xf32>, vector<40x128xf32> -> vector<40x128xf32>
    %c1_428 = arith.constant 1 : index
    %c0_429 = arith.constant 0 : index
    %c0_430 = arith.constant 0 : index
    %298 = vector.load %arg6[%c1_428, %c0_429, %c0_430] : memref<4x288x128xf32, #tpu.memory_space<vmem>>, vector<1x288x128xf32>
    %299 = vector.shape_cast %298 : vector<1x288x128xf32> to vector<288x128xf32>
    %cst_431 = arith.constant dense<0.000000e+00> : vector<40x128xf32>
    %300 = tpu.matmul %294, %299, %cst_431 {dimension_numbers = #tpu.dot_dimension_numbers<[1], [0], [0], [1], [0, 0, 1, 1], [], []>} : vector<40x288xf32>, vector<288x128xf32>, vector<40x128xf32> -> vector<40x128xf32>
    %301 = arith.maximumf %297, %300 : vector<40x128xf32>
    %c2_432 = arith.constant 2 : index
    %c0_433 = arith.constant 0 : index
    %c0_434 = arith.constant 0 : index
    %302 = vector.load %arg6[%c2_432, %c0_433, %c0_434] : memref<4x288x128xf32, #tpu.memory_space<vmem>>, vector<1x288x128xf32>
    %303 = vector.shape_cast %302 : vector<1x288x128xf32> to vector<288x128xf32>
    %cst_435 = arith.constant dense<0.000000e+00> : vector<40x128xf32>
    %304 = tpu.matmul %294, %303, %cst_435 {dimension_numbers = #tpu.dot_dimension_numbers<[1], [0], [0], [1], [0, 0, 1, 1], [], []>} : vector<40x288xf32>, vector<288x128xf32>, vector<40x128xf32> -> vector<40x128xf32>
    %305 = arith.maximumf %301, %304 : vector<40x128xf32>
    %c3_436 = arith.constant 3 : index
    %c0_437 = arith.constant 0 : index
    %c0_438 = arith.constant 0 : index
    %306 = vector.load %arg6[%c3_436, %c0_437, %c0_438] : memref<4x288x128xf32, #tpu.memory_space<vmem>>, vector<1x288x128xf32>
    %307 = vector.shape_cast %306 : vector<1x288x128xf32> to vector<288x128xf32>
    %cst_439 = arith.constant dense<0.000000e+00> : vector<40x128xf32>
    %308 = tpu.matmul %294, %307, %cst_439 {dimension_numbers = #tpu.dot_dimension_numbers<[1], [0], [0], [1], [0, 0, 1, 1], [], []>} : vector<40x288xf32>, vector<288x128xf32>, vector<40x128xf32> -> vector<40x128xf32>
    %309 = arith.maximumf %305, %308 : vector<40x128xf32>
    %c0_440 = arith.constant 0 : index
    %c0_441 = arith.constant 0 : index
    %310 = vector.load %arg7[%c0_440, %c0_441] : memref<1x128xf32, #tpu.memory_space<vmem>>, vector<1x128xf32>
    %311 = vector.broadcast %310 : vector<1x128xf32> to vector<40x128xf32>
    %312 = arith.addf %309, %311 : vector<40x128xf32>
    %cst_442 = arith.constant 0.000000e+00 : f32
    %313 = vector.broadcast %cst_442 : f32 to vector<40x128xf32>
    %314 = arith.maximumf %312, %313 : vector<40x128xf32>
    %c0_443 = arith.constant 0 : index
    %c0_444 = arith.constant 0 : index
    %315 = vector.load %arg8[%c0_443, %c0_444] : memref<1x128xf32, #tpu.memory_space<vmem>>, vector<1x128xf32>
    %316 = vector.broadcast %315 : vector<1x128xf32> to vector<40x128xf32>
    %317 = arith.mulf %314, %316 : vector<40x128xf32>
    %c0_445 = arith.constant 0 : index
    %c0_446 = arith.constant 0 : index
    %318 = vector.load %arg9[%c0_445, %c0_446] : memref<1x128xf32, #tpu.memory_space<vmem>>, vector<1x128xf32>
    %319 = vector.broadcast %318 : vector<1x128xf32> to vector<40x128xf32>
    %320 = arith.addf %317, %319 : vector<40x128xf32>
    %321 = vector.extract_strided_slice %320 {offsets = [0, 0], sizes = [1, 16], strides = [1, 1]} : vector<40x128xf32> to vector<1x16xf32>
    %c0_447 = arith.constant 0 : index
    %c0_448 = arith.constant 0 : index
    %322 = vector.load %arg20[%c0_447, %c0_448] : memref<1x640xf32, #tpu.memory_space<vmem>>, vector<1x16xf32>
    tpu.vector_store %arg20[%c0_447, %c0_448], %321 {strides = array<i32>} : memref<1x640xf32, #tpu.memory_space<vmem>>, vector<1x16xf32>,
    %323 = vector.extract_strided_slice %320 {offsets = [1, 0], sizes = [1, 16], strides = [1, 1]} : vector<40x128xf32> to vector<1x16xf32>
    %c0_449 = arith.constant 0 : index
    %c16_450 = arith.constant 16 : index
    %324 = vector.load %arg20[%c0_449, %c16_450] : memref<1x640xf32, #tpu.memory_space<vmem>>, vector<1x16xf32>
    tpu.vector_store %arg20[%c0_449, %c16_450], %323 {strides = array<i32>} : memref<1x640xf32, #tpu.memory_space<vmem>>, vector<1x16xf32>,
    %325 = vector.extract_strided_slice %320 {offsets = [2, 0], sizes = [1, 16], strides = [1, 1]} : vector<40x128xf32> to vector<1x16xf32>
    %c0_451 = arith.constant 0 : index
    %c32_452 = arith.constant 32 : index
    %326 = vector.load %arg20[%c0_451, %c32_452] : memref<1x640xf32, #tpu.memory_space<vmem>>, vector<1x16xf32>
    tpu.vector_store %arg20[%c0_451, %c32_452], %325 {strides = array<i32>} : memref<1x640xf32, #tpu.memory_space<vmem>>, vector<1x16xf32>,
    %327 = vector.extract_strided_slice %320 {offsets = [3, 0], sizes = [1, 16], strides = [1, 1]} : vector<40x128xf32> to vector<1x16xf32>
    %c0_453 = arith.constant 0 : index
    %c48_454 = arith.constant 48 : index
    %328 = vector.load %arg20[%c0_453, %c48_454] : memref<1x640xf32, #tpu.memory_space<vmem>>, vector<1x16xf32>
    tpu.vector_store %arg20[%c0_453, %c48_454], %327 {strides = array<i32>} : memref<1x640xf32, #tpu.memory_space<vmem>>, vector<1x16xf32>,
    %329 = vector.extract_strided_slice %320 {offsets = [4, 0], sizes = [1, 16], strides = [1, 1]} : vector<40x128xf32> to vector<1x16xf32>
    %c0_455 = arith.constant 0 : index
    %c64_456 = arith.constant 64 : index
    %330 = vector.load %arg20[%c0_455, %c64_456] : memref<1x640xf32, #tpu.memory_space<vmem>>, vector<1x16xf32>
    tpu.vector_store %arg20[%c0_455, %c64_456], %329 {strides = array<i32>} : memref<1x640xf32, #tpu.memory_space<vmem>>, vector<1x16xf32>,
    %331 = vector.extract_strided_slice %320 {offsets = [5, 0], sizes = [1, 16], strides = [1, 1]} : vector<40x128xf32> to vector<1x16xf32>
    %c0_457 = arith.constant 0 : index
    %c80_458 = arith.constant 80 : index
    %332 = vector.load %arg20[%c0_457, %c80_458] : memref<1x640xf32, #tpu.memory_space<vmem>>, vector<1x16xf32>
    tpu.vector_store %arg20[%c0_457, %c80_458], %331 {strides = array<i32>} : memref<1x640xf32, #tpu.memory_space<vmem>>, vector<1x16xf32>,
    %333 = vector.extract_strided_slice %320 {offsets = [6, 0], sizes = [1, 16], strides = [1, 1]} : vector<40x128xf32> to vector<1x16xf32>
    %c0_459 = arith.constant 0 : index
    %c96_460 = arith.constant 96 : index
    %334 = vector.load %arg20[%c0_459, %c96_460] : memref<1x640xf32, #tpu.memory_space<vmem>>, vector<1x16xf32>
    tpu.vector_store %arg20[%c0_459, %c96_460], %333 {strides = array<i32>} : memref<1x640xf32, #tpu.memory_space<vmem>>, vector<1x16xf32>,
    %335 = vector.extract_strided_slice %320 {offsets = [7, 0], sizes = [1, 16], strides = [1, 1]} : vector<40x128xf32> to vector<1x16xf32>
    %c0_461 = arith.constant 0 : index
    %c112_462 = arith.constant 112 : index
    %336 = vector.load %arg20[%c0_461, %c112_462] : memref<1x640xf32, #tpu.memory_space<vmem>>, vector<1x16xf32>
    tpu.vector_store %arg20[%c0_461, %c112_462], %335 {strides = array<i32>} : memref<1x640xf32, #tpu.memory_space<vmem>>, vector<1x16xf32>,
    %337 = vector.extract_strided_slice %320 {offsets = [8, 0], sizes = [1, 16], strides = [1, 1]} : vector<40x128xf32> to vector<1x16xf32>
    %c0_463 = arith.constant 0 : index
    %c128_464 = arith.constant 128 : index
    %338 = vector.load %arg20[%c0_463, %c128_464] : memref<1x640xf32, #tpu.memory_space<vmem>>, vector<1x16xf32>
    tpu.vector_store %arg20[%c0_463, %c128_464], %337 {strides = array<i32>} : memref<1x640xf32, #tpu.memory_space<vmem>>, vector<1x16xf32>,
    %339 = vector.extract_strided_slice %320 {offsets = [9, 0], sizes = [1, 16], strides = [1, 1]} : vector<40x128xf32> to vector<1x16xf32>
    %c0_465 = arith.constant 0 : index
    %c144_466 = arith.constant 144 : index
    %340 = vector.load %arg20[%c0_465, %c144_466] : memref<1x640xf32, #tpu.memory_space<vmem>>, vector<1x16xf32>
    tpu.vector_store %arg20[%c0_465, %c144_466], %339 {strides = array<i32>} : memref<1x640xf32, #tpu.memory_space<vmem>>, vector<1x16xf32>,
    %341 = vector.extract_strided_slice %320 {offsets = [10, 0], sizes = [1, 16], strides = [1, 1]} : vector<40x128xf32> to vector<1x16xf32>
    %c0_467 = arith.constant 0 : index
    %c160_468 = arith.constant 160 : index
    %342 = vector.load %arg20[%c0_467, %c160_468] : memref<1x640xf32, #tpu.memory_space<vmem>>, vector<1x16xf32>
    tpu.vector_store %arg20[%c0_467, %c160_468], %341 {strides = array<i32>} : memref<1x640xf32, #tpu.memory_space<vmem>>, vector<1x16xf32>,
    %343 = vector.extract_strided_slice %320 {offsets = [11, 0], sizes = [1, 16], strides = [1, 1]} : vector<40x128xf32> to vector<1x16xf32>
    %c0_469 = arith.constant 0 : index
    %c176_470 = arith.constant 176 : index
    %344 = vector.load %arg20[%c0_469, %c176_470] : memref<1x640xf32, #tpu.memory_space<vmem>>, vector<1x16xf32>
    tpu.vector_store %arg20[%c0_469, %c176_470], %343 {strides = array<i32>} : memref<1x640xf32, #tpu.memory_space<vmem>>, vector<1x16xf32>,
    %345 = vector.extract_strided_slice %320 {offsets = [12, 0], sizes = [1, 16], strides = [1, 1]} : vector<40x128xf32> to vector<1x16xf32>
    %c0_471 = arith.constant 0 : index
    %c192_472 = arith.constant 192 : index
    %346 = vector.load %arg20[%c0_471, %c192_472] : memref<1x640xf32, #tpu.memory_space<vmem>>, vector<1x16xf32>
    tpu.vector_store %arg20[%c0_471, %c192_472], %345 {strides = array<i32>} : memref<1x640xf32, #tpu.memory_space<vmem>>, vector<1x16xf32>,
    %347 = vector.extract_strided_slice %320 {offsets = [13, 0], sizes = [1, 16], strides = [1, 1]} : vector<40x128xf32> to vector<1x16xf32>
    %c0_473 = arith.constant 0 : index
    %c208_474 = arith.constant 208 : index
    %348 = vector.load %arg20[%c0_473, %c208_474] : memref<1x640xf32, #tpu.memory_space<vmem>>, vector<1x16xf32>
    tpu.vector_store %arg20[%c0_473, %c208_474], %347 {strides = array<i32>} : memref<1x640xf32, #tpu.memory_space<vmem>>, vector<1x16xf32>,
    %349 = vector.extract_strided_slice %320 {offsets = [14, 0], sizes = [1, 16], strides = [1, 1]} : vector<40x128xf32> to vector<1x16xf32>
    %c0_475 = arith.constant 0 : index
    %c224_476 = arith.constant 224 : index
    %350 = vector.load %arg20[%c0_475, %c224_476] : memref<1x640xf32, #tpu.memory_space<vmem>>, vector<1x16xf32>
    tpu.vector_store %arg20[%c0_475, %c224_476], %349 {strides = array<i32>} : memref<1x640xf32, #tpu.memory_space<vmem>>, vector<1x16xf32>,
    %351 = vector.extract_strided_slice %320 {offsets = [15, 0], sizes = [1, 16], strides = [1, 1]} : vector<40x128xf32> to vector<1x16xf32>
    %c0_477 = arith.constant 0 : index
    %c240_478 = arith.constant 240 : index
    %352 = vector.load %arg20[%c0_477, %c240_478] : memref<1x640xf32, #tpu.memory_space<vmem>>, vector<1x16xf32>
    tpu.vector_store %arg20[%c0_477, %c240_478], %351 {strides = array<i32>} : memref<1x640xf32, #tpu.memory_space<vmem>>, vector<1x16xf32>,
    %353 = vector.extract_strided_slice %320 {offsets = [16, 0], sizes = [1, 16], strides = [1, 1]} : vector<40x128xf32> to vector<1x16xf32>
    %c0_479 = arith.constant 0 : index
    %c256_480 = arith.constant 256 : index
    %354 = vector.load %arg20[%c0_479, %c256_480] : memref<1x640xf32, #tpu.memory_space<vmem>>, vector<1x16xf32>
    tpu.vector_store %arg20[%c0_479, %c256_480], %353 {strides = array<i32>} : memref<1x640xf32, #tpu.memory_space<vmem>>, vector<1x16xf32>,
    %355 = vector.extract_strided_slice %320 {offsets = [17, 0], sizes = [1, 16], strides = [1, 1]} : vector<40x128xf32> to vector<1x16xf32>
    %c0_481 = arith.constant 0 : index
    %c272_482 = arith.constant 272 : index
    %356 = vector.load %arg20[%c0_481, %c272_482] : memref<1x640xf32, #tpu.memory_space<vmem>>, vector<1x16xf32>
    tpu.vector_store %arg20[%c0_481, %c272_482], %355 {strides = array<i32>} : memref<1x640xf32, #tpu.memory_space<vmem>>, vector<1x16xf32>,
    %357 = vector.extract_strided_slice %320 {offsets = [18, 0], sizes = [1, 16], strides = [1, 1]} : vector<40x128xf32> to vector<1x16xf32>
    %c0_483 = arith.constant 0 : index
    %c288_484 = arith.constant 288 : index
    %358 = vector.load %arg20[%c0_483, %c288_484] : memref<1x640xf32, #tpu.memory_space<vmem>>, vector<1x16xf32>
    tpu.vector_store %arg20[%c0_483, %c288_484], %357 {strides = array<i32>} : memref<1x640xf32, #tpu.memory_space<vmem>>, vector<1x16xf32>,
    %359 = vector.extract_strided_slice %320 {offsets = [19, 0], sizes = [1, 16], strides = [1, 1]} : vector<40x128xf32> to vector<1x16xf32>
    %c0_485 = arith.constant 0 : index
    %c304_486 = arith.constant 304 : index
    %360 = vector.load %arg20[%c0_485, %c304_486] : memref<1x640xf32, #tpu.memory_space<vmem>>, vector<1x16xf32>
    tpu.vector_store %arg20[%c0_485, %c304_486], %359 {strides = array<i32>} : memref<1x640xf32, #tpu.memory_space<vmem>>, vector<1x16xf32>,
    %361 = vector.extract_strided_slice %320 {offsets = [20, 0], sizes = [1, 16], strides = [1, 1]} : vector<40x128xf32> to vector<1x16xf32>
    %c0_487 = arith.constant 0 : index
    %c320_488 = arith.constant 320 : index
    %362 = vector.load %arg20[%c0_487, %c320_488] : memref<1x640xf32, #tpu.memory_space<vmem>>, vector<1x16xf32>
    tpu.vector_store %arg20[%c0_487, %c320_488], %361 {strides = array<i32>} : memref<1x640xf32, #tpu.memory_space<vmem>>, vector<1x16xf32>,
    %363 = vector.extract_strided_slice %320 {offsets = [21, 0], sizes = [1, 16], strides = [1, 1]} : vector<40x128xf32> to vector<1x16xf32>
    %c0_489 = arith.constant 0 : index
    %c336_490 = arith.constant 336 : index
    %364 = vector.load %arg20[%c0_489, %c336_490] : memref<1x640xf32, #tpu.memory_space<vmem>>, vector<1x16xf32>
    tpu.vector_store %arg20[%c0_489, %c336_490], %363 {strides = array<i32>} : memref<1x640xf32, #tpu.memory_space<vmem>>, vector<1x16xf32>,
    %365 = vector.extract_strided_slice %320 {offsets = [22, 0], sizes = [1, 16], strides = [1, 1]} : vector<40x128xf32> to vector<1x16xf32>
    %c0_491 = arith.constant 0 : index
    %c352_492 = arith.constant 352 : index
    %366 = vector.load %arg20[%c0_491, %c352_492] : memref<1x640xf32, #tpu.memory_space<vmem>>, vector<1x16xf32>
    tpu.vector_store %arg20[%c0_491, %c352_492], %365 {strides = array<i32>} : memref<1x640xf32, #tpu.memory_space<vmem>>, vector<1x16xf32>,
    %367 = vector.extract_strided_slice %320 {offsets = [23, 0], sizes = [1, 16], strides = [1, 1]} : vector<40x128xf32> to vector<1x16xf32>
    %c0_493 = arith.constant 0 : index
    %c368_494 = arith.constant 368 : index
    %368 = vector.load %arg20[%c0_493, %c368_494] : memref<1x640xf32, #tpu.memory_space<vmem>>, vector<1x16xf32>
    tpu.vector_store %arg20[%c0_493, %c368_494], %367 {strides = array<i32>} : memref<1x640xf32, #tpu.memory_space<vmem>>, vector<1x16xf32>,
    %369 = vector.extract_strided_slice %320 {offsets = [24, 0], sizes = [1, 16], strides = [1, 1]} : vector<40x128xf32> to vector<1x16xf32>
    %c0_495 = arith.constant 0 : index
    %c384_496 = arith.constant 384 : index
    %370 = vector.load %arg20[%c0_495, %c384_496] : memref<1x640xf32, #tpu.memory_space<vmem>>, vector<1x16xf32>
    tpu.vector_store %arg20[%c0_495, %c384_496], %369 {strides = array<i32>} : memref<1x640xf32, #tpu.memory_space<vmem>>, vector<1x16xf32>,
    %371 = vector.extract_strided_slice %320 {offsets = [25, 0], sizes = [1, 16], strides = [1, 1]} : vector<40x128xf32> to vector<1x16xf32>
    %c0_497 = arith.constant 0 : index
    %c400_498 = arith.constant 400 : index
    %372 = vector.load %arg20[%c0_497, %c400_498] : memref<1x640xf32, #tpu.memory_space<vmem>>, vector<1x16xf32>
    tpu.vector_store %arg20[%c0_497, %c400_498], %371 {strides = array<i32>} : memref<1x640xf32, #tpu.memory_space<vmem>>, vector<1x16xf32>,
    %373 = vector.extract_strided_slice %320 {offsets = [26, 0], sizes = [1, 16], strides = [1, 1]} : vector<40x128xf32> to vector<1x16xf32>
    %c0_499 = arith.constant 0 : index
    %c416_500 = arith.constant 416 : index
    %374 = vector.load %arg20[%c0_499, %c416_500] : memref<1x640xf32, #tpu.memory_space<vmem>>, vector<1x16xf32>
    tpu.vector_store %arg20[%c0_499, %c416_500], %373 {strides = array<i32>} : memref<1x640xf32, #tpu.memory_space<vmem>>, vector<1x16xf32>,
    %375 = vector.extract_strided_slice %320 {offsets = [27, 0], sizes = [1, 16], strides = [1, 1]} : vector<40x128xf32> to vector<1x16xf32>
    %c0_501 = arith.constant 0 : index
    %c432_502 = arith.constant 432 : index
    %376 = vector.load %arg20[%c0_501, %c432_502] : memref<1x640xf32, #tpu.memory_space<vmem>>, vector<1x16xf32>
    tpu.vector_store %arg20[%c0_501, %c432_502], %375 {strides = array<i32>} : memref<1x640xf32, #tpu.memory_space<vmem>>, vector<1x16xf32>,
    %377 = vector.extract_strided_slice %320 {offsets = [28, 0], sizes = [1, 16], strides = [1, 1]} : vector<40x128xf32> to vector<1x16xf32>
    %c0_503 = arith.constant 0 : index
    %c448_504 = arith.constant 448 : index
    %378 = vector.load %arg20[%c0_503, %c448_504] : memref<1x640xf32, #tpu.memory_space<vmem>>, vector<1x16xf32>
    tpu.vector_store %arg20[%c0_503, %c448_504], %377 {strides = array<i32>} : memref<1x640xf32, #tpu.memory_space<vmem>>, vector<1x16xf32>,
    %379 = vector.extract_strided_slice %320 {offsets = [29, 0], sizes = [1, 16], strides = [1, 1]} : vector<40x128xf32> to vector<1x16xf32>
    %c0_505 = arith.constant 0 : index
    %c464_506 = arith.constant 464 : index
    %380 = vector.load %arg20[%c0_505, %c464_506] : memref<1x640xf32, #tpu.memory_space<vmem>>, vector<1x16xf32>
    tpu.vector_store %arg20[%c0_505, %c464_506], %379 {strides = array<i32>} : memref<1x640xf32, #tpu.memory_space<vmem>>, vector<1x16xf32>,
    %381 = vector.extract_strided_slice %320 {offsets = [30, 0], sizes = [1, 16], strides = [1, 1]} : vector<40x128xf32> to vector<1x16xf32>
    %c0_507 = arith.constant 0 : index
    %c480_508 = arith.constant 480 : index
    %382 = vector.load %arg20[%c0_507, %c480_508] : memref<1x640xf32, #tpu.memory_space<vmem>>, vector<1x16xf32>
    tpu.vector_store %arg20[%c0_507, %c480_508], %381 {strides = array<i32>} : memref<1x640xf32, #tpu.memory_space<vmem>>, vector<1x16xf32>,
    %383 = vector.extract_strided_slice %320 {offsets = [31, 0], sizes = [1, 16], strides = [1, 1]} : vector<40x128xf32> to vector<1x16xf32>
    %c0_509 = arith.constant 0 : index
    %c496_510 = arith.constant 496 : index
    %384 = vector.load %arg20[%c0_509, %c496_510] : memref<1x640xf32, #tpu.memory_space<vmem>>, vector<1x16xf32>
    tpu.vector_store %arg20[%c0_509, %c496_510], %383 {strides = array<i32>} : memref<1x640xf32, #tpu.memory_space<vmem>>, vector<1x16xf32>,
    %385 = vector.extract_strided_slice %320 {offsets = [32, 0], sizes = [1, 16], strides = [1, 1]} : vector<40x128xf32> to vector<1x16xf32>
    %c0_511 = arith.constant 0 : index
    %c512 = arith.constant 512 : index
    %386 = vector.load %arg20[%c0_511, %c512] : memref<1x640xf32, #tpu.memory_space<vmem>>, vector<1x16xf32>
    tpu.vector_store %arg20[%c0_511, %c512], %385 {strides = array<i32>} : memref<1x640xf32, #tpu.memory_space<vmem>>, vector<1x16xf32>,
    %387 = vector.extract_strided_slice %320 {offsets = [33, 0], sizes = [1, 16], strides = [1, 1]} : vector<40x128xf32> to vector<1x16xf32>
    %c0_512 = arith.constant 0 : index
    %c528 = arith.constant 528 : index
    %388 = vector.load %arg20[%c0_512, %c528] : memref<1x640xf32, #tpu.memory_space<vmem>>, vector<1x16xf32>
    tpu.vector_store %arg20[%c0_512, %c528], %387 {strides = array<i32>} : memref<1x640xf32, #tpu.memory_space<vmem>>, vector<1x16xf32>,
    %389 = vector.extract_strided_slice %320 {offsets = [34, 0], sizes = [1, 16], strides = [1, 1]} : vector<40x128xf32> to vector<1x16xf32>
    %c0_513 = arith.constant 0 : index
    %c544 = arith.constant 544 : index
    %390 = vector.load %arg20[%c0_513, %c544] : memref<1x640xf32, #tpu.memory_space<vmem>>, vector<1x16xf32>
    tpu.vector_store %arg20[%c0_513, %c544], %389 {strides = array<i32>} : memref<1x640xf32, #tpu.memory_space<vmem>>, vector<1x16xf32>,
    %391 = vector.extract_strided_slice %320 {offsets = [35, 0], sizes = [1, 16], strides = [1, 1]} : vector<40x128xf32> to vector<1x16xf32>
    %c0_514 = arith.constant 0 : index
    %c560 = arith.constant 560 : index
    %392 = vector.load %arg20[%c0_514, %c560] : memref<1x640xf32, #tpu.memory_space<vmem>>, vector<1x16xf32>
    tpu.vector_store %arg20[%c0_514, %c560], %391 {strides = array<i32>} : memref<1x640xf32, #tpu.memory_space<vmem>>, vector<1x16xf32>,
    %393 = vector.extract_strided_slice %320 {offsets = [36, 0], sizes = [1, 16], strides = [1, 1]} : vector<40x128xf32> to vector<1x16xf32>
    %c0_515 = arith.constant 0 : index
    %c576 = arith.constant 576 : index
    %394 = vector.load %arg20[%c0_515, %c576] : memref<1x640xf32, #tpu.memory_space<vmem>>, vector<1x16xf32>
    tpu.vector_store %arg20[%c0_515, %c576], %393 {strides = array<i32>} : memref<1x640xf32, #tpu.memory_space<vmem>>, vector<1x16xf32>,
    %395 = vector.extract_strided_slice %320 {offsets = [37, 0], sizes = [1, 16], strides = [1, 1]} : vector<40x128xf32> to vector<1x16xf32>
    %c0_516 = arith.constant 0 : index
    %c592 = arith.constant 592 : index
    %396 = vector.load %arg20[%c0_516, %c592] : memref<1x640xf32, #tpu.memory_space<vmem>>, vector<1x16xf32>
    tpu.vector_store %arg20[%c0_516, %c592], %395 {strides = array<i32>} : memref<1x640xf32, #tpu.memory_space<vmem>>, vector<1x16xf32>,
    %397 = vector.extract_strided_slice %320 {offsets = [38, 0], sizes = [1, 16], strides = [1, 1]} : vector<40x128xf32> to vector<1x16xf32>
    %c0_517 = arith.constant 0 : index
    %c608 = arith.constant 608 : index
    %398 = vector.load %arg20[%c0_517, %c608] : memref<1x640xf32, #tpu.memory_space<vmem>>, vector<1x16xf32>
    tpu.vector_store %arg20[%c0_517, %c608], %397 {strides = array<i32>} : memref<1x640xf32, #tpu.memory_space<vmem>>, vector<1x16xf32>,
    %399 = vector.extract_strided_slice %320 {offsets = [39, 0], sizes = [1, 16], strides = [1, 1]} : vector<40x128xf32> to vector<1x16xf32>
    %c0_518 = arith.constant 0 : index
    %c624 = arith.constant 624 : index
    %400 = vector.load %arg20[%c0_518, %c624] : memref<1x640xf32, #tpu.memory_space<vmem>>, vector<1x16xf32>
    tpu.vector_store %arg20[%c0_518, %c624], %399 {strides = array<i32>} : memref<1x640xf32, #tpu.memory_space<vmem>>, vector<1x16xf32>,
    %c0_519 = arith.constant 0 : index
    %c0_520 = arith.constant 0 : index
    %401 = vector.load %arg20[%c0_519, %c0_520] : memref<1x640xf32, #tpu.memory_space<vmem>>, vector<1x640xf32>
    %c0_521 = arith.constant 0 : index
    %c0_522 = arith.constant 0 : index
    %402 = vector.load %arg10[%c0_521, %c0_522] : memref<640x128xf32, #tpu.memory_space<vmem>>, vector<640x128xf32>
    %cst_523 = arith.constant dense<0.000000e+00> : vector<1x128xf32>
    %403 = tpu.matmul %401, %402, %cst_523 {dimension_numbers = #tpu.dot_dimension_numbers<[1], [0], [0], [1], [0, 0, 1, 1], [], []>} : vector<1x640xf32>, vector<640x128xf32>, vector<1x128xf32> -> vector<1x128xf32>
    %c0_524 = arith.constant 0 : index
    %c0_525 = arith.constant 0 : index
    %404 = vector.load %arg11[%c0_524, %c0_525] : memref<1x128xf32, #tpu.memory_space<vmem>>, vector<1x128xf32>
    %405 = arith.addf %403, %404 : vector<1x128xf32>
    %cst_526 = arith.constant 0.000000e+00 : f32
    %406 = vector.broadcast %cst_526 : f32 to vector<1x128xf32>
    %407 = arith.maximumf %405, %406 : vector<1x128xf32>
    %c0_527 = arith.constant 0 : index
    %c0_528 = arith.constant 0 : index
    %408 = vector.load %arg12[%c0_527, %c0_528] : memref<128x128xf32, #tpu.memory_space<vmem>>, vector<128x128xf32>
    %cst_529 = arith.constant dense<0.000000e+00> : vector<1x128xf32>
    %409 = tpu.matmul %407, %408, %cst_529 {dimension_numbers = #tpu.dot_dimension_numbers<[1], [0], [0], [1], [0, 0, 1, 1], [], []>} : vector<1x128xf32>, vector<128x128xf32>, vector<1x128xf32> -> vector<1x128xf32>
    %c0_530 = arith.constant 0 : index
    %c0_531 = arith.constant 0 : index
    %410 = vector.load %arg13[%c0_530, %c0_531] : memref<1x128xf32, #tpu.memory_space<vmem>>, vector<1x128xf32>
    %411 = arith.addf %409, %410 : vector<1x128xf32>
    %cst_532 = arith.constant 0.000000e+00 : f32
    %412 = vector.broadcast %cst_532 : f32 to vector<1x128xf32>
    %413 = arith.maximumf %411, %412 : vector<1x128xf32>
    %c0_533 = arith.constant 0 : index
    %c0_534 = arith.constant 0 : index
    %414 = vector.load %arg14[%c0_533, %c0_534] : memref<128x128xf32, #tpu.memory_space<vmem>>, vector<128x128xf32>
    %cst_535 = arith.constant dense<0.000000e+00> : vector<1x128xf32>
    %415 = tpu.matmul %413, %414, %cst_535 {dimension_numbers = #tpu.dot_dimension_numbers<[1], [0], [0], [1], [0, 0, 1, 1], [], []>} : vector<1x128xf32>, vector<128x128xf32>, vector<1x128xf32> -> vector<1x128xf32>
    %c0_536 = arith.constant 0 : index
    %c0_537 = arith.constant 0 : index
    %416 = vector.load %arg15[%c0_536, %c0_537] : memref<1x128xf32, #tpu.memory_space<vmem>>, vector<1x128xf32>
    %417 = arith.addf %415, %416 : vector<1x128xf32>
    %c0_538 = arith.constant 0 : index
    %c0_539 = arith.constant 0 : index
    %c0_540 = arith.constant 0 : index
    %418 = vector.load %arg16[%c0_538, %c0_539, %c0_540] : memref<1x1x128xf32, #tpu.memory_space<vmem>>, vector<1x1x128xf32>
    %419 = vector.shape_cast %418 : vector<1x1x128xf32> to vector<1x128xf32>
    %420 = vector.shape_cast %417 : vector<1x128xf32> to vector<1x1x128xf32>
    tpu.vector_store %arg16[%c0_538, %c0_539, %c0_540], %420 {strides = array<i32>} : memref<1x1x128xf32, #tpu.memory_space<vmem>>, vector<1x1x128xf32>,
    return
  }
  func.func @transform_0(%arg0: i32) -> (i32, i32, i32) {
    %c0_i32 = arith.constant 0 : i32
    %c0_i32_0 = arith.constant 0 : i32
    %c0_i32_1 = arith.constant 0 : i32
    return %arg0, %c0_i32, %c0_i32_0 : i32, i32, i32
  }
  func.func @transform_1(%arg0: i32) -> (i32, i32, i32) {
    %c0_i32 = arith.constant 0 : i32
    %c0_i32_0 = arith.constant 0 : i32
    %c0_i32_1 = arith.constant 0 : i32
    %c0_i32_2 = arith.constant 0 : i32
    return %c0_i32, %c0_i32_0, %c0_i32_1 : i32, i32, i32
  }
  func.func @transform_2(%arg0: i32) -> (i32, i32) {
    %c0_i32 = arith.constant 0 : i32
    %c0_i32_0 = arith.constant 0 : i32
    %c0_i32_1 = arith.constant 0 : i32
    return %c0_i32, %c0_i32_0 : i32, i32
  }
  func.func @transform_3(%arg0: i32) -> (i32, i32) {
    %c0_i32 = arith.constant 0 : i32
    %c0_i32_0 = arith.constant 0 : i32
    %c0_i32_1 = arith.constant 0 : i32
    return %c0_i32, %c0_i32_0 : i32, i32
  }
  func.func @transform_4(%arg0: i32) -> (i32, i32) {
    %c0_i32 = arith.constant 0 : i32
    %c0_i32_0 = arith.constant 0 : i32
    %c0_i32_1 = arith.constant 0 : i32
    return %c0_i32, %c0_i32_0 : i32, i32
  }
  func.func @transform_5(%arg0: i32) -> (i32, i32, i32) {
    %c0_i32 = arith.constant 0 : i32
    %c0_i32_0 = arith.constant 0 : i32
    %c0_i32_1 = arith.constant 0 : i32
    %c0_i32_2 = arith.constant 0 : i32
    return %c0_i32, %c0_i32_0, %c0_i32_1 : i32, i32, i32
  }
  func.func @transform_6(%arg0: i32) -> (i32, i32) {
    %c0_i32 = arith.constant 0 : i32
    %c0_i32_0 = arith.constant 0 : i32
    %c0_i32_1 = arith.constant 0 : i32
    return %c0_i32, %c0_i32_0 : i32, i32
  }
  func.func @transform_7(%arg0: i32) -> (i32, i32) {
    %c0_i32 = arith.constant 0 : i32
    %c0_i32_0 = arith.constant 0 : i32
    %c0_i32_1 = arith.constant 0 : i32
    return %c0_i32, %c0_i32_0 : i32, i32
  }
  func.func @transform_8(%arg0: i32) -> (i32, i32) {
    %c0_i32 = arith.constant 0 : i32
    %c0_i32_0 = arith.constant 0 : i32
    %c0_i32_1 = arith.constant 0 : i32
    return %c0_i32, %c0_i32_0 : i32, i32
  }
  func.func @transform_9(%arg0: i32) -> (i32, i32) {
    %c0_i32 = arith.constant 0 : i32
    %c0_i32_0 = arith.constant 0 : i32
    %c0_i32_1 = arith.constant 0 : i32
    return %c0_i32, %c0_i32_0 : i32, i32
  }
  func.func @transform_10(%arg0: i32) -> (i32, i32) {
    %c0_i32 = arith.constant 0 : i32
    %c0_i32_0 = arith.constant 0 : i32
    %c0_i32_1 = arith.constant 0 : i32
    return %c0_i32, %c0_i32_0 : i32, i32
  }
  func.func @transform_11(%arg0: i32) -> (i32, i32) {
    %c0_i32 = arith.constant 0 : i32
    %c0_i32_0 = arith.constant 0 : i32
    %c0_i32_1 = arith.constant 0 : i32
    return %c0_i32, %c0_i32_0 : i32, i32
  }
  func.func @transform_12(%arg0: i32) -> (i32, i32) {
    %c0_i32 = arith.constant 0 : i32
    %c0_i32_0 = arith.constant 0 : i32
    %c0_i32_1 = arith.constant 0 : i32
    return %c0_i32, %c0_i32_0 : i32, i32
  }
  func.func @transform_13(%arg0: i32) -> (i32, i32) {
    %c0_i32 = arith.constant 0 : i32
    %c0_i32_0 = arith.constant 0 : i32
    %c0_i32_1 = arith.constant 0 : i32
    return %c0_i32, %c0_i32_0 : i32, i32
  }
  func.func @transform_14(%arg0: i32) -> (i32, i32) {
    %c0_i32 = arith.constant 0 : i32
    %c0_i32_0 = arith.constant 0 : i32
    %c0_i32_1 = arith.constant 0 : i32
    return %c0_i32, %c0_i32_0 : i32, i32
  }
  func.func @transform_15(%arg0: i32) -> (i32, i32, i32) {
    %c0_i32 = arith.constant 0 : i32
    %c0_i32_0 = arith.constant 0 : i32
    %c0_i32_1 = arith.constant 0 : i32
    return %arg0, %c0_i32, %c0_i32_0 : i32, i32, i32
  }
}

</mosaic_0001>

<bundles_post_ra>
// kernel: lenet_forward.1
= control target key start
LH: loop header
LB: loop body
LE: loop exit
PB: predicated region body
PF: predicated region fallthrough
CT: control target
= control target key end

     0   :  { %s10710_s0 = inlined_call_operand.vmem [shape: f32[2,72,128], index: 0, kind: input, shape index: {}]   ;;  %s10711_s1 = inlined_call_operand.vmem [shape: f32[4,512,128], index: 1, kind: input, shape index: {}]   ;;  %s10712_s2 = inlined_call_operand.vmem [shape: f32[1,128], index: 2, kind: input, shape index: {}]   ;;  %s10713_s3 = inlined_call_operand.vmem [shape: f32[1,128], index: 3, kind: input, shape index: {}]   ;;  %s10714_s4 = inlined_call_operand.vmem [shape: f32[1,128], index: 4, kind: input, shape index: {}]   ;;  %s10715_s5 = inlined_call_operand.vmem [shape: f32[4,288,128], index: 5, kind: input, shape index: {}]   ;;  %s10716_s6 = inlined_call_operand.vmem [shape: f32[1,128], index: 6, kind: input, shape index: {}]   ;;  %s10717_s7 = inlined_call_operand.vmem [shape: f32[1,128], index: 7, kind: input, shape index: {}]   ;;  %s10718_s8 = inlined_call_operand.vmem [shape: f32[1,128], index: 8, kind: input, shape index: {}]   ;;  %s10719_s9 = inlined_call_operand.vmem [shape: f32[640,128], index: 9, kind: input, shape index: {}]   ;;  %s10720_s10 = inlined_call_operand.vmem [shape: f32[1,128], index: 10, kind: input, shape index: {}]   ;;  %s10721_s11 = inlined_call_operand.vmem [shape: f32[128,128], index: 11, kind: input, shape index: {}]   ;;  %s10722_s12 = inlined_call_operand.vmem [shape: f32[1,128], index: 12, kind: input, shape index: {}]   ;;  %s10723_s13 = inlined_call_operand.vmem [shape: f32[128,128], index: 13, kind: input, shape index: {}]   ;;  %s10724_s14 = inlined_call_operand.vmem [shape: f32[1,128], index: 14, kind: input, shape index: {}]   ;;  %s10725_s15 = inlined_call_operand.hbm [shape: f32[2,1,128], index: 15, kind: output, shape index: {}]  }
   0x1   :  { %10749 = sst [smem:[#allocation47_spill]] %s10710_s0 }
   0x2   :  { %10750 = sst [smem:[#allocation48_spill]] %s10711_s1 }
   0x3   :  { %10751 = sst [smem:[#allocation49_spill]] %s10724_s14 }
   0x4   :  { %20 = vsyncpa [#allocation7], 0 }
   0x5   :  { %22 = vsyncpa [#allocation7 + $0x1], 0  ;;  %s6422_s18 = smov 0   ;;  %s6424_s19 = smov 0  }
   0x6   :  { %s6426_s20 = smov 0   ;;  %s6428_s21 = smov 0  }
   0x7 LB: > { %10752 = sst [smem:[#allocation9_spill]] %s6320_s18  ;;  %s6443_s22 = sadd.s32 4294967295, %s6332_s21   ;;  %s6332_s21 = sphi %s6428_s21, %s10886_s21   ;;  %s6328_s20 = sphi %s6426_s20, %s10888_s20   ;;  %s6324_s19 = sphi %s6424_s19, %s10890_s19   ;;  %s6320_s18 = sphi %s6422_s18, %s10889_s18  }
   0x8   : > { %10753 = sst [smem:[#allocation10_spill]] %s6328_s20  ;;  %s5859_s23 = sadd.s32 4294967294, %s6332_s21  }
   0x9   : > { %10754 = sst [smem:[#allocation11_spill]] %s6332_s21  ;;  %s6447_s24 = sadd.s32 1, %s6332_s21  }
   0xa   : > { %10755 = sst [smem:[#allocation12_spill]] %s6447_s24  ;;  %s355_s25 = sadd.s32 1, %s6328_s20 }
   0xb   : > { %s352_s26 = ssub.s32 %s6332_s21, %s6447_s24  ;;  %p365_p0 = scmp.ne.s32.totalorder %s6328_s20, %s6324_s19 }
   0xc   : > { %p353_p1 = scmp.eq.s32.totalorder %s352_s26, 0  ;;  %p366_p2 = scmp.eq.s32.totalorder %s6443_s22, 1 }
   0xd   : > { %p371_p3 = scmp.ne.s32.totalorder %s6324_s19, %s6320_s18  ;;  %p372_p4 = scmp.eq.s32.totalorder %s5859_s23, 1 }
   0xe   : > { %s6458_s27 = scalar_select %p353_p1, %s6328_s20, %s355_s25  }
   0xf   : > { %p6460_p5 = por %p366_p2, %p365_p0  ;;  %p6464_p6 = por %p372_p4, %p371_p3 }
  0x10   : > { %10756 = sst [smem:[#allocation13_spill]] %s6458_s27  ;;  %p5862_p7 = scmp.ge.s32.totalorder %s6332_s21, 1 }
  0x11   : > { %s10758_s29 = scalar_select %p6464_p6, 1, 0 }
  0x12   : > { %p440_p8 = scmp.lt.s32.totalorder %s6332_s21, 3 }
  0x13   : > { %10759 = sst [smem:[#allocation14_spill]] %s10758_s29 }
  0x14   : > { %p441_p9 = pnand %p5862_p7, %p440_p8 }
  0x16   : > { %444 = sbr.rel (%p441_p9) target bundleno = 2853 (0xb25), region = 80 }
  0x1b   : > { %p487_p10 = scmp.lt.s32.totalorder %s6443_s22, 1  ;;  %s10760_s0 = sld [smem:[#allocation47_spill]]  ;;  %vm499_vm0 = vcmask 64512   ;;  %vm10742_vm1 = vcmask 130112   ;;  %vm529_vm2 = vcmask 195712   ;;  %vm544_vm3 = vcmask 261312  }
  0x1c   : > { %s10729_s26 = smov 32   ;;  %vm587_vm4 = vcmask 326912   ;;  %vm630_vm5 = vcmask 392512   ;;  %vm10743_vm6 = vcmask 458112   ;;  %vm716_vm7 = vcmask 523712   ;;  %s10761_s1 = sld [smem:[#allocation48_spill]] }
  0x1d   : > { %s488_s30 = scalar_select %p487_p10, %s6443_s22, 1  ;;  %vm759_vm8 = vcmask 589312   ;;  %vm802_vm9 = vcmask 654912   ;;  %vm845_vm10 = vcmask 720512   ;;  %vm888_vm11 = vcmask 786112  }
  0x1e   : > { %vm931_vm12 = vcmask 851712   ;;  %s10763_s20 = smov 32   ;;  %vm974_vm13 = vcmask 917312   ;;  %vm1017_vm14 = vcmask 982912   ;;  %vm1060_vm15 = vcmask 1048512   ;;  %s10738_s29 = smov 16  }
  0x1f   : > { %s6190_s16 = smul.u32 72, %s488_s30  ;;  %s10734_s30 = smov 64  }
  0x20   : > { %s10740_s27 = smov 48   ;;  %s10745_s14 = smov 112  }
  0x21   : > { %s6475_s25 = scalar_lea.vmem %s10760_s0, %s6190_s16  ;;  %s10726_s16 = smov 96  }
  0x22   : > { %v6478_v0 = vld [vmem:[%s6475_s25 + $0x11] sm:$0xff]  ;;  %v6481_v1 = vld [vmem:[%s6475_s25 + $0x1] sm:$0xff]  ;;  %v6490_v3 = vld [vmem:[%s6475_s25 + $0x19] sm:$0xff]  ;;  %s10747_s21 = smov 80   ;;  %s10829_s17 = smov 16  }
  0x23   : > { %570 = vrot.lane.b32.xlu1 %v6478_v0, %s10729_s26  ;;  %566 = vrot.lane.b32.xlu0 %v6481_v1, %s10729_s26  ;;  %v556_v2 = vld [vmem:[%s6475_s25 + $0x21] sm:$0xff]  ;;  %v6493_v4 = vld [vmem:[%s6475_s25 + $0x9] sm:$0xff]  ;;  %s10830_s0 = smov 48   ;;  %s485_s24 = sand.u32 1, %s6324_s19  }
  0x24   : > { %574 = vrot.lane.b32.xlu2 %v556_v2, %s10729_s26  ;;  %v557_v5 = vld [vmem:[%s6475_s25 + $0x29] sm:$0xff]  ;;  %v558_v6 = vld [vmem:[%s6475_s25 + $0x31] sm:$0xff]  ;;  %v6536_v7 = vld [vmem:[%s6475_s25] sm:$0xff]  ;;  %s486_s18 = scalar_lea.vmem [#allocation6], %s485_s24 }
  0x25   : > { %v6539_v8 = vld [vmem:[%s6475_s25 + $0x8] sm:$0xff]  ;;  %v728_v9 = vld [vmem:[%s6475_s25 + $0x20] sm:$0xff]  ;;  %v6551_v10 = vld [vmem:[%s6475_s25 + $0x10] sm:$0xff]  ;;  %500 = vst.msk [vmem:[#allocation2] sm:$0xff] %vm499_vm0, %v6536_v7 }
  0x26   : > { %504 = vst.msk [vmem:[#allocation2 + $0x80] sm:$0xff] %vm499_vm0, %v728_v9  ;;  %v6555_v11 = vld [vmem:[%s6475_s25 + $0x18] sm:$0xff]  ;;  %v729_v12 = vld [vmem:[%s6475_s25 + $0x28] sm:$0xff]  ;;  %v730_v13 = vld [vmem:[%s6475_s25 + $0x30] sm:$0xff] }
  0x27   : > { %519 = vst.msk [vmem:[#allocation2 + $0x80] sm:$0xff] %vm10742_vm1, %v728_v9 }
  0x28   : > { %534 = vst.msk [vmem:[#allocation2 + $0x80] sm:$0xff] %vm529_vm2, %v728_v9 }
  0x29   : > { %549 = vst.msk [vmem:[#allocation2 + $0x80] sm:$0xff] %vm544_vm3, %v728_v9 }
  0x2a   : > { %502 = vst.msk [vmem:[#allocation2 + $0x40] sm:$0xff] %vm499_vm0, %v6551_v10 }
  0x2b   : > { %572 = vrot.lane.b32.xlu1 %v6490_v3, %s10729_s26  ;;  %568 = vrot.lane.b32.xlu0 %v6493_v4, %s10729_s26  ;;  %517 = vst.msk [vmem:[#allocation2 + $0x40] sm:$0xff] %vm10742_vm1, %v6551_v10 }
  0x2c   : > { %576 = vrot.lane.b32.xlu2 %v557_v5, %s10729_s26  ;;  %532 = vst.msk [vmem:[#allocation2 + $0x40] sm:$0xff] %vm529_vm2, %v6551_v10 }
  0x2d   : > { %547 = vst.msk [vmem:[#allocation2 + $0x40] sm:$0xff] %vm544_vm3, %v6551_v10 }
  0x2e   : > { %515 = vst.msk [vmem:[#allocation2] sm:$0xff] %vm10742_vm1, %v6536_v7 }
  0x2f   : > { %530 = vst.msk [vmem:[#allocation2] sm:$0xff] %vm529_vm2, %v6536_v7 }
  0x30   : > { %545 = vst.msk [vmem:[#allocation2] sm:$0xff] %vm544_vm3, %v6536_v7 }
  0x31   : > { %505 = vst.msk [vmem:[#allocation2 + $0xa0] sm:$0xff] %vm499_vm0, %v729_v12 }
  0x32   : > { %520 = vst.msk [vmem:[#allocation2 + $0xa0] sm:$0xff] %vm10742_vm1, %v729_v12 }
  0x33   : > { %609 = vrot.lane.b32.xlu1 %v6481_v1, %s10729_s26  ;;  %578 = vrot.lane.b32.xlu0 %v558_v6, %s10729_s26  ;;  %535 = vst.msk [vmem:[#allocation2 + $0xa0] sm:$0xff] %vm529_vm2, %v729_v12 }
  0x34   : > { %611 = vrot.lane.b32.xlu2 %v6493_v4, %s10729_s26  ;;  %550 = vst.msk [vmem:[#allocation2 + $0xa0] sm:$0xff] %vm544_vm3, %v729_v12 }
  0x35   : > { %503 = vst.msk [vmem:[#allocation2 + $0x60] sm:$0xff] %vm499_vm0, %v6555_v11 }
  0x36   : > { %518 = vst.msk [vmem:[#allocation2 + $0x60] sm:$0xff] %vm10742_vm1, %v6555_v11 }
  0x37   : > { %533 = vst.msk [vmem:[#allocation2 + $0x60] sm:$0xff] %vm529_vm2, %v6555_v11 }
  0x38   : > { %548 = vst.msk [vmem:[#allocation2 + $0x60] sm:$0xff] %vm544_vm3, %v6555_v11 }
  0x39   : > { %501 = vst.msk [vmem:[#allocation2 + $0x20] sm:$0xff] %vm499_vm0, %v6539_v8 }
  0x3a   : > { %516 = vst.msk [vmem:[#allocation2 + $0x20] sm:$0xff] %vm10742_vm1, %v6539_v8 }
  0x3b   : > { %615 = vrot.lane.b32.xlu1 %v6490_v3, %s10729_s26  ;;  %613 = vrot.lane.b32.xlu0 %v6478_v0, %s10729_s26  ;;  %531 = vst.msk [vmem:[#allocation2 + $0x20] sm:$0xff] %vm529_vm2, %v6539_v8 }
  0x3c   : > { %617 = vrot.lane.b32.xlu2 %v556_v2, %s10729_s26  ;;  %546 = vst.msk [vmem:[#allocation2 + $0x20] sm:$0xff] %vm544_vm3, %v6539_v8 }
  0x3d   : > { %506 = vst.msk [vmem:[#allocation2 + $0xc0] sm:$0xff] %vm499_vm0, %v730_v13 }
  0x3e   : > { %521 = vst.msk [vmem:[#allocation2 + $0xc0] sm:$0xff] %vm10742_vm1, %v730_v13 }
  0x3f   : > { %536 = vst.msk [vmem:[#allocation2 + $0xc0] sm:$0xff] %vm529_vm2, %v730_v13 }
  0x40   : > { %551 = vst.msk [vmem:[#allocation2 + $0xc0] sm:$0xff] %vm544_vm3, %v730_v13 }
  0x41   : > { %1635 = vst.msk [vmem:[#allocation2 + $0x10] sm:$0xff] %vm499_vm0, %v6539_v8 }
  0x42   : > { %1649 = vst.msk [vmem:[#allocation2 + $0x10] sm:$0xff] %vm10742_vm1, %v6539_v8 }
  0x43   : > { %621 = vrot.lane.b32.xlu1 %v558_v6, %s10729_s26  ;;  %619 = vrot.lane.b32.xlu0 %v557_v5, %s10729_s26  ;;  %1663 = vst.msk [vmem:[#allocation2 + $0x10] sm:$0xff] %vm529_vm2, %v6539_v8 }
  0x44   : > { %652 = vrot.lane.b32.xlu2 %v6481_v1, %s10729_s26  ;;  %1677 = vst.msk [vmem:[#allocation2 + $0x10] sm:$0xff] %vm544_vm3, %v6539_v8 }
  0x45   : > { %1636 = vst.msk [vmem:[#allocation2 + $0x30] sm:$0xff] %vm499_vm0, %v6551_v10 }
  0x46   : > { %1650 = vst.msk [vmem:[#allocation2 + $0x30] sm:$0xff] %vm10742_vm1, %v6551_v10 }
  0x47   : > { %1664 = vst.msk [vmem:[#allocation2 + $0x30] sm:$0xff] %vm529_vm2, %v6551_v10 }
  0x48   : > { %1678 = vst.msk [vmem:[#allocation2 + $0x30] sm:$0xff] %vm544_vm3, %v6551_v10 }
  0x4b   : > { %656 = vrot.lane.b32.xlu1 %v6478_v0, %s10729_s26  ;;  %654 = vrot.lane.b32.xlu0 %v6493_v4, %s10729_s26 }
  0x4c   : > { %658 = vrot.lane.b32.xlu2 %v6490_v3, %s10729_s26 }
  0x53   : > { %662 = vrot.lane.b32.xlu1 %v557_v5, %s10729_s26  ;;  %660 = vrot.lane.b32.xlu0 %v556_v2, %s10729_s26 }
  0x54   : > { %664 = vrot.lane.b32.xlu2 %v558_v6, %s10729_s26 }
  0x5b   : > { %697 = vrot.lane.b32.xlu1 %v6493_v4, %s10729_s26  ;;  %695 = vrot.lane.b32.xlu0 %v6481_v1, %s10729_s26 }
  0x5c   : > { %699 = vrot.lane.b32.xlu2 %v6478_v0, %s10729_s26 }
  0x63   : > { %703 = vrot.lane.b32.xlu1 %v556_v2, %s10729_s26  ;;  %701 = vrot.lane.b32.xlu0 %v6490_v3, %s10729_s26 }
  0x64   : > { %705 = vrot.lane.b32.xlu2 %v557_v5, %s10729_s26 }
  0x6b   : > { %738 = vrot.lane.b32.xlu1 %v6536_v7, %s10729_s26  ;;  %707 = vrot.lane.b32.xlu0 %v558_v6, %s10729_s26 }
  0x6c   : > { %740 = vrot.lane.b32.xlu2 %v6539_v8, %s10729_s26 }
  0x73   : > { %744 = vrot.lane.b32.xlu1 %v6555_v11, %s10729_s26  ;;  %742 = vrot.lane.b32.xlu0 %v6551_v10, %s10729_s26 }
  0x74   : > { %746 = vrot.lane.b32.xlu2 %v728_v9, %s10729_s26 }
  0x7b   : > { %750 = vrot.lane.b32.xlu1 %v730_v13, %s10729_s26  ;;  %748 = vrot.lane.b32.xlu0 %v729_v12, %s10729_s26 }
  0x7c   : > { %781 = vrot.lane.b32.xlu2 %v6536_v7, %s10729_s26 }
  0x7e   : > { %v575_v14 = vpop.permute.xlu2 %574 }
  0x7f   : > { %592 = vst.msk [vmem:[#allocation2 + $0x80] sm:$0xff] %vm587_vm4, %v575_v14 }
  0x83   : > { %785 = vrot.lane.b32.xlu1 %v6551_v10, %s10729_s26  ;;  %783 = vrot.lane.b32.xlu0 %v6539_v8, %s10729_s26 }
  0x84   : > { %787 = vrot.lane.b32.xlu2 %v6555_v11, %s10729_s26 }
  0x86   : > { %v577_v15 = vpop.permute.xlu2 %576 }
  0x87   : > { %593 = vst.msk [vmem:[#allocation2 + $0xa0] sm:$0xff] %vm587_vm4, %v577_v15 }
  0x8b   : > { %2244 = vrot.lane.b32.xlu1 %v6539_v8, %s10734_s30  ;;  %2202 = vrot.lane.b32.xlu0 %v6539_v8, %s10734_s30 }
  0x8c   : > { %1082 = vrot.lane.b32.xlu2 %v6536_v7, %s10734_s30 }
  0x8e   : > { %v612_v16 = vpop.permute.xlu2 %611 }
  0x93   : > { %2286 = vrot.lane.b32.xlu1 %v6539_v8, %s10734_s30  ;;  %1698 = vrot.lane.b32.xlu0 %v6493_v4, %s10729_s26 }
  0x94   : > { %1124 = vrot.lane.b32.xlu2 %v6536_v7, %s10734_s30 }
  0x95   : > { %v571_v17 = vpop.permute.xlu1 %570  ;;  %v567_v18 = vpop.permute.xlu0 %566 }
  0x96   : > { %590 = vst.msk [vmem:[#allocation2 + $0x40] sm:$0xff] %vm587_vm4, %v571_v17  ;;  %v618_v19 = vpop.permute.xlu2 %617 }
  0x97   : > { %588 = vst.msk [vmem:[#allocation2] sm:$0xff] %vm587_vm4, %v567_v18 }
  0x98   : > { %635 = vst.msk [vmem:[#allocation2 + $0x80] sm:$0xff] %vm630_vm5, %v618_v19 }
  0x9b   : > { %2328 = vrot.lane.b32.xlu1 %v6539_v8, %s10734_s30  ;;  %1740 = vrot.lane.b32.xlu0 %v6493_v4, %s10729_s26 }
  0x9c   : > { %1166 = vrot.lane.b32.xlu2 %v6536_v7, %s10734_s30 }
  0x9d   : > { %v573_v20 = vpop.permute.xlu1 %572  ;;  %v569_v21 = vpop.permute.xlu0 %568 }
  0x9e   : > { %591 = vst.msk [vmem:[#allocation2 + $0x60] sm:$0xff] %vm587_vm4, %v573_v20  ;;  %v653_v22 = vpop.permute.xlu2 %652 }
  0x9f   : > { %589 = vst.msk [vmem:[#allocation2 + $0x20] sm:$0xff] %vm587_vm4, %v569_v21 }
  0xa0   : > { %632 = vst.msk [vmem:[#allocation2 + $0x20] sm:$0xff] %vm630_vm5, %v612_v16 }
  0xa3   : > { %2370 = vrot.lane.b32.xlu1 %v6493_v4, %s10726_s16  ;;  %1782 = vrot.lane.b32.xlu0 %v6493_v4, %s10729_s26 }
  0xa4   : > { %1208 = vrot.lane.b32.xlu2 %v6536_v7, %s10734_s30 }
  0xa5   : > { %v610_v23 = vpop.permute.xlu1 %609  ;;  %v579_v24 = vpop.permute.xlu0 %578 }
  0xa6   : > { %631 = vst.msk [vmem:[#allocation2] sm:$0xff] %vm630_vm5, %v610_v23  ;;  %v659_v25 = vpop.permute.xlu2 %658 }
  0xa7   : > { %594 = vst.msk [vmem:[#allocation2 + $0xc0] sm:$0xff] %vm587_vm4, %v579_v24 }
  0xa8   : > { %674 = vst.msk [vmem:[#allocation2] sm:$0xff] %vm10743_vm6, %v653_v22 }
  0xab   : > { %2412 = vrot.lane.b32.xlu1 %v6493_v4, %s10726_s16  ;;  %1824 = vrot.lane.b32.xlu0 %v6493_v4, %s10729_s26 }
  0xac   : > { %1250 = vrot.lane.b32.xlu2 %v6481_v1, %s10726_s16 }
  0xad   : > { %v616_v26 = vpop.permute.xlu1 %615  ;;  %v614_v27 = vpop.permute.xlu0 %613 }
  0xae   : > { %634 = vst.msk [vmem:[#allocation2 + $0x60] sm:$0xff] %vm630_vm5, %v616_v26  ;;  %v665_v28 = vpop.permute.xlu2 %664 }
  0xaf   : > { %633 = vst.msk [vmem:[#allocation2 + $0x40] sm:$0xff] %vm630_vm5, %v614_v27 }
  0xb0   : > { %677 = vst.msk [vmem:[#allocation2 + $0x60] sm:$0xff] %vm10743_vm6, %v659_v25 }
  0xb3   : > { %2454 = vrot.lane.b32.xlu1 %v6493_v4, %s10726_s16  ;;  %1866 = vrot.lane.b32.xlu0 %v6539_v8, %s10729_s26 }
  0xb4   : > { %1292 = vrot.lane.b32.xlu2 %v6481_v1, %s10726_s16 }
  0xb5   : > { %v622_v29 = vpop.permute.xlu1 %621  ;;  %v620_v30 = vpop.permute.xlu0 %619 }
  0xb6   : > { %637 = vst.msk [vmem:[#allocation2 + $0xc0] sm:$0xff] %vm630_vm5, %v622_v29  ;;  %v700_v31 = vpop.permute.xlu2 %699  ;;  %v2822_v29 = vld [vmem:[%s10761_s1 + $0x170] sm:$0xff] }
  0xb7   : > { %636 = vst.msk [vmem:[#allocation2 + $0xa0] sm:$0xff] %vm630_vm5, %v620_v30  ;;  %v2821_v30 = vld [vmem:[%s10761_s1 + $0x168] sm:$0xff] }
  0xb8   : > { %680 = vst.msk [vmem:[#allocation2 + $0xc0] sm:$0xff] %vm10743_vm6, %v665_v28  ;;  %v2823_v28 = vld [vmem:[%s10761_s1 + $0x178] sm:$0xff] }
  0xb9   : > { %2916 = vmatpush.msra.mxu2 %v2823_v28  ;;  %v2831_v28 = vld [vmem:[%s10761_s1 + $0x1b8] sm:$0xff] }
  0xbb   : > { %2496 = vrot.lane.b32.xlu1 %v6493_v4, %s10726_s16  ;;  %1908 = vrot.lane.b32.xlu0 %v6539_v8, %s10729_s26 }
  0xbc   : > { %1334 = vrot.lane.b32.xlu2 %v6481_v1, %s10726_s16  ;;  %2917 = vmatpush.msra.mxu2 %v2822_v29  ;;  %v2783_v29 = vld [vmem:[%s10761_s1 + $0x38] sm:$0xff] }
  0xbd   : > { %v657_v32 = vpop.permute.xlu1 %656  ;;  %v655_v33 = vpop.permute.xlu0 %654 }
  0xbe   : > { %676 = vst.msk [vmem:[#allocation2 + $0x40] sm:$0xff] %vm10743_vm6, %v657_v32  ;;  %v706_v34 = vpop.permute.xlu2 %705  ;;  %2918 = vmatpush.msra.mxu2 %v2821_v30  ;;  %v2799_v30 = vld [vmem:[%s10761_s1 + $0xb8] sm:$0xff] }
  0xbf   : > { %675 = vst.msk [vmem:[#allocation2 + $0x20] sm:$0xff] %vm10743_vm6, %v655_v33 }
  0xc0   : > { %719 = vst.msk [vmem:[#allocation2 + $0x40] sm:$0xff] %vm716_vm7, %v700_v31 }
  0xc3   : > { %2204 = vrot.lane.b32.xlu1 %v6551_v10, %s10734_s30  ;;  %1950 = vrot.lane.b32.xlu0 %v6539_v8, %s10729_s26 }
  0xc4   : > { %2538 = vrot.lane.b32.xlu2 %v6539_v8, %s10726_s16 }
  0xc5   : > { %v663_v35 = vpop.permute.xlu1 %662  ;;  %v661_v36 = vpop.permute.xlu0 %660 }
  0xc6   : > { %679 = vst.msk [vmem:[#allocation2 + $0xa0] sm:$0xff] %vm10743_vm6, %v663_v35  ;;  %v741_v37 = vpop.permute.xlu2 %740  ;;  %v2819_v35 = vld [vmem:[%s10761_s1 + $0x158] sm:$0xff] }
  0xc7   : > { %678 = vst.msk [vmem:[#allocation2 + $0x80] sm:$0xff] %vm10743_vm6, %v661_v36  ;;  %v2818_v36 = vld [vmem:[%s10761_s1 + $0x150] sm:$0xff] }
  0xc8   : > { %722 = vst.msk [vmem:[#allocation2 + $0xa0] sm:$0xff] %vm716_vm7, %v706_v34  ;;  %v2820_v34 = vld [vmem:[%s10761_s1 + $0x160] sm:$0xff] }
  0xc9   : > { %2919 = vmatpush.msra.mxu2 %v2820_v34  ;;  %v2829_v34 = vld [vmem:[%s10761_s1 + $0x1a8] sm:$0xff] }
  0xcb   : > { %1992 = vrot.lane.b32.xlu1 %v6539_v8, %s10729_s26  ;;  %1376 = vrot.lane.b32.xlu0 %v6481_v1, %s10726_s16 }
  0xcc   : > { %2246 = vrot.lane.b32.xlu2 %v6551_v10, %s10734_s30  ;;  %2920 = vmatpush.msra.mxu2 %v2819_v35 }
  0xcd   : > { %v698_v38 = vpop.permute.xlu1 %697  ;;  %v696_v39 = vpop.permute.xlu0 %695 }
  0xce   : > { %718 = vst.msk [vmem:[#allocation2 + $0x20] sm:$0xff] %vm716_vm7, %v698_v38  ;;  %v747_v40 = vpop.permute.xlu2 %746  ;;  %2921 = vmatpush.msra.mxu2 %v2818_v36  ;;  %v1572_v36 = vld [vmem:[%s6475_s25 + $0x1] sm:$0xff] }
  0xcf   : > { %717 = vst.msk [vmem:[#allocation2] sm:$0xff] %vm716_vm7, %v696_v39 }
  0xd0   : > { %761 = vst.msk [vmem:[#allocation2 + $0x20] sm:$0xff] %vm759_vm8, %v741_v37  ;;  %v2817_v37 = vld [vmem:[%s10761_s1 + $0x148] sm:$0xff] }
  0xd1   : > { %2922 = vmatpush.msra.mxu2 %v2817_v37 }
  0xd3   : > { %1084 = vrot.lane.b32.xlu1 %v6539_v8, %s10734_s30  ;;  %2580 = vrot.lane.b32.xlu0 %v6539_v8, %s10726_s16 }
  0xd4   : > { %1418 = vrot.lane.b32.xlu2 %v6536_v7, %s10726_s16 }
  0xd5   : > { %v704_v41 = vpop.permute.xlu1 %703  ;;  %v702_v42 = vpop.permute.xlu0 %701 }
  0xd6   : > { %721 = vst.msk [vmem:[#allocation2 + $0x80] sm:$0xff] %vm716_vm7, %v704_v41  ;;  %v782_v43 = vpop.permute.xlu2 %781  ;;  %v2816_v41 = vld [vmem:[%s10761_s1 + $0x140] sm:$0xff] }
  0xd7   : > { %720 = vst.msk [vmem:[#allocation2 + $0x60] sm:$0xff] %vm716_vm7, %v702_v42  ;;  %v2815_v42 = vld [vmem:[%s10761_s1 + $0x138] sm:$0xff]  ;;  %2923 = vmatpush.msra.mxu2 %v2816_v41  ;;  %v2780_v41 = vld [vmem:[%s10761_s1 + $0x20] sm:$0xff] }
  0xd8   : > { %764 = vst.msk [vmem:[#allocation2 + $0x80] sm:$0xff] %vm759_vm8, %v747_v40 }
  0xd9   : > { %2924 = vmatpush.msra.mxu2 %v2815_v42  ;;  %v2796_v42 = vld [vmem:[%s10761_s1 + $0xa0] sm:$0xff] }
  0xdb   : > { %2034 = vrot.lane.b32.xlu1 %v6493_v4, %s10734_s30  ;;  %1700 = vrot.lane.b32.xlu0 %v6478_v0, %s10729_s26 }
  0xdc   : > { %2288 = vrot.lane.b32.xlu2 %v6551_v10, %s10734_s30 }
  0xdd   : > { %v739_v44 = vpop.permute.xlu1 %738  ;;  %v708_v45 = vpop.permute.xlu0 %707 }
  0xde   : > { %760 = vst.msk [vmem:[#allocation2] sm:$0xff] %vm759_vm8, %v739_v44  ;;  %v788_v46 = vpop.permute.xlu2 %787  ;;  %v2813_v44 = vld [vmem:[%s10761_s1 + $0x128] sm:$0xff] }
  0xdf   : > { %723 = vst.msk [vmem:[#allocation2 + $0xc0] sm:$0xff] %vm716_vm7, %v708_v45 }
  0xe0   : > { %803 = vst.msk [vmem:[#allocation2] sm:$0xff] %vm802_vm9, %v782_v43  ;;  %v2814_v43 = vld [vmem:[%s10761_s1 + $0x130] sm:$0xff] }
  0xe1   : > { %2925 = vmatpush.msra.mxu2 %v2814_v43  ;;  %v7098_v43 = vld [vmem:[%s6475_s25 + $0x9] sm:$0xff] }
  0xe3   : > { %1126 = vrot.lane.b32.xlu1 %v6539_v8, %s10734_s30  ;;  %2622 = vrot.lane.b32.xlu0 %v6539_v8, %s10726_s16 }
  0xe4   : > { %1460 = vrot.lane.b32.xlu2 %v6536_v7, %s10726_s16  ;;  %2926 = vmatpush.msra.mxu2 %v2813_v44  ;;  %v2827_v44 = vld [vmem:[%s10761_s1 + $0x198] sm:$0xff] }
  0xe5   : > { %v745_v47 = vpop.permute.xlu1 %744  ;;  %v743_v48 = vpop.permute.xlu0 %742 }
  0xe6   : > { %763 = vst.msk [vmem:[#allocation2 + $0x60] sm:$0xff] %vm759_vm8, %v745_v47  ;;  %v1083_v49 = vpop.permute.xlu2 %1082  ;;  %v2812_v47 = vld [vmem:[%s10761_s1 + $0x120] sm:$0xff] }
  0xe7   : > { %762 = vst.msk [vmem:[#allocation2 + $0x40] sm:$0xff] %vm759_vm8, %v743_v48  ;;  %2927 = vmatpush.msra.mxu2 %v2812_v47  ;;  %v2811_v48 = vld [vmem:[%s10761_s1 + $0x118] sm:$0xff]  ;;  %v2778_v47 = vld [vmem:[%s10761_s1 + $0x10] sm:$0xff] }
  0xe8   : > { %806 = vst.msk [vmem:[#allocation2 + $0x60] sm:$0xff] %vm802_vm9, %v788_v46 }
  0xe9   : > { %1103 = vst.msk [vmem:[#allocation2 + $0x8] sm:$0xff] %vm499_vm0, %v1083_v49  ;;  %2928 = vmatpush.msra.mxu2 %v2811_v48  ;;  %v2809_v49 = vld [vmem:[%s10761_s1 + $0x108] sm:$0xff]  ;;  %v7123_v48 = vld [vmem:[%s6475_s25 + $0x20] sm:$0xff] }
  0xea   : > { %1638 = vst.msk [vmem:[#allocation2 + $0x70] sm:$0xff] %vm499_vm0, %v7123_v48 }
  0xeb   : > { %2076 = vrot.lane.b32.xlu1 %v6493_v4, %s10734_s30  ;;  %1742 = vrot.lane.b32.xlu0 %v6478_v0, %s10729_s26  ;;  %1652 = vst.msk [vmem:[#allocation2 + $0x70] sm:$0xff] %vm10742_vm1, %v7123_v48 }
  0xec   : > { %2330 = vrot.lane.b32.xlu2 %v6551_v10, %s10734_s30  ;;  %1666 = vst.msk [vmem:[#allocation2 + $0x70] sm:$0xff] %vm529_vm2, %v7123_v48 }
  0xed   : > { %v751_v50 = vpop.permute.xlu1 %750  ;;  %v749_v51 = vpop.permute.xlu0 %748  ;;  %1680 = vst.msk [vmem:[#allocation2 + $0x70] sm:$0xff] %vm544_vm3, %v7123_v48 }
  0xee   : > { %766 = vst.msk [vmem:[#allocation2 + $0xc0] sm:$0xff] %vm759_vm8, %v751_v50  ;;  %v1125_v52 = vpop.permute.xlu2 %1124 }
  0xef   : > { %765 = vst.msk [vmem:[#allocation2 + $0xa0] sm:$0xff] %vm759_vm8, %v749_v51 }
  0xf0   : > { %1145 = vst.msk [vmem:[#allocation2 + $0x8] sm:$0xff] %vm10742_vm1, %v1125_v52  ;;  %v2839_v52 = vld [vmem:[%s10761_s1 + $0x1f8] sm:$0xff] }
  0xf1   : > { %2954 = vmatpush.msra.mxu3 %v2839_v52  ;;  %v2777_v52 = vld [vmem:[%s10761_s1 + $0x8] sm:$0xff] }
  0xf3   : > { %824 = vrot.lane.b32.xlu1 %v6536_v7, %s10729_s26  ;;  %2664 = vrot.lane.b32.xlu0 %v6539_v8, %s10726_s16 }
  0xf4   : > { %1168 = vrot.lane.b32.xlu2 %v6539_v8, %s10734_s30 }
  0xf5   : > { %v786_v53 = vpop.permute.xlu1 %785  ;;  %v784_v54 = vpop.permute.xlu0 %783 }
  0xf6   : > { %805 = vst.msk [vmem:[#allocation2 + $0x40] sm:$0xff] %vm802_vm9, %v786_v53  ;;  %v1167_v55 = vpop.permute.xlu2 %1166 }
  0xf7   : > { %804 = vst.msk [vmem:[#allocation2 + $0x20] sm:$0xff] %vm802_vm9, %v784_v54  ;;  %v2808_v54 = vld [vmem:[%s10761_s1 + $0x100] sm:$0xff] }
  0xf8   : > { %1187 = vst.msk [vmem:[#allocation2 + $0x8] sm:$0xff] %vm529_vm2, %v1167_v55  ;;  %v2807_v55 = vld [vmem:[%s10761_s1 + $0xf8] sm:$0xff] }
  0xf9   : > { %2878 = vmatpush.msra.mxu1 %v2807_v55  ;;  %v2776_v55 = vld [vmem:[%s10761_s1] sm:$0xff] }
  0xfb   : > { %1784 = vrot.lane.b32.xlu1 %v6478_v0, %s10729_s26  ;;  %1502 = vrot.lane.b32.xlu0 %v6536_v7, %s10726_s16 }
  0xfc   : > { %2118 = vrot.lane.b32.xlu2 %v6493_v4, %s10734_s30 }
  0xfd   : > { %v2245_v56 = vpop.permute.xlu1 %2244  ;;  %v2203_v57 = vpop.permute.xlu0 %2202 }
  0xfe   : > { %2223 = vst.msk [vmem:[#allocation2 + $0x18] sm:$0xff] %vm499_vm0, %v2203_v57  ;;  %v1209_v58 = vpop.permute.xlu2 %1208  ;;  %v2790_v57 = vld [vmem:[%s10761_s1 + $0x70] sm:$0xff] }
  0xff   : > { %2265 = vst.msk [vmem:[#allocation2 + $0x18] sm:$0xff] %vm10742_vm1, %v2245_v56  ;;  %v2838_v56 = vld [vmem:[%s10761_s1 + $0x1f0] sm:$0xff] }
 0x100   : > { %1229 = vst.msk [vmem:[#allocation2 + $0x8] sm:$0xff] %vm544_vm3, %v1209_v58  ;;  %v2806_v58 = vld [vmem:[%s10761_s1 + $0xf0] sm:$0xff]  ;;  %2955 = vmatpush.msra.mxu3 %v2838_v56 }
 0x101   : > { %2879 = vmatpush.msra.mxu1 %v2806_v58 }
 0x103   : > { %867 = vrot.lane.b32.xlu1 %v6536_v7, %s10729_s26  ;;  %2372 = vrot.lane.b32.xlu0 %v6478_v0, %s10726_s16 }
 0x104   : > { %1210 = vrot.lane.b32.xlu2 %v6539_v8, %s10734_s30 }
 0x105   : > { %v2287_v59 = vpop.permute.xlu1 %2286  ;;  %v1699_v60 = vpop.permute.xlu0 %1698 }
 0x106   : > { %2307 = vst.msk [vmem:[#allocation2 + $0x18] sm:$0xff] %vm529_vm2, %v2287_v59  ;;  %v1251_v61 = vpop.permute.xlu2 %1250  ;;  %v6954_v59 = vld [vmem:[%s6475_s25 + $0x11] sm:$0xff] }
 0x107   : > { %1719 = vst.msk [vmem:[#allocation2 + $0x10] sm:$0xff] %vm587_vm4, %v1699_v60  ;;  %v2837_v60 = vld [vmem:[%s10761_s1 + $0x1e8] sm:$0xff] }
 0x108   : > { %1271 = vst.msk [vmem:[#allocation2 + $0x8] sm:$0xff] %vm587_vm4, %v1251_v61  ;;  %v2789_v61 = vld [vmem:[%s10761_s1 + $0x68] sm:$0xff]  ;;  %2956 = vmatpush.msra.mxu3 %v2837_v60 }
 0x10b   : > { %1826 = vrot.lane.b32.xlu1 %v6478_v0, %s10729_s26  ;;  %1544 = vrot.lane.b32.xlu0 %v6536_v7, %s10726_s16 }
 0x10c   : > { %2160 = vrot.lane.b32.xlu2 %v6493_v4, %s10734_s30 }
 0x10d   : > { %v2329_v62 = vpop.permute.xlu1 %2328  ;;  %v1741_v63 = vpop.permute.xlu0 %1740 }
 0x10e   : > { %2349 = vst.msk [vmem:[#allocation2 + $0x18] sm:$0xff] %vm544_vm3, %v2329_v62  ;;  %v1293_v2 = vpop.permute.xlu2 %1292  ;;  %v6970_v62 = vld [vmem:[%s6475_s25 + $0x18] sm:$0xff] }
 0x10f   : > { %1761 = vst.msk [vmem:[#allocation2 + $0x10] sm:$0xff] %vm630_vm5, %v1741_v63 }
 0x110   : > { %1313 = vst.msk [vmem:[#allocation2 + $0x8] sm:$0xff] %vm630_vm5, %v1293_v2 }
 0x111   : > { %1637 = vst.msk [vmem:[#allocation2 + $0x50] sm:$0xff] %vm499_vm0, %v6970_v62 }
 0x112   : > { %1651 = vst.msk [vmem:[#allocation2 + $0x50] sm:$0xff] %vm10742_vm1, %v6970_v62 }
 0x113   : > { %910 = vrot.lane.b32.xlu1 %v6481_v1, %s10734_s30  ;;  %2414 = vrot.lane.b32.xlu0 %v6478_v0, %s10726_s16  ;;  %1665 = vst.msk [vmem:[#allocation2 + $0x50] sm:$0xff] %vm529_vm2, %v6970_v62 }
 0x114   : > { %1252 = vrot.lane.b32.xlu2 %v6493_v4, %s10726_s16  ;;  %1679 = vst.msk [vmem:[#allocation2 + $0x50] sm:$0xff] %vm544_vm3, %v6970_v62 }
 0x115   : > { %v2371_v5 = vpop.permute.xlu1 %2370  ;;  %v1783_v6 = vpop.permute.xlu0 %1782 }
 0x116   : > { %2391 = vst.msk [vmem:[#allocation2 + $0x18] sm:$0xff] %vm587_vm4, %v2371_v5  ;;  %v1335_v7 = vpop.permute.xlu2 %1334  ;;  %v2788_v5 = vld [vmem:[%s10761_s1 + $0x60] sm:$0xff] }
 0x117   : > { %1803 = vst.msk [vmem:[#allocation2 + $0x10] sm:$0xff] %vm10743_vm6, %v1783_v6  ;;  %v2804_v6 = vld [vmem:[%s10761_s1 + $0xe0] sm:$0xff] }
 0x118   : > { %1355 = vst.msk [vmem:[#allocation2 + $0x8] sm:$0xff] %vm10743_vm6, %v1335_v7  ;;  %v2835_v7 = vld [vmem:[%s10761_s1 + $0x1d8] sm:$0xff] }
 0x11b   : > { %2456 = vrot.lane.b32.xlu1 %v6478_v0, %s10726_s16  ;;  %1868 = vrot.lane.b32.xlu0 %v6551_v10, %s10729_s26 }
 0x11c   : > { %953 = vrot.lane.b32.xlu2 %v6481_v1, %s10734_s30 }
 0x11d   : > { %v2413_v9 = vpop.permute.xlu1 %2412  ;;  %v1825_v12 = vpop.permute.xlu0 %1824 }
 0x11e   : > { %2433 = vst.msk [vmem:[#allocation2 + $0x18] sm:$0xff] %vm630_vm5, %v2413_v9  ;;  %v2539_v13 = vpop.permute.xlu2 %2538 }
 0x11f   : > { %1845 = vst.msk [vmem:[#allocation2 + $0x10] sm:$0xff] %vm716_vm7, %v1825_v12  ;;  %v6994_v12 = vld [vmem:[%s6475_s25 + $0x19] sm:$0xff] }
 0x123   : > { %1910 = vrot.lane.b32.xlu1 %v6551_v10, %s10729_s26  ;;  %1294 = vrot.lane.b32.xlu0 %v6493_v4, %s10726_s16 }
 0x124   : > { %2498 = vrot.lane.b32.xlu2 %v6478_v0, %s10726_s16 }
 0x125   : > { %v2455_v14 = vpop.permute.xlu1 %2454  ;;  %v1867_v15 = vpop.permute.xlu0 %1866 }
 0x126   : > { %2475 = vst.msk [vmem:[#allocation2 + $0x18] sm:$0xff] %vm10743_vm6, %v2455_v14  ;;  %v2247_v16 = vpop.permute.xlu2 %2246  ;;  %v2803_v14 = vld [vmem:[%s10761_s1 + $0xd8] sm:$0xff] }
 0x127   : > { %1887 = vst.msk [vmem:[#allocation2 + $0x10] sm:$0xff] %vm759_vm8, %v1867_v15  ;;  %v2834_v15 = vld [vmem:[%s10761_s1 + $0x1d0] sm:$0xff] }
 0x12b   : > { %1336 = vrot.lane.b32.xlu1 %v6493_v4, %s10726_s16  ;;  %996 = vrot.lane.b32.xlu0 %v6481_v1, %s10734_s30 }
 0x12c   : > { %1952 = vrot.lane.b32.xlu2 %v6551_v10, %s10729_s26 }
 0x12d   : > { %v2497_v17 = vpop.permute.xlu1 %2496  ;;  %v1909_v18 = vpop.permute.xlu0 %1908 }
 0x12e   : > { %2517 = vst.msk [vmem:[#allocation2 + $0x18] sm:$0xff] %vm716_vm7, %v2497_v17  ;;  %v1419_v19 = vpop.permute.xlu2 %1418  ;;  %v2786_v17 = vld [vmem:[%s10761_s1 + $0x50] sm:$0xff] }
 0x12f   : > { %1929 = vst.msk [vmem:[#allocation2 + $0x10] sm:$0xff] %vm802_vm9, %v1909_v18 }
 0x130   : > { %2559 = vst.msk [vmem:[#allocation2 + $0x18] sm:$0xff] %vm759_vm8, %v2539_v13  ;;  %v2787_v13 = vld [vmem:[%s10761_s1 + $0x58] sm:$0xff] }
 0x133   : > { %2540 = vrot.lane.b32.xlu1 %v6551_v10, %s10726_s16  ;;  %2206 = vrot.lane.b32.xlu0 %v6555_v11, %s10734_s30 }
 0x134   : > { %1039 = vrot.lane.b32.xlu2 %v6481_v1, %s10734_s30 }
 0x135   : > { %v2205_v20 = vpop.permute.xlu1 %2204  ;;  %v1951_v21 = vpop.permute.xlu0 %1950 }
 0x136   : > { %2224 = vst.msk [vmem:[#allocation2 + $0x38] sm:$0xff] %vm499_vm0, %v2205_v20  ;;  %v2289_v22 = vpop.permute.xlu2 %2288  ;;  %v2833_v20 = vld [vmem:[%s10761_s1 + $0x1c8] sm:$0xff] }
 0x137   : > { %1971 = vst.msk [vmem:[#allocation2 + $0x10] sm:$0xff] %vm845_vm10, %v1951_v21  ;;  %v2785_v21 = vld [vmem:[%s10761_s1 + $0x48] sm:$0xff] }
 0x138   : > { %2266 = vst.msk [vmem:[#allocation2 + $0x38] sm:$0xff] %vm10742_vm1, %v2247_v16  ;;  %v7009_v16 = vld [vmem:[%s6475_s25 + $0x10] sm:$0xff] }
 0x139   : > { %2308 = vst.msk [vmem:[#allocation2 + $0x38] sm:$0xff] %vm529_vm2, %v2289_v22 }
 0x13b   : > { %1994 = vrot.lane.b32.xlu1 %v6551_v10, %s10729_s26  ;;  %1378 = vrot.lane.b32.xlu0 %v6493_v4, %s10726_s16 }
 0x13c   : > { %2248 = vrot.lane.b32.xlu2 %v6555_v11, %s10734_s30 }
 0x13d   : > { %v1993_v23 = vpop.permute.xlu1 %1992  ;;  %v1377_v24 = vpop.permute.xlu0 %1376 }
 0x13e   : > { %2013 = vst.msk [vmem:[#allocation2 + $0x10] sm:$0xff] %vm888_vm11, %v1993_v23  ;;  %v1461_v1 = vpop.permute.xlu2 %1460 }
 0x13f   : > { %1397 = vst.msk [vmem:[#allocation2 + $0x8] sm:$0xff] %vm716_vm7, %v1377_v24  ;;  %v2801_v24 = vld [vmem:[%s10761_s1 + $0xc8] sm:$0xff] }
 0x140   : > { %1439 = vst.msk [vmem:[#allocation2 + $0x8] sm:$0xff] %vm759_vm8, %v1419_v19  ;;  %v2802_v19 = vld [vmem:[%s10761_s1 + $0xd0] sm:$0xff] }
 0x141   : > { %1481 = vst.msk [vmem:[#allocation2 + $0x8] sm:$0xff] %vm802_vm9, %v1461_v1  ;;  %v2832_v1 = vld [vmem:[%s10761_s1 + $0x1c0] sm:$0xff] }
 0x143   : > { %1086 = vrot.lane.b32.xlu1 %v6551_v10, %s10734_s30  ;;  %2582 = vrot.lane.b32.xlu0 %v6551_v10, %s10726_s16 }
 0x144   : > { %1420 = vrot.lane.b32.xlu2 %v6539_v8, %s10726_s16 }
 0x145   : > { %v1085_v25 = vpop.permute.xlu1 %1084  ;;  %v2581_v26 = vpop.permute.xlu0 %2580 }
 0x146   : > { %1104 = vst.msk [vmem:[#allocation2 + $0x28] sm:$0xff] %vm499_vm0, %v1085_v25  ;;  %v2331_v27 = vpop.permute.xlu2 %2330  ;;  %v2784_v25 = vld [vmem:[%s10761_s1 + $0x40] sm:$0xff] }
 0x147   : > { %2601 = vst.msk [vmem:[#allocation2 + $0x18] sm:$0xff] %vm802_vm9, %v2581_v26 }
 0x148   : > { %2350 = vst.msk [vmem:[#allocation2 + $0x38] sm:$0xff] %vm544_vm3, %v2331_v27  ;;  %v2800_v27 = vld [vmem:[%s10761_s1 + $0xc0] sm:$0xff] }
 0x14b   : > { %2036 = vrot.lane.b32.xlu1 %v6478_v0, %s10734_s30  ;;  %1702 = vrot.lane.b32.xlu0 %v6490_v3, %s10729_s26  ;;  %s10762_s26 = smov 96  }
 0x14c   : > { %2290 = vrot.lane.b32.xlu2 %v6555_v11, %s10734_s30 }
 0x14d   : > { %v2035_v31 = vpop.permute.xlu1 %2034  ;;  %v1701_v32 = vpop.permute.xlu0 %1700 }
 0x14e   : > { %2055 = vst.msk [vmem:[#allocation2 + $0x10] sm:$0xff] %vm931_vm12, %v2035_v31  ;;  %v1169_v33 = vpop.permute.xlu2 %1168  ;;  %v2830_v31 = vld [vmem:[%s10761_s1 + $0x1b0] sm:$0xff] }
 0x14f   : > { %1720 = vst.msk [vmem:[#allocation2 + $0x30] sm:$0xff] %vm587_vm4, %v1701_v32  ;;  %v2782_v32 = vld [vmem:[%s10761_s1 + $0x30] sm:$0xff] }
 0x153   : > { %1128 = vrot.lane.b32.xlu1 %v6551_v10, %s10734_s30  ;;  %2624 = vrot.lane.b32.xlu0 %v6551_v10, %s10762_s26 }
 0x154   : > { %1462 = vrot.lane.b32.xlu2 %v6539_v8, %s10762_s26 }
 0x155   : > { %v1127_v38 = vpop.permute.xlu1 %1126  ;;  %v2623_v39 = vpop.permute.xlu0 %2622 }
 0x156   : > { %1146 = vst.msk [vmem:[#allocation2 + $0x28] sm:$0xff] %vm10742_vm1, %v1127_v38  ;;  %v2119_v40 = vpop.permute.xlu2 %2118  ;;  %v2797_v38 = vld [vmem:[%s10761_s1 + $0xa8] sm:$0xff] }
 0x157   : > { %2643 = vst.msk [vmem:[#allocation2 + $0x18] sm:$0xff] %vm845_vm10, %v2623_v39  ;;  %v2828_v39 = vld [vmem:[%s10761_s1 + $0x1a0] sm:$0xff] }
 0x158   : > { %1188 = vst.msk [vmem:[#allocation2 + $0x28] sm:$0xff] %vm529_vm2, %v1169_v33  ;;  %v2798_v33 = vld [vmem:[%s10761_s1 + $0xb0] sm:$0xff] }
 0x15b   : > { %2078 = vrot.lane.b32.xlu1 %v6478_v0, %s10734_s30  ;;  %1744 = vrot.lane.b32.xlu0 %v6490_v3, %s10763_s20 }
 0x15c   : > { %2332 = vrot.lane.b32.xlu2 %v6555_v11, %s10734_s30  ;;  %v2810_v11 = vld [vmem:[%s10761_s1 + $0x110] sm:$0xff] }
 0x15d   : > { %v2077_v45 = vpop.permute.xlu1 %2076  ;;  %v1743_v46 = vpop.permute.xlu0 %1742  ;;  %2929 = vmatpush.msra.mxu2 %v2810_v11  ;;  %v2794_v11 = vld [vmem:[%s10761_s1 + $0x90] sm:$0xff] }
 0x15e   : > { %2097 = vst.msk [vmem:[#allocation2 + $0x10] sm:$0xff] %vm974_vm13, %v2077_v45  ;;  %v1211_v0 = vpop.permute.xlu2 %1210  ;;  %v2779_v45 = vld [vmem:[%s10761_s1 + $0x18] sm:$0xff] }
 0x15f   : > { %1762 = vst.msk [vmem:[#allocation2 + $0x30] sm:$0xff] %vm630_vm5, %v1743_v46  ;;  %2930 = vmatpush.msra.mxu2 %v2809_v49  ;;  %v2795_v46 = vld [vmem:[%s10761_s1 + $0x98] sm:$0xff] }
 0x160   : > { %2139 = vst.msk [vmem:[#allocation2 + $0x10] sm:$0xff] %vm1017_vm14, %v2119_v40 }
 0x161   : > { %1230 = vst.msk [vmem:[#allocation2 + $0x28] sm:$0xff] %vm544_vm3, %v1211_v0  ;;  %2931 = vmatpush.msra.mxu2 %v2808_v54  ;;  %v2826_v0 = vld [vmem:[%s10761_s1 + $0x190] sm:$0xff] }
 0x163   : > { %826 = vrot.lane.b32.xlu1 %v6539_v8, %s10763_s20  ;;  %2666 = vrot.lane.b32.xlu0 %v6551_v10, %s10762_s26 }
 0x164   : > { %1170 = vrot.lane.b32.xlu2 %v6551_v10, %s10734_s30  ;;  %v2791_v10 = vld [vmem:[%s10761_s1 + $0x78] sm:$0xff]  ;;  %s10764_s30 = smov 64  }
 0x165   : > { %v825_v50 = vpop.permute.xlu1 %824  ;;  %v2665_v51 = vpop.permute.xlu0 %2664  ;;  %2840 = vmatpush.msra.mxu0 %v2791_v10  ;;  %v2824_v10 = vld [vmem:[%s10761_s1 + $0x180] sm:$0xff] }
 0x166   : > { %846 = vst.msk [vmem:[#allocation2] sm:$0xff] %vm845_vm10, %v825_v50  ;;  %v2161_v53 = vpop.permute.xlu2 %2160 }
 0x167   : > { %2685 = vst.msk [vmem:[#allocation2 + $0x18] sm:$0xff] %vm888_vm11, %v2665_v51  ;;  %2841 = vmatpush.msra.mxu0 %v2790_v57  ;;  %v2825_v51 = vld [vmem:[%s10761_s1 + $0x188] sm:$0xff]  ;;  %v2792_v57 = vld [vmem:[%s10761_s1 + $0x80] sm:$0xff] }
 0x168   : > { %2699 = vst.msk [vmem:[#allocation2 + $0x18] sm:$0xff] %vm931_vm12, %v6493_v4 }
 0x169   : > { %2713 = vst.msk [vmem:[#allocation2 + $0x18] sm:$0xff] %vm974_vm13, %v6493_v4  ;;  %2842 = vmatpush.msra.mxu0 %v2789_v61 }
 0x16a   : > { %2727 = vst.msk [vmem:[#allocation2 + $0x18] sm:$0xff] %vm1017_vm14, %v6493_v4 }
 0x16b   : > { %2741 = vst.msk [vmem:[#allocation2 + $0x18] sm:$0xff] %vm1060_vm15, %v6493_v4  ;;  %1786 = vrot.lane.b32.xlu1 %v6490_v3, %s10763_s20  ;;  %1504 = vrot.lane.b32.xlu0 %v6539_v8, %s10762_s26  ;;  %v2805_v4 = vld [vmem:[%s10761_s1 + $0xe8] sm:$0xff]  ;;  %v2836_v3 = vld [vmem:[%s10761_s1 + $0x1e0] sm:$0xff] }
 0x16c   : > { %2181 = vst.msk [vmem:[#allocation2 + $0x10] sm:$0xff] %vm1060_vm15, %v2161_v53  ;;  %2120 = vrot.lane.b32.xlu2 %v6954_v59, %s10764_s30  ;;  %2880 = vmatpush.msra.mxu1 %v2805_v4  ;;  %v2793_v53 = vld [vmem:[%s10761_s1 + $0x88] sm:$0xff] }
 0x16d   : > { %v1785_v63 = vpop.permute.xlu1 %1784  ;;  %v1503_v2 = vpop.permute.xlu0 %1502  ;;  %2957 = vmatpush.msra.mxu3 %v2836_v3  ;;  %2843 = vmatpush.msra.mxu0 %v2788_v5 }
 0x16e   : > { %1804 = vst.msk [vmem:[#allocation2 + $0x30] sm:$0xff] %vm10743_vm6, %v1785_v63  ;;  %v1253_v9 = vpop.permute.xlu2 %1252  ;;  %2881 = vmatpush.msra.mxu1 %v2804_v6 }
 0x16f   : > { %1523 = vst.msk [vmem:[#allocation2 + $0x8] sm:$0xff] %vm845_vm10, %v1503_v2  ;;  %2958 = vmatpush.msra.mxu3 %v2835_v7  ;;  %2844 = vmatpush.msra.mxu0 %v2787_v13 }
 0x170   : > { %1272 = vst.msk [vmem:[#allocation2 + $0x28] sm:$0xff] %vm587_vm4, %v1253_v9  ;;  %2882 = vmatpush.msra.mxu1 %v2803_v14 }
 0x171   : > { %2959 = vmatpush.msra.mxu3 %v2834_v15  ;;  %2845 = vmatpush.msra.mxu0 %v2786_v17 }
 0x172   : > { %2883 = vmatpush.msra.mxu1 %v2802_v19  ;;  %v2751_v56 = vld [vmem:[#allocation2 + $0x18] sm:$0xff] }
 0x173   : > { %869 = vrot.lane.b32.xlu1 %v6539_v8, %s10763_s20  ;;  %2374 = vrot.lane.b32.xlu0 %v6994_v12, %s10762_s26  ;;  %v2750_v18 = vld [vmem:[#allocation2 + $0x10] sm:$0xff] }
 0x174   : > { %2932 = vmatmul.f32.vlgmr.msra.gmra.mxu2 %v2750_v18  ;;  %1212 = vrot.lane.b32.xlu2 %v7009_v16, %s10764_s30 }
 0x175   : > { %v868_v22 = vpop.permute.xlu1 %867  ;;  %v2373_v23 = vpop.permute.xlu0 %2372  ;;  %2960 = vmatpush.msra.mxu3 %v2833_v20  ;;  %2846 = vmatpush.msra.mxu0 %v2785_v21 }
 0x176   : > { %889 = vst.msk [vmem:[#allocation2] sm:$0xff] %vm888_vm11, %v868_v22  ;;  %v7044_v26 = vpop.permute.xlu2 %953  ;;  %2884 = vmatpush.msra.mxu1 %v2801_v24 }
 0x177   : > { %2392 = vst.msk [vmem:[#allocation2 + $0x38] sm:$0xff] %vm587_vm4, %v2373_v23  ;;  %2961 = vmatpush.msra.mxu3 %v2832_v1  ;;  %2847 = vmatpush.msra.mxu0 %v2784_v25  ;;  %v7217_v23 = vld [vmem:[%s6475_s25 + $0x21] sm:$0xff] }
 0x178   : > { %2885 = vmatpush.msra.mxu1 %v2800_v27 }
 0x179   : > { %2962 = vmatpush.msra.mxu3 %v2831_v28  ;;  %2848 = vmatpush.msra.mxu0 %v2783_v29 }
 0x17a   : > { %2886 = vmatpush.msra.mxu1 %v2799_v30 }
 0x17b   : > { %1828 = vrot.lane.b32.xlu1 %v6994_v12, %s10763_s20  ;;  %1546 = vrot.lane.b32.xlu0 %v6539_v8, %s10762_s26  ;;  %v2781_v8 = vld [vmem:[%s10761_s1 + $0x28] sm:$0xff] }
 0x17c   : > { %2162 = vrot.lane.b32.xlu2 %v6954_v59, %s10764_s30  ;;  %2963 = vmatpush.msra.mxu3 %v2830_v31 }
 0x17d   : > { %v1827_v35 = vpop.permute.xlu1 %1826  ;;  %v1545_v37 = vpop.permute.xlu0 %1544  ;;  %2849 = vmatpush.msra.mxu0 %v2782_v32  ;;  %2887 = vmatpush.msra.mxu1 %v2798_v33 }
 0x17e   : > { %1846 = vst.msk [vmem:[#allocation2 + $0x30] sm:$0xff] %vm716_vm7, %v1827_v35  ;;  %v7088_v40 = vpop.permute.xlu2 %2498  ;;  %2964 = vmatpush.msra.mxu3 %v2829_v34 }
 0x17f   : > { %1565 = vst.msk [vmem:[#allocation2 + $0x8] sm:$0xff] %vm888_vm11, %v1545_v37  ;;  %2850 = vmatpush.msra.mxu0 %v2781_v8  ;;  %2888 = vmatpush.msra.mxu1 %v2797_v38 }
 0x180   : > { %1579 = vst.msk [vmem:[#allocation2 + $0x8] sm:$0xff] %vm931_vm12, %v1572_v36  ;;  %2965 = vmatpush.msra.mxu3 %v2828_v39 }
 0x181   : > { %1593 = vst.msk [vmem:[#allocation2 + $0x8] sm:$0xff] %vm974_vm13, %v1572_v36  ;;  %2851 = vmatpush.msra.mxu0 %v2780_v41  ;;  %2889 = vmatpush.msra.mxu1 %v2796_v42 }
 0x182   : > { %1607 = vst.msk [vmem:[#allocation2 + $0x8] sm:$0xff] %vm1017_vm14, %v1572_v36  ;;  %2966 = vmatpush.msra.mxu3 %v2827_v44 }
 0x183   : > { %1621 = vst.msk [vmem:[#allocation2 + $0x8] sm:$0xff] %vm1060_vm15, %v1572_v36  ;;  %912 = vrot.lane.b32.xlu1 %v7098_v43, %s10764_s30  ;;  %2416 = vrot.lane.b32.xlu0 %v6994_v12, %s10762_s26 }
 0x184   : > { %2852 = vmatpush.msra.mxu0 %v2779_v45  ;;  %1254 = vrot.lane.b32.xlu2 %v6954_v59, %s10762_s26 }
 0x185   : > { %v911_v49 = vpop.permute.xlu1 %910  ;;  %v2415_v50 = vpop.permute.xlu0 %2414  ;;  %2890 = vmatpush.msra.mxu1 %v2795_v46  ;;  %2967 = vmatpush.msra.mxu3 %v2826_v0 }
 0x186   : > { %932 = vst.msk [vmem:[#allocation2] sm:$0xff] %vm931_vm12, %v911_v49  ;;  %2853 = vmatpush.msra.mxu0 %v2778_v47  ;;  %v1953_v54 = vpop.permute.xlu2 %1952 }
 0x187   : > { %2434 = vst.msk [vmem:[#allocation2 + $0x38] sm:$0xff] %vm630_vm5, %v2415_v50  ;;  %2891 = vmatpush.msra.mxu1 %v2794_v11  ;;  %2968 = vmatpush.msra.mxu3 %v2825_v51 }
 0x188   : > { %975 = vst.msk [vmem:[#allocation2] sm:$0xff] %vm974_vm13, %v7044_v26  ;;  %2854 = vmatpush.msra.mxu0 %v2777_v52 }
 0x189   : > { %2892 = vmatpush.msra.mxu1 %v2793_v53  ;;  %2969 = vmatpush.msra.mxu3 %v2824_v10 }
 0x18a   : > { %2855 = vmatpush.msra.mxu0 %v2776_v55  ;;  %v2749_v58 = vld [vmem:[#allocation2 + $0x8] sm:$0xff]  ;;  %2970 = vmatmul.f32.vlgmr.msra.gmra.mxu3 %v2751_v56 }
 0x18b   : > { %2458 = vrot.lane.b32.xlu1 %v6994_v12, %s10762_s26  ;;  %1870 = vrot.lane.b32.xlu0 %v6970_v62, %s10763_s20 }
 0x18c   : > { %2893 = vmatpush.msra.mxu1 %v2792_v57  ;;  %955 = vrot.lane.b32.xlu2 %v7098_v43, %s10764_s30 }
 0x18d   : > { %v2457_v60 = vpop.permute.xlu1 %2456  ;;  %v1869_v61 = vpop.permute.xlu0 %1868  ;;  %2894 = vmatmul.f32.vlgmr.msra.gmra.mxu1 %v2749_v58 }
 0x18e   : > { %2476 = vst.msk [vmem:[#allocation2 + $0x38] sm:$0xff] %vm10743_vm6, %v2457_v60  ;;  %v1040_v4 = vpop.permute.xlu2 %1039 }
 0x18f   : > { %1888 = vst.msk [vmem:[#allocation2 + $0x30] sm:$0xff] %vm759_vm8, %v1869_v61 }
 0x190   : > { %2518 = vst.msk [vmem:[#allocation2 + $0x38] sm:$0xff] %vm716_vm7, %v7088_v40 }
 0x193   : > { %1912 = vrot.lane.b32.xlu1 %v6970_v62, %s10763_s20  ;;  %1296 = vrot.lane.b32.xlu0 %v6954_v59, %s10762_s26 }
 0x194   : > { %2500 = vrot.lane.b32.xlu2 %v6994_v12, %s10762_s26 }
 0x195   : > { %v1911_v3 = vpop.permute.xlu1 %1910  ;;  %v1295_v63 = vpop.permute.xlu0 %1294 }
 0x196   : > { %1930 = vst.msk [vmem:[#allocation2 + $0x30] sm:$0xff] %vm802_vm9, %v1911_v3  ;;  %v2249_v2 = vpop.permute.xlu2 %2248 }
 0x197   : > { %1314 = vst.msk [vmem:[#allocation2 + $0x28] sm:$0xff] %vm630_vm5, %v1295_v63 }
 0x198   : > { %1972 = vst.msk [vmem:[#allocation2 + $0x30] sm:$0xff] %vm845_vm10, %v1953_v54 }
 0x19b   : > { %1338 = vrot.lane.b32.xlu1 %v6954_v59, %s10762_s26  ;;  %998 = vrot.lane.b32.xlu0 %v7098_v43, %s10764_s30 }
 0x19c   : > { %1954 = vrot.lane.b32.xlu2 %v6970_v62, %s10763_s20 }
 0x19d   : > { %v1337_v5 = vpop.permute.xlu1 %1336  ;;  %v997_v6 = vpop.permute.xlu0 %996 }
 0x19e   : > { %1356 = vst.msk [vmem:[#allocation2 + $0x28] sm:$0xff] %vm10743_vm6, %v1337_v5  ;;  %v1421_v7 = vpop.permute.xlu2 %1420  ;;  %v7373_v5 = vld [vmem:[%s6475_s25 + $0x29] sm:$0xff] }
 0x19f   : > { %1018 = vst.msk [vmem:[#allocation2] sm:$0xff] %vm1017_vm14, %v997_v6 }
 0x1a0   : > { %1061 = vst.msk [vmem:[#allocation2] sm:$0xff] %vm1060_vm15, %v1040_v4 }
 0x1a3   : > { %2542 = vrot.lane.b32.xlu1 %v6970_v62, %s10762_s26  ;;  %2208 = vrot.lane.b32.xlu0 %v7123_v48, %s10764_s30 }
 0x1a4   : > { %1041 = vrot.lane.b32.xlu2 %v7098_v43, %s10764_s30 }
 0x1a5   : > { %v2541_v9 = vpop.permute.xlu1 %2540  ;;  %v2207_v13 = vpop.permute.xlu0 %2206 }
 0x1a6   : > { %2560 = vst.msk [vmem:[#allocation2 + $0x38] sm:$0xff] %vm759_vm8, %v2541_v9  ;;  %v2291_v15 = vpop.permute.xlu2 %2290 }
 0x1a7   : > { %2225 = vst.msk [vmem:[#allocation2 + $0x58] sm:$0xff] %vm499_vm0, %v2207_v13  ;;  %v2748_v14 = vld [vmem:[#allocation2] sm:$0xff] }
 0x1a8   : > { %2267 = vst.msk [vmem:[#allocation2 + $0x58] sm:$0xff] %vm10742_vm1, %v2249_v2  ;;  %2856 = vmatmul.f32.vlgmr.msra.gmra.mxu0 %v2748_v14 }
 0x1a9   : > { %2309 = vst.msk [vmem:[#allocation2 + $0x58] sm:$0xff] %vm529_vm2, %v2291_v15 }
 0x1ab   : > { %1996 = vrot.lane.b32.xlu1 %v6970_v62, %s10763_s20  ;;  %1380 = vrot.lane.b32.xlu0 %v6954_v59, %s10762_s26 }
 0x1ac   : > { %2250 = vrot.lane.b32.xlu2 %v7123_v48, %s10764_s30 }
 0x1ad   : > { %v1995_v17 = vpop.permute.xlu1 %1994  ;;  %v1379_v18 = vpop.permute.xlu0 %1378 }
 0x1ae   : > { %2014 = vst.msk [vmem:[#allocation2 + $0x30] sm:$0xff] %vm888_vm11, %v1995_v17  ;;  %v1463_v19 = vpop.permute.xlu2 %1462 }
 0x1af   : > { %1398 = vst.msk [vmem:[#allocation2 + $0x28] sm:$0xff] %vm716_vm7, %v1379_v18 }
 0x1b0   : > { %1440 = vst.msk [vmem:[#allocation2 + $0x28] sm:$0xff] %vm759_vm8, %v1421_v7 }
 0x1b1   : > { %1482 = vst.msk [vmem:[#allocation2 + $0x28] sm:$0xff] %vm802_vm9, %v1463_v19 }
 0x1b3   : > { %1088 = vrot.lane.b32.xlu1 %v6970_v62, %s10764_s30  ;;  %2584 = vrot.lane.b32.xlu0 %v6970_v62, %s10762_s26 }
 0x1b4   : > { %1422 = vrot.lane.b32.xlu2 %v7009_v16, %s10762_s26 }
 0x1b5   : > { %v1087_v20 = vpop.permute.xlu1 %1086  ;;  %v2583_v21 = vpop.permute.xlu0 %2582 }
 0x1b6   : > { %1105 = vst.msk [vmem:[#allocation2 + $0x48] sm:$0xff] %vm499_vm0, %v1087_v20  ;;  %v2333_v22 = vpop.permute.xlu2 %2332 }
 0x1b7   : > { %2602 = vst.msk [vmem:[#allocation2 + $0x38] sm:$0xff] %vm802_vm9, %v2583_v21 }
 0x1b8   : > { %2351 = vst.msk [vmem:[#allocation2 + $0x58] sm:$0xff] %vm544_vm3, %v2333_v22 }
 0x1bb   : > { %2038 = vrot.lane.b32.xlu1 %v6994_v12, %s10764_s30  ;;  %1704 = vrot.lane.b32.xlu0 %v7217_v23, %s10763_s20 }
 0x1bc   : > { %2292 = vrot.lane.b32.xlu2 %v7123_v48, %s10764_s30 }
 0x1bd   : > { %v2037_v24 = vpop.permute.xlu1 %2036  ;;  %v1703_v1 = vpop.permute.xlu0 %1702 }
 0x1be   : > { %2056 = vst.msk [vmem:[#allocation2 + $0x30] sm:$0xff] %vm931_vm12, %v2037_v24  ;;  %v1171_v25 = vpop.permute.xlu2 %1170 }
 0x1bf   : > { %1721 = vst.msk [vmem:[#allocation2 + $0x50] sm:$0xff] %vm587_vm4, %v1703_v1 }
 0x1c3   : > { %1130 = vrot.lane.b32.xlu1 %v6970_v62, %s10764_s30  ;;  %2626 = vrot.lane.b32.xlu0 %v6970_v62, %s10762_s26 }
 0x1c4   : > { %1464 = vrot.lane.b32.xlu2 %v7009_v16, %s10762_s26 }
 0x1c5   : > { %v1129_v26 = vpop.permute.xlu1 %1128  ;;  %v2625_v27 = vpop.permute.xlu0 %2624 }
 0x1c6   : > { %1147 = vst.msk [vmem:[#allocation2 + $0x48] sm:$0xff] %vm10742_vm1, %v1129_v26  ;;  %v2121_v28 = vpop.permute.xlu2 %2120 }
 0x1c7   : > { %2644 = vst.msk [vmem:[#allocation2 + $0x38] sm:$0xff] %vm845_vm10, %v2625_v27 }
 0x1c8   : > { %1189 = vst.msk [vmem:[#allocation2 + $0x48] sm:$0xff] %vm529_vm2, %v1171_v25 }
 0x1cb   : > { %2080 = vrot.lane.b32.xlu1 %v6994_v12, %s10764_s30  ;;  %1746 = vrot.lane.b32.xlu0 %v7217_v23, %s10763_s20 }
 0x1cc   : > { %2334 = vrot.lane.b32.xlu2 %v7123_v48, %s10764_s30 }
 0x1cd   : > { %v2079_v29 = vpop.permute.xlu1 %2078  ;;  %v1745_v30 = vpop.permute.xlu0 %1744 }
 0x1ce   : > { %2098 = vst.msk [vmem:[#allocation2 + $0x30] sm:$0xff] %vm974_vm13, %v2079_v29  ;;  %v1213_v31 = vpop.permute.xlu2 %1212 }
 0x1cf   : > { %1763 = vst.msk [vmem:[#allocation2 + $0x50] sm:$0xff] %vm630_vm5, %v1745_v30  ;;  %v1574_v30 = vld [vmem:[%s6475_s25 + $0x11] sm:$0xff] }
 0x1d0   : > { %2140 = vst.msk [vmem:[#allocation2 + $0x30] sm:$0xff] %vm1017_vm14, %v2121_v28 }
 0x1d1   : > { %1231 = vst.msk [vmem:[#allocation2 + $0x48] sm:$0xff] %vm544_vm3, %v1213_v31 }
 0x1d3   : > { %828 = vrot.lane.b32.xlu1 %v7009_v16, %s10763_s20  ;;  %2668 = vrot.lane.b32.xlu0 %v6970_v62, %s10762_s26 }
 0x1d4   : > { %1172 = vrot.lane.b32.xlu2 %v6970_v62, %s10764_s30 }
 0x1d5   : > { %v827_v32 = vpop.permute.xlu1 %826  ;;  %v2667_v33 = vpop.permute.xlu0 %2666 }
 0x1d6   : > { %847 = vst.msk [vmem:[#allocation2 + $0x20] sm:$0xff] %vm845_vm10, %v827_v32  ;;  %v2163_v34 = vpop.permute.xlu2 %2162 }
 0x1d7   : > { %2686 = vst.msk [vmem:[#allocation2 + $0x38] sm:$0xff] %vm888_vm11, %v2667_v33  ;;  %v7448_v33 = vld [vmem:[%s6475_s25 + $0x19] sm:$0xff] }
 0x1d8   : > { %2700 = vst.msk [vmem:[#allocation2 + $0x38] sm:$0xff] %vm931_vm12, %v6954_v59 }
 0x1d9   : > { %2714 = vst.msk [vmem:[#allocation2 + $0x38] sm:$0xff] %vm974_vm13, %v6954_v59 }
 0x1da   : > { %2728 = vst.msk [vmem:[#allocation2 + $0x38] sm:$0xff] %vm1017_vm14, %v6954_v59 }
 0x1db   : > { %2742 = vst.msk [vmem:[#allocation2 + $0x38] sm:$0xff] %vm1060_vm15, %v6954_v59  ;;  %1788 = vrot.lane.b32.xlu1 %v7217_v23, %s10763_s20  ;;  %1506 = vrot.lane.b32.xlu0 %v7009_v16, %s10762_s26 }
 0x1dc   : > { %2182 = vst.msk [vmem:[#allocation2 + $0x30] sm:$0xff] %vm1060_vm15, %v2163_v34  ;;  %2122 = vrot.lane.b32.xlu2 %v6994_v12, %s10764_s30 }
 0x1dd   : > { %v1787_v35 = vpop.permute.xlu1 %1786  ;;  %v1505_v36 = vpop.permute.xlu0 %1504 }
 0x1de   : > { %1805 = vst.msk [vmem:[#allocation2 + $0x50] sm:$0xff] %vm10743_vm6, %v1787_v35  ;;  %v1255_v37 = vpop.permute.xlu2 %1254 }
 0x1df   : > { %1524 = vst.msk [vmem:[#allocation2 + $0x28] sm:$0xff] %vm845_vm10, %v1505_v36 }
 0x1e0   : > { %1273 = vst.msk [vmem:[#allocation2 + $0x48] sm:$0xff] %vm587_vm4, %v1255_v37 }
 0x1e2   : > { %v2755_v0 = vld [vmem:[#allocation2 + $0x38] sm:$0xff] }
 0x1e3   : > { %871 = vrot.lane.b32.xlu1 %v7009_v16, %s10763_s20  ;;  %2376 = vrot.lane.b32.xlu0 %v7217_v23, %s10762_s26  ;;  %v2754_v8 = vld [vmem:[#allocation2 + $0x30] sm:$0xff] }
 0x1e4   : > { %2935 = vmatmul.f32.gmra.mxu2 %v2754_v8  ;;  %1214 = vrot.lane.b32.xlu2 %v6970_v62, %s10764_s30 }
 0x1e5   : > { %v870_v38 = vpop.permute.xlu1 %869  ;;  %v2375_v39 = vpop.permute.xlu0 %2374  ;;  %2973 = vmatmul.f32.gmra.mxu3 %v2755_v0 }
 0x1e6   : > { %890 = vst.msk [vmem:[#allocation2 + $0x20] sm:$0xff] %vm888_vm11, %v870_v38  ;;  %v956_v40 = vpop.permute.xlu2 %955 }
 0x1e7   : > { %2393 = vst.msk [vmem:[#allocation2 + $0x58] sm:$0xff] %vm587_vm4, %v2375_v39 }
 0x1eb   : > { %1830 = vrot.lane.b32.xlu1 %v7217_v23, %s10763_s20  ;;  %1548 = vrot.lane.b32.xlu0 %v7009_v16, %s10762_s26  ;;  %v7302_v16 = vld [vmem:[%s6475_s25 + $0x28] sm:$0xff] }
 0x1ec   : > { %2164 = vrot.lane.b32.xlu2 %v6994_v12, %s10764_s30  ;;  %1639 = vst.msk [vmem:[#allocation2 + $0x90] sm:$0xff] %vm499_vm0, %v7302_v16 }
 0x1ed   : > { %v1829_v41 = vpop.permute.xlu1 %1828  ;;  %v1547_v42 = vpop.permute.xlu0 %1546  ;;  %1653 = vst.msk [vmem:[#allocation2 + $0x90] sm:$0xff] %vm10742_vm1, %v7302_v16 }
 0x1ee   : > { %1847 = vst.msk [vmem:[#allocation2 + $0x50] sm:$0xff] %vm716_vm7, %v1829_v41  ;;  %v2501_v44 = vpop.permute.xlu2 %2500 }
 0x1ef   : > { %1566 = vst.msk [vmem:[#allocation2 + $0x28] sm:$0xff] %vm888_vm11, %v1547_v42 }
 0x1f0   : > { %1580 = vst.msk [vmem:[#allocation2 + $0x28] sm:$0xff] %vm931_vm12, %v7098_v43 }
 0x1f1   : > { %1594 = vst.msk [vmem:[#allocation2 + $0x28] sm:$0xff] %vm974_vm13, %v7098_v43 }
 0x1f2   : > { %1608 = vst.msk [vmem:[#allocation2 + $0x28] sm:$0xff] %vm1017_vm14, %v7098_v43 }
 0x1f3   : > { %1622 = vst.msk [vmem:[#allocation2 + $0x28] sm:$0xff] %vm1060_vm15, %v7098_v43  ;;  %914 = vrot.lane.b32.xlu1 %v6954_v59, %s10764_s30  ;;  %2418 = vrot.lane.b32.xlu0 %v7217_v23, %s10762_s26 }
 0x1f4   : > { %1256 = vrot.lane.b32.xlu2 %v6994_v12, %s10762_s26  ;;  %1667 = vst.msk [vmem:[#allocation2 + $0x90] sm:$0xff] %vm529_vm2, %v7302_v16 }
 0x1f5   : > { %v913_v45 = vpop.permute.xlu1 %912  ;;  %v2417_v46 = vpop.permute.xlu0 %2416  ;;  %1681 = vst.msk [vmem:[#allocation2 + $0x90] sm:$0xff] %vm544_vm3, %v7302_v16 }
 0x1f6   : > { %933 = vst.msk [vmem:[#allocation2 + $0x20] sm:$0xff] %vm931_vm12, %v913_v45  ;;  %v1955_v43 = vpop.permute.xlu2 %1954 }
 0x1f7   : > { %2435 = vst.msk [vmem:[#allocation2 + $0x58] sm:$0xff] %vm630_vm5, %v2417_v46 }
 0x1f8   : > { %976 = vst.msk [vmem:[#allocation2 + $0x20] sm:$0xff] %vm974_vm13, %v956_v40 }
 0x1fa   : > { %v2753_v47 = vld [vmem:[#allocation2 + $0x28] sm:$0xff] }
 0x1fb   : > { %2460 = vrot.lane.b32.xlu1 %v7217_v23, %s10762_s26  ;;  %1872 = vrot.lane.b32.xlu0 %v7123_v48, %s10763_s20 }
 0x1fc   : > { %2897 = vmatmul.f32.gmra.mxu1 %v2753_v47  ;;  %957 = vrot.lane.b32.xlu2 %v6954_v59, %s10764_s30 }
 0x1fd   : > { %v2459_v11 = vpop.permute.xlu1 %2458  ;;  %v1871_v49 = vpop.permute.xlu0 %1870 }
 0x1fe   : > { %2477 = vst.msk [vmem:[#allocation2 + $0x58] sm:$0xff] %vm10743_vm6, %v2459_v11  ;;  %v1042_v50 = vpop.permute.xlu2 %1041 }
 0x1ff   : > { %1889 = vst.msk [vmem:[#allocation2 + $0x50] sm:$0xff] %vm759_vm8, %v1871_v49 }
 0x200   : > { %2519 = vst.msk [vmem:[#allocation2 + $0x58] sm:$0xff] %vm716_vm7, %v2501_v44 }
 0x203   : > { %1914 = vrot.lane.b32.xlu1 %v7123_v48, %s10763_s20  ;;  %1298 = vrot.lane.b32.xlu0 %v6994_v12, %s10762_s26 }
 0x204   : > { %2502 = vrot.lane.b32.xlu2 %v7217_v23, %s10762_s26 }
 0x205   : > { %v1913_v51 = vpop.permute.xlu1 %1912  ;;  %v1297_v52 = vpop.permute.xlu0 %1296 }
 0x206   : > { %1931 = vst.msk [vmem:[#allocation2 + $0x50] sm:$0xff] %vm802_vm9, %v1913_v51  ;;  %v2251_v53 = vpop.permute.xlu2 %2250 }
 0x207   : > { %1315 = vst.msk [vmem:[#allocation2 + $0x48] sm:$0xff] %vm630_vm5, %v1297_v52 }
 0x208   : > { %1973 = vst.msk [vmem:[#allocation2 + $0x50] sm:$0xff] %vm845_vm10, %v1955_v43 }
 0x20b   : > { %1340 = vrot.lane.b32.xlu1 %v6994_v12, %s10762_s26  ;;  %1000 = vrot.lane.b32.xlu0 %v6954_v59, %s10764_s30 }
 0x20c   : > { %1956 = vrot.lane.b32.xlu2 %v7123_v48, %s10763_s20 }
 0x20d   : > { %v1339_v54 = vpop.permute.xlu1 %1338  ;;  %v999_v10 = vpop.permute.xlu0 %998 }
 0x20e   : > { %1357 = vst.msk [vmem:[#allocation2 + $0x48] sm:$0xff] %vm10743_vm6, %v1339_v54  ;;  %v1423_v55 = vpop.permute.xlu2 %1422 }
 0x20f   : > { %1019 = vst.msk [vmem:[#allocation2 + $0x20] sm:$0xff] %vm1017_vm14, %v999_v10 }
 0x210   : > { %1062 = vst.msk [vmem:[#allocation2 + $0x20] sm:$0xff] %vm1060_vm15, %v1042_v50 }
 0x213   : > { %2544 = vrot.lane.b32.xlu1 %v7123_v48, %s10762_s26  ;;  %2210 = vrot.lane.b32.xlu0 %v7302_v16, %s10764_s30 }
 0x214   : > { %1043 = vrot.lane.b32.xlu2 %v6954_v59, %s10764_s30 }
 0x215   : > { %v2543_v56 = vpop.permute.xlu1 %2542  ;;  %v2209_v57 = vpop.permute.xlu0 %2208 }
 0x216   : > { %2561 = vst.msk [vmem:[#allocation2 + $0x58] sm:$0xff] %vm759_vm8, %v2543_v56  ;;  %v2293_v60 = vpop.permute.xlu2 %2292 }
 0x217   : > { %2226 = vst.msk [vmem:[#allocation2 + $0x78] sm:$0xff] %vm499_vm0, %v2209_v57  ;;  %v2752_v58 = vld [vmem:[#allocation2 + $0x20] sm:$0xff] }
 0x218   : > { %2268 = vst.msk [vmem:[#allocation2 + $0x78] sm:$0xff] %vm10742_vm1, %v2251_v53  ;;  %2859 = vmatmul.f32.gmra.mxu0 %v2752_v58 }
 0x219   : > { %2310 = vst.msk [vmem:[#allocation2 + $0x78] sm:$0xff] %vm529_vm2, %v2293_v60 }
 0x21b   : > { %1998 = vrot.lane.b32.xlu1 %v7123_v48, %s10763_s20  ;;  %1382 = vrot.lane.b32.xlu0 %v6994_v12, %s10762_s26 }
 0x21c   : > { %2252 = vrot.lane.b32.xlu2 %v7302_v16, %s10764_s30 }
 0x21d   : > { %v1997_v61 = vpop.permute.xlu1 %1996  ;;  %v1381_v59 = vpop.permute.xlu0 %1380 }
 0x21e   : > { %2015 = vst.msk [vmem:[#allocation2 + $0x50] sm:$0xff] %vm888_vm11, %v1997_v61  ;;  %v1465_v4 = vpop.permute.xlu2 %1464 }
 0x21f   : > { %1399 = vst.msk [vmem:[#allocation2 + $0x48] sm:$0xff] %vm716_vm7, %v1381_v59 }
 0x220   : > { %1441 = vst.msk [vmem:[#allocation2 + $0x48] sm:$0xff] %vm759_vm8, %v1423_v55  ;;  %v7529_v55 = vld [vmem:[%s6475_s25 + $0x31] sm:$0xff] }
 0x221   : > { %1483 = vst.msk [vmem:[#allocation2 + $0x48] sm:$0xff] %vm802_vm9, %v1465_v4 }
 0x223   : > { %1090 = vrot.lane.b32.xlu1 %v7123_v48, %s10764_s30  ;;  %2586 = vrot.lane.b32.xlu0 %v7123_v48, %s10762_s26 }
 0x224   : > { %1424 = vrot.lane.b32.xlu2 %v6970_v62, %s10762_s26 }
 0x225   : > { %v1089_v3 = vpop.permute.xlu1 %1088  ;;  %v2585_v63 = vpop.permute.xlu0 %2584 }
 0x226   : > { %1106 = vst.msk [vmem:[#allocation2 + $0x68] sm:$0xff] %vm499_vm0, %v1089_v3  ;;  %v2335_v2 = vpop.permute.xlu2 %2334 }
 0x227   : > { %2603 = vst.msk [vmem:[#allocation2 + $0x58] sm:$0xff] %vm802_vm9, %v2585_v63 }
 0x228   : > { %2352 = vst.msk [vmem:[#allocation2 + $0x78] sm:$0xff] %vm544_vm3, %v2335_v2 }
 0x22b   : > { %2040 = vrot.lane.b32.xlu1 %v7217_v23, %s10764_s30  ;;  %1706 = vrot.lane.b32.xlu0 %v7373_v5, %s10763_s20 }
 0x22c   : > { %2294 = vrot.lane.b32.xlu2 %v7302_v16, %s10764_s30 }
 0x22d   : > { %v2039_v6 = vpop.permute.xlu1 %2038  ;;  %v1705_v7 = vpop.permute.xlu0 %1704 }
 0x22e   : > { %2057 = vst.msk [vmem:[#allocation2 + $0x50] sm:$0xff] %vm931_vm12, %v2039_v6  ;;  %v1173_v9 = vpop.permute.xlu2 %1172 }
 0x22f   : > { %1722 = vst.msk [vmem:[#allocation2 + $0x70] sm:$0xff] %vm587_vm4, %v1705_v7 }
 0x233   : > { %1132 = vrot.lane.b32.xlu1 %v7123_v48, %s10764_s30  ;;  %2628 = vrot.lane.b32.xlu0 %v7123_v48, %s10762_s26 }
 0x234   : > { %1466 = vrot.lane.b32.xlu2 %v6970_v62, %s10762_s26 }
 0x235   : > { %v1131_v13 = vpop.permute.xlu1 %1130  ;;  %v2627_v14 = vpop.permute.xlu0 %2626 }
 0x236   : > { %1148 = vst.msk [vmem:[#allocation2 + $0x68] sm:$0xff] %vm10742_vm1, %v1131_v13  ;;  %v2123_v15 = vpop.permute.xlu2 %2122 }
 0x237   : > { %2645 = vst.msk [vmem:[#allocation2 + $0x58] sm:$0xff] %vm845_vm10, %v2627_v14 }
 0x238   : > { %1190 = vst.msk [vmem:[#allocation2 + $0x68] sm:$0xff] %vm529_vm2, %v1173_v9 }
 0x23b   : > { %2082 = vrot.lane.b32.xlu1 %v7217_v23, %s10764_s30  ;;  %1748 = vrot.lane.b32.xlu0 %v7373_v5, %s10763_s20 }
 0x23c   : > { %2336 = vrot.lane.b32.xlu2 %v7302_v16, %s10764_s30 }
 0x23d   : > { %v2081_v17 = vpop.permute.xlu1 %2080  ;;  %v1747_v18 = vpop.permute.xlu0 %1746 }
 0x23e   : > { %2099 = vst.msk [vmem:[#allocation2 + $0x50] sm:$0xff] %vm974_vm13, %v2081_v17  ;;  %v1215_v19 = vpop.permute.xlu2 %1214 }
 0x23f   : > { %1764 = vst.msk [vmem:[#allocation2 + $0x70] sm:$0xff] %vm630_vm5, %v1747_v18 }
 0x240   : > { %2141 = vst.msk [vmem:[#allocation2 + $0x50] sm:$0xff] %vm1017_vm14, %v2123_v15 }
 0x241   : > { %1232 = vst.msk [vmem:[#allocation2 + $0x68] sm:$0xff] %vm544_vm3, %v1215_v19 }
 0x243   : > { %830 = vrot.lane.b32.xlu1 %v6970_v62, %s10763_s20  ;;  %2670 = vrot.lane.b32.xlu0 %v7123_v48, %s10762_s26 }
 0x244   : > { %1174 = vrot.lane.b32.xlu2 %v7123_v48, %s10764_s30 }
 0x245   : > { %v829_v20 = vpop.permute.xlu1 %828  ;;  %v2669_v21 = vpop.permute.xlu0 %2668 }
 0x246   : > { %848 = vst.msk [vmem:[#allocation2 + $0x40] sm:$0xff] %vm845_vm10, %v829_v20  ;;  %v2165_v22 = vpop.permute.xlu2 %2164 }
 0x247   : > { %2687 = vst.msk [vmem:[#allocation2 + $0x58] sm:$0xff] %vm888_vm11, %v2669_v21 }
 0x248   : > { %2701 = vst.msk [vmem:[#allocation2 + $0x58] sm:$0xff] %vm931_vm12, %v6994_v12 }
 0x249   : > { %2715 = vst.msk [vmem:[#allocation2 + $0x58] sm:$0xff] %vm974_vm13, %v6994_v12 }
 0x24a   : > { %2729 = vst.msk [vmem:[#allocation2 + $0x58] sm:$0xff] %vm1017_vm14, %v6994_v12 }
 0x24b   : > { %2743 = vst.msk [vmem:[#allocation2 + $0x58] sm:$0xff] %vm1060_vm15, %v6994_v12  ;;  %1790 = vrot.lane.b32.xlu1 %v7373_v5, %s10763_s20  ;;  %1508 = vrot.lane.b32.xlu0 %v6970_v62, %s10762_s26 }
 0x24c   : > { %2183 = vst.msk [vmem:[#allocation2 + $0x50] sm:$0xff] %vm1060_vm15, %v2165_v22  ;;  %2124 = vrot.lane.b32.xlu2 %v7217_v23, %s10764_s30  ;;  %v7611_v22 = vld [vmem:[%s6475_s25 + $0x38] sm:$0xff] }
 0x24d   : > { %v1789_v24 = vpop.permute.xlu1 %1788  ;;  %v1507_v1 = vpop.permute.xlu0 %1506  ;;  %1641 = vst.msk [vmem:[#allocation2 + $0xd0] sm:$0xff] %vm499_vm0, %v7611_v22 }
 0x24e   : > { %1806 = vst.msk [vmem:[#allocation2 + $0x70] sm:$0xff] %vm10743_vm6, %v1789_v24  ;;  %v1257_v25 = vpop.permute.xlu2 %1256  ;;  %v7614_v24 = vld [vmem:[%s6475_s25 + $0x21] sm:$0xff] }
 0x24f   : > { %1525 = vst.msk [vmem:[#allocation2 + $0x48] sm:$0xff] %vm845_vm10, %v1507_v1 }
 0x250   : > { %1274 = vst.msk [vmem:[#allocation2 + $0x68] sm:$0xff] %vm587_vm4, %v1257_v25 }
 0x251   : > { %1655 = vst.msk [vmem:[#allocation2 + $0xd0] sm:$0xff] %vm10742_vm1, %v7611_v22 }
 0x252   : > { %v2759_v35 = vld [vmem:[#allocation2 + $0x58] sm:$0xff]  ;;  %1669 = vst.msk [vmem:[#allocation2 + $0xd0] sm:$0xff] %vm529_vm2, %v7611_v22 }
 0x253   : > { %873 = vrot.lane.b32.xlu1 %v6970_v62, %s10763_s20  ;;  %2378 = vrot.lane.b32.xlu0 %v7373_v5, %s10762_s26  ;;  %v2758_v12 = vld [vmem:[#allocation2 + $0x50] sm:$0xff]  ;;  %1683 = vst.msk [vmem:[#allocation2 + $0xd0] sm:$0xff] %vm544_vm3, %v7611_v22 }
 0x254   : > { %2938 = vmatmul.f32.gmra.mxu2 %v2758_v12  ;;  %1216 = vrot.lane.b32.xlu2 %v7123_v48, %s10764_s30 }
 0x255   : > { %v872_v26 = vpop.permute.xlu1 %871  ;;  %v2377_v27 = vpop.permute.xlu0 %2376  ;;  %2976 = vmatmul.f32.gmra.mxu3 %v2759_v35 }
 0x256   : > { %891 = vst.msk [vmem:[#allocation2 + $0x40] sm:$0xff] %vm888_vm11, %v872_v26  ;;  %v958_v28 = vpop.permute.xlu2 %957 }
 0x257   : > { %2394 = vst.msk [vmem:[#allocation2 + $0x78] sm:$0xff] %vm587_vm4, %v2377_v27 }
 0x25b   : > { %1832 = vrot.lane.b32.xlu1 %v7373_v5, %s10763_s20  ;;  %1550 = vrot.lane.b32.xlu0 %v6970_v62, %s10762_s26  ;;  %v7458_v62 = vld [vmem:[%s6475_s25 + $0x30] sm:$0xff] }
 0x25c   : > { %2166 = vrot.lane.b32.xlu2 %v7217_v23, %s10764_s30  ;;  %1640 = vst.msk [vmem:[#allocation2 + $0xb0] sm:$0xff] %vm499_vm0, %v7458_v62 }
 0x25d   : > { %v1831_v29 = vpop.permute.xlu1 %1830  ;;  %v1549_v31 = vpop.permute.xlu0 %1548  ;;  %1654 = vst.msk [vmem:[#allocation2 + $0xb0] sm:$0xff] %vm10742_vm1, %v7458_v62 }
 0x25e   : > { %1848 = vst.msk [vmem:[#allocation2 + $0x70] sm:$0xff] %vm716_vm7, %v1831_v29  ;;  %v2503_v32 = vpop.permute.xlu2 %2502 }
 0x25f   : > { %1567 = vst.msk [vmem:[#allocation2 + $0x48] sm:$0xff] %vm888_vm11, %v1549_v31 }
 0x260   : > { %1581 = vst.msk [vmem:[#allocation2 + $0x48] sm:$0xff] %vm931_vm12, %v1574_v30 }
 0x261   : > { %1595 = vst.msk [vmem:[#allocation2 + $0x48] sm:$0xff] %vm974_vm13, %v1574_v30 }
 0x262   : > { %1609 = vst.msk [vmem:[#allocation2 + $0x48] sm:$0xff] %vm1017_vm14, %v1574_v30 }
 0x263   : > { %1623 = vst.msk [vmem:[#allocation2 + $0x48] sm:$0xff] %vm1060_vm15, %v1574_v30  ;;  %916 = vrot.lane.b32.xlu1 %v7448_v33, %s10764_s30  ;;  %2420 = vrot.lane.b32.xlu0 %v7373_v5, %s10762_s26 }
 0x264   : > { %1258 = vrot.lane.b32.xlu2 %v7217_v23, %s10762_s26  ;;  %1668 = vst.msk [vmem:[#allocation2 + $0xb0] sm:$0xff] %vm529_vm2, %v7458_v62 }
 0x265   : > { %v915_v34 = vpop.permute.xlu1 %914  ;;  %v2419_v36 = vpop.permute.xlu0 %2418  ;;  %1682 = vst.msk [vmem:[#allocation2 + $0xb0] sm:$0xff] %vm544_vm3, %v7458_v62 }
 0x266   : > { %934 = vst.msk [vmem:[#allocation2 + $0x40] sm:$0xff] %vm931_vm12, %v915_v34  ;;  %v1957_v37 = vpop.permute.xlu2 %1956 }
 0x267   : > { %2436 = vst.msk [vmem:[#allocation2 + $0x78] sm:$0xff] %vm630_vm5, %v2419_v36 }
 0x268   : > { %977 = vst.msk [vmem:[#allocation2 + $0x40] sm:$0xff] %vm974_vm13, %v958_v28 }
 0x26a   : > { %v2757_v8 = vld [vmem:[#allocation2 + $0x48] sm:$0xff] }
 0x26b   : > { %2462 = vrot.lane.b32.xlu1 %v7373_v5, %s10762_s26  ;;  %1874 = vrot.lane.b32.xlu0 %v7302_v16, %s10763_s20 }
 0x26c   : > { %2900 = vmatmul.f32.gmra.mxu1 %v2757_v8  ;;  %959 = vrot.lane.b32.xlu2 %v7448_v33, %s10764_s30 }
 0x26d   : > { %v2461_v38 = vpop.permute.xlu1 %2460  ;;  %v1873_v39 = vpop.permute.xlu0 %1872 }
 0x26e   : > { %2478 = vst.msk [vmem:[#allocation2 + $0x78] sm:$0xff] %vm10743_vm6, %v2461_v38  ;;  %v1044_v40 = vpop.permute.xlu2 %1043 }
 0x26f   : > { %1890 = vst.msk [vmem:[#allocation2 + $0x70] sm:$0xff] %vm759_vm8, %v1873_v39 }
 0x270   : > { %2520 = vst.msk [vmem:[#allocation2 + $0x78] sm:$0xff] %vm716_vm7, %v2503_v32 }
 0x273   : > { %1916 = vrot.lane.b32.xlu1 %v7302_v16, %s10763_s20  ;;  %1300 = vrot.lane.b32.xlu0 %v7217_v23, %s10762_s26 }
 0x274   : > { %2504 = vrot.lane.b32.xlu2 %v7373_v5, %s10762_s26 }
 0x275   : > { %v1915_v41 = vpop.permute.xlu1 %1914  ;;  %v1299_v42 = vpop.permute.xlu0 %1298 }
 0x276   : > { %1932 = vst.msk [vmem:[#allocation2 + $0x70] sm:$0xff] %vm802_vm9, %v1915_v41  ;;  %v2253_v44 = vpop.permute.xlu2 %2252 }
 0x277   : > { %1316 = vst.msk [vmem:[#allocation2 + $0x68] sm:$0xff] %vm630_vm5, %v1299_v42 }
 0x278   : > { %1974 = vst.msk [vmem:[#allocation2 + $0x70] sm:$0xff] %vm845_vm10, %v1957_v37 }
 0x27b   : > { %1342 = vrot.lane.b32.xlu1 %v7217_v23, %s10762_s26  ;;  %1002 = vrot.lane.b32.xlu0 %v7448_v33, %s10764_s30 }
 0x27c   : > { %1958 = vrot.lane.b32.xlu2 %v7302_v16, %s10763_s20 }
 0x27d   : > { %v1341_v45 = vpop.permute.xlu1 %1340  ;;  %v1001_v46 = vpop.permute.xlu0 %1000 }
 0x27e   : > { %1358 = vst.msk [vmem:[#allocation2 + $0x68] sm:$0xff] %vm10743_vm6, %v1341_v45  ;;  %v1425_v0 = vpop.permute.xlu2 %1424 }
 0x27f   : > { %1020 = vst.msk [vmem:[#allocation2 + $0x40] sm:$0xff] %vm1017_vm14, %v1001_v46 }
 0x280   : > { %1063 = vst.msk [vmem:[#allocation2 + $0x40] sm:$0xff] %vm1060_vm15, %v1044_v40 }
 0x283   : > { %2546 = vrot.lane.b32.xlu1 %v7302_v16, %s10762_s26  ;;  %2212 = vrot.lane.b32.xlu0 %v7458_v62, %s10764_s30 }
 0x284   : > { %1045 = vrot.lane.b32.xlu2 %v7448_v33, %s10764_s30 }
 0x285   : > { %v2545_v43 = vpop.permute.xlu1 %2544  ;;  %v2211_v47 = vpop.permute.xlu0 %2210 }
 0x286   : > { %2562 = vst.msk [vmem:[#allocation2 + $0x78] sm:$0xff] %vm759_vm8, %v2545_v43  ;;  %v2295_v49 = vpop.permute.xlu2 %2294 }
 0x287   : > { %2227 = vst.msk [vmem:[#allocation2 + $0x98] sm:$0xff] %vm499_vm0, %v2211_v47  ;;  %v2756_v11 = vld [vmem:[#allocation2 + $0x40] sm:$0xff] }
 0x288   : > { %2269 = vst.msk [vmem:[#allocation2 + $0x98] sm:$0xff] %vm10742_vm1, %v2253_v44  ;;  %2862 = vmatmul.f32.gmra.mxu0 %v2756_v11 }
 0x289   : > { %2311 = vst.msk [vmem:[#allocation2 + $0x98] sm:$0xff] %vm529_vm2, %v2295_v49  ;;  %v815_v49 = vld [vmem:[%s6475_s25 + $0x28] sm:$0xff] }
 0x28b   : > { %2000 = vrot.lane.b32.xlu1 %v7302_v16, %s10763_s20  ;;  %1384 = vrot.lane.b32.xlu0 %v7217_v23, %s10762_s26 }
 0x28c   : > { %2254 = vrot.lane.b32.xlu2 %v7458_v62, %s10764_s30 }
 0x28d   : > { %v1999_v50 = vpop.permute.xlu1 %1998  ;;  %v1383_v51 = vpop.permute.xlu0 %1382 }
 0x28e   : > { %2016 = vst.msk [vmem:[#allocation2 + $0x70] sm:$0xff] %vm888_vm11, %v1999_v50  ;;  %v1467_v52 = vpop.permute.xlu2 %1466 }
 0x28f   : > { %1400 = vst.msk [vmem:[#allocation2 + $0x68] sm:$0xff] %vm716_vm7, %v1383_v51 }
 0x290   : > { %1442 = vst.msk [vmem:[#allocation2 + $0x68] sm:$0xff] %vm759_vm8, %v1425_v0  ;;  %v7684_v0 = vld [vmem:[%s6475_s25 + $0x39] sm:$0xff] }
 0x291   : > { %1484 = vst.msk [vmem:[#allocation2 + $0x68] sm:$0xff] %vm802_vm9, %v1467_v52 }
 0x293   : > { %1092 = vrot.lane.b32.xlu1 %v7302_v16, %s10764_s30  ;;  %2588 = vrot.lane.b32.xlu0 %v7302_v16, %s10762_s26 }
 0x294   : > { %1426 = vrot.lane.b32.xlu2 %v7123_v48, %s10762_s26 }
 0x295   : > { %v1091_v53 = vpop.permute.xlu1 %1090  ;;  %v2587_v54 = vpop.permute.xlu0 %2586 }
 0x296   : > { %1107 = vst.msk [vmem:[#allocation2 + $0x88] sm:$0xff] %vm499_vm0, %v1091_v53  ;;  %v2337_v10 = vpop.permute.xlu2 %2336 }
 0x297   : > { %2604 = vst.msk [vmem:[#allocation2 + $0x78] sm:$0xff] %vm802_vm9, %v2587_v54 }
 0x298   : > { %2353 = vst.msk [vmem:[#allocation2 + $0x98] sm:$0xff] %vm544_vm3, %v2337_v10 }
 0x29b   : > { %2042 = vrot.lane.b32.xlu1 %v7373_v5, %s10764_s30  ;;  %1708 = vrot.lane.b32.xlu0 %v7529_v55, %s10763_s20 }
 0x29c   : > { %2296 = vrot.lane.b32.xlu2 %v7458_v62, %s10764_s30 }
 0x29d   : > { %v2041_v56 = vpop.permute.xlu1 %2040  ;;  %v1707_v57 = vpop.permute.xlu0 %1706 }
 0x29e   : > { %2058 = vst.msk [vmem:[#allocation2 + $0x70] sm:$0xff] %vm931_vm12, %v2041_v56  ;;  %v1175_v58 = vpop.permute.xlu2 %1174 }
 0x29f   : > { %1723 = vst.msk [vmem:[#allocation2 + $0x90] sm:$0xff] %vm587_vm4, %v1707_v57 }
 0x2a3   : > { %789 = vrot.lane.b32.xlu1 %v7123_v48, %s10763_s20  ;;  %2630 = vrot.lane.b32.xlu0 %v7302_v16, %s10762_s26 }
 0x2a4   : > { %1134 = vrot.lane.b32.xlu2 %v7302_v16, %s10764_s30 }
 0x2a5   : > { %v1133_v60 = vpop.permute.xlu1 %1132  ;;  %v2629_v61 = vpop.permute.xlu0 %2628 }
 0x2a6   : > { %1149 = vst.msk [vmem:[#allocation2 + $0x88] sm:$0xff] %vm10742_vm1, %v1133_v60  ;;  %v2125_v59 = vpop.permute.xlu2 %2124 }
 0x2a7   : > { %2646 = vst.msk [vmem:[#allocation2 + $0x78] sm:$0xff] %vm845_vm10, %v2629_v61 }
 0x2a8   : > { %1191 = vst.msk [vmem:[#allocation2 + $0x88] sm:$0xff] %vm529_vm2, %v1175_v58 }
 0x2ab   : > { %1750 = vrot.lane.b32.xlu1 %v7529_v55, %s10763_s20  ;;  %1468 = vrot.lane.b32.xlu0 %v7123_v48, %s10762_s26  ;;  %v1492_v48 = vld [vmem:[%s6475_s25 + $0x20] sm:$0xff] }
 0x2ac   : > { %2084 = vrot.lane.b32.xlu2 %v7373_v5, %s10764_s30 }
 0x2ad   : > { %v2083_v4 = vpop.permute.xlu1 %2082  ;;  %v1749_v3 = vpop.permute.xlu0 %1748 }
 0x2ae   : > { %2100 = vst.msk [vmem:[#allocation2 + $0x70] sm:$0xff] %vm974_vm13, %v2083_v4  ;;  %v1217_v63 = vpop.permute.xlu2 %1216 }
 0x2af   : > { %1765 = vst.msk [vmem:[#allocation2 + $0x90] sm:$0xff] %vm630_vm5, %v1749_v3 }
 0x2b0   : > { %2142 = vst.msk [vmem:[#allocation2 + $0x70] sm:$0xff] %vm1017_vm14, %v2125_v59 }
 0x2b1   : > { %1233 = vst.msk [vmem:[#allocation2 + $0x88] sm:$0xff] %vm544_vm3, %v1217_v63 }
 0x2b3   : > { %2672 = vrot.lane.b32.xlu1 %v7302_v16, %s10762_s26  ;;  %2338 = vrot.lane.b32.xlu0 %v7458_v62, %s10764_s30 }
 0x2b4   : > { %832 = vrot.lane.b32.xlu2 %v1492_v48, %s10763_s20 }
 0x2b5   : > { %v831_v2 = vpop.permute.xlu1 %830  ;;  %v2671_v6 = vpop.permute.xlu0 %2670 }
 0x2b6   : > { %849 = vst.msk [vmem:[#allocation2 + $0x60] sm:$0xff] %vm845_vm10, %v831_v2  ;;  %v2167_v7 = vpop.permute.xlu2 %2166 }
 0x2b7   : > { %2688 = vst.msk [vmem:[#allocation2 + $0x78] sm:$0xff] %vm888_vm11, %v2671_v6 }
 0x2b8   : > { %2702 = vst.msk [vmem:[#allocation2 + $0x78] sm:$0xff] %vm931_vm12, %v7217_v23 }
 0x2b9   : > { %2716 = vst.msk [vmem:[#allocation2 + $0x78] sm:$0xff] %vm974_vm13, %v7217_v23 }
 0x2ba   : > { %2730 = vst.msk [vmem:[#allocation2 + $0x78] sm:$0xff] %vm1017_vm14, %v7217_v23 }
 0x2bb   : > { %2744 = vst.msk [vmem:[#allocation2 + $0x78] sm:$0xff] %vm1060_vm15, %v7217_v23  ;;  %1510 = vrot.lane.b32.xlu1 %v1492_v48, %s10762_s26  ;;  %1176 = vrot.lane.b32.xlu0 %v7302_v16, %s10764_s30 }
 0x2bc   : > { %2184 = vst.msk [vmem:[#allocation2 + $0x70] sm:$0xff] %vm1060_vm15, %v2167_v7  ;;  %1792 = vrot.lane.b32.xlu2 %v7529_v55, %s10763_s20 }
 0x2bd   : > { %v1791_v9 = vpop.permute.xlu1 %1790  ;;  %v1509_v13 = vpop.permute.xlu0 %1508 }
 0x2be   : > { %1807 = vst.msk [vmem:[#allocation2 + $0x90] sm:$0xff] %vm10743_vm6, %v1791_v9  ;;  %v1259_v14 = vpop.permute.xlu2 %1258  ;;  %v7770_v9 = vld [vmem:[%s6475_s25 + $0x29] sm:$0xff] }
 0x2bf   : > { %1526 = vst.msk [vmem:[#allocation2 + $0x68] sm:$0xff] %vm845_vm10, %v1509_v13 }
 0x2c0   : > { %1275 = vst.msk [vmem:[#allocation2 + $0x88] sm:$0xff] %vm587_vm4, %v1259_v14 }
 0x2c2   : > { %v2763_v25 = vld [vmem:[#allocation2 + $0x78] sm:$0xff] }
 0x2c3   : > { %2380 = vrot.lane.b32.xlu1 %v7529_v55, %s10762_s26  ;;  %2126 = vrot.lane.b32.xlu0 %v7373_v5, %s10764_s30  ;;  %v2762_v23 = vld [vmem:[#allocation2 + $0x70] sm:$0xff] }
 0x2c4   : > { %2941 = vmatmul.f32.gmra.mxu2 %v2762_v23  ;;  %875 = vrot.lane.b32.xlu2 %v1492_v48, %s10763_s20 }
 0x2c5   : > { %v874_v15 = vpop.permute.xlu1 %873  ;;  %v2379_v17 = vpop.permute.xlu0 %2378  ;;  %2979 = vmatmul.f32.gmra.mxu3 %v2763_v25 }
 0x2c6   : > { %892 = vst.msk [vmem:[#allocation2 + $0x60] sm:$0xff] %vm888_vm11, %v874_v15  ;;  %v960_v18 = vpop.permute.xlu2 %959 }
 0x2c7   : > { %2395 = vst.msk [vmem:[#allocation2 + $0x98] sm:$0xff] %vm587_vm4, %v2379_v17 }
 0x2cb   : > { %1552 = vrot.lane.b32.xlu1 %v1492_v48, %s10762_s26  ;;  %1218 = vrot.lane.b32.xlu0 %v7302_v16, %s10764_s30 }
 0x2cc   : > { %1834 = vrot.lane.b32.xlu2 %v7529_v55, %s10763_s20 }
 0x2cd   : > { %v1833_v19 = vpop.permute.xlu1 %1832  ;;  %v1551_v20 = vpop.permute.xlu0 %1550 }
 0x2ce   : > { %1849 = vst.msk [vmem:[#allocation2 + $0x90] sm:$0xff] %vm716_vm7, %v1833_v19  ;;  %v2505_v21 = vpop.permute.xlu2 %2504 }
 0x2cf   : > { %1568 = vst.msk [vmem:[#allocation2 + $0x68] sm:$0xff] %vm888_vm11, %v1551_v20 }
 0x2d0   : > { %1582 = vst.msk [vmem:[#allocation2 + $0x68] sm:$0xff] %vm931_vm12, %v7448_v33 }
 0x2d1   : > { %1596 = vst.msk [vmem:[#allocation2 + $0x68] sm:$0xff] %vm974_vm13, %v7448_v33 }
 0x2d2   : > { %1610 = vst.msk [vmem:[#allocation2 + $0x68] sm:$0xff] %vm1017_vm14, %v7448_v33 }
 0x2d3   : > { %1624 = vst.msk [vmem:[#allocation2 + $0x68] sm:$0xff] %vm1060_vm15, %v7448_v33  ;;  %2422 = vrot.lane.b32.xlu1 %v7529_v55, %s10762_s26  ;;  %2168 = vrot.lane.b32.xlu0 %v7373_v5, %s10764_s30 }
 0x2d4   : > { %918 = vrot.lane.b32.xlu2 %v7614_v24, %s10764_s30 }
 0x2d5   : > { %v917_v1 = vpop.permute.xlu1 %916  ;;  %v2421_v12 = vpop.permute.xlu0 %2420 }
 0x2d6   : > { %935 = vst.msk [vmem:[#allocation2 + $0x60] sm:$0xff] %vm931_vm12, %v917_v1  ;;  %v1959_v26 = vpop.permute.xlu2 %1958 }
 0x2d7   : > { %2437 = vst.msk [vmem:[#allocation2 + $0x98] sm:$0xff] %vm630_vm5, %v2421_v12 }
 0x2d8   : > { %978 = vst.msk [vmem:[#allocation2 + $0x60] sm:$0xff] %vm974_vm13, %v960_v18 }
 0x2da   : > { %v2761_v27 = vld [vmem:[#allocation2 + $0x68] sm:$0xff] }
 0x2db   : > { %1876 = vrot.lane.b32.xlu1 %v7458_v62, %s10763_s20  ;;  %1260 = vrot.lane.b32.xlu0 %v7373_v5, %s10762_s26 }
 0x2dc   : > { %2903 = vmatmul.f32.gmra.mxu1 %v2761_v27  ;;  %2464 = vrot.lane.b32.xlu2 %v7529_v55, %s10762_s26 }
 0x2dd   : > { %v2463_v28 = vpop.permute.xlu1 %2462  ;;  %v1875_v29 = vpop.permute.xlu0 %1874 }
 0x2de   : > { %2479 = vst.msk [vmem:[#allocation2 + $0x98] sm:$0xff] %vm10743_vm6, %v2463_v28  ;;  %v1046_v30 = vpop.permute.xlu2 %1045 }
 0x2df   : > { %1891 = vst.msk [vmem:[#allocation2 + $0x90] sm:$0xff] %vm759_vm8, %v1875_v29 }
 0x2e0   : > { %2521 = vst.msk [vmem:[#allocation2 + $0x98] sm:$0xff] %vm716_vm7, %v2505_v21 }
 0x2e3   : > { %1302 = vrot.lane.b32.xlu1 %v7373_v5, %s10762_s26  ;;  %961 = vrot.lane.b32.xlu0 %v7614_v24, %s10764_s30 }
 0x2e4   : > { %1918 = vrot.lane.b32.xlu2 %v7458_v62, %s10763_s20 }
 0x2e5   : > { %v1917_v31 = vpop.permute.xlu1 %1916  ;;  %v1301_v32 = vpop.permute.xlu0 %1300 }
 0x2e6   : > { %1933 = vst.msk [vmem:[#allocation2 + $0x90] sm:$0xff] %vm802_vm9, %v1917_v31  ;;  %v2255_v33 = vpop.permute.xlu2 %2254 }
 0x2e7   : > { %1317 = vst.msk [vmem:[#allocation2 + $0x88] sm:$0xff] %vm630_vm5, %v1301_v32 }
 0x2e8   : > { %1975 = vst.msk [vmem:[#allocation2 + $0x90] sm:$0xff] %vm845_vm10, %v1959_v26 }
 0x2eb   : > { %1004 = vrot.lane.b32.xlu1 %v7614_v24, %s10764_s30  ;;  %2506 = vrot.lane.b32.xlu0 %v7529_v55, %s10762_s26 }
 0x2ec   : > { %1344 = vrot.lane.b32.xlu2 %v7373_v5, %s10762_s26 }
 0x2ed   : > { %v1343_v34 = vpop.permute.xlu1 %1342  ;;  %v1003_v35 = vpop.permute.xlu0 %1002 }
 0x2ee   : > { %1359 = vst.msk [vmem:[#allocation2 + $0x88] sm:$0xff] %vm10743_vm6, %v1343_v34  ;;  %v1427_v36 = vpop.permute.xlu2 %1426 }
 0x2ef   : > { %1021 = vst.msk [vmem:[#allocation2 + $0x60] sm:$0xff] %vm1017_vm14, %v1003_v35 }
 0x2f0   : > { %1064 = vst.msk [vmem:[#allocation2 + $0x60] sm:$0xff] %vm1060_vm15, %v1046_v30 }
 0x2f3   : > { %2214 = vrot.lane.b32.xlu1 %v7611_v22, %s10764_s30  ;;  %1960 = vrot.lane.b32.xlu0 %v7458_v62, %s10763_s20 }
 0x2f4   : > { %2548 = vrot.lane.b32.xlu2 %v7458_v62, %s10762_s26 }
 0x2f5   : > { %v2547_v37 = vpop.permute.xlu1 %2546  ;;  %v2213_v8 = vpop.permute.xlu0 %2212 }
 0x2f6   : > { %2563 = vst.msk [vmem:[#allocation2 + $0x98] sm:$0xff] %vm759_vm8, %v2547_v37  ;;  %v2297_v39 = vpop.permute.xlu2 %2296 }
 0x2f7   : > { %2228 = vst.msk [vmem:[#allocation2 + $0xb8] sm:$0xff] %vm499_vm0, %v2213_v8  ;;  %v2760_v38 = vld [vmem:[#allocation2 + $0x60] sm:$0xff]  ;;  %v816_v8 = vld [vmem:[%s6475_s25 + $0x30] sm:$0xff] }
 0x2f8   : > { %2865 = vmatmul.f32.gmra.mxu0 %v2760_v38  ;;  %2270 = vst.msk [vmem:[#allocation2 + $0xb8] sm:$0xff] %vm10742_vm1, %v2255_v33 }
 0x2f9   : > { %2312 = vst.msk [vmem:[#allocation2 + $0xb8] sm:$0xff] %vm529_vm2, %v2297_v39 }
 0x2fb   : > { %1386 = vrot.lane.b32.xlu1 %v7373_v5, %s10762_s26  ;;  %1047 = vrot.lane.b32.xlu0 %v7614_v24, %s10764_s30 }
 0x2fc   : > { %2002 = vrot.lane.b32.xlu2 %v7458_v62, %s10763_s20 }
 0x2fd   : > { %v2001_v40 = vpop.permute.xlu1 %2000  ;;  %v1385_v41 = vpop.permute.xlu0 %1384 }
 0x2fe   : > { %2017 = vst.msk [vmem:[#allocation2 + $0x90] sm:$0xff] %vm888_vm11, %v2001_v40  ;;  %v1135_v42 = vpop.permute.xlu2 %1134 }
 0x2ff   : > { %1401 = vst.msk [vmem:[#allocation2 + $0x88] sm:$0xff] %vm716_vm7, %v1385_v41 }
 0x300   : > { %1443 = vst.msk [vmem:[#allocation2 + $0x88] sm:$0xff] %vm759_vm8, %v1427_v36 }
 0x303   : > { %2590 = vrot.lane.b32.xlu1 %v7458_v62, %s10762_s26  ;;  %2256 = vrot.lane.b32.xlu0 %v7611_v22, %s10764_s30 }
 0x304   : > { %1094 = vrot.lane.b32.xlu2 %v7458_v62, %s10764_s30 }
 0x305   : > { %v1093_v44 = vpop.permute.xlu1 %1092  ;;  %v2589_v45 = vpop.permute.xlu0 %2588 }
 0x306   : > { %1108 = vst.msk [vmem:[#allocation2 + $0xa8] sm:$0xff] %vm499_vm0, %v1093_v44  ;;  %v2085_v46 = vpop.permute.xlu2 %2084 }
 0x307   : > { %2605 = vst.msk [vmem:[#allocation2 + $0x98] sm:$0xff] %vm802_vm9, %v2589_v45 }
 0x308   : > { %1150 = vst.msk [vmem:[#allocation2 + $0xa8] sm:$0xff] %vm10742_vm1, %v1135_v42 }
 0x30b   : > { %1710 = vrot.lane.b32.xlu1 %v7684_v0, %s10763_s20  ;;  %1428 = vrot.lane.b32.xlu0 %v7302_v16, %s10762_s26 }
 0x30c   : > { %2044 = vrot.lane.b32.xlu2 %v7529_v55, %s10764_s30 }
 0x30d   : > { %v2043_v43 = vpop.permute.xlu1 %2042  ;;  %v1709_v47 = vpop.permute.xlu0 %1708 }
 0x30e   : > { %2059 = vst.msk [vmem:[#allocation2 + $0x90] sm:$0xff] %vm931_vm12, %v2043_v43  ;;  %v833_v11 = vpop.permute.xlu2 %832 }
 0x30f   : > { %1724 = vst.msk [vmem:[#allocation2 + $0xb0] sm:$0xff] %vm587_vm4, %v1709_v47 }
 0x310   : > { %2101 = vst.msk [vmem:[#allocation2 + $0x90] sm:$0xff] %vm974_vm13, %v2085_v46 }
 0x313   : > { %2632 = vrot.lane.b32.xlu1 %v7458_v62, %s10762_s26  ;;  %2298 = vrot.lane.b32.xlu0 %v7611_v22, %s10764_s30 }
 0x314   : > { %791 = vrot.lane.b32.xlu2 %v815_v49, %s10763_s20 }
 0x315   : > { %v790_v50 = vpop.permute.xlu1 %789  ;;  %v2631_v51 = vpop.permute.xlu0 %2630 }
 0x316   : > { %807 = vst.msk [vmem:[#allocation2 + $0x80] sm:$0xff] %vm802_vm9, %v790_v50  ;;  %v1793_v52 = vpop.permute.xlu2 %1792 }
 0x317   : > { %2647 = vst.msk [vmem:[#allocation2 + $0x98] sm:$0xff] %vm845_vm10, %v2631_v51 }
 0x318   : > { %850 = vst.msk [vmem:[#allocation2 + $0x80] sm:$0xff] %vm845_vm10, %v833_v11 }
 0x31b   : > { %1470 = vrot.lane.b32.xlu1 %v7302_v16, %s10762_s26  ;;  %1136 = vrot.lane.b32.xlu0 %v7458_v62, %s10764_s30 }
 0x31c   : > { %1752 = vrot.lane.b32.xlu2 %v7684_v0, %s10763_s20 }
 0x31d   : > { %v1751_v53 = vpop.permute.xlu1 %1750  ;;  %v1469_v54 = vpop.permute.xlu0 %1468 }
 0x31e   : > { %1766 = vst.msk [vmem:[#allocation2 + $0xb0] sm:$0xff] %vm630_vm5, %v1751_v53  ;;  %v876_v10 = vpop.permute.xlu2 %875 }
 0x31f   : > { %1485 = vst.msk [vmem:[#allocation2 + $0x88] sm:$0xff] %vm802_vm9, %v1469_v54 }
 0x320   : > { %1808 = vst.msk [vmem:[#allocation2 + $0xb0] sm:$0xff] %vm10743_vm6, %v1793_v52 }
 0x321   : > { %893 = vst.msk [vmem:[#allocation2 + $0x80] sm:$0xff] %vm888_vm11, %v876_v10 }
 0x323   : > { %2340 = vrot.lane.b32.xlu1 %v7611_v22, %s10764_s30  ;;  %2086 = vrot.lane.b32.xlu0 %v7529_v55, %s10764_s30 }
 0x324   : > { %2674 = vrot.lane.b32.xlu2 %v7458_v62, %s10762_s26 }
 0x325   : > { %v2673_v16 = vpop.permute.xlu1 %2672  ;;  %v2339_v56 = vpop.permute.xlu0 %2338 }
 0x326   : > { %2689 = vst.msk [vmem:[#allocation2 + $0x98] sm:$0xff] %vm888_vm11, %v2673_v16  ;;  %v1835_v57 = vpop.permute.xlu2 %1834 }
 0x327   : > { %2703 = vst.msk [vmem:[#allocation2 + $0x98] sm:$0xff] %vm931_vm12, %v7373_v5 }
 0x328   : > { %2717 = vst.msk [vmem:[#allocation2 + $0x98] sm:$0xff] %vm974_vm13, %v7373_v5 }
 0x329   : > { %2731 = vst.msk [vmem:[#allocation2 + $0x98] sm:$0xff] %vm1017_vm14, %v7373_v5 }
 0x32a   : > { %2745 = vst.msk [vmem:[#allocation2 + $0x98] sm:$0xff] %vm1060_vm15, %v7373_v5 }
 0x32b   : > { %2354 = vst.msk [vmem:[#allocation2 + $0xb8] sm:$0xff] %vm544_vm3, %v2339_v56  ;;  %1178 = vrot.lane.b32.xlu1 %v7458_v62, %s10764_s30  ;;  %834 = vrot.lane.b32.xlu0 %v815_v49, %s10763_s20 }
 0x32c   : > { %1850 = vst.msk [vmem:[#allocation2 + $0xb0] sm:$0xff] %vm716_vm7, %v1835_v57  ;;  %1512 = vrot.lane.b32.xlu2 %v815_v49, %s10762_s26 }
 0x32d   : > { %v1511_v58 = vpop.permute.xlu1 %1510  ;;  %v1177_v60 = vpop.permute.xlu0 %1176 }
 0x32e   : > { %1527 = vst.msk [vmem:[#allocation2 + $0x88] sm:$0xff] %vm845_vm10, %v1511_v58  ;;  %v919_v61 = vpop.permute.xlu2 %918 }
 0x32f   : > { %1192 = vst.msk [vmem:[#allocation2 + $0xa8] sm:$0xff] %vm529_vm2, %v1177_v60 }
 0x330   : > { %936 = vst.msk [vmem:[#allocation2 + $0x80] sm:$0xff] %vm931_vm12, %v919_v61  ;;  %v5911_v61 = vld [vmem:[%s10761_s1 + $0x378] sm:$0xff] }
 0x331   : > { %v7792_v19 = vld [vmem:[#allocation2 + $0x98] sm:$0xff]  ;;  %3133 = vmatpush.msrb.mxu2 %v5911_v61  ;;  %v5886_v61 = vld [vmem:[%s10761_s1 + $0x2b0] sm:$0xff] }
 0x332   : > { %2982 = vmatmul.f32.gmra.mxu3 %v7792_v19 }
 0x333   : > { %2128 = vrot.lane.b32.xlu1 %v7529_v55, %s10764_s30  ;;  %1794 = vrot.lane.b32.xlu0 %v7684_v0, %s10763_s20 }
 0x334   : > { %2382 = vrot.lane.b32.xlu2 %v7684_v0, %s10762_s26 }
 0x335   : > { %v2381_v5 = vpop.permute.xlu1 %2380  ;;  %v2127_v59 = vpop.permute.xlu0 %2126 }
 0x336   : > { %2396 = vst.msk [vmem:[#allocation2 + $0xb8] sm:$0xff] %vm587_vm4, %v2381_v5  ;;  %v2465_v4 = vpop.permute.xlu2 %2464 }
 0x337   : > { %2143 = vst.msk [vmem:[#allocation2 + $0x90] sm:$0xff] %vm1017_vm14, %v2127_v59 }
 0x33b   : > { %1220 = vrot.lane.b32.xlu1 %v7458_v62, %s10764_s30  ;;  %877 = vrot.lane.b32.xlu0 %v815_v49, %s10763_s20 }
 0x33c   : > { %1554 = vrot.lane.b32.xlu2 %v815_v49, %s10762_s26 }
 0x33d   : > { %v1553_v3 = vpop.permute.xlu1 %1552  ;;  %v1219_v63 = vpop.permute.xlu0 %1218 }
 0x33e   : > { %1569 = vst.msk [vmem:[#allocation2 + $0x88] sm:$0xff] %vm888_vm11, %v1553_v3  ;;  %v1919_v48 = vpop.permute.xlu2 %1918 }
 0x33f   : > { %1583 = vst.msk [vmem:[#allocation2 + $0x88] sm:$0xff] %vm931_vm12, %v7614_v24 }
 0x340   : > { %1597 = vst.msk [vmem:[#allocation2 + $0x88] sm:$0xff] %vm974_vm13, %v7614_v24 }
 0x341   : > { %1611 = vst.msk [vmem:[#allocation2 + $0x88] sm:$0xff] %vm1017_vm14, %v7614_v24 }
 0x342   : > { %1625 = vst.msk [vmem:[#allocation2 + $0x88] sm:$0xff] %vm1060_vm15, %v7614_v24 }
 0x343   : > { %1234 = vst.msk [vmem:[#allocation2 + $0xa8] sm:$0xff] %vm544_vm3, %v1219_v63  ;;  %2170 = vrot.lane.b32.xlu1 %v7529_v55, %s10764_s30  ;;  %1836 = vrot.lane.b32.xlu0 %v7684_v0, %s10763_s20  ;;  %v5927_v63 = vld [vmem:[%s10761_s1 + $0x3f8] sm:$0xff] }
 0x344   : > { %2424 = vrot.lane.b32.xlu2 %v7684_v0, %s10762_s26  ;;  %3171 = vmatpush.msrb.mxu3 %v5927_v63  ;;  %v5885_v63 = vld [vmem:[%s10761_s1 + $0x2a8] sm:$0xff] }
 0x345   : > { %v2423_v2 = vpop.permute.xlu1 %2422  ;;  %v2169_v6 = vpop.permute.xlu0 %2168 }
 0x346   : > { %2438 = vst.msk [vmem:[#allocation2 + $0xb8] sm:$0xff] %vm630_vm5, %v2423_v2  ;;  %v1345_v7 = vpop.permute.xlu2 %1344  ;;  %v5895_v2 = vld [vmem:[%s10761_s1 + $0x2f8] sm:$0xff] }
 0x347   : > { %2185 = vst.msk [vmem:[#allocation2 + $0x90] sm:$0xff] %vm1060_vm15, %v2169_v6  ;;  %v5910_v6 = vld [vmem:[%s10761_s1 + $0x370] sm:$0xff]  ;;  %3095 = vmatpush.msrb.mxu1 %v5895_v2  ;;  %v5916_v2 = vld [vmem:[%s10761_s1 + $0x3a0] sm:$0xff] }
 0x348   : > { %2480 = vst.msk [vmem:[#allocation2 + $0xb8] sm:$0xff] %vm10743_vm6, %v2465_v4  ;;  %3134 = vmatpush.msrb.mxu2 %v5910_v6 }
 0x349   : > { %v7796_v21 = vld [vmem:[#allocation2 + $0x88] sm:$0xff] }
 0x34a   : > { %2906 = vmatmul.f32.gmra.mxu1 %v7796_v21 }
 0x34b   : > { %1262 = vrot.lane.b32.xlu1 %v7529_v55, %s10762_s26  ;;  %920 = vrot.lane.b32.xlu0 %v7770_v9, %s10764_s30 }
 0x34c   : > { %1878 = vrot.lane.b32.xlu2 %v7611_v22, %s10763_s20 }
 0x34d   : > { %v1877_v13 = vpop.permute.xlu1 %1876  ;;  %v1261_v14 = vpop.permute.xlu0 %1260 }
 0x34e   : > { %1892 = vst.msk [vmem:[#allocation2 + $0xb0] sm:$0xff] %vm759_vm8, %v1877_v13  ;;  %v7780_v23 = vld [vmem:[#allocation2 + $0x90] sm:$0xff]  ;;  %v2549_v15 = vpop.permute.xlu2 %2548  ;;  %v5878_v13 = vld [vmem:[%s10761_s1 + $0x270] sm:$0xff] }
 0x34f   : > { %1276 = vst.msk [vmem:[#allocation2 + $0xa8] sm:$0xff] %vm587_vm4, %v1261_v14  ;;  %2944 = vmatmul.f32.gmra.mxu2 %v7780_v23  ;;  %v5894_v14 = vld [vmem:[%s10761_s1 + $0x2f0] sm:$0xff] }
 0x350   : > { %1934 = vst.msk [vmem:[#allocation2 + $0xb0] sm:$0xff] %vm802_vm9, %v1919_v48  ;;  %v5879_v48 = vld [vmem:[%s10761_s1 + $0x278] sm:$0xff]  ;;  %3096 = vmatpush.msrb.mxu1 %v5894_v14  ;;  %v5884_v14 = vld [vmem:[%s10761_s1 + $0x2a0] sm:$0xff] }
 0x351   : > { %3057 = vmatpush.msrb.mxu0 %v5879_v48  ;;  %v5900_v48 = vld [vmem:[%s10761_s1 + $0x320] sm:$0xff] }
 0x353   : > { %963 = vrot.lane.b32.xlu1 %v7770_v9, %s10764_s30  ;;  %2466 = vrot.lane.b32.xlu0 %v7684_v0, %s10762_s26 }
 0x354   : > { %1304 = vrot.lane.b32.xlu2 %v7529_v55, %s10762_s26  ;;  %3058 = vmatpush.msrb.mxu0 %v5878_v13  ;;  %v5868_v13 = vld [vmem:[%s10761_s1 + $0x220] sm:$0xff] }
 0x355   : > { %v1303_v17 = vpop.permute.xlu1 %1302  ;;  %v962_v18 = vpop.permute.xlu0 %961 }
 0x356   : > { %1318 = vst.msk [vmem:[#allocation2 + $0xa8] sm:$0xff] %vm630_vm5, %v1303_v17  ;;  %v2003_v20 = vpop.permute.xlu2 %2002 }
 0x357   : > { %979 = vst.msk [vmem:[#allocation2 + $0x80] sm:$0xff] %vm974_vm13, %v962_v18 }
 0x358   : > { %1360 = vst.msk [vmem:[#allocation2 + $0xa8] sm:$0xff] %vm10743_vm6, %v1345_v7  ;;  %v5926_v7 = vld [vmem:[%s10761_s1 + $0x3f0] sm:$0xff] }
 0x359   : > { %3172 = vmatpush.msrb.mxu3 %v5926_v7 }
 0x35b   : > { %2508 = vrot.lane.b32.xlu1 %v7684_v0, %s10762_s26  ;;  %1920 = vrot.lane.b32.xlu0 %v7611_v22, %s10763_s20 }
 0x35c   : > { %1006 = vrot.lane.b32.xlu2 %v7770_v9, %s10764_s30 }
 0x35d   : > { %v1005_v24 = vpop.permute.xlu1 %1004  ;;  %v2507_v1 = vpop.permute.xlu0 %2506 }
 0x35e   : > { %1022 = vst.msk [vmem:[#allocation2 + $0x80] sm:$0xff] %vm1017_vm14, %v1005_v24  ;;  %v1095_v25 = vpop.permute.xlu2 %1094  ;;  %v5877_v24 = vld [vmem:[%s10761_s1 + $0x268] sm:$0xff] }
 0x35f   : > { %2522 = vst.msk [vmem:[#allocation2 + $0xb8] sm:$0xff] %vm716_vm7, %v2507_v1  ;;  %v5893_v1 = vld [vmem:[%s10761_s1 + $0x2e8] sm:$0xff]  ;;  %3059 = vmatpush.msrb.mxu0 %v5877_v24 }
 0x360   : > { %2564 = vst.msk [vmem:[#allocation2 + $0xb8] sm:$0xff] %vm759_vm8, %v2549_v15  ;;  %v5925_v15 = vld [vmem:[%s10761_s1 + $0x3e8] sm:$0xff]  ;;  %3097 = vmatpush.msrb.mxu1 %v5893_v1  ;;  %v5914_v1 = vld [vmem:[%s10761_s1 + $0x390] sm:$0xff] }
 0x361   : > { %1109 = vst.msk [vmem:[#allocation2 + $0xc8] sm:$0xff] %vm499_vm0, %v1095_v25  ;;  %3173 = vmatpush.msrb.mxu3 %v5925_v15  ;;  %v5908_v25 = vld [vmem:[%s10761_s1 + $0x360] sm:$0xff]  ;;  %v5915_v15 = vld [vmem:[%s10761_s1 + $0x398] sm:$0xff]  ;;  %v5897_v24 = vld [vmem:[%s10761_s1 + $0x308] sm:$0xff] }
 0x363   : > { %1962 = vrot.lane.b32.xlu1 %v7611_v22, %s10763_s20  ;;  %1346 = vrot.lane.b32.xlu0 %v7529_v55, %s10762_s26 }
 0x364   : > { %2550 = vrot.lane.b32.xlu2 %v7611_v22, %s10762_s26 }
 0x365   : > { %v2215_v12 = vpop.permute.xlu1 %2214  ;;  %v1961_v26 = vpop.permute.xlu0 %1960 }
 0x366   : > { %2229 = vst.msk [vmem:[#allocation2 + $0xd8] sm:$0xff] %vm499_vm0, %v2215_v12  ;;  %v2045_v27 = vpop.permute.xlu2 %2044  ;;  %v5924_v12 = vld [vmem:[%s10761_s1 + $0x3e0] sm:$0xff] }
 0x367   : > { %1976 = vst.msk [vmem:[#allocation2 + $0xb0] sm:$0xff] %vm845_vm10, %v1961_v26  ;;  %v5907_v26 = vld [vmem:[%s10761_s1 + $0x358] sm:$0xff]  ;;  %3174 = vmatpush.msrb.mxu3 %v5924_v12  ;;  %v5866_v12 = vld [vmem:[%s10761_s1 + $0x210] sm:$0xff] }
 0x368   : > { %2018 = vst.msk [vmem:[#allocation2 + $0xb0] sm:$0xff] %vm888_vm11, %v2003_v20 }
 0x369   : > { %2060 = vst.msk [vmem:[#allocation2 + $0xb0] sm:$0xff] %vm931_vm12, %v2045_v27 }
 0x36b   : > { %1388 = vrot.lane.b32.xlu1 %v7529_v55, %s10762_s26  ;;  %1049 = vrot.lane.b32.xlu0 %v7770_v9, %s10764_s30 }
 0x36c   : > { %2004 = vrot.lane.b32.xlu2 %v7611_v22, %s10763_s20 }
 0x36d   : > { %v1387_v28 = vpop.permute.xlu1 %1386  ;;  %v1048_v29 = vpop.permute.xlu0 %1047 }
 0x36e   : > { %1402 = vst.msk [vmem:[#allocation2 + $0xa8] sm:$0xff] %vm716_vm7, %v1387_v28  ;;  %v792_v30 = vpop.permute.xlu2 %791  ;;  %v5876_v28 = vld [vmem:[%s10761_s1 + $0x260] sm:$0xff] }
 0x36f   : > { %1065 = vst.msk [vmem:[#allocation2 + $0x80] sm:$0xff] %vm1060_vm15, %v1048_v29  ;;  %v5892_v29 = vld [vmem:[%s10761_s1 + $0x2e0] sm:$0xff]  ;;  %3060 = vmatpush.msrb.mxu0 %v5876_v28 }
 0x370   : > { %808 = vst.msk [vmem:[#allocation2 + $0xa0] sm:$0xff] %vm802_vm9, %v792_v30  ;;  %v5923_v30 = vld [vmem:[%s10761_s1 + $0x3d8] sm:$0xff]  ;;  %3098 = vmatpush.msrb.mxu1 %v5892_v29  ;;  %v5913_v29 = vld [vmem:[%s10761_s1 + $0x388] sm:$0xff] }
 0x371   : > { %3175 = vmatpush.msrb.mxu3 %v5923_v30  ;;  %v5865_v30 = vld [vmem:[%s10761_s1 + $0x208] sm:$0xff] }
 0x373   : > { %1430 = vrot.lane.b32.xlu1 %v7458_v62, %s10762_s26  ;;  %2592 = vrot.lane.b32.xlu0 %v7611_v22, %s10762_s26 }
 0x374   : > { %2046 = vrot.lane.b32.xlu2 %v7684_v0, %s10764_s30 }
 0x375   : > { %v2591_v31 = vpop.permute.xlu1 %2590  ;;  %v2257_v32 = vpop.permute.xlu0 %2256 }
 0x376   : > { %2606 = vst.msk [vmem:[#allocation2 + $0xb8] sm:$0xff] %vm802_vm9, %v2591_v31  ;;  %v7836_v33 = vld [vmem:[#allocation2 + $0x80] sm:$0xff]  ;;  %v1753_v34 = vpop.permute.xlu2 %1752 }
 0x377   : > { %2271 = vst.msk [vmem:[#allocation2 + $0xd8] sm:$0xff] %vm10742_vm1, %v2257_v32  ;;  %2868 = vmatmul.f32.gmra.mxu0 %v7836_v33 }
 0x37b   : > { %793 = vrot.lane.b32.xlu1 %v7458_v62, %s10763_s20  ;;  %2634 = vrot.lane.b32.xlu0 %v7611_v22, %s10762_s26 }
 0x37c   : > { %1472 = vrot.lane.b32.xlu2 %v7458_v62, %s10762_s26 }
 0x37d   : > { %v1711_v35 = vpop.permute.xlu1 %1710  ;;  %v1429_v36 = vpop.permute.xlu0 %1428 }
 0x37e   : > { %1725 = vst.msk [vmem:[#allocation2 + $0xd0] sm:$0xff] %vm587_vm4, %v1711_v35  ;;  %v2675_v37 = vpop.permute.xlu2 %2674  ;;  %v5891_v35 = vld [vmem:[%s10761_s1 + $0x2d8] sm:$0xff] }
 0x37f   : > { %1444 = vst.msk [vmem:[#allocation2 + $0xa8] sm:$0xff] %vm759_vm8, %v1429_v36  ;;  %v5906_v36 = vld [vmem:[%s10761_s1 + $0x350] sm:$0xff]  ;;  %3099 = vmatpush.msrb.mxu1 %v5891_v35  ;;  %v5864_v35 = vld [vmem:[%s10761_s1 + $0x200] sm:$0xff] }
 0x380   : > { %1767 = vst.msk [vmem:[#allocation2 + $0xd0] sm:$0xff] %vm630_vm5, %v1753_v34  ;;  %v5875_v34 = vld [vmem:[%s10761_s1 + $0x258] sm:$0xff] }
 0x381   : > { %3061 = vmatpush.msrb.mxu0 %v5875_v34  ;;  %v5975_v34 = vld [vmem:[%s10761_s1 + $0x578] sm:$0xff] }
 0x383   : > { %2676 = vrot.lane.b32.xlu1 %v7611_v22, %s10762_s26  ;;  %2088 = vrot.lane.b32.xlu0 %v7684_v0, %s10764_s30 }
 0x384   : > { %836 = vrot.lane.b32.xlu2 %v816_v8, %s10763_s20 }
 0x385   : > { %v2633_v38 = vpop.permute.xlu1 %2632  ;;  %v2299_v39 = vpop.permute.xlu0 %2298 }
 0x386   : > { %2648 = vst.msk [vmem:[#allocation2 + $0xb8] sm:$0xff] %vm845_vm10, %v2633_v38  ;;  %v1513_v40 = vpop.permute.xlu2 %1512  ;;  %v5874_v38 = vld [vmem:[%s10761_s1 + $0x250] sm:$0xff] }
 0x387   : > { %2313 = vst.msk [vmem:[#allocation2 + $0xd8] sm:$0xff] %vm529_vm2, %v2299_v39  ;;  %3062 = vmatpush.msrb.mxu0 %v5874_v38 }
 0x388   : > { %2690 = vst.msk [vmem:[#allocation2 + $0xb8] sm:$0xff] %vm888_vm11, %v2675_v37  ;;  %v5922_v37 = vld [vmem:[%s10761_s1 + $0x3d0] sm:$0xff] }
 0x389   : > { %2704 = vst.msk [vmem:[#allocation2 + $0xb8] sm:$0xff] %vm931_vm12, %v7529_v55  ;;  %3176 = vmatpush.msrb.mxu3 %v5922_v37 }
 0x38a   : > { %2718 = vst.msk [vmem:[#allocation2 + $0xb8] sm:$0xff] %vm974_vm13, %v7529_v55 }
 0x38b   : > { %2130 = vrot.lane.b32.xlu1 %v7684_v0, %s10764_s30  ;;  %1514 = vrot.lane.b32.xlu0 %v7458_v62, %s10762_s26  ;;  %2732 = vst.msk [vmem:[#allocation2 + $0xb8] sm:$0xff] %vm1017_vm14, %v7529_v55 }
 0x38c   : > { %2746 = vst.msk [vmem:[#allocation2 + $0xb8] sm:$0xff] %vm1060_vm15, %v7529_v55  ;;  %879 = vrot.lane.b32.xlu2 %v816_v8, %s10763_s20  ;;  %v5905_v8 = vld [vmem:[%s10761_s1 + $0x348] sm:$0xff] }
 0x38d   : > { %v1471_v22 = vpop.permute.xlu1 %1470  ;;  %v1137_v41 = vpop.permute.xlu0 %1136 }
 0x38e   : > { %1486 = vst.msk [vmem:[#allocation2 + $0xa8] sm:$0xff] %vm802_vm9, %v1471_v22  ;;  %v2383_v42 = vpop.permute.xlu2 %2382  ;;  %v5921_v22 = vld [vmem:[%s10761_s1 + $0x3c8] sm:$0xff] }
 0x38f   : > { %1151 = vst.msk [vmem:[#allocation2 + $0xc8] sm:$0xff] %vm10742_vm1, %v1137_v41  ;;  %v5873_v41 = vld [vmem:[%s10761_s1 + $0x248] sm:$0xff]  ;;  %3177 = vmatpush.msrb.mxu3 %v5921_v22  ;;  %v5974_v22 = vld [vmem:[%s10761_s1 + $0x570] sm:$0xff] }
 0x390   : > { %1528 = vst.msk [vmem:[#allocation2 + $0xa8] sm:$0xff] %vm845_vm10, %v1513_v40  ;;  %v5890_v40 = vld [vmem:[%s10761_s1 + $0x2d0] sm:$0xff]  ;;  %3063 = vmatpush.msrb.mxu0 %v5873_v41 }
 0x391   : > { %3100 = vmatpush.msrb.mxu1 %v5890_v40  ;;  %v5959_v40 = vld [vmem:[%s10761_s1 + $0x4f8] sm:$0xff]  ;;  %v5990_v41 = vld [vmem:[%s10761_s1 + $0x5f0] sm:$0xff] }
 0x393   : > { %2172 = vrot.lane.b32.xlu1 %v7684_v0, %s10764_s30  ;;  %1556 = vrot.lane.b32.xlu0 %v7458_v62, %s10762_s26  ;;  %v7913_v60 = vld [vmem:[#allocation2 + $0xb8] sm:$0xff] }
 0x394   : > { %922 = vrot.lane.b32.xlu2 %v7529_v55, %s10764_s30  ;;  %2985 = vmatmul.f32.gmra.mxu3 %v7913_v60 }
 0x395   : > { %v2341_v44 = vpop.permute.xlu1 %2340  ;;  %v2087_v45 = vpop.permute.xlu0 %2086 }
 0x396   : > { %2355 = vst.msk [vmem:[#allocation2 + $0xd8] sm:$0xff] %vm544_vm3, %v2341_v44  ;;  %v1555_v46 = vpop.permute.xlu2 %1554  ;;  %v5889_v44 = vld [vmem:[%s10761_s1 + $0x2c8] sm:$0xff] }
 0x397   : > { %2102 = vst.msk [vmem:[#allocation2 + $0xb0] sm:$0xff] %vm974_vm13, %v2087_v45  ;;  %v5904_v45 = vld [vmem:[%s10761_s1 + $0x340] sm:$0xff]  ;;  %3101 = vmatpush.msrb.mxu1 %v5889_v44  ;;  %v5942_v44 = vld [vmem:[%s10761_s1 + $0x470] sm:$0xff] }
 0x398   : > { %2397 = vst.msk [vmem:[#allocation2 + $0xd8] sm:$0xff] %vm587_vm4, %v2383_v42 }
 0x399   : > { %1570 = vst.msk [vmem:[#allocation2 + $0xa8] sm:$0xff] %vm888_vm11, %v1555_v46 }
 0x39a   : > { %1584 = vst.msk [vmem:[#allocation2 + $0xa8] sm:$0xff] %vm931_vm12, %v7770_v9 }
 0x39b   : > { %965 = vrot.lane.b32.xlu0 %v7529_v55, %s10764_s30  ;;  %1008 = vrot.lane.b32.xlu1 %v7529_v55, %s10764_s30  ;;  %1598 = vst.msk [vmem:[#allocation2 + $0xa8] sm:$0xff] %vm974_vm13, %v7770_v9 }
 0x39c   : > { %1612 = vst.msk [vmem:[#allocation2 + $0xa8] sm:$0xff] %vm1017_vm14, %v7770_v9  ;;  %1051 = vrot.lane.b32.xlu2 %v7529_v55, %s10764_s30 }
 0x39d   : > { %v1179_v62 = vpop.permute.xlu1 %1178  ;;  %1626 = vst.msk [vmem:[#allocation2 + $0xa8] sm:$0xff] %vm1060_vm15, %v7770_v9  ;;  %v835_v43 = vpop.permute.xlu0 %834  ;;  %v5909_v9 = vld [vmem:[%s10761_s1 + $0x368] sm:$0xff] }
 0x39e   : > { %1193 = vst.msk [vmem:[#allocation2 + $0xc8] sm:$0xff] %vm529_vm2, %v1179_v62  ;;  %v2425_v47 = vpop.permute.xlu2 %2424  ;;  %3135 = vmatpush.msrb.mxu2 %v5909_v9  ;;  %v5920_v62 = vld [vmem:[%s10761_s1 + $0x3c0] sm:$0xff]  ;;  %v5899_v9 = vld [vmem:[%s10761_s1 + $0x318] sm:$0xff] }
 0x39f   : > { %851 = vst.msk [vmem:[#allocation2 + $0xa0] sm:$0xff] %vm845_vm10, %v835_v43  ;;  %v5872_v43 = vld [vmem:[%s10761_s1 + $0x240] sm:$0xff]  ;;  %3178 = vmatpush.msrb.mxu3 %v5920_v62 }
 0x3a0   : > { %2439 = vst.msk [vmem:[#allocation2 + $0xd8] sm:$0xff] %vm630_vm5, %v2425_v47  ;;  %3136 = vmatpush.msrb.mxu2 %v5908_v25  ;;  %v5903_v47 = vld [vmem:[%s10761_s1 + $0x338] sm:$0xff]  ;;  %3064 = vmatpush.msrb.mxu0 %v5872_v43  ;;  %v5896_v25 = vld [vmem:[%s10761_s1 + $0x300] sm:$0xff] }
 0x3a1   : > { %v1578_v43 = vld [vmem:[%s6475_s25 + $0x31] sm:$0xff] }
 0x3a2   : > { %3137 = vmatpush.msrb.mxu2 %v5907_v26  ;;  %v5882_v26 = vld [vmem:[%s10761_s1 + $0x290] sm:$0xff] }
 0x3a4   : > { %v7922_v3 = vld [vmem:[#allocation2 + $0xa8] sm:$0xff]  ;;  %3138 = vmatpush.msrb.mxu2 %v5906_v36  ;;  %v5880_v36 = vld [vmem:[%s10761_s1 + $0x280] sm:$0xff] }
 0x3a5   : > { %v2129_v11 = vpop.permute.xlu1 %2128  ;;  %v1795_v49 = vpop.permute.xlu0 %1794  ;;  %2909 = vmatmul.f32.gmra.mxu1 %v7922_v3 }
 0x3a6   : > { %2144 = vst.msk [vmem:[#allocation2 + $0xb0] sm:$0xff] %vm1017_vm14, %v2129_v11  ;;  %v1879_v50 = vpop.permute.xlu2 %1878  ;;  %3139 = vmatpush.msrb.mxu2 %v5905_v8  ;;  %v5888_v11 = vld [vmem:[%s10761_s1 + $0x2c0] sm:$0xff]  ;;  %v5991_v8 = vld [vmem:[%s10761_s1 + $0x5f8] sm:$0xff] }
 0x3a7   : > { %1809 = vst.msk [vmem:[#allocation2 + $0xd0] sm:$0xff] %vm10743_vm6, %v1795_v49  ;;  %v5919_v49 = vld [vmem:[%s10761_s1 + $0x3b8] sm:$0xff]  ;;  %3102 = vmatpush.msrb.mxu1 %v5888_v11  ;;  %v5941_v11 = vld [vmem:[%s10761_s1 + $0x468] sm:$0xff] }
 0x3a8   : > { %3140 = vmatpush.msrb.mxu2 %v5904_v45  ;;  %3179 = vmatpush.msrb.mxu3 %v5919_v49  ;;  %v5958_v45 = vld [vmem:[%s10761_s1 + $0x4f0] sm:$0xff]  ;;  %v5957_v49 = vld [vmem:[%s10761_s1 + $0x4e8] sm:$0xff] }
 0x3aa   : > { %3141 = vmatpush.msrb.mxu2 %v5903_v47 }
 0x3ad   : > { %v1221_v51 = vpop.permute.xlu1 %1220  ;;  %v878_v52 = vpop.permute.xlu0 %877 }
 0x3ae   : > { %1235 = vst.msk [vmem:[#allocation2 + $0xc8] sm:$0xff] %vm544_vm3, %v1221_v51  ;;  %v1305_v55 = vpop.permute.xlu2 %1304  ;;  %v5887_v51 = vld [vmem:[%s10761_s1 + $0x2b8] sm:$0xff] }
 0x3af   : > { %894 = vst.msk [vmem:[#allocation2 + $0xa0] sm:$0xff] %vm888_vm11, %v878_v52  ;;  %v5902_v52 = vld [vmem:[%s10761_s1 + $0x330] sm:$0xff]  ;;  %3103 = vmatpush.msrb.mxu1 %v5887_v51  ;;  %v5988_v51 = vld [vmem:[%s10761_s1 + $0x5e0] sm:$0xff] }
 0x3b0   : > { %3142 = vmatpush.msrb.mxu2 %v5902_v52  ;;  %v5971_v52 = vld [vmem:[%s10761_s1 + $0x558] sm:$0xff] }
 0x3b1   : > { %3104 = vmatpush.msrb.mxu1 %v5886_v61 }
 0x3b3   : > { %3105 = vmatpush.msrb.mxu1 %v5885_v63  ;;  %v5970_v63 = vld [vmem:[%s10761_s1 + $0x550] sm:$0xff] }
 0x3b5   : > { %v2171_v53 = vpop.permute.xlu1 %2170  ;;  %v1837_v54 = vpop.permute.xlu0 %1836  ;;  %3106 = vmatpush.msrb.mxu1 %v5884_v14  ;;  %v5985_v14 = vld [vmem:[%s10761_s1 + $0x5c8] sm:$0xff] }
 0x3b6   : > { %2186 = vst.msk [vmem:[#allocation2 + $0xb0] sm:$0xff] %vm1060_vm15, %v2171_v53  ;;  %v1007_v10 = vpop.permute.xlu2 %1006 }
 0x3b7   : > { %1851 = vst.msk [vmem:[#allocation2 + $0xd0] sm:$0xff] %vm716_vm7, %v1837_v54 }
 0x3b8   : > { %1893 = vst.msk [vmem:[#allocation2 + $0xd0] sm:$0xff] %vm759_vm8, %v1879_v50  ;;  %v5871_v50 = vld [vmem:[%s10761_s1 + $0x238] sm:$0xff] }
 0x3b9   : > { %3065 = vmatpush.msrb.mxu0 %v5871_v50  ;;  %v5972_v50 = vld [vmem:[%s10761_s1 + $0x560] sm:$0xff] }
 0x3bd   : > { %v1263_v16 = vpop.permute.xlu1 %1262  ;;  %v7908_v56 = vld [vmem:[#allocation2 + $0xb0] sm:$0xff]  ;;  %v921_v57 = vpop.permute.xlu0 %920 }
 0x3be   : > { %1277 = vst.msk [vmem:[#allocation2 + $0xc8] sm:$0xff] %vm587_vm4, %v1263_v16  ;;  %2947 = vmatmul.f32.gmra.mxu2 %v7908_v56  ;;  %v2551_v58 = vpop.permute.xlu2 %2550  ;;  %v5918_v16 = vld [vmem:[%s10761_s1 + $0x3b0] sm:$0xff] }
 0x3bf   : > { %937 = vst.msk [vmem:[#allocation2 + $0xa0] sm:$0xff] %vm931_vm12, %v921_v57  ;;  %v5901_v57 = vld [vmem:[%s10761_s1 + $0x328] sm:$0xff]  ;;  %3180 = vmatpush.msrb.mxu3 %v5918_v16  ;;  %v5987_v16 = vld [vmem:[%s10761_s1 + $0x5d8] sm:$0xff] }
 0x3c0   : > { %1319 = vst.msk [vmem:[#allocation2 + $0xc8] sm:$0xff] %vm630_vm5, %v1305_v55  ;;  %3143 = vmatpush.msrb.mxu2 %v5901_v57 }
 0x3c2   : > { %3144 = vmatpush.msrb.mxu2 %v5900_v48  ;;  %v5986_v48 = vld [vmem:[%s10761_s1 + $0x5d0] sm:$0xff] }
 0x3c4   : > { %3145 = vmatpush.msrb.mxu2 %v5899_v9  ;;  %v8240_v9 = vld [vmem:[#allocation2 + $0x38] sm:$0xff] }
 0x3c5   : > { %v964_v5 = vpop.permute.xlu1 %963  ;;  %v2467_v59 = vpop.permute.xlu0 %2466 }
 0x3c6   : > { %980 = vst.msk [vmem:[#allocation2 + $0xa0] sm:$0xff] %vm974_vm13, %v964_v5  ;;  %v2005_v4 = vpop.permute.xlu2 %2004  ;;  %v5917_v5 = vld [vmem:[%s10761_s1 + $0x3a8] sm:$0xff] }
 0x3c7   : > { %2481 = vst.msk [vmem:[#allocation2 + $0xd8] sm:$0xff] %vm10743_vm6, %v2467_v59  ;;  %v5869_v59 = vld [vmem:[%s10761_s1 + $0x228] sm:$0xff]  ;;  %3181 = vmatpush.msrb.mxu3 %v5917_v5 }
 0x3c8   : > { %1023 = vst.msk [vmem:[#allocation2 + $0xa0] sm:$0xff] %vm1017_vm14, %v1007_v10 }
 0x3c9   : > { %3182 = vmatpush.msrb.mxu3 %v5916_v2  ;;  %v5969_v2 = vld [vmem:[%s10761_s1 + $0x548] sm:$0xff] }
 0x3cb   : > { %3183 = vmatpush.msrb.mxu3 %v5915_v15  ;;  %v5937_v15 = vld [vmem:[%s10761_s1 + $0x448] sm:$0xff] }
 0x3cd   : > { %v2509_v17 = vpop.permute.xlu1 %2508  ;;  %v1921_v18 = vpop.permute.xlu0 %1920  ;;  %3184 = vmatpush.msrb.mxu3 %v5914_v1 }
 0x3ce   : > { %2523 = vst.msk [vmem:[#allocation2 + $0xd8] sm:$0xff] %vm716_vm7, %v2509_v17  ;;  %v2047_v20 = vpop.permute.xlu2 %2046  ;;  %v5898_v17 = vld [vmem:[%s10761_s1 + $0x310] sm:$0xff] }
 0x3cf   : > { %1935 = vst.msk [vmem:[#allocation2 + $0xd0] sm:$0xff] %vm802_vm9, %v1921_v18  ;;  %v5867_v18 = vld [vmem:[%s10761_s1 + $0x218] sm:$0xff]  ;;  %3146 = vmatpush.msrb.mxu2 %v5898_v17  ;;  %3185 = vmatpush.msrb.mxu3 %v5913_v29  ;;  %v5968_v17 = vld [vmem:[%s10761_s1 + $0x540] sm:$0xff] }
 0x3d0   : > { %2565 = vst.msk [vmem:[#allocation2 + $0xd8] sm:$0xff] %vm759_vm8, %v2551_v58  ;;  %v5870_v58 = vld [vmem:[%s10761_s1 + $0x230] sm:$0xff]  ;;  %v5935_v29 = vld [vmem:[%s10761_s1 + $0x438] sm:$0xff] }
 0x3d1   : > { %3066 = vmatpush.msrb.mxu0 %v5870_v58  ;;  %3147 = vmatpush.msrb.mxu2 %v5897_v24  ;;  %v5984_v24 = vld [vmem:[%s10761_s1 + $0x5c0] sm:$0xff] }
 0x3d3   : > { %3067 = vmatpush.msrb.mxu0 %v5869_v59  ;;  %3148 = vmatpush.msrb.mxu2 %v5896_v25  ;;  %v5939_v59 = vld [vmem:[%s10761_s1 + $0x458] sm:$0xff] }
 0x3d4   : > { %v5967_v25 = vld [vmem:[%s10761_s1 + $0x538] sm:$0xff] }
 0x3d5   : > { %v1963_v27 = vpop.permute.xlu1 %1962  ;;  %v1347_v31 = vpop.permute.xlu0 %1346  ;;  %3068 = vmatpush.msrb.mxu0 %v5868_v13  ;;  %3357 = vmatpush.msra.mxu2 %v5975_v34  ;;  %v5954_v13 = vld [vmem:[%s10761_s1 + $0x4d0] sm:$0xff]  ;;  %v8295_v34 = vld [vmem:[#allocation2 + $0x30] sm:$0xff] }
 0x3d6   : > { %1977 = vst.msk [vmem:[#allocation2 + $0xd0] sm:$0xff] %vm845_vm10, %v1963_v27  ;;  %v1473_v32 = vpop.permute.xlu2 %1472 }
 0x3d7   : > { %1361 = vst.msk [vmem:[#allocation2 + $0xc8] sm:$0xff] %vm10743_vm6, %v1347_v31  ;;  %3069 = vmatpush.msrb.mxu0 %v5867_v18  ;;  %v5881_v31 = vld [vmem:[%s10761_s1 + $0x288] sm:$0xff]  ;;  %3358 = vmatpush.msra.mxu2 %v5974_v22 }
 0x3d8   : > { %2019 = vst.msk [vmem:[#allocation2 + $0xd0] sm:$0xff] %vm888_vm11, %v2005_v4  ;;  %v5953_v18 = vld [vmem:[%s10761_s1 + $0x4c8] sm:$0xff] }
 0x3d9   : > { %2061 = vst.msk [vmem:[#allocation2 + $0xd0] sm:$0xff] %vm931_vm12, %v2047_v20  ;;  %v5883_v20 = vld [vmem:[%s10761_s1 + $0x298] sm:$0xff]  ;;  %3070 = vmatpush.msrb.mxu0 %v5866_v12  ;;  %v5936_v12 = vld [vmem:[%s10761_s1 + $0x440] sm:$0xff]  ;;  %v5933_v22 = vld [vmem:[%s10761_s1 + $0x428] sm:$0xff] }
 0x3da   : > { %3107 = vmatpush.msrb.mxu1 %v5883_v20  ;;  %v8259_v20 = vld [vmem:[#allocation2 + $0x10] sm:$0xff] }
 0x3db   : > { %3071 = vmatpush.msrb.mxu0 %v5865_v30  ;;  %v8286_v30 = vld [vmem:[#allocation2 + $0x8] sm:$0xff] }
 0x3dc   : > { %3108 = vmatpush.msrb.mxu1 %v5882_v26  ;;  %v5952_v26 = vld [vmem:[%s10761_s1 + $0x4c0] sm:$0xff] }
 0x3dd   : > { %v1389_v39 = vpop.permute.xlu1 %1388  ;;  %v1050_v42 = vpop.permute.xlu0 %1049  ;;  %3072 = vmatpush.msrb.mxu0 %v5864_v35  ;;  %v5982_v35 = vld [vmem:[%s10761_s1 + $0x5b0] sm:$0xff] }
 0x3de   : > { %1403 = vst.msk [vmem:[#allocation2 + $0xc8] sm:$0xff] %vm716_vm7, %v1389_v39  ;;  %v837_v46 = vpop.permute.xlu2 %836  ;;  %3109 = vmatpush.msrb.mxu1 %v5881_v31  ;;  %v5943_v39 = vld [vmem:[%s10761_s1 + $0x478] sm:$0xff] }
 0x3df   : > { %1066 = vst.msk [vmem:[#allocation2 + $0xa0] sm:$0xff] %vm1060_vm15, %v1050_v42  ;;  %3281 = vmatpush.msra.mxu0 %v5943_v39  ;;  %v5973_v42 = vld [vmem:[%s10761_s1 + $0x568] sm:$0xff]  ;;  %v5951_v31 = vld [vmem:[%s10761_s1 + $0x4b8] sm:$0xff] }
 0x3e0   : > { %3110 = vmatpush.msrb.mxu1 %v5880_v36  ;;  %3359 = vmatpush.msra.mxu2 %v5973_v42  ;;  %v5965_v36 = vld [vmem:[%s10761_s1 + $0x528] sm:$0xff]  ;;  %v8325_v42 = vld [vmem:[#allocation2 + $0x28] sm:$0xff] }
 0x3e1   : > { %3282 = vmatpush.msra.mxu0 %v5942_v44  ;;  %v5981_v39 = vld [vmem:[%s10761_s1 + $0x5a8] sm:$0xff] }
 0x3e2   : > { %3319 = vmatpush.msra.mxu1 %v5959_v40  ;;  %3360 = vmatpush.msra.mxu2 %v5972_v50  ;;  %v8316_v40 = vld [vmem:[#allocation2 + $0x78] sm:$0xff]  ;;  %v5949_v44 = vld [vmem:[%s10761_s1 + $0x4a8] sm:$0xff]  ;;  %v5962_v50 = vld [vmem:[%s10761_s1 + $0x510] sm:$0xff] }
 0x3e3   : > { %3283 = vmatpush.msra.mxu0 %v5941_v11  ;;  %v8346_v11 = vld [vmem:[#allocation2 + $0x20] sm:$0xff] }
 0x3e4   : > { %3320 = vmatpush.msra.mxu1 %v5958_v45  ;;  %3361 = vmatpush.msra.mxu2 %v5971_v52  ;;  %v5980_v45 = vld [vmem:[%s10761_s1 + $0x5a0] sm:$0xff]  ;;  %v5947_v52 = vld [vmem:[%s10761_s1 + $0x498] sm:$0xff] }
 0x3e5   : > { %v1431_v55 = vpop.permute.xlu1 %1430  ;;  %v2593_v53 = vpop.permute.xlu0 %2592 }
 0x3e6   : > { %1445 = vst.msk [vmem:[#allocation2 + $0xc8] sm:$0xff] %vm759_vm8, %v1431_v55  ;;  %v8044_v54 = vld [vmem:[#allocation2 + $0xa0] sm:$0xff]  ;;  %v880_v10 = vpop.permute.xlu2 %879  ;;  %3321 = vmatpush.msra.mxu1 %v5957_v49  ;;  %v5940_v55 = vld [vmem:[%s10761_s1 + $0x460] sm:$0xff]  ;;  %3362 = vmatpush.msra.mxu2 %v5970_v63  ;;  %v5979_v49 = vld [vmem:[%s10761_s1 + $0x598] sm:$0xff] }
 0x3e7   : > { %2607 = vst.msk [vmem:[#allocation2 + $0xd8] sm:$0xff] %vm802_vm9, %v2593_v53  ;;  %2871 = vmatmul.f32.gmra.mxu0 %v8044_v54  ;;  %v8204_v53 = vld [vmem:[#allocation2 + $0x18] sm:$0xff]  ;;  %v5929_v63 = vld [vmem:[%s10761_s1 + $0x408] sm:$0xff] }
 0x3e8   : > { %1487 = vst.msk [vmem:[#allocation2 + $0xc8] sm:$0xff] %vm802_vm9, %v1473_v32  ;;  %v5912_v32 = vld [vmem:[%s10761_s1 + $0x380] sm:$0xff]  ;;  %3284 = vmatpush.msra.mxu0 %v5940_v55  ;;  %3363 = vmatpush.msra.mxu2 %v5969_v2  ;;  %v5961_v55 = vld [vmem:[%s10761_s1 + $0x508] sm:$0xff] }
 0x3e9   : > { %3186 = vmatpush.msrb.mxu3 %v5912_v32  ;;  %v5966_v32 = vld [vmem:[%s10761_s1 + $0x530] sm:$0xff]  ;;  %v5976_v2 = vld [vmem:[%s10761_s1 + $0x580] sm:$0xff] }
 0x3ea   : > { %3285 = vmatpush.msra.mxu0 %v5939_v59  ;;  %3364 = vmatpush.msra.mxu2 %v5968_v17  ;;  %v5977_v59 = vld [vmem:[%s10761_s1 + $0x588] sm:$0xff]  ;;  %v6055_v17 = vld [vmem:[%s10761_s1 + $0x7f8] sm:$0xff] }
 0x3eb   : > { %3395 = vmatpush.msra.mxu3 %v5991_v8  ;;  %v5950_v8 = vld [vmem:[%s10761_s1 + $0x4b0] sm:$0xff] }
 0x3ec   : > { %3365 = vmatpush.msra.mxu2 %v5967_v25  ;;  %v6023_v25 = vld [vmem:[%s10761_s1 + $0x6f8] sm:$0xff] }
 0x3ed   : > { %v794_v4 = vpop.permute.xlu1 %793  ;;  %v2635_v6 = vpop.permute.xlu0 %2634  ;;  %3396 = vmatpush.msra.mxu3 %v5990_v41  ;;  %v5964_v41 = vld [vmem:[%s10761_s1 + $0x520] sm:$0xff] }
 0x3ee   : > { %809 = vst.msk [vmem:[#allocation2 + $0xc0] sm:$0xff] %vm802_vm9, %v794_v4  ;;  %v923_v7 = vpop.permute.xlu2 %922  ;;  %v5955_v4 = vld [vmem:[%s10761_s1 + $0x4d8] sm:$0xff]  ;;  %3366 = vmatpush.msra.mxu2 %v5966_v32  ;;  %v6021_v32 = vld [vmem:[%s10761_s1 + $0x6e8] sm:$0xff] }
 0x3ef   : > { %2649 = vst.msk [vmem:[#allocation2 + $0xd8] sm:$0xff] %vm845_vm10, %v2635_v6  ;;  %v5938_v6 = vld [vmem:[%s10761_s1 + $0x450] sm:$0xff] }
 0x3f0   : > { %852 = vst.msk [vmem:[#allocation2 + $0xc0] sm:$0xff] %vm845_vm10, %v837_v46  ;;  %v5989_v46 = vld [vmem:[%s10761_s1 + $0x5e8] sm:$0xff]  ;;  %3286 = vmatpush.msra.mxu0 %v5938_v6  ;;  %3367 = vmatpush.msra.mxu2 %v5965_v36  ;;  %v6039_v6 = vld [vmem:[%s10761_s1 + $0x778] sm:$0xff] }
 0x3f1   : > { %895 = vst.msk [vmem:[#allocation2 + $0xc0] sm:$0xff] %vm888_vm11, %v880_v10  ;;  %3397 = vmatpush.msra.mxu3 %v5989_v46  ;;  %v5956_v10 = vld [vmem:[%s10761_s1 + $0x4e0] sm:$0xff]  ;;  %v8334_v46 = vld [vmem:[#allocation2 + $0x50] sm:$0xff] }
 0x3f2   : > { %938 = vst.msk [vmem:[#allocation2 + $0xc0] sm:$0xff] %vm931_vm12, %v923_v7  ;;  %3322 = vmatpush.msra.mxu1 %v5956_v10  ;;  %3287 = vmatpush.msra.mxu0 %v5937_v15  ;;  %v5978_v10 = vld [vmem:[%s10761_s1 + $0x590] sm:$0xff]  ;;  %v5944_v15 = vld [vmem:[%s10761_s1 + $0x480] sm:$0xff]  ;;  %v6035_v36 = vld [vmem:[%s10761_s1 + $0x758] sm:$0xff] }
 0x3f3   : > { %3398 = vmatpush.msra.mxu3 %v5988_v51  ;;  %3368 = vmatpush.msra.mxu2 %v5964_v41  ;;  %v5931_v51 = vld [vmem:[%s10761_s1 + $0x418] sm:$0xff]  ;;  %v6050_v41 = vld [vmem:[%s10761_s1 + $0x7d0] sm:$0xff] }
 0x3f4   : > { %3323 = vmatpush.msra.mxu1 %v5955_v4  ;;  %3288 = vmatpush.msra.mxu0 %v5936_v12  ;;  %v8386_v4 = vld [vmem:[#allocation2 + $0x40] sm:$0xff]  ;;  %v6054_v12 = vld [vmem:[%s10761_s1 + $0x7f0] sm:$0xff] }
 0x3f5   : > { %v2677_v27 = vpop.permute.xlu1 %2676  ;;  %v2089_v28 = vpop.permute.xlu0 %2088  ;;  %3399 = vmatpush.msra.mxu3 %v5987_v16  ;;  %v8368_v16 = vld [vmem:[#allocation2 + $0x48] sm:$0xff] }
 0x3f6   : > { %2691 = vst.msk [vmem:[#allocation2 + $0xd8] sm:$0xff] %vm888_vm11, %v2677_v27  ;;  %v1052_v5 = vpop.permute.xlu2 %1051  ;;  %3324 = vmatpush.msra.mxu1 %v5954_v13  ;;  %v8277_v27 = vld [vmem:[#allocation2 + $0x58] sm:$0xff]  ;;  %3289 = vmatpush.msra.mxu0 %v5935_v29  ;;  %v6022_v29 = vld [vmem:[%s10761_s1 + $0x6f0] sm:$0xff] }
 0x3f7   : > { %2705 = vst.msk [vmem:[#allocation2 + $0xd8] sm:$0xff] %vm931_vm12, %v7684_v0  ;;  %3400 = vmatpush.msra.mxu3 %v5986_v48  ;;  %v5945_v48 = vld [vmem:[%s10761_s1 + $0x488] sm:$0xff]  ;;  %v5928_v13 = vld [vmem:[%s10761_s1 + $0x400] sm:$0xff] }
 0x3f8   : > { %2719 = vst.msk [vmem:[#allocation2 + $0xd8] sm:$0xff] %vm974_vm13, %v7684_v0  ;;  %3325 = vmatpush.msra.mxu1 %v5953_v18  ;;  %v8415_v18 = vld [vmem:[#allocation2 + $0x60] sm:$0xff] }
 0x3f9   : > { %2733 = vst.msk [vmem:[#allocation2 + $0xd8] sm:$0xff] %vm1017_vm14, %v7684_v0  ;;  %3401 = vmatpush.msra.mxu3 %v5985_v14  ;;  %v8405_v14 = vld [vmem:[#allocation2 + $0x68] sm:$0xff] }
 0x3fa   : > { %2747 = vst.msk [vmem:[#allocation2 + $0xd8] sm:$0xff] %vm1060_vm15, %v7684_v0  ;;  %3326 = vmatpush.msra.mxu1 %v5952_v26  ;;  %v6037_v26 = vld [vmem:[%s10761_s1 + $0x768] sm:$0xff] }
 0x3fb   : > { %2103 = vst.msk [vmem:[#allocation2 + $0xd0] sm:$0xff] %vm974_vm13, %v2089_v28  ;;  %3402 = vmatpush.msra.mxu3 %v5984_v24  ;;  %v5983_v28 = vld [vmem:[%s10761_s1 + $0x5b8] sm:$0xff] }
 0x3fc   : > { %3327 = vmatpush.msra.mxu1 %v5951_v31  ;;  %v6007_v24 = vld [vmem:[%s10761_s1 + $0x678] sm:$0xff]  ;;  %v6053_v31 = vld [vmem:[%s10761_s1 + $0x7e8] sm:$0xff] }
 0x3fd   : > { %v2131_v0 = vpop.permute.xlu1 %2130  ;;  %v1515_v37 = vpop.permute.xlu0 %1514  ;;  %3403 = vmatpush.msra.mxu3 %v5983_v28  ;;  %v6006_v28 = vld [vmem:[%s10761_s1 + $0x670] sm:$0xff] }
 0x3fe   : > { %2145 = vst.msk [vmem:[#allocation2 + $0xd0] sm:$0xff] %vm1017_vm14, %v2131_v0  ;;  %v8304_v0 = vld [vmem:[#allocation2] sm:$0xff]  ;;  %3328 = vmatpush.msra.mxu1 %v5950_v8  ;;  %v6051_v8 = vld [vmem:[%s10761_s1 + $0x7d8] sm:$0xff] }
 0x3ff   : > { %1529 = vst.msk [vmem:[#allocation2 + $0xc8] sm:$0xff] %vm845_vm10, %v1515_v37  ;;  %3404 = vmatpush.msra.mxu3 %v5982_v35  ;;  %v5934_v37 = vld [vmem:[%s10761_s1 + $0x430] sm:$0xff]  ;;  %v6036_v35 = vld [vmem:[%s10761_s1 + $0x760] sm:$0xff] }
 0x400   : > { %3290 = vmatpush.msra.mxu0 %v5934_v37  ;;  %3329 = vmatpush.msra.mxu1 %v5949_v44  ;;  %v6004_v37 = vld [vmem:[%s10761_s1 + $0x660] sm:$0xff]  ;;  %v6033_v44 = vld [vmem:[%s10761_s1 + $0x748] sm:$0xff] }
 0x401   : > { %v8153_v38 = vld [vmem:[#allocation2 + $0xd8] sm:$0xff]  ;;  %3405 = vmatpush.msra.mxu3 %v5981_v39  ;;  %v6019_v39 = vld [vmem:[%s10761_s1 + $0x6d8] sm:$0xff] }
 0x402   : > { %2988 = vmatmul.f32.gmra.mxu3 %v8153_v38  ;;  %3291 = vmatpush.msra.mxu0 %v5933_v22  ;;  %v6034_v22 = vld [vmem:[%s10761_s1 + $0x750] sm:$0xff] }
 0x403   : > { %3406 = vmatpush.msra.mxu3 %v5980_v45  ;;  %v6002_v45 = vld [vmem:[%s10761_s1 + $0x650] sm:$0xff] }
 0x405   : > { %v2173_v62 = vpop.permute.xlu1 %2172  ;;  %v1557_v47 = vpop.permute.xlu0 %1556  ;;  %3407 = vmatpush.msra.mxu3 %v5979_v49  ;;  %v6032_v49 = vld [vmem:[%s10761_s1 + $0x740] sm:$0xff] }
 0x406   : > { %2187 = vst.msk [vmem:[#allocation2 + $0xd0] sm:$0xff] %vm1060_vm15, %v2173_v62  ;;  %v5963_v62 = vld [vmem:[%s10761_s1 + $0x518] sm:$0xff] }
 0x407   : > { %1571 = vst.msk [vmem:[#allocation2 + $0xc8] sm:$0xff] %vm888_vm11, %v1557_v47  ;;  %v5948_v47 = vld [vmem:[%s10761_s1 + $0x4a0] sm:$0xff]  ;;  %3369 = vmatpush.msra.mxu2 %v5963_v62  ;;  %3408 = vmatpush.msra.mxu3 %v5978_v10  ;;  %v6018_v62 = vld [vmem:[%s10761_s1 + $0x6d0] sm:$0xff] }
 0x408   : > { %1585 = vst.msk [vmem:[#allocation2 + $0xc8] sm:$0xff] %vm931_vm12, %v1578_v43  ;;  %3330 = vmatpush.msra.mxu1 %v5948_v47  ;;  %v6001_v47 = vld [vmem:[%s10761_s1 + $0x648] sm:$0xff]  ;;  %v6016_v10 = vld [vmem:[%s10761_s1 + $0x6c0] sm:$0xff] }
 0x409   : > { %1599 = vst.msk [vmem:[#allocation2 + $0xc8] sm:$0xff] %vm974_vm13, %v1578_v43  ;;  %3370 = vmatpush.msra.mxu2 %v5962_v50  ;;  %3409 = vmatpush.msra.mxu3 %v5977_v59  ;;  %v6017_v50 = vld [vmem:[%s10761_s1 + $0x6c8] sm:$0xff]  ;;  %v6030_v59 = vld [vmem:[%s10761_s1 + $0x730] sm:$0xff] }
 0x40a   : > { %1613 = vst.msk [vmem:[#allocation2 + $0xc8] sm:$0xff] %vm1017_vm14, %v1578_v43  ;;  %3187 = vmatmul.f32.vlgmr.msrb.gmra.mxu3 %v8204_v53  ;;  %3331 = vmatpush.msra.mxu1 %v5947_v52  ;;  %v6031_v52 = vld [vmem:[%s10761_s1 + $0x738] sm:$0xff] }
 0x40b   : > { %1627 = vst.msk [vmem:[#allocation2 + $0xc8] sm:$0xff] %vm1060_vm15, %v1578_v43  ;;  %v5932_v43 = vld [vmem:[%s10761_s1 + $0x420] sm:$0xff]  ;;  %3371 = vmatpush.msra.mxu2 %v5961_v55  ;;  %3410 = vmatpush.msra.mxu3 %v5976_v2  ;;  %v6029_v2 = vld [vmem:[%s10761_s1 + $0x728] sm:$0xff] }
 0x40c   : > { %3292 = vmatpush.msra.mxu0 %v5932_v43  ;;  %v6049_v43 = vld [vmem:[%s10761_s1 + $0x7c8] sm:$0xff]  ;;  %v6000_v55 = vld [vmem:[%s10761_s1 + $0x640] sm:$0xff] }
 0x40d   : > { %v1009_v57 = vpop.permute.xlu1 %1008  ;;  %v8214_v58 = vld [vmem:[#allocation2 + $0xd0] sm:$0xff]  ;;  %v966_v61 = vpop.permute.xlu0 %965  ;;  %3619 = vmatpush.msrb.mxu3 %v6055_v17  ;;  %v5997_v17 = vld [vmem:[%s10761_s1 + $0x628] sm:$0xff] }
 0x40e   : > { %2950 = vmatmul.f32.gmra.mxu2 %v8214_v58  ;;  %981 = vst.msk [vmem:[#allocation2 + $0xc0] sm:$0xff] %vm974_vm13, %v966_v61  ;;  %3293 = vmatpush.msra.mxu0 %v5931_v51  ;;  %v5946_v61 = vld [vmem:[%s10761_s1 + $0x490] sm:$0xff]  ;;  %v6048_v51 = vld [vmem:[%s10761_s1 + $0x7c0] sm:$0xff] }
 0x40f   : > { %1024 = vst.msk [vmem:[#allocation2 + $0xc0] sm:$0xff] %vm1017_vm14, %v1009_v57  ;;  %v5960_v57 = vld [vmem:[%s10761_s1 + $0x500] sm:$0xff]  ;;  %3332 = vmatpush.msra.mxu1 %v5946_v61  ;;  %3620 = vmatpush.msrb.mxu3 %v6054_v12  ;;  %v6015_v61 = vld [vmem:[%s10761_s1 + $0x6b8] sm:$0xff] }
 0x410   : > { %1067 = vst.msk [vmem:[#allocation2 + $0xc0] sm:$0xff] %vm1060_vm15, %v1052_v5  ;;  %v8380_v5 = vld [vmem:[#allocation2 + $0x70] sm:$0xff]  ;;  %3372 = vmatpush.msra.mxu2 %v5960_v57 }
 0x411   : > { %3333 = vmatpush.msra.mxu1 %v5945_v48  ;;  %3621 = vmatpush.msrb.mxu3 %v6053_v31  ;;  %v5999_v57 = vld [vmem:[%s10761_s1 + $0x638] sm:$0xff]  ;;  %v6046_v48 = vld [vmem:[%s10761_s1 + $0x7b0] sm:$0xff]  ;;  %v8582_v31 = vpop.f32.mrf.mxu1 }
 0x412   : > { %v8238_v7 = vld [vmem:[#allocation2 + $0xc8] sm:$0xff]  ;;  %3190 = vmatmul.f32.gmra.mxu3 %v8240_v9 }
 0x413   : > { %2912 = vmatmul.f32.gmra.mxu1 %v8238_v7 }
 0x414   : > { %3334 = vmatpush.msra.mxu1 %v5944_v15  ;;  %v6045_v15 = vld [vmem:[%s10761_s1 + $0x7a8] sm:$0xff] }
 0x416   : > { %3149 = vmatmul.f32.vlgmr.msrb.gmra.mxu2 %v8259_v20 }
 0x417   : > { %v8265_v1 = vld [vmem:[#allocation2 + $0xc0] sm:$0xff]  ;;  %3581 = vmatpush.msrb.mxu2 %v6039_v6  ;;  %v5998_v6 = vld [vmem:[%s10761_s1 + $0x630] sm:$0xff] }
 0x418   : > { %2874 = vmatmul.f32.gmra.mxu0 %v8265_v1 }
 0x41a   : > { %3193 = vmatmul.f32.gmra.mxu3 %v8277_v27 }
 0x41b   : > { %3111 = vmatmul.f32.vlgmr.msrb.gmra.mxu1 %v8286_v30 }
 0x41c   : > { %3543 = vmatpush.msrb.mxu1 %v6023_v25  ;;  %v6013_v25 = vld [vmem:[%s10761_s1 + $0x6a8] sm:$0xff] }
 0x41e   : > { %3152 = vmatmul.f32.gmra.mxu2 %v8295_v34  ;;  %3544 = vmatpush.msrb.mxu1 %v6022_v29  ;;  %v6012_v29 = vld [vmem:[%s10761_s1 + $0x6a0] sm:$0xff] }
 0x420   : > { %3073 = vmatmul.f32.vlgmr.msrb.gmra.mxu0 %v8304_v0  ;;  %3545 = vmatpush.msrb.mxu1 %v6021_v32  ;;  %v6043_v32 = vld [vmem:[%s10761_s1 + $0x798] sm:$0xff] }
 0x422   : > { %3196 = vmatmul.f32.gmra.mxu3 %v8316_v40 }
 0x423   : > { %3114 = vmatmul.f32.gmra.mxu1 %v8325_v42 }
 0x426   : > { %3155 = vmatmul.f32.gmra.mxu2 %v8334_v46 }
 0x428   : > { %3076 = vmatmul.f32.gmra.mxu0 %v8346_v11 }
 0x42a   : > { %3199 = vmatmul.f32.gmra.mxu3 %v7792_v19  ;;  %v5930_v19 = vld [vmem:[%s10761_s1 + $0x410] sm:$0xff] }
 0x42b   : > { %3117 = vmatmul.f32.gmra.mxu1 %v8368_v16  ;;  %3294 = vmatpush.msra.mxu0 %v5930_v19  ;;  %v6047_v19 = vld [vmem:[%s10761_s1 + $0x7b8] sm:$0xff] }
 0x42d   : > { %3295 = vmatpush.msra.mxu0 %v5929_v63  ;;  %v8537_v63 = vpop.f32.mrf.mxu3 }
 0x42e   : > { %3158 = vmatmul.f32.gmra.mxu2 %v8380_v5 }
 0x42f   : > { %3296 = vmatpush.msra.mxu0 %v5928_v13  ;;  %v6014_v13 = vld [vmem:[%s10761_s1 + $0x6b0] sm:$0xff] }
 0x430   : > { %3079 = vmatmul.f32.gmra.mxu0 %v8386_v4 }
 0x431   : > { %3505 = vmatpush.msrb.mxu0 %v6007_v24  ;;  %v6028_v24 = vld [vmem:[%s10761_s1 + $0x720] sm:$0xff] }
 0x432   : > { %3202 = vmatmul.f32.gmra.mxu3 %v7913_v60 }
 0x433   : > { %3120 = vmatmul.f32.gmra.mxu1 %v8405_v14  ;;  %3506 = vmatpush.msrb.mxu0 %v6006_v28  ;;  %v5996_v28 = vld [vmem:[%s10761_s1 + $0x620] sm:$0xff] }
 0x435   : > { %v8570_v12 = vpop.f32.mrf.mxu3 }
 0x436   : > { %3161 = vmatmul.f32.gmra.mxu2 %v7780_v23  ;;  %v6038_v23 = vld [vmem:[%s10761_s1 + $0x770] sm:$0xff] }
 0x437   : > { %3582 = vmatpush.msrb.mxu2 %v6038_v23  ;;  %v6044_v23 = vld [vmem:[%s10761_s1 + $0x7a0] sm:$0xff] }
 0x438   : > { %3082 = vmatmul.f32.gmra.mxu0 %v8415_v18 }
 0x439   : > { %3583 = vmatpush.msrb.mxu2 %v6037_v26  ;;  %v6027_v26 = vld [vmem:[%s10761_s1 + $0x718] sm:$0xff] }
 0x43a   : > { %3205 = vmatmul.f32.gmra.mxu3 %v8153_v38 }
 0x43b   : > { %3123 = vmatmul.f32.gmra.mxu1 %v7796_v21  ;;  %v6005_v21 = vld [vmem:[%s10761_s1 + $0x668] sm:$0xff]  ;;  %3584 = vmatpush.msrb.mxu2 %v6036_v35  ;;  %v6026_v35 = vld [vmem:[%s10761_s1 + $0x710] sm:$0xff] }
 0x43c   : > { %3507 = vmatpush.msrb.mxu0 %v6005_v21  ;;  %v8584_v21 = vpop.f32.mrf.mxu2 }
 0x43d   : > { %3585 = vmatpush.msrb.mxu2 %v6035_v36  ;;  %v8596_v36 = vld [vmem:[#allocation2 + $0x98] sm:$0xff] }
 0x43e   : > { %3164 = vmatmul.f32.gmra.mxu2 %v7908_v56  ;;  %v6052_v56 = vld [vmem:[%s10761_s1 + $0x7e0] sm:$0xff]  ;;  %3508 = vmatpush.msrb.mxu0 %v6004_v37  ;;  %v6011_v37 = vld [vmem:[%s10761_s1 + $0x698] sm:$0xff] }
 0x43f   : > { %3622 = vmatpush.msrb.mxu3 %v6052_v56  ;;  %3586 = vmatpush.msrb.mxu2 %v6034_v22  ;;  %v5995_v56 = vld [vmem:[%s10761_s1 + $0x618] sm:$0xff]  ;;  %v6010_v22 = vld [vmem:[%s10761_s1 + $0x690] sm:$0xff] }
 0x440   : > { %3085 = vmatmul.f32.gmra.mxu0 %v7836_v33  ;;  %v6020_v33 = vld [vmem:[%s10761_s1 + $0x6e0] sm:$0xff] }
 0x441   : > { %3546 = vmatpush.msrb.mxu1 %v6020_v33  ;;  %3623 = vmatpush.msrb.mxu3 %v6051_v8  ;;  %v6025_v33 = vld [vmem:[%s10761_s1 + $0x708] sm:$0xff]  ;;  %v6042_v8 = vld [vmem:[%s10761_s1 + $0x790] sm:$0xff] }
 0x442   : > { %3411 = vmatmul.f32.vlgmr.msra.gmra.mxu3 %v8204_v53  ;;  %3587 = vmatpush.msrb.mxu2 %v6033_v44  ;;  %v8620_v44 = vpop.f32.mrf.mxu0 }
 0x443   : > { %3126 = vmatmul.f32.gmra.mxu1 %v7922_v3  ;;  %v6003_v3 = vld [vmem:[%s10761_s1 + $0x658] sm:$0xff]  ;;  %3624 = vmatpush.msrb.mxu3 %v6050_v41  ;;  %v8618_v41 = vpop.f32.mrf.mxu3 }
 0x444   : > { %3509 = vmatpush.msrb.mxu0 %v6003_v3  ;;  %3547 = vmatpush.msrb.mxu1 %v6019_v39  ;;  %v5994_v3 = vld [vmem:[%s10761_s1 + $0x610] sm:$0xff]  ;;  %v6024_v39 = vld [vmem:[%s10761_s1 + $0x700] sm:$0xff] }
 0x445   : > { %3625 = vmatpush.msrb.mxu3 %v6049_v43  ;;  %3588 = vmatpush.msrb.mxu2 %v6032_v49  ;;  %v8628_v43 = vpop.f32.mrf.mxu2  ;;  %v6009_v49 = vld [vmem:[%s10761_s1 + $0x688] sm:$0xff] }
 0x446   : > { %3167 = vmatmul.f32.gmra.mxu2 %v8214_v58  ;;  %3510 = vmatpush.msrb.mxu0 %v6002_v45  ;;  %v6041_v45 = vld [vmem:[%s10761_s1 + $0x788] sm:$0xff] }
 0x447   : > { %3548 = vmatpush.msrb.mxu1 %v6018_v62  ;;  %3626 = vmatpush.msrb.mxu3 %v6048_v51  ;;  %v8626_v62 = vpop.f32.mrf.mxu1  ;;  %v5992_v51 = vld [vmem:[%s10761_s1 + $0x600] sm:$0xff] }
 0x448   : > { %3088 = vmatmul.f32.gmra.mxu0 %v8044_v54  ;;  %3589 = vmatpush.msrb.mxu2 %v6031_v52  ;;  %v6008_v52 = vld [vmem:[%s10761_s1 + $0x680] sm:$0xff] }
 0x449   : > { %3511 = vmatpush.msrb.mxu0 %v6001_v47  ;;  %3549 = vmatpush.msrb.mxu1 %v6017_v50  ;;  %v5993_v47 = vld [vmem:[%s10761_s1 + $0x608] sm:$0xff]  ;;  %v6040_v50 = vld [vmem:[%s10761_s1 + $0x780] sm:$0xff]  ;;  %s5802_s1 = sshll.u32 %s486_s18, 4  ;;  %s5803_s1 = int_to_ptr.vmem [resolvable:$true] %s5802_s1 }
 0x44a   : > { %3414 = vmatmul.f32.gmra.mxu3 %v8240_v9  ;;  %3590 = vmatpush.msrb.mxu2 %v6030_v59 }
 0x44b   : > { %3129 = vmatmul.f32.gmra.mxu1 %v8238_v7  ;;  %3512 = vmatpush.msrb.mxu0 %v6000_v55  ;;  %v8648_v55 = vpop.f32.mrf.mxu3 }
 0x44c   : > { %3550 = vmatpush.msrb.mxu1 %v6016_v10  ;;  %3627 = vmatpush.msrb.mxu3 %v6047_v19  ;;  %v8650_v10 = vpop.f32.mrf.mxu0  ;;  %v6261_v19 = vld [vmem:[#allocation2 + $0x90] sm:$0xff] }
 0x44d   : > { %3513 = vmatpush.msrb.mxu0 %v5999_v57  ;;  %3591 = vmatpush.msrb.mxu2 %v6029_v2  ;;  %v8654_v57 = vpop.f32.mrf.mxu2  ;;  %v6263_v2 = vld [vmem:[#allocation2 + $0xb0] sm:$0xff] }
 0x44e   : > { %3373 = vmatmul.f32.vlgmr.msra.gmra.mxu2 %v8259_v20  ;;  %3551 = vmatpush.msrb.mxu1 %v6015_v61  ;;  %v6262_v61 = vld [vmem:[#allocation2 + $0x88] sm:$0xff] }
 0x44f   : > { %3628 = vmatpush.msrb.mxu3 %v6046_v48  ;;  %3514 = vmatpush.msrb.mxu0 %v5998_v6 }
 0x450   : > { %3091 = vmatmul.f32.gmra.mxu0 %v8265_v1  ;;  %3552 = vmatpush.msrb.mxu1 %v6014_v13 }
 0x451   : > { %3629 = vmatpush.msrb.mxu3 %v6045_v15  ;;  %3515 = vmatpush.msrb.mxu0 %v5997_v17  ;;  %v6264_v15 = vld [vmem:[#allocation2 + $0x80] sm:$0xff]  ;;  %v6265_v17 = vld [vmem:[#allocation2 + $0xa8] sm:$0xff] }
 0x452   : > { %3417 = vmatmul.f32.gmra.mxu3 %v8277_v27  ;;  %3592 = vmatpush.msrb.mxu2 %v6028_v24 }
 0x453   : > { %3335 = vmatmul.f32.vlgmr.msra.gmra.mxu1 %v8286_v30  ;;  %3630 = vmatpush.msrb.mxu3 %v6044_v23  ;;  %v8658_v59 = vpop.f32.mrf.mxu3 }
 0x454   : > { %3553 = vmatpush.msrb.mxu1 %v6013_v25  ;;  %3593 = vmatpush.msrb.mxu2 %v6027_v26  ;;  %10765 = vst [vmem:[#allocation15_spill] sm:$0xff] %v8658_v59  ;;  %v8660_v48 = vpop.f32.mrf.mxu0 }
 0x455   : > { %3516 = vmatpush.msrb.mxu0 %v5996_v28  ;;  %3631 = vmatpush.msrb.mxu3 %v6043_v32  ;;  %v8664_v13 = vpop.f32.mrf.mxu2 }
 0x456   : > { %3376 = vmatmul.f32.gmra.mxu2 %v8295_v34  ;;  %3554 = vmatpush.msrb.mxu1 %v6012_v29 }
 0x457   : > { %3594 = vmatpush.msrb.mxu2 %v6026_v35  ;;  %3517 = vmatpush.msrb.mxu0 %v5995_v56 }
 0x458   : > { %3297 = vmatmul.f32.vlgmr.msra.gmra.mxu0 %v8304_v0  ;;  %3555 = vmatpush.msrb.mxu1 %v6011_v37 }
 0x459   : > { %3595 = vmatpush.msrb.mxu2 %v6025_v33  ;;  %3632 = vmatpush.msrb.mxu3 %v6042_v8  ;;  %v6266_v33 = vld [vmem:[#allocation2 + $0xb8] sm:$0xff] }
 0x45a   : > { %3420 = vmatmul.f32.gmra.mxu3 %v8316_v40  ;;  %3518 = vmatpush.msrb.mxu0 %v5994_v3 }
 0x45b   : > { %3338 = vmatmul.f32.gmra.mxu1 %v8325_v42  ;;  %3596 = vmatpush.msrb.mxu2 %v6024_v39  ;;  %v8667_v24 = vpop.f32.mrf.mxu3 }
 0x45c   : > { %3556 = vmatpush.msrb.mxu1 %v6010_v22  ;;  %3633 = vmatpush.msrb.mxu3 %v6041_v45  ;;  %10766 = vst [vmem:[#allocation16_spill] sm:$0xff] %v8667_v24  ;;  %v8669_v25 = vpop.f32.mrf.mxu0 }
 0x45d   : > { %3519 = vmatpush.msrb.mxu0 %v5993_v47  ;;  %v8674_v26 = vpop.f32.mrf.mxu2 }
 0x45e   : > { %3379 = vmatmul.f32.gmra.mxu2 %v8334_v46  ;;  %3634 = vmatpush.msrb.mxu3 %v6040_v50  ;;  %10767 = vst [vmem:[#allocation17_spill] sm:$0xff] %v8674_v26 }
 0x45f   : > { %3557 = vmatpush.msrb.mxu1 %v6009_v49  ;;  %3520 = vmatpush.msrb.mxu0 %v5992_v51 }
 0x460   : > { %3300 = vmatmul.f32.gmra.mxu0 %v8346_v11 }
 0x461   : > { %3558 = vmatpush.msrb.mxu1 %v6008_v52 }
 0x462   : > { %3423 = vmatmul.f32.gmra.mxu3 %v8596_v36 }
 0x463   : > { %3341 = vmatmul.f32.gmra.mxu1 %v8368_v16 }
 0x465   : > { %v8686_v32 = vpop.f32.mrf.mxu2 }
 0x466   : > { %3382 = vmatmul.f32.gmra.mxu2 %v8380_v5  ;;  %10770 = vst [vmem:[#allocation20_spill] sm:$0xff] %v8686_v32 }
 0x468   : > { %3303 = vmatmul.f32.gmra.mxu0 %v8386_v4 }
 0x46a   : > { %3426 = vmatmul.f32.gmra.mxu3 %v7913_v60  ;;  %v8652_v60 = vpop.f32.mrf.mxu1 }
 0x46b   : > { %3344 = vmatmul.f32.gmra.mxu1 %v8405_v14 }
 0x46e   : > { %3385 = vmatmul.f32.gmra.mxu2 %v6261_v19 }
 0x470   : > { %3306 = vmatmul.f32.gmra.mxu0 %v8415_v18 }
 0x472   : > { %3429 = vmatmul.f32.gmra.mxu3 %v8153_v38  ;;  %v8662_v6 = vpop.f32.mrf.mxu1 }
 0x473   : > { %3347 = vmatmul.f32.gmra.mxu1 %v6262_v61 }
 0x476   : > { %3388 = vmatmul.f32.gmra.mxu2 %v6263_v2 }
 0x478   : > { %3309 = vmatmul.f32.gmra.mxu0 %v6264_v15 }
 0x47a   : > { %3635 = vmatmul.f32.vlgmr.msrb.gmra.mxu3 %v8204_v53  ;;  %v8672_v23 = vpop.f32.mrf.mxu1  ;;  %v8681_v53 = vpop.f32.mrf.mxu0 }
 0x47b   : > { %3350 = vmatmul.f32.gmra.mxu1 %v6265_v17 }
 0x47e   : > { %3391 = vmatmul.f32.gmra.mxu2 %v8214_v58 }
 0x480   : > { %3312 = vmatmul.f32.gmra.mxu0 %v8044_v54 }
 0x482   : > { %3638 = vmatmul.f32.gmra.mxu3 %v8240_v9  ;;  %v8684_v29 = vpop.f32.mrf.mxu1  ;;  %v8693_v9 = vpop.f32.mrf.mxu0 }
 0x483   : > { %3353 = vmatmul.f32.gmra.mxu1 %v8238_v7  ;;  %10769 = vst [vmem:[#allocation19_spill] sm:$0xff] %v8684_v29 }
 0x484   : > { %10771 = vst [vmem:[#allocation21_spill] sm:$0xff] %v8693_v9 }
 0x485   : > { %v8679_v28 = vpop.f32.mrf.mxu3 }
 0x486   : > { %10768 = vst [vmem:[#allocation18_spill] sm:$0xff] %v8679_v28  ;;  %3597 = vmatmul.f32.vlgmr.msrb.gmra.mxu2 %v8259_v20 }
 0x488   : > { %3315 = vmatmul.f32.gmra.mxu0 %v8265_v1 }
 0x48a   : > { %3641 = vmatmul.f32.gmra.mxu3 %v8277_v27 }
 0x48b   : > { %3559 = vmatmul.f32.vlgmr.msrb.gmra.mxu1 %v8286_v30 }
 0x48d   : > { %v8691_v35 = vpop.f32.mrf.mxu3 }
 0x48e   : > { %3600 = vmatmul.f32.gmra.mxu2 %v8295_v34 }
 0x490   : > { %v8696_v56 = vpop.f32.mrf.mxu1  ;;  %3521 = vmatmul.f32.vlgmr.msrb.gmra.mxu0 %v8304_v0 }
 0x491   : > { %10772 = vst [vmem:[#allocation22_spill] sm:$0xff] %v8696_v56  ;;  %v8699_v20 = vpop.f32.mrf.mxu2 }
 0x492   : > { %10773 = vst [vmem:[#allocation23_spill] sm:$0xff] %v8699_v20  ;;  %3644 = vmatmul.f32.gmra.mxu3 %v8316_v40 }
 0x493   : > { %3562 = vmatmul.f32.gmra.mxu1 %v8325_v42 }
 0x495   : > { %v8703_v37 = vpop.f32.mrf.mxu3  ;;  %v8705_v27 = vpop.f32.mrf.mxu0 }
 0x496   : > { %10774 = vst [vmem:[#allocation24_spill] sm:$0xff] %v8705_v27  ;;  %3603 = vmatmul.f32.gmra.mxu2 %v8334_v46 }
 0x498   : > { %v8708_v30 = vpop.f32.mrf.mxu1  ;;  %3524 = vmatmul.f32.gmra.mxu0 %v8346_v11 }
 0x499   : > { %v8711_v34 = vpop.f32.mrf.mxu2 }
 0x49a   : > { %3647 = vmatmul.f32.gmra.mxu3 %v8596_v36 }
 0x49b   : > { %3565 = vmatmul.f32.gmra.mxu1 %v8368_v16 }
 0x49d   : > { %v8715_v0 = vpop.f32.mrf.mxu3  ;;  %v8717_v40 = vpop.f32.mrf.mxu0 }
 0x49e   : > { %3606 = vmatmul.f32.gmra.mxu2 %v8380_v5 }
 0x4a0   : > { %v8720_v42 = vpop.f32.mrf.mxu1  ;;  %3527 = vmatmul.f32.gmra.mxu0 %v8386_v4 }
 0x4a1   : > { %v8723_v46 = vpop.f32.mrf.mxu2 }
 0x4a2   : > { %3650 = vmatmul.f32.gmra.mxu3 %v6266_v33 }
 0x4a3   : > { %3568 = vmatmul.f32.gmra.mxu1 %v8405_v14 }
 0x4a5   : > { %v8726_v11 = vpop.f32.mrf.mxu3  ;;  %v8728_v36 = vpop.f32.mrf.mxu0 }
 0x4a6   : > { %3609 = vmatmul.f32.gmra.mxu2 %v6261_v19 }
 0x4a8   : > { %v8730_v16 = vpop.f32.mrf.mxu1  ;;  %3530 = vmatmul.f32.gmra.mxu0 %v8415_v18 }
 0x4a9   : > { %v8733_v5 = vpop.f32.mrf.mxu2 }
 0x4aa   : > { %3653 = vmatmul.f32.gmra.mxu3 %v8153_v38 }
 0x4ab   : > { %3571 = vmatmul.f32.gmra.mxu1 %v6262_v61 }
 0x4ad   : > { %v8736_v4 = vpop.f32.mrf.mxu3  ;;  %v8738_v8 = vpop.f32.mrf.mxu0 }
 0x4ae   : > { %10775 = vst [vmem:[#allocation25_spill] sm:$0xff] %v8736_v4  ;;  %3612 = vmatmul.f32.gmra.mxu2 %v6263_v2 }
 0x4b0   : > { %v8740_v14 = vpop.f32.mrf.mxu1  ;;  %3533 = vmatmul.f32.gmra.mxu0 %v6264_v15 }
 0x4b1   : > { %v8742_v3 = vpop.f32.mrf.mxu2 }
 0x4b3   : > { %3574 = vmatmul.f32.gmra.mxu1 %v6265_v17 }
 0x4b5   : > { %v8744_v39 = vpop.f32.mrf.mxu3  ;;  %v8746_v22 = vpop.f32.mrf.mxu0 }
 0x4b6   : > { %10776 = vst [vmem:[#allocation26_spill] sm:$0xff] %v8744_v39  ;;  %3615 = vmatmul.f32.gmra.mxu2 %v8214_v58 }
 0x4b8   : > { %v8749_v18 = vpop.f32.mrf.mxu1  ;;  %3536 = vmatmul.f32.gmra.mxu0 %v8044_v54 }
 0x4b9   : > { %v8752_v38 = vpop.f32.mrf.mxu2 }
 0x4ba   : > { %10777 = vst [vmem:[#allocation27_spill] sm:$0xff] %v8752_v38 }
 0x4bb   : > { %3577 = vmatmul.f32.gmra.mxu1 %v8238_v7 }
 0x4bd   : > { %v8755_v45 = vpop.f32.mrf.mxu3  ;;  %v8757_v47 = vpop.f32.mrf.mxu0 }
 0x4be   : > { %10778 = vst [vmem:[#allocation28_spill] sm:$0xff] %v8755_v45 }
 0x4c0   : > { %v8759_v49 = vpop.f32.mrf.mxu1  ;;  %3539 = vmatmul.f32.gmra.mxu0 %v8265_v1 }
 0x4c1   : > { %10779 = vst [vmem:[#allocation29_spill] sm:$0xff] %v8759_v49  ;;  %v8762_v50 = vpop.f32.mrf.mxu2 }
 0x4c2   : > { %10780 = vst [vmem:[#allocation30_spill] sm:$0xff] %v8762_v50 }
 0x4c5   : > { %v3412_v51 = vpop.f32.mrf.mxu3  ;;  %v8764_v58 = vpop.f32.mrf.mxu0 }
 0x4c6   : > { %10781 = vst [vmem:[#allocation31_spill] sm:$0xff] %v8764_v58 }
 0x4c8   : > { %v8766_v52 = vpop.f32.mrf.mxu1 }
 0x4c9   : > { %10782 = vst [vmem:[#allocation32_spill] sm:$0xff] %v8766_v52  ;;  %v8768_v54 = vpop.f32.mrf.mxu2 }
 0x4ca   : > { %10783 = vst [vmem:[#allocation33_spill] sm:$0xff] %v8768_v54 }
 0x4cd   : > { %v3415_v19 = vpop.f32.mrf.mxu3  ;;  %v8770_v61 = vpop.f32.mrf.mxu0 }
 0x4ce   : > { %10784 = vst [vmem:[#allocation34_spill] sm:$0xff] %v8770_v61 }
 0x4d0   : > { %v3336_v7 = vpop.f32.mrf.mxu1 }
 0x4d1   : > { %v3374_v2 = vpop.f32.mrf.mxu2 }
 0x4d5   : > { %v8772_v15 = vpop.f32.mrf.mxu3  ;;  %v3298_v17 = vpop.f32.mrf.mxu0 }
 0x4d8   : > { %v3339_v33 = vpop.f32.mrf.mxu1 }
 0x4d9   : > { %v3377_v28 = vpop.f32.mrf.mxu2 }
 0x4dd   : > { %v8774_v1 = vpop.f32.mrf.mxu3  ;;  %v3301_v45 = vpop.f32.mrf.mxu0 }
 0x4de   : > { %10785 = vst [vmem:[#allocation35_spill] sm:$0xff] %v8774_v1 }
 0x4e0   : > { %v3342_v20 = vpop.f32.mrf.mxu1 }
 0x4e1   : > { %v8776_v56 = vpop.f32.mrf.mxu2 }
 0x4e5   : > { %v8778_v27 = vpop.f32.mrf.mxu3  ;;  %v3304_v24 = vpop.f32.mrf.mxu0 }
 0x4e6   : > { %10786 = vst [vmem:[#allocation36_spill] sm:$0xff] %v8778_v27 }
 0x4e8   : > { %v8780_v54 = vpop.f32.mrf.mxu1 }
 0x4e9   : > { %v8782_v52 = vpop.f32.mrf.mxu2 }
 0x4ed   : > { %v8784_v61 = vpop.f32.mrf.mxu0  ;;  %v8786_v39 = vpop.f32.mrf.mxu3 }
 0x4ee   : > { %10787 = vst [vmem:[#allocation37_spill] sm:$0xff] %v8786_v39  ;;  %v3113_v39 = vadd.f32 %v8708_v30, %v8717_v40  ;;  %v2899_v30 = vadd.f32 %v8626_v62, %v8650_v10  ;;  %v8825_v62 = vld [vmem:[%s10712_s2] ss:$0 sm:$0xff]  ;;  %v3119_v10 = vadd.f32 %v8730_v16, %v8738_v8 }
 0x4f0   : > { %v8788_v32 = vpop.f32.mrf.mxu1  ;;  %v3157_v8 = vadd.f32 %v8733_v5, %v3119_v10  ;;  %v3122_v5 = vadd.f32 %v8740_v14, %v8746_v22 }
 0x4f1   : > { %10788 = vst [vmem:[#allocation38_spill] sm:$0xff] %v8788_v32  ;;  %v8790_v50 = vpop.f32.mrf.mxu2 }
 0x4f2   : > { %10789 = vst [vmem:[#allocation39_spill] sm:$0xff] %v8790_v50  ;;  %v2896_v50 = vadd.f32 %v8582_v31, %v8620_v44 }
 0x4f5   : > { %v8792_v29 = vpop.f32.mrf.mxu0  ;;  %v8798_v27 = vpop.f32.mrf.mxu3 }
 0x4f6   : > { %10790 = vst [vmem:[#allocation40_spill] sm:$0xff] %v8792_v29 }
 0x4f7   : > { %10793 = vst [vmem:[#allocation43_spill] sm:$0xff] %v8798_v27 }
 0x4f8   : > { %v8794_v9 = vpop.f32.mrf.mxu1  ;;  %v10799_v10 = vld [vmem:[#allocation38_spill] sm:$0xff] }
 0x4f9   : > { %10791 = vst [vmem:[#allocation41_spill] sm:$0xff] %v8794_v9  ;;  %v8796_v59 = vpop.f32.mrf.mxu2  ;;  %v3337_v9 = vadd.f32 %v3336_v7, %v3298_v17  ;;  %v3340_v7 = vadd.f32 %v3339_v33, %v3301_v45  ;;  %v3195_v33 = vadd.f32 %v8715_v0, %v3157_v8 }
 0x4fa   : > { %10792 = vst [vmem:[#allocation42_spill] sm:$0xff] %v8796_v59  ;;  %v3151_v59 = vadd.f32 %v8711_v34, %v3113_v39 }
 0x4fb   : > { %v3375_v29 = vadd.f32 %v3374_v2, %v3337_v9 }
 0x4fd   : > { %v8800_v49 = vpop.f32.mrf.mxu0  ;;  %v3636_v26 = vpop.f32.mrf.mxu3  ;;  %v3413_v44 = vadd.f32 %v3412_v51, %v3375_v29 }
 0x4fe   : > { %10794 = vst [vmem:[#allocation44_spill] sm:$0xff] %v8800_v49  ;;  %v2934_v49 = vadd.f32 %v8584_v21, %v2896_v50 }
 0x500   : > { %v8802_v58 = vpop.f32.mrf.mxu1  ;;  %v2972_v31 = vadd.f32 %v8537_v63, %v2934_v49 }
 0x501   : > { %10795 = vst [vmem:[#allocation45_spill] sm:$0xff] %v8802_v58  ;;  %v8804_v4 = vpop.f32.mrf.mxu2  ;;  %v3189_v58 = vadd.f32 %v8691_v35, %v3151_v59  ;;  %v2937_v59 = vadd.f32 %v8628_v43, %v2899_v30 }
 0x502   : > { %10796 = vst [vmem:[#allocation46_spill] sm:$0xff] %v8804_v4  ;;  %v3116_v4 = vadd.f32 %v8720_v42, %v8728_v36  ;;  %v3378_v42 = vadd.f32 %v3377_v28, %v3340_v7  ;;  %v3343_v28 = vadd.f32 %v3342_v20, %v3304_v24 }
 0x503   : > { %v3209_v39 = vmax.f32 %v2972_v31, %v3189_v58 }
 0x504   : > { %v3154_v21 = vadd.f32 %v8723_v46, %v3116_v4  ;;  %v3416_v46 = vadd.f32 %v3415_v19, %v3378_v42  ;;  %v8837_v4 = vld [vmem:[%s10713_s3] ss:$0 sm:$0xff]  ;;  %v3381_v58 = vadd.f32 %v8776_v56, %v3343_v28 }
 0x505   : > { %v8808_v38 = vpop.f32.mrf.mxu0  ;;  %v3639_v1 = vpop.f32.mrf.mxu3  ;;  %v3433_v35 = vmax.f32 %v3209_v39, %v3413_v44 }
 0x506   : > { %v3192_v63 = vadd.f32 %v8703_v37, %v3154_v21  ;;  %v3419_v56 = vadd.f32 %v8772_v15, %v3381_v58 }
 0x508   : > { %v3560_v32 = vpop.f32.mrf.mxu1 }
 0x509   : > { %v3598_v27 = vpop.f32.mrf.mxu2 }
 0x50d   : > { %v3522_v40 = vpop.f32.mrf.mxu0  ;;  %v3642_v45 = vpop.f32.mrf.mxu3 }
 0x50e   : > { %v3561_v17 = vadd.f32 %v3560_v32, %v3522_v40  ;;  %v2975_v32 = vadd.f32 %v8570_v12, %v2937_v59 }
 0x510   : > { %v3563_v34 = vpop.f32.mrf.mxu1  ;;  %v3599_v50 = vadd.f32 %v3598_v27, %v3561_v17  ;;  %v2902_v27 = vadd.f32 %v8652_v60, %v8660_v48  ;;  %v3210_v16 = vmax.f32 %v2975_v32, %v3192_v63  ;;  %v8843_v60 = vld [vmem:[%s10714_s4] ss:$0 sm:$0xff]  ;;  %v10798_v63 = vld [vmem:[#allocation40_spill] sm:$0xff] }
 0x511   : > { %v3601_v9 = vpop.f32.mrf.mxu2 }
 0x512   : > { %v3637_v36 = vadd.f32 %v3636_v26, %v3599_v50  ;;  %v2940_v20 = vadd.f32 %v8654_v57, %v2902_v27  ;;  %v3434_v51 = vmax.f32 %v3210_v16, %v3416_v46  ;;  %v2905_v57 = vadd.f32 %v8662_v6, %v8669_v25 }
 0x514   : > { %v3657_v29 = vmax.f32 %v3433_v35, %v3637_v36  ;;  %v2978_v31 = vadd.f32 %v8618_v41, %v2940_v20  ;;  %v3160_v41 = vadd.f32 %v8742_v3, %v3122_v5  ;;  %v3125_v3 = vadd.f32 %v8749_v18, %v8757_v47  ;;  %v10797_v36 = vld [vmem:[#allocation35_spill] sm:$0xff]  ;;  %v10805_v20 = vld [vmem:[#allocation29_spill] sm:$0xff] }
 0x515   : > { %v3525_v43 = vpop.f32.mrf.mxu0  ;;  %v3645_v25 = vpop.f32.mrf.mxu3  ;;  %v10807_v5 = vld [vmem:[#allocation21_spill] sm:$0xff] }
 0x516   : > { %v3668_v26 = vadd.f32 %v8825_v62, %v3657_v29  ;;  %v3564_v37 = vadd.f32 %v3563_v34, %v3525_v43  ;;  %v3211_v7 = vmax.f32 %v2978_v31, %v3195_v33  ;;  %v3349_v29 = vadd.f32 %v10799_v10, %v10798_v63  ;;  %v10816_v63 = vld [vmem:[#allocation34_spill] sm:$0xff]  ;;  %v10817_v10 = vld [vmem:[#allocation32_spill] sm:$0xff] }
 0x518   : > { %v3566_v49 = vpop.f32.mrf.mxu1  ;;  %v3675_v12 = vmax.f32 %v3668_v26, 0.0  ;;  %v3602_v24 = vadd.f32 %v3601_v9, %v3564_v37  ;;  %v3435_v15 = vmax.f32 %v3211_v7, %v3419_v56  ;;  %v3198_v9 = vadd.f32 %v8726_v11, %v3160_v41  ;;  %v10802_v26 = vld [vmem:[#allocation39_spill] sm:$0xff] }
 0x519   : > { %v3604_v48 = vpop.f32.mrf.mxu2  ;;  %v3387_v37 = vadd.f32 %v10802_v26, %v3349_v29  ;;  %v3131_v29 = vadd.f32 %v10817_v10, %v10816_v63 }
 0x51a   : > { %v3686_v19 = vmul.f32 %v8837_v4, %v3675_v12  ;;  %v3640_v2 = vadd.f32 %v3639_v1, %v3602_v24  ;;  %v3346_v1 = vadd.f32 %v8780_v54, %v8784_v61  ;;  %v2943_v54 = vadd.f32 %v8664_v13, %v2905_v57  ;;  %v10803_v12 = vld [vmem:[#allocation25_spill] sm:$0xff]  ;;  %v10804_v24 = vld [vmem:[#allocation31_spill] sm:$0xff]  ;;  %v10809_v57 = vld [vmem:[#allocation44_spill] sm:$0xff] }
 0x51b   : > { %v2908_v13 = vadd.f32 %v8672_v23, %v8681_v53  ;;  %v10801_v53 = vld [vmem:[#allocation17_spill] sm:$0xff] }
 0x51c   : > { %v8852_v30 = vadd.f32 %v8843_v60, %v3686_v19  ;;  %v3658_v40 = vmax.f32 %v3434_v51, %v3640_v2  ;;  %v3384_v34 = vadd.f32 %v8782_v52, %v3346_v1  ;;  %v2981_v35 = vadd.f32 %v8648_v55, %v2943_v54  ;;  %v10800_v55 = vld [vmem:[#allocation27_spill] sm:$0xff] }
 0x51d   : > { %v3528_v44 = vpop.f32.mrf.mxu0  ;;  %v3163_v27 = vadd.f32 %v10800_v55, %v3125_v3  ;;  %v2946_v46 = vadd.f32 %v10801_v53, %v2908_v13  ;;  %v3648_v16 = vpop.f32.mrf.mxu3  ;;  %v3128_v51 = vadd.f32 %v10805_v20, %v10804_v24  ;;  %v10806_v2 = vld [vmem:[#allocation15_spill] sm:$0xff]  ;;  %v10821_v53 = vld [vmem:[#allocation37_spill] sm:$0xff] }
 0x51e   : > { %3704 = vst [vmem:[#allocation3] sm:$0xff] %v8852_v30  ;;  %v3669_v0 = vadd.f32 %v8825_v62, %v3658_v40  ;;  %v3567_v14 = vadd.f32 %v3566_v49, %v3528_v44  ;;  %v3422_v52 = vadd.f32 %v10797_v36, %v3384_v34  ;;  %v3212_v32 = vmax.f32 %v2981_v35, %v3198_v9  ;;  %v10808_v40 = vld [vmem:[#allocation19_spill] sm:$0xff]  ;;  %v10810_v44 = vld [vmem:[#allocation41_spill] sm:$0xff]  ;;  %v10813_v34 = vld [vmem:[#allocation20_spill] sm:$0xff] }
 0x51f   : > { %3717 = vst.msk [vmem:[#allocation4] sm:$0xff] %vm499_vm0, %v8852_v30  ;;  %v2984_v33 = vadd.f32 %v10806_v2, %v2946_v46  ;;  %v2911_v31 = vadd.f32 %v10808_v40, %v10807_v5  ;;  %v3352_v56 = vadd.f32 %v10810_v44, %v10809_v57  ;;  %v10815_v36 = vld [vmem:[#allocation26_spill] sm:$0xff]  ;;  %v10826_v57 = vld [vmem:[#allocation28_spill] sm:$0xff] }
 0x520   : > { %v3569_v22 = vpop.f32.mrf.mxu1  ;;  %v3676_v17 = vmax.f32 %v3669_v0, 0.0  ;;  %v3605_v6 = vadd.f32 %v3604_v48, %v3567_v14  ;;  %3727 = vst.msk [vmem:[#allocation4] sm:$0xff] %vm10742_vm1, %v8852_v30  ;;  %v3436_v28 = vmax.f32 %v3212_v32, %v3422_v52  ;;  %v3201_v48 = vadd.f32 %v10803_v12, %v3163_v27  ;;  %v10818_v32 = vld [vmem:[#allocation16_spill] sm:$0xff]  ;;  %v10825_v2 = vld [vmem:[#allocation46_spill] sm:$0xff] }
 0x521   : > { %v3607_v61 = vpop.f32.mrf.mxu2  ;;  %v10819_v27 = vld [vmem:[#allocation24_spill] sm:$0xff] }
 0x522   : > { %v3687_v39 = vmul.f32 %v8837_v4, %v3676_v17  ;;  %v3643_v21 = vadd.f32 %v3642_v45, %v3605_v6  ;;  %v3213_v6 = vmax.f32 %v2984_v33, %v3201_v48  ;;  %v10823_v48 = vld [vmem:[#allocation33_spill] sm:$0xff] }
 0x524   : > { %v8874_v50 = vadd.f32 %v8843_v60, %v3687_v39  ;;  %v3659_v59 = vmax.f32 %v3435_v15, %v3643_v21  ;;  %v2949_v39 = vadd.f32 %v10813_v34, %v2911_v31  ;;  %v10814_v21 = vld [vmem:[#allocation42_spill] sm:$0xff] }
 0x525   : > { %v3531_v42 = vpop.f32.mrf.mxu0  ;;  %v3390_v9 = vadd.f32 %v10814_v21, %v3352_v56 }
 0x526   : > { %3705 = vst [vmem:[#allocation3 + $0x8] sm:$0xff] %v8874_v50  ;;  %v3670_v11 = vadd.f32 %v8825_v62, %v3659_v59  ;;  %v3570_v18 = vadd.f32 %v3569_v22, %v3531_v42  ;;  %v10811_v22 = vld [vmem:[#allocation36_spill] sm:$0xff]  ;;  %v6338_v42 = vmov 0.0   ;;  %v2987_v55 = vadd.f32 %v10818_v32, %v2949_v39 }
 0x527   : > { %3718 = vst.msk [vmem:[#allocation4 + $0x18] sm:$0xff] %vm499_vm0, %v8874_v50  ;;  %v3425_v7 = vadd.f32 %v10811_v22, %v3387_v37  ;;  %v3428_v46 = vadd.f32 %v10821_v53, %v3390_v9  ;;  %v10827_v22 = vld [vmem:[#allocation18_spill] sm:$0xff]  ;;  %v6075_v53 = vld [vmem:[%s10715_s5 + $0x190] sm:$0xff] }
 0x528   : > { %v3572_v47 = vpop.f32.mrf.mxu1  ;;  %v3677_v43 = vmax.f32 %v3670_v11, 0.0  ;;  %v3608_v23 = vadd.f32 %v3607_v61, %v3570_v18  ;;  %3728 = vst.msk [vmem:[#allocation4 + $0x18] sm:$0xff] %vm10742_vm1, %v8874_v50 }
 0x529   : > { %v3610_v8 = vpop.f32.mrf.mxu2  ;;  %v3437_v59 = vmax.f32 %v3213_v6, %v3425_v7  ;;  %3711 = vst [vmem:[#allocation3 + $0x38] sm:$0xff] %v6338_v42 }
 0x52a   : > { %v3688_v45 = vmul.f32 %v8837_v4, %v3677_v43  ;;  %v3646_v49 = vadd.f32 %v3645_v25, %v3608_v23  ;;  %v10812_v25 = vld [vmem:[#allocation30_spill] sm:$0xff] }
 0x52b   : > { %v3166_v54 = vadd.f32 %v10812_v25, %v3128_v51  ;;  %v10820_v43 = vld [vmem:[#allocation22_spill] sm:$0xff]  ;;  %v10824_v51 = vld [vmem:[#allocation23_spill] sm:$0xff] }
 0x52c   : > { %v8896_v58 = vadd.f32 %v8843_v60, %v3688_v45  ;;  %v3660_v19 = vmax.f32 %v3436_v28, %v3646_v49  ;;  %v2914_v23 = vadd.f32 %v10820_v43, %v10819_v27  ;;  %v10822_v45 = vld [vmem:[#allocation45_spill] sm:$0xff]  ;;  %v10828_v25 = vld [vmem:[#allocation43_spill] sm:$0xff] }
 0x52d   : > { %v3534_v1 = vpop.f32.mrf.mxu0  ;;  %v8903_v0 = vld [vmem:[#allocation3 + $0x2] sm:$0xff]  ;;  %v3204_v52 = vadd.f32 %v10815_v36, %v3166_v54  ;;  %v3355_v49 = vadd.f32 %v10822_v45, %v8808_v38  ;;  %v3169_v38 = vadd.f32 %v10823_v48, %v3131_v29  ;;  %v4662_v27 = vld [vmem:[%s10715_s5 + $0x78] sm:$0xff]  ;;  %v4659_v45 = vld [vmem:[%s10715_s5 + $0x60] sm:$0xff] }
 0x52e   : > { %v8905_v14 = vld [vmem:[#allocation3 + $0x1] sm:$0xff]  ;;  %3706 = vst [vmem:[#allocation3 + $0x10] sm:$0xff] %v8896_v58  ;;  %v3671_v41 = vadd.f32 %v8825_v62, %v3660_v19  ;;  %v3573_v17 = vadd.f32 %v3572_v47, %v3534_v1  ;;  %3802 = vrot.lane.b32.xlu2 %v8903_v0, %s10763_s20  ;;  %v3651_v47 = vpop.f32.mrf.mxu3  ;;  %v2952_v19 = vadd.f32 %v10824_v51, %v2914_v23  ;;  %v6076_v43 = vld [vmem:[%s10715_s5 + $0x198] sm:$0xff] }
 0x52f   : > { %3772 = vrot.lane.b32.xlu1 %v8905_v14, %s10738_s29  ;;  %3742 = vrot.lane.b32.xlu0 %v8905_v14, %s10738_s29  ;;  %3719 = vst.msk [vmem:[#allocation4 + $0x30] sm:$0xff] %vm499_vm0, %v8896_v58  ;;  %v3214_v12 = vmax.f32 %v2987_v55, %v3204_v52  ;;  %v3393_v33 = vadd.f32 %v10825_v2, %v3355_v49  ;;  %v4661_v23 = vld [vmem:[%s10715_s5 + $0x70] sm:$0xff]  ;;  %v4655_v2 = vld [vmem:[%s10715_s5 + $0x40] sm:$0xff] }
 0x530   : > { %v3678_v61 = vmax.f32 %v3671_v41, 0.0  ;;  %v3611_v15 = vadd.f32 %v3610_v8, %v3573_v17  ;;  %3729 = vst.msk [vmem:[#allocation4 + $0x30] sm:$0xff] %vm10742_vm1, %v8896_v58  ;;  %v3575_v3 = vpop.f32.mrf.mxu1  ;;  %v3207_v44 = vadd.f32 %v10826_v57, %v3169_v38  ;;  %v2990_v7 = vadd.f32 %v10827_v22, %v2952_v19  ;;  %4699 = vmatpush.msra.mxu0 %v4662_v27  ;;  %v4657_v48 = vld [vmem:[%s10715_s5 + $0x50] sm:$0xff]  ;;  %v6070_v19 = vld [vmem:[%s10715_s5 + $0x168] sm:$0xff] }
 0x531   : > { %v3613_v28 = vpop.f32.mrf.mxu2  ;;  %v3431_v54 = vadd.f32 %v10828_v25, %v3393_v33  ;;  %4832 = vmatpush.msra.mxu3 %v6076_v43  ;;  %v6071_v38 = vld [vmem:[%s10715_s5 + $0x170] sm:$0xff]  ;;  %v6069_v33 = vld [vmem:[%s10715_s5 + $0x160] sm:$0xff] }
 0x532   : > { %v3689_v35 = vmul.f32 %v8837_v4, %v3678_v61  ;;  %v3649_v13 = vadd.f32 %v3648_v16, %v3611_v15  ;;  %v3215_v21 = vmax.f32 %v2990_v7, %v3207_v44  ;;  %4700 = vmatpush.msra.mxu0 %v4661_v23  ;;  %v4653_v57 = vld [vmem:[%s10715_s5 + $0x30] sm:$0xff]  ;;  %v4652_v7 = vld [vmem:[%s10715_s5 + $0x28] sm:$0xff]  ;;  %v4651_v25 = vld [vmem:[%s10715_s5 + $0x20] sm:$0xff] }
 0x533   : > { %4833 = vmatpush.msra.mxu3 %v6075_v53  ;;  %v6067_v44 = vld [vmem:[%s10715_s5 + $0x150] sm:$0xff] }
 0x534   : > { %v8928_v11 = vadd.f32 %v8843_v60, %v3689_v35  ;;  %v3661_v18 = vmax.f32 %v3437_v59, %v3649_v13  ;;  %v3439_v59 = vmax.f32 %v3215_v21, %v3431_v54  ;;  %v6065_v54 = vld [vmem:[%s10715_s5 + $0x140] sm:$0xff] }
 0x535   : > { %v3537_v26 = vpop.f32.mrf.mxu0  ;;  %v8934_v37 = vld [vmem:[#allocation3 + $0xa] sm:$0xff] }
 0x536   : > { %3707 = vst [vmem:[#allocation3 + $0x18] sm:$0xff] %v8928_v11  ;;  %v3672_v16 = vadd.f32 %v8825_v62, %v3661_v18  ;;  %v3576_v8 = vadd.f32 %v3575_v3, %v3537_v26  ;;  %3892 = vrot.lane.b32.xlu2 %v8852_v30, %s10763_s20  ;;  %v8967_v17 = vld [vmem:[#allocation3 + $0x9] sm:$0xff]  ;;  %v3654_v39 = vpop.f32.mrf.mxu3 }
 0x537   : > { %3862 = vrot.lane.b32.xlu1 %v8852_v30, %s10763_s20  ;;  %3832 = vrot.lane.b32.xlu0 %v8903_v0, %s10763_s20  ;;  %4157 = vst.msk [vmem:[#allocation4 + $0x8] sm:$0xff] %vm499_vm0, %v8934_v37  ;;  %v3438_v30 = vmax.f32 %v3214_v12, %v3428_v46  ;;  %v4660_v46 = vld [vmem:[%s10715_s5 + $0x68] sm:$0xff]  ;;  %v6072_v12 = vld [vmem:[%s10715_s5 + $0x178] sm:$0xff] }
 0x538   : > { %v3679_v24 = vmax.f32 %v3672_v16, 0.0  ;;  %v3614_v20 = vadd.f32 %v3613_v28, %v3576_v8  ;;  %4167 = vst.msk [vmem:[#allocation4 + $0x8] sm:$0xff] %vm10742_vm1, %v8934_v37  ;;  %v3578_v31 = vpop.f32.mrf.mxu1  ;;  %v6074_v28 = vld [vmem:[%s10715_s5 + $0x188] sm:$0xff]  ;;  %4701 = vmatpush.msra.mxu0 %v4660_v46  ;;  %v6073_v16 = vld [vmem:[%s10715_s5 + $0x180] sm:$0xff]  ;;  %v4658_v8 = vld [vmem:[%s10715_s5 + $0x58] sm:$0xff] }
 0x539   : > { %4177 = vst.msk [vmem:[#allocation4 + $0x8] sm:$0xff] %vm529_vm2, %v8874_v50  ;;  %v3616_v34 = vpop.f32.mrf.mxu2  ;;  %4834 = vmatpush.msra.mxu3 %v6074_v28  ;;  %v4680_v46 = vld [vmem:[%s10715_s5 + $0x108] sm:$0xff]  ;;  %v4679_v28 = vld [vmem:[%s10715_s5 + $0x100] sm:$0xff] }
 0x53a   : > { %v3690_v5 = vmul.f32 %v8837_v4, %v3679_v24  ;;  %v3652_v40 = vadd.f32 %v3651_v47, %v3614_v20  ;;  %4187 = vst.msk [vmem:[#allocation4 + $0x8] sm:$0xff] %vm544_vm3, %v8874_v50  ;;  %4702 = vmatpush.msra.mxu0 %v4659_v45  ;;  %v4656_v24 = vld [vmem:[%s10715_s5 + $0x48] sm:$0xff] }
 0x53b   : > { %3720 = vst.msk [vmem:[#allocation4 + $0x48] sm:$0xff] %vm499_vm0, %v8928_v11  ;;  %4835 = vmatpush.msra.mxu3 %v6073_v16 }
 0x53c   : > { %v8962_v56 = vadd.f32 %v8843_v60, %v3690_v5  ;;  %v3662_v1 = vmax.f32 %v3438_v30, %v3652_v40  ;;  %3730 = vst.msk [vmem:[#allocation4 + $0x48] sm:$0xff] %vm10742_vm1, %v8928_v11  ;;  %4703 = vmatpush.msra.mxu0 %v4658_v8  ;;  %v4654_v5 = vld [vmem:[%s10715_s5 + $0x38] sm:$0xff] }
 0x53d   : > { %v3540_v41 = vpop.f32.mrf.mxu0  ;;  %v8969_v6 = vld [vmem:[#allocation3 + $0x12] sm:$0xff]  ;;  %4836 = vmatpush.msra.mxu3 %v6072_v12 }
 0x53e   : > { %3708 = vst [vmem:[#allocation3 + $0x20] sm:$0xff] %v8962_v56  ;;  %v3673_v61 = vadd.f32 %v8825_v62, %v3662_v1  ;;  %v3579_v15 = vadd.f32 %v3578_v31, %v3540_v41  ;;  %3744 = vrot.lane.b32.xlu2 %v8967_v17, %s10738_s29  ;;  %v4174_v29 = vld [vmem:[#allocation3 + $0x18] sm:$0xff]  ;;  %4704 = vmatpush.msra.mxu0 %v4657_v48  ;;  %v6068_v31 = vld [vmem:[%s10715_s5 + $0x158] sm:$0xff] }
 0x53f   : > { %3952 = vrot.lane.b32.xlu1 %v8905_v14, %s10740_s27  ;;  %3922 = vrot.lane.b32.xlu0 %v8905_v14, %s10740_s27  ;;  %4158 = vst.msk [vmem:[#allocation4 + $0x20] sm:$0xff] %vm499_vm0, %v8969_v6  ;;  %v9063_v47 = vld [vmem:[#allocation3 + $0x11] sm:$0xff] }
 0x540   : > { %v3680_v9 = vmax.f32 %v3673_v61, 0.0  ;;  %v3617_v3 = vadd.f32 %v3616_v34, %v3579_v15  ;;  %4168 = vst.msk [vmem:[#allocation4 + $0x20] sm:$0xff] %vm10742_vm1, %v8969_v6  ;;  %4837 = vmatpush.msra.mxu3 %v6071_v38  ;;  %4705 = vmatpush.msra.mxu0 %v4656_v24  ;;  %v4650_v61 = vld [vmem:[%s10715_s5 + $0x18] sm:$0xff]  ;;  %v4649_v34 = vld [vmem:[%s10715_s5 + $0x10] sm:$0xff] }
 0x541   : > { %4178 = vst.msk [vmem:[#allocation4 + $0x20] sm:$0xff] %vm529_vm2, %v8896_v58  ;;  %v6064_v15 = vld [vmem:[%s10715_s5 + $0x138] sm:$0xff] }
 0x542   : > { %v3691_v35 = vmul.f32 %v8837_v4, %v3680_v9  ;;  %v3655_v13 = vadd.f32 %v3654_v39, %v3617_v3  ;;  %4188 = vst.msk [vmem:[#allocation4 + $0x20] sm:$0xff] %vm544_vm3, %v8896_v58  ;;  %4838 = vmatpush.msra.mxu3 %v6070_v19  ;;  %4706 = vmatpush.msra.mxu0 %v4655_v2  ;;  %v6063_v9 = vld [vmem:[%s10715_s5 + $0x130] sm:$0xff] }
 0x544   : > { %v3702_v14 = vadd.f32 %v8843_v60, %v3691_v35  ;;  %v3663_v42 = vmax.f32 %v3439_v59, %v3655_v13  ;;  %4839 = vmatpush.msra.mxu3 %v6069_v33  ;;  %4707 = vmatpush.msra.mxu0 %v4654_v5  ;;  %v4648_v59 = vld [vmem:[%s10715_s5 + $0x8] sm:$0xff]  ;;  %v4647_v13 = vld [vmem:[%s10715_s5] sm:$0xff]  ;;  %v4678_v5 = vld [vmem:[%s10715_s5 + $0xf8] sm:$0xff] }
 0x545   : > { %v8990_v36 = vld [vmem:[#allocation3 + $0x1a] sm:$0xff]  ;;  %4731 = vmatpush.msra.mxu1 %v4678_v5 }
 0x546   : > { %3709 = vst [vmem:[#allocation3 + $0x28] sm:$0xff] %v3702_v14  ;;  %v3674_v52 = vadd.f32 %v8825_v62, %v3663_v42  ;;  %4012 = vrot.lane.b32.xlu2 %v8903_v0, %s10764_s30  ;;  %v9001_v10 = vld [vmem:[#allocation3 + $0x20] sm:$0xff]  ;;  %4840 = vmatpush.msra.mxu3 %v6068_v31  ;;  %v6061_v14 = vld [vmem:[%s10715_s5 + $0x120] sm:$0xff] }
 0x547   : > { %3774 = vrot.lane.b32.xlu1 %v8967_v17, %s10738_s29  ;;  %3982 = vrot.lane.b32.xlu0 %v8903_v0, %s10764_s30  ;;  %4159 = vst.msk [vmem:[#allocation4 + $0x38] sm:$0xff] %vm499_vm0, %v8990_v36  ;;  %v9171_v40 = vld [vmem:[#allocation3 + $0x19] sm:$0xff] }
 0x548   : > { %v3681_v63 = vmax.f32 %v3674_v52, 0.0  ;;  %4169 = vst.msk [vmem:[#allocation4 + $0x38] sm:$0xff] %vm10742_vm1, %v8990_v36  ;;  %4708 = vmatpush.msra.mxu0 %v4653_v57  ;;  %4841 = vmatpush.msra.mxu3 %v6067_v44  ;;  %v6062_v35 = vld [vmem:[%s10715_s5 + $0x128] sm:$0xff] }
 0x549   : > { %4179 = vst.msk [vmem:[#allocation4 + $0x38] sm:$0xff] %vm529_vm2, %v4174_v29  ;;  %v4676_v31 = vld [vmem:[%s10715_s5 + $0xe8] sm:$0xff] }
 0x54a   : > { %v3692_v62 = vmul.f32 %v8837_v4, %v3681_v63  ;;  %4189 = vst.msk [vmem:[#allocation4 + $0x38] sm:$0xff] %vm544_vm3, %v4174_v29  ;;  %4709 = vmatpush.msra.mxu0 %v4652_v7  ;;  %v4674_v7 = vld [vmem:[%s10715_s5 + $0xd8] sm:$0xff] }
 0x54b   : > { %3721 = vst.msk [vmem:[#allocation4 + $0x60] sm:$0xff] %vm499_vm0, %v9001_v10 }
 0x54c   : > { %v3703_v0 = vadd.f32 %v8843_v60, %v3692_v62  ;;  %3731 = vst.msk [vmem:[#allocation4 + $0x60] sm:$0xff] %vm10742_vm1, %v9001_v10  ;;  %4710 = vmatpush.msra.mxu0 %v4651_v25 }
 0x54d   : > { %v9013_v18 = vld [vmem:[#allocation3 + $0x22] sm:$0xff] }
 0x54e   : > { %3710 = vst [vmem:[#allocation3 + $0x30] sm:$0xff] %v3703_v0  ;;  %3834 = vrot.lane.b32.xlu2 %v8934_v37, %s10763_s20  ;;  %v9039_v60 = vld [vmem:[#allocation3 + $0x28] sm:$0xff]  ;;  %4711 = vmatpush.msra.mxu0 %v4650_v61  ;;  %v4671_v61 = vld [vmem:[%s10715_s5 + $0xc0] sm:$0xff] }
 0x54f   : > { %4042 = vrot.lane.b32.xlu1 %v8874_v50, %s10762_s26  ;;  %3804 = vrot.lane.b32.xlu0 %v8934_v37, %s10763_s20  ;;  %4160 = vst.msk [vmem:[#allocation4 + $0x50] sm:$0xff] %vm499_vm0, %v9013_v18  ;;  %v9337_v19 = vld [vmem:[#allocation3 + $0x21] sm:$0xff] }
 0x550   : > { %4170 = vst.msk [vmem:[#allocation4 + $0x50] sm:$0xff] %vm10742_vm1, %v9013_v18  ;;  %4712 = vmatpush.msra.mxu0 %v4649_v34  ;;  %v4669_v34 = vld [vmem:[%s10715_s5 + $0xb0] sm:$0xff] }
 0x551   : > { %4180 = vst.msk [vmem:[#allocation4 + $0x50] sm:$0xff] %vm529_vm2, %v9001_v10 }
 0x552   : > { %4190 = vst.msk [vmem:[#allocation4 + $0x50] sm:$0xff] %vm544_vm3, %v9001_v10  ;;  %4713 = vmatpush.msra.mxu0 %v4648_v59 }
 0x554   : > { %4714 = vmatpush.msra.mxu0 %v4647_v13  ;;  %v4666_v13 = vld [vmem:[%s10715_s5 + $0x98] sm:$0xff] }
 0x555   : > { %v9029_v4 = vld [vmem:[#allocation3 + $0x2a] sm:$0xff] }
 0x556   : > { %4102 = vrot.lane.b32.xlu2 %v8967_v17, %s10745_s14  ;;  %4161 = vst.msk [vmem:[#allocation4 + $0x68] sm:$0xff] %vm499_vm0, %v9029_v4 }
 0x557   : > { %3864 = vrot.lane.b32.xlu1 %v8874_v50, %s10763_s20  ;;  %4072 = vrot.lane.b32.xlu0 %v8874_v50, %s10762_s26  ;;  %4171 = vst.msk [vmem:[#allocation4 + $0x68] sm:$0xff] %vm10742_vm1, %v9029_v4 }
 0x558   : > { %4181 = vst.msk [vmem:[#allocation4 + $0x68] sm:$0xff] %vm529_vm2, %v9039_v60 }
 0x559   : > { %4191 = vst.msk [vmem:[#allocation4 + $0x68] sm:$0xff] %vm544_vm3, %v9039_v60 }
 0x55e   : > { %3924 = vrot.lane.b32.xlu2 %v8967_v17, %s10740_s27 }
 0x55f   : > { %4132 = vrot.lane.b32.xlu1 %v8967_v17, %s10745_s14  ;;  %3894 = vrot.lane.b32.xlu0 %v8874_v50, %s10763_s20 }
 0x566   : > { %4232 = vrot.lane.b32.xlu2 %v8967_v17, %s10738_s29 }
 0x567   : > { %3954 = vrot.lane.b32.xlu1 %v8967_v17, %s10740_s27  ;;  %4202 = vrot.lane.b32.xlu0 %v8967_v17, %s10738_s29  ;;  %v6066_v17 = vld [vmem:[%s10715_s5 + $0x148] sm:$0xff] }
 0x568   : > { %4842 = vmatpush.msra.mxu3 %v6066_v17  ;;  %v4672_v17 = vld [vmem:[%s10715_s5 + $0xc8] sm:$0xff] }
 0x56a   : > { %4843 = vmatpush.msra.mxu3 %v6065_v54 }
 0x56c   : > { %4844 = vmatpush.msra.mxu3 %v6064_v15 }
 0x56e   : > { %4262 = vrot.lane.b32.xlu2 %v8934_v37, %s10763_s20  ;;  %4845 = vmatpush.msra.mxu3 %v6063_v9  ;;  %v4668_v9 = vld [vmem:[%s10715_s5 + $0xa8] sm:$0xff] }
 0x56f   : > { %3984 = vrot.lane.b32.xlu1 %v8934_v37, %s10764_s30  ;;  %3746 = vrot.lane.b32.xlu0 %v9063_v47, %s10738_s29 }
 0x570   : > { %4846 = vmatpush.msra.mxu3 %v6062_v35  ;;  %v4667_v35 = vld [vmem:[%s10715_s5 + $0xa0] sm:$0xff] }
 0x572   : > { %4847 = vmatpush.msra.mxu3 %v6061_v14  ;;  %v4665_v14 = vld [vmem:[%s10715_s5 + $0x90] sm:$0xff] }
 0x576   : > { %4014 = vrot.lane.b32.xlu2 %v8934_v37, %s10764_s30 }
 0x577   : > { %3776 = vrot.lane.b32.xlu1 %v9063_v47, %s10738_s29  ;;  %4562 = vrot.lane.b32.xlu0 %v9063_v47, %s10745_s14  ;;  %s5800_s29 = scalar_lea.hbm %s10725_s15, %s6443_s22 }
 0x57e   : > { %3806 = vrot.lane.b32.xlu2 %v8969_v6, %s10763_s20 }
 0x57f   : > { %4592 = vrot.lane.b32.xlu1 %v9063_v47, %s10745_s14  ;;  %4292 = vrot.lane.b32.xlu0 %v8934_v37, %s10763_s20 }
 0x586   : > { %3836 = vrot.lane.b32.xlu2 %v8969_v6, %s10763_s20 }
 0x587   : > { %4322 = vrot.lane.b32.xlu1 %v8896_v58, %s10764_s30  ;;  %4044 = vrot.lane.b32.xlu0 %v8896_v58, %s10762_s26 }
 0x588   : > { %v3803_v50 = vpop.permute.xlu2 %3802 }
 0x58e   : > { %3866 = vrot.lane.b32.xlu2 %v8896_v58, %s10763_s20 }
 0x58f   : > { %4352 = vrot.lane.b32.xlu1 %v8896_v58, %s10764_s30  ;;  %4074 = vrot.lane.b32.xlu0 %v8896_v58, %s10762_s26 }
 0x590   : > { %v3893_v32 = vpop.permute.xlu2 %3892 }
 0x596   : > { %3896 = vrot.lane.b32.xlu2 %v8896_v58, %s10763_s20 }
 0x597   : > { %4382 = vrot.lane.b32.xlu1 %v9063_v47, %s10747_s21  ;;  %4104 = vrot.lane.b32.xlu0 %v9063_v47, %s10745_s14 }
 0x598   : > { %v3745_v55 = vpop.permute.xlu2 %3744 }
 0x599   : > { %3758 = vst.msk [vmem:[#allocation4 + $0x18] sm:$0xff] %vm529_vm2, %v3745_v55  ;;  %v4681_v55 = vld [vmem:[%s10715_s5 + $0x110] sm:$0xff] }
 0x59e   : > { %3926 = vrot.lane.b32.xlu2 %v9063_v47, %s10740_s27 }
 0x59f   : > { %4412 = vrot.lane.b32.xlu1 %v9063_v47, %s10747_s21  ;;  %4134 = vrot.lane.b32.xlu0 %v9063_v47, %s10745_s14 }
 0x5a0   : > { %v9122_v37 = vpop.permute.xlu2 %4012 }
 0x5a1   : > { %v3773_v26 = vpop.permute.xlu1 %3772  ;;  %v3743_v49 = vpop.permute.xlu0 %3742 }
 0x5a2   : > { %3757 = vst.msk [vmem:[#allocation4] sm:$0xff] %vm529_vm2, %v3743_v49 }
 0x5a3   : > { %3787 = vst.msk [vmem:[#allocation4] sm:$0xff] %vm544_vm3, %v3773_v26 }
 0x5a4   : > { %3817 = vst.msk [vmem:[#allocation4] sm:$0xff] %vm587_vm4, %v3803_v50 }
 0x5a6   : > { %3956 = vrot.lane.b32.xlu2 %v9063_v47, %s10740_s27 }
 0x5a7   : > { %4442 = vrot.lane.b32.xlu1 %v8969_v6, %s10762_s26  ;;  %4204 = vrot.lane.b32.xlu0 %v9063_v47, %s10829_s17 }
 0x5a8   : > { %v9154_v51 = vpop.permute.xlu2 %3834 }
 0x5a9   : > { %v3863_v20 = vpop.permute.xlu1 %3862  ;;  %v3833_v30 = vpop.permute.xlu0 %3832 }
 0x5aa   : > { %3847 = vst.msk [vmem:[#allocation4] sm:$0xff] %vm630_vm5, %v3833_v30 }
 0x5ab   : > { %3877 = vst.msk [vmem:[#allocation4] sm:$0xff] %vm10743_vm6, %v3863_v20 }
 0x5ac   : > { %3907 = vst.msk [vmem:[#allocation4] sm:$0xff] %vm716_vm7, %v3893_v32  ;;  %v4682_v32 = vld [vmem:[%s10715_s5 + $0x118] sm:$0xff] }
 0x5ad   : > { %4775 = vmatpush.msra.mxu2 %v4682_v32 }
 0x5ae   : > { %3748 = vrot.lane.b32.xlu2 %v9171_v40, %s10829_s17 }
 0x5af   : > { %4472 = vrot.lane.b32.xlu1 %v8969_v6, %s10762_s26  ;;  %4234 = vrot.lane.b32.xlu0 %v9063_v47, %s10829_s17 }
 0x5b0   : > { %v4103_v22 = vpop.permute.xlu2 %4102  ;;  %4776 = vmatpush.msra.mxu2 %v4681_v55 }
 0x5b1   : > { %v3953_v1 = vpop.permute.xlu1 %3952  ;;  %v3923_v41 = vpop.permute.xlu0 %3922 }
 0x5b2   : > { %3937 = vst.msk [vmem:[#allocation4] sm:$0xff] %vm759_vm8, %v3923_v41  ;;  %4777 = vmatpush.msra.mxu2 %v4680_v46  ;;  %v4673_v41 = vld [vmem:[%s10715_s5 + $0xd0] sm:$0xff] }
 0x5b3   : > { %3967 = vst.msk [vmem:[#allocation4] sm:$0xff] %vm802_vm9, %v3953_v1  ;;  %v4675_v1 = vld [vmem:[%s10715_s5 + $0xe0] sm:$0xff] }
 0x5b4   : > { %4778 = vmatpush.msra.mxu2 %v4679_v28 }
 0x5b6   : > { %4502 = vrot.lane.b32.xlu2 %v8896_v58, %s10762_s26 }
 0x5b7   : > { %4264 = vrot.lane.b32.xlu1 %v8969_v6, %s10763_s20  ;;  %3986 = vrot.lane.b32.xlu0 %v8969_v6, %s10764_s30 }
 0x5b8   : > { %v3925_v21 = vpop.permute.xlu2 %3924 }
 0x5b9   : > { %v3775_v39 = vpop.permute.xlu1 %3774  ;;  %v3983_v3 = vpop.permute.xlu0 %3982 }
 0x5ba   : > { %3788 = vst.msk [vmem:[#allocation4 + $0x18] sm:$0xff] %vm544_vm3, %v3775_v39 }
 0x5bb   : > { %3997 = vst.msk [vmem:[#allocation4] sm:$0xff] %vm845_vm10, %v3983_v3 }
 0x5bc   : > { %4027 = vst.msk [vmem:[#allocation4] sm:$0xff] %vm888_vm11, %v9122_v37 }
 0x5be   : > { %4016 = vrot.lane.b32.xlu2 %v8969_v6, %s10764_s30 }
 0x5bf   : > { %3778 = vrot.lane.b32.xlu1 %v9171_v40, %s10829_s17  ;;  %4564 = vrot.lane.b32.xlu0 %v9171_v40, %s10745_s14 }
 0x5c0   : > { %v4233_v52 = vpop.permute.xlu2 %4232 }
 0x5c1   : > { %v4043_v42 = vpop.permute.xlu1 %4042  ;;  %v3805_v63 = vpop.permute.xlu0 %3804 }
 0x5c2   : > { %4057 = vst.msk [vmem:[#allocation4] sm:$0xff] %vm931_vm12, %v4043_v42 }
 0x5c3   : > { %3818 = vst.msk [vmem:[#allocation4 + $0x18] sm:$0xff] %vm587_vm4, %v3805_v63  ;;  %v4664_v63 = vld [vmem:[%s10715_s5 + $0x88] sm:$0xff] }
 0x5c4   : > { %3848 = vst.msk [vmem:[#allocation4 + $0x18] sm:$0xff] %vm630_vm5, %v9154_v51 }
 0x5c6   : > { %4594 = vrot.lane.b32.xlu2 %v9171_v40, %s10745_s14 }
 0x5c7   : > { %4532 = vrot.lane.b32.xlu1 %v8896_v58, %s10762_s26  ;;  %4294 = vrot.lane.b32.xlu0 %v8969_v6, %s10763_s20 }
 0x5c8   : > { %v4263_v62 = vpop.permute.xlu2 %4262 }
 0x5c9   : > { %v3865_v29 = vpop.permute.xlu1 %3864  ;;  %v4073_v0 = vpop.permute.xlu0 %4072 }
 0x5ca   : > { %3878 = vst.msk [vmem:[#allocation4 + $0x18] sm:$0xff] %vm10743_vm6, %v3865_v29 }
 0x5cb   : > { %4087 = vst.msk [vmem:[#allocation4] sm:$0xff] %vm974_vm13, %v4073_v0 }
 0x5cc   : > { %4117 = vst.msk [vmem:[#allocation4] sm:$0xff] %vm1017_vm14, %v4103_v22 }
 0x5ce   : > { %4324 = vrot.lane.b32.xlu2 %v8928_v11, %s10764_s30 }
 0x5cf   : > { %4046 = vrot.lane.b32.xlu1 %v8928_v11, %s10762_s26  ;;  %3808 = vrot.lane.b32.xlu0 %v8990_v36, %s10763_s20 }
 0x5d0   : > { %v4015_v47 = vpop.permute.xlu2 %4014 }
 0x5d1   : > { %v4133_v58 = vpop.permute.xlu1 %4132  ;;  %v3895_v50 = vpop.permute.xlu0 %3894 }
 0x5d2   : > { %4147 = vst.msk [vmem:[#allocation4] sm:$0xff] %vm1060_vm15, %v4133_v58 }
 0x5d3   : > { %3908 = vst.msk [vmem:[#allocation4 + $0x18] sm:$0xff] %vm716_vm7, %v3895_v50 }
 0x5d4   : > { %3938 = vst.msk [vmem:[#allocation4 + $0x18] sm:$0xff] %vm759_vm8, %v3925_v21 }
 0x5d6   : > { %4354 = vrot.lane.b32.xlu2 %v8928_v11, %s10764_s30 }
 0x5d7   : > { %4076 = vrot.lane.b32.xlu1 %v8928_v11, %s10762_s26  ;;  %3838 = vrot.lane.b32.xlu0 %v8990_v36, %s10763_s20 }
 0x5d8   : > { %v3807_v43 = vpop.permute.xlu2 %3806 }
 0x5d9   : > { %v3955_v27 = vpop.permute.xlu1 %3954  ;;  %v9276_v23 = vld [vmem:[#allocation4] sm:$0xff]  ;;  %v4203_v53 = vpop.permute.xlu0 %4202 }
 0x5da   : > { %3968 = vst.msk [vmem:[#allocation4 + $0x18] sm:$0xff] %vm802_vm9, %v3955_v27  ;;  %4715 = vmatmul.f32.vlgmr.msra.gmra.mxu0 %v9276_v23  ;;  %4848 = vmatmul.f32.vlgmr.msra.gmra.mxu3 %v9276_v23 }
 0x5db   : > { %4217 = vst.msk [vmem:[#allocation4 + $0x8] sm:$0xff] %vm587_vm4, %v4203_v53 }
 0x5dc   : > { %4247 = vst.msk [vmem:[#allocation4 + $0x8] sm:$0xff] %vm630_vm5, %v4233_v52 }
 0x5dd   : > { %4277 = vst.msk [vmem:[#allocation4 + $0x8] sm:$0xff] %vm10743_vm6, %v4263_v62  ;;  %v4663_v62 = vld [vmem:[%s10715_s5 + $0x80] sm:$0xff] }
 0x5de   : > { %4384 = vrot.lane.b32.xlu2 %v9171_v40, %s10747_s21 }
 0x5df   : > { %4106 = vrot.lane.b32.xlu1 %v9171_v40, %s10745_s14  ;;  %3868 = vrot.lane.b32.xlu0 %v8928_v11, %s10763_s20 }
 0x5e0   : > { %v3837_v37 = vpop.permute.xlu2 %3836 }
 0x5e1   : > { %v3985_v26 = vpop.permute.xlu1 %3984  ;;  %v3747_v45 = vpop.permute.xlu0 %3746 }
 0x5e2   : > { %3998 = vst.msk [vmem:[#allocation4 + $0x18] sm:$0xff] %vm845_vm10, %v3985_v26 }
 0x5e3   : > { %4028 = vst.msk [vmem:[#allocation4 + $0x18] sm:$0xff] %vm888_vm11, %v4015_v47 }
 0x5e4   : > { %3759 = vst.msk [vmem:[#allocation4 + $0x30] sm:$0xff] %vm529_vm2, %v3747_v45 }
 0x5e6   : > { %4414 = vrot.lane.b32.xlu2 %v9171_v40, %s10747_s21 }
 0x5e7   : > { %4136 = vrot.lane.b32.xlu1 %v9171_v40, %s10745_s14  ;;  %3898 = vrot.lane.b32.xlu0 %v8928_v11, %s10763_s20 }
 0x5e8   : > { %v3867_v49 = vpop.permute.xlu2 %3866 }
 0x5e9   : > { %v3777_v16 = vpop.permute.xlu1 %3776  ;;  %v4563_v8 = vpop.permute.xlu0 %4562 }
 0x5ea   : > { %3789 = vst.msk [vmem:[#allocation4 + $0x30] sm:$0xff] %vm544_vm3, %v3777_v16  ;;  %v4555_v16 = vld [vmem:[#allocation3 + $0x29] sm:$0xff] }
 0x5eb   : > { %3819 = vst.msk [vmem:[#allocation4 + $0x30] sm:$0xff] %vm587_vm4, %v3807_v43 }
 0x5ec   : > { %3849 = vst.msk [vmem:[#allocation4 + $0x30] sm:$0xff] %vm630_vm5, %v3837_v37 }
 0x5ed   : > { %4577 = vst.msk [vmem:[#allocation4 + $0x10] sm:$0xff] %vm499_vm0, %v4563_v8 }
 0x5ee   : > { %3879 = vst.msk [vmem:[#allocation4 + $0x30] sm:$0xff] %vm10743_vm6, %v3867_v49  ;;  %4444 = vrot.lane.b32.xlu2 %v8990_v36, %s10762_s26 }
 0x5ef   : > { %4206 = vrot.lane.b32.xlu1 %v9171_v40, %s10829_s17  ;;  %3928 = vrot.lane.b32.xlu0 %v9171_v40, %s10830_s0 }
 0x5f0   : > { %v3897_v12 = vpop.permute.xlu2 %3896 }
 0x5f1   : > { %v4593_v48 = vpop.permute.xlu1 %4592  ;;  %3909 = vst.msk [vmem:[#allocation4 + $0x30] sm:$0xff] %vm716_vm7, %v3897_v12  ;;  %v4293_v38 = vpop.permute.xlu0 %4292 }
 0x5f2   : > { %4607 = vst.msk [vmem:[#allocation4 + $0x10] sm:$0xff] %vm10742_vm1, %v4593_v48  ;;  %vm10744_vm1 = vcmask 261120  }
 0x5f3   : > { %4617 = vst.msk [vmem:[#allocation4 + $0x10] sm:$0xff] %vm529_vm2, %v8969_v6 }
 0x5f4   : > { %4627 = vst.msk [vmem:[#allocation4 + $0x10] sm:$0xff] %vm544_vm3, %v8969_v6 }
 0x5f5   : > { %4307 = vst.msk [vmem:[#allocation4 + $0x8] sm:$0xff] %vm716_vm7, %v4293_v38 }
 0x5f6   : > { %4474 = vrot.lane.b32.xlu2 %v8990_v36, %s10762_s26 }
 0x5f7   : > { %4236 = vrot.lane.b32.xlu1 %v9171_v40, %s10829_s17  ;;  %3958 = vrot.lane.b32.xlu0 %v9171_v40, %s10830_s0  ;;  %v4677_v40 = vld [vmem:[%s10715_s5 + $0xf0] sm:$0xff] }
 0x5f8   : > { %v3927_v24 = vpop.permute.xlu2 %3926  ;;  %4732 = vmatpush.msra.mxu1 %v4677_v40 }
 0x5f9   : > { %v4323_v20 = vpop.permute.xlu1 %4322  ;;  %3939 = vst.msk [vmem:[#allocation4 + $0x30] sm:$0xff] %vm759_vm8, %v3927_v24  ;;  %v4045_v51 = vpop.permute.xlu0 %4044 }
 0x5fa   : > { %4337 = vst.msk [vmem:[#allocation4 + $0x8] sm:$0xff] %vm759_vm8, %v4323_v20  ;;  %4733 = vmatpush.msra.mxu1 %v4676_v31 }
 0x5fb   : > { %4058 = vst.msk [vmem:[#allocation4 + $0x18] sm:$0xff] %vm931_vm12, %v4045_v51  ;;  %v4634_v6 = vld [vmem:[#allocation4 + $0x10] sm:$0xff] }
 0x5fc   : > { %6056 = vmatmul.msk.f32.vlgmr.msra.gmra.mxu2 %vm10744_vm1, %v4634_v6  ;;  %4734 = vmatpush.msra.mxu1 %v4675_v1 }
 0x5fe   : > { %4266 = vrot.lane.b32.xlu2 %v8990_v36, %s10763_s20  ;;  %4735 = vmatpush.msra.mxu1 %v4674_v7 }
 0x5ff   : > { %3988 = vrot.lane.b32.xlu1 %v8990_v36, %s10764_s30  ;;  %3750 = vrot.lane.b32.xlu0 %v9337_v19, %s10829_s17 }
 0x600   : > { %v3957_v30 = vpop.permute.xlu2 %3956  ;;  %4736 = vmatpush.msra.mxu1 %v4673_v41 }
 0x601   : > { %v4353_v2 = vpop.permute.xlu1 %4352  ;;  %3969 = vst.msk [vmem:[#allocation4 + $0x30] sm:$0xff] %vm802_vm9, %v3957_v30  ;;  %v4075_v33 = vpop.permute.xlu0 %4074 }
 0x602   : > { %4367 = vst.msk [vmem:[#allocation4 + $0x8] sm:$0xff] %vm802_vm9, %v4353_v2  ;;  %4737 = vmatpush.msra.mxu1 %v4672_v17 }
 0x603   : > { %4088 = vst.msk [vmem:[#allocation4 + $0x18] sm:$0xff] %vm974_vm13, %v4075_v33 }
 0x604   : > { %4738 = vmatpush.msra.mxu1 %v4671_v61 }
 0x606   : > { %3780 = vrot.lane.b32.xlu2 %v9337_v19, %s10829_s17 }
 0x607   : > { %4566 = vrot.lane.b32.xlu1 %v9337_v19, %s10745_s14  ;;  %4504 = vrot.lane.b32.xlu0 %v8928_v11, %s10762_s26 }
 0x608   : > { %v3749_v44 = vpop.permute.xlu2 %3748 }
 0x609   : > { %v4383_v57 = vpop.permute.xlu1 %4382  ;;  %v4105_v22 = vpop.permute.xlu0 %4104  ;;  %3760 = vst.msk [vmem:[#allocation4 + $0x48] sm:$0xff] %vm529_vm2, %v3749_v44 }
 0x60a   : > { %4397 = vst.msk [vmem:[#allocation4 + $0x8] sm:$0xff] %vm845_vm10, %v4383_v57 }
 0x60b   : > { %4118 = vst.msk [vmem:[#allocation4 + $0x18] sm:$0xff] %vm1017_vm14, %v4105_v22  ;;  %v4556_v22 = vld [vmem:[#allocation3 + $0x31] sm:$0xff] }
 0x60e   : > { %4534 = vrot.lane.b32.xlu2 %v8928_v11, %s10762_s26  ;;  %v4670_v11 = vld [vmem:[%s10715_s5 + $0xb8] sm:$0xff] }
 0x60f   : > { %4296 = vrot.lane.b32.xlu1 %v8990_v36, %s10763_s20  ;;  %4018 = vrot.lane.b32.xlu0 %v8990_v36, %s10764_s30 }
 0x610   : > { %v4503_v54 = vpop.permute.xlu2 %4502  ;;  %4739 = vmatpush.msra.mxu1 %v4670_v11  ;;  %v4316_v11 = vld [vmem:[#allocation3 + $0x30] sm:$0xff] }
 0x611   : > { %v4413_v25 = vpop.permute.xlu1 %4412  ;;  %v4135_v15 = vpop.permute.xlu0 %4134 }
 0x612   : > { %4427 = vst.msk [vmem:[#allocation4 + $0x8] sm:$0xff] %vm888_vm11, %v4413_v25  ;;  %4740 = vmatpush.msra.mxu1 %v4669_v34 }
 0x613   : > { %4148 = vst.msk [vmem:[#allocation4 + $0x18] sm:$0xff] %vm1060_vm15, %v4135_v15 }
 0x614   : > { %4741 = vmatpush.msra.mxu1 %v4668_v9  ;;  %v9575_v9 = vld [vmem:[#allocation3 + $0x32] sm:$0xff] }
 0x616   : > { %4048 = vrot.lane.b32.xlu2 %v8962_v56, %s10762_s26  ;;  %4742 = vmatpush.msra.mxu1 %v4667_v35 }
 0x617   : > { %3810 = vrot.lane.b32.xlu1 %v9013_v18, %s10763_s20  ;;  %4596 = vrot.lane.b32.xlu0 %v9337_v19, %s10745_s14 }
 0x618   : > { %v4017_v21 = vpop.permute.xlu2 %4016  ;;  %4743 = vmatpush.msra.mxu1 %v4666_v13 }
 0x619   : > { %v4443_v39 = vpop.permute.xlu1 %4442  ;;  %v4205_v3 = vpop.permute.xlu0 %4204 }
 0x61a   : > { %4457 = vst.msk [vmem:[#allocation4 + $0x8] sm:$0xff] %vm931_vm12, %v4443_v39  ;;  %v9401_v59 = vld [vmem:[#allocation4 + $0x18] sm:$0xff]  ;;  %4744 = vmatpush.msra.mxu1 %v4665_v14 }
 0x61b   : > { %4218 = vst.msk [vmem:[#allocation4 + $0x20] sm:$0xff] %vm587_vm4, %v4205_v3  ;;  %4718 = vmatmul.f32.gmra.mxu0 %v9401_v59  ;;  %4851 = vmatmul.f32.gmra.mxu3 %v9401_v59 }
 0x61c   : > { %4745 = vmatpush.msra.mxu1 %v4664_v63 }
 0x61e   : > { %4078 = vrot.lane.b32.xlu2 %v8962_v56, %s10762_s26  ;;  %4746 = vmatpush.msra.mxu1 %v4663_v62 }
 0x61f   : > { %3840 = vrot.lane.b32.xlu1 %v9013_v18, %s10763_s20  ;;  %4326 = vrot.lane.b32.xlu0 %v8962_v56, %s10764_s30 }
 0x620   : > { %v4595_v52 = vpop.permute.xlu2 %4594 }
 0x621   : > { %v4473_v42 = vpop.permute.xlu1 %4472  ;;  %v4235_v29 = vpop.permute.xlu0 %4234 }
 0x622   : > { %4487 = vst.msk [vmem:[#allocation4 + $0x8] sm:$0xff] %vm974_vm13, %v4473_v42 }
 0x623   : > { %4517 = vst.msk [vmem:[#allocation4 + $0x8] sm:$0xff] %vm1017_vm14, %v4503_v54 }
 0x624   : > { %4248 = vst.msk [vmem:[#allocation4 + $0x20] sm:$0xff] %vm630_vm5, %v4235_v29 }
 0x626   : > { %4108 = vrot.lane.b32.xlu2 %v9337_v19, %s10745_s14 }
 0x627   : > { %3870 = vrot.lane.b32.xlu1 %v8962_v56, %s10763_s20  ;;  %4356 = vrot.lane.b32.xlu0 %v8962_v56, %s10764_s30 }
 0x628   : > { %v4325_v58 = vpop.permute.xlu2 %4324 }
 0x629   : > { %v4265_v0 = vpop.permute.xlu1 %4264  ;;  %v3987_v47 = vpop.permute.xlu0 %3986 }
 0x62a   : > { %4278 = vst.msk [vmem:[#allocation4 + $0x20] sm:$0xff] %vm10743_vm6, %v4265_v0  ;;  %vm10831_vm6 = vcmask 130112  }
 0x62b   : > { %3999 = vst.msk [vmem:[#allocation4 + $0x30] sm:$0xff] %vm845_vm10, %v3987_v47 }
 0x62c   : > { %4029 = vst.msk [vmem:[#allocation4 + $0x30] sm:$0xff] %vm888_vm11, %v4017_v21 }
 0x62e   : > { %4138 = vrot.lane.b32.xlu2 %v9337_v19, %s10745_s14 }
 0x62f   : > { %3900 = vrot.lane.b32.xlu1 %v8962_v56, %s10763_s20  ;;  %4386 = vrot.lane.b32.xlu0 %v9337_v19, %s10747_s21 }
 0x630   : > { %v4355_v32 = vpop.permute.xlu2 %4354 }
 0x631   : > { %v3779_v50 = vpop.permute.xlu1 %3778  ;;  %v4565_v55 = vpop.permute.xlu0 %4564 }
 0x632   : > { %3790 = vst.msk [vmem:[#allocation4 + $0x48] sm:$0xff] %vm544_vm3, %v3779_v50  ;;  %v6092_v50 = vld [vmem:[%s10715_s5 + $0x218] sm:$0xff] }
 0x633   : > { %4578 = vst.msk [vmem:[#allocation4 + $0x28] sm:$0xff] %vm499_vm0, %v4565_v55  ;;  %v6091_v55 = vld [vmem:[%s10715_s5 + $0x210] sm:$0xff]  ;;  %4864 = vmatpush.msrb.mxu0 %v6092_v50 }
 0x634   : > { %4608 = vst.msk [vmem:[#allocation4 + $0x28] sm:$0xff] %vm10831_vm6, %v4595_v52  ;;  %vm10832_vm6 = vcmask 458112   ;;  %v6120_v50 = vld [vmem:[%s10715_s5 + $0x2d0] sm:$0xff] }
 0x635   : > { %4618 = vst.msk [vmem:[#allocation4 + $0x28] sm:$0xff] %vm529_vm2, %v8990_v36  ;;  %4865 = vmatpush.msrb.mxu0 %v6091_v55  ;;  %v6104_v55 = vld [vmem:[%s10715_s5 + $0x250] sm:$0xff] }
 0x636   : > { %4628 = vst.msk [vmem:[#allocation4 + $0x28] sm:$0xff] %vm544_vm3, %v8990_v36  ;;  %4208 = vrot.lane.b32.xlu2 %v9337_v19, %s10829_s17 }
 0x637   : > { %3930 = vrot.lane.b32.xlu1 %v9337_v19, %s10830_s0  ;;  %4416 = vrot.lane.b32.xlu0 %v9337_v19, %s10747_s21 }
 0x638   : > { %v4385_v27 = vpop.permute.xlu2 %4384 }
 0x639   : > { %v4533_v56 = vpop.permute.xlu1 %4532  ;;  %v4295_v43 = vpop.permute.xlu0 %4294 }
 0x63a   : > { %4547 = vst.msk [vmem:[#allocation4 + $0x8] sm:$0xff] %vm1060_vm15, %v4533_v56  ;;  %v6117_v56 = vld [vmem:[%s10715_s5 + $0x2b8] sm:$0xff] }
 0x63b   : > { %4308 = vst.msk [vmem:[#allocation4 + $0x20] sm:$0xff] %vm716_vm7, %v4295_v43  ;;  %4970 = vmatpush.msrb.mxu2 %v6117_v56  ;;  %v6090_v43 = vld [vmem:[%s10715_s5 + $0x208] sm:$0xff] }
 0x63c   : > { %4338 = vst.msk [vmem:[#allocation4 + $0x20] sm:$0xff] %vm759_vm8, %v4325_v58  ;;  %4866 = vmatpush.msrb.mxu0 %v6090_v43  ;;  %v6119_v43 = vld [vmem:[%s10715_s5 + $0x2c8] sm:$0xff] }
 0x63d   : > { %4368 = vst.msk [vmem:[#allocation4 + $0x20] sm:$0xff] %vm802_vm9, %v4355_v32  ;;  %v9462_v36 = vld [vmem:[#allocation4 + $0x28] sm:$0xff]  ;;  %v6133_v32 = vld [vmem:[%s10715_s5 + $0x338] sm:$0xff] }
 0x63e   : > { %4398 = vst.msk [vmem:[#allocation4 + $0x20] sm:$0xff] %vm845_vm10, %v4385_v27  ;;  %6057 = vmatmul.msk.f32.gmra.mxu2 %vm10744_vm1, %v9462_v36  ;;  %4238 = vrot.lane.b32.xlu2 %v9337_v19, %s10829_s17  ;;  %v6132_v27 = vld [vmem:[%s10715_s5 + $0x330] sm:$0xff] }
 0x63f   : > { %3960 = vrot.lane.b32.xlu1 %v9337_v19, %s10830_s0  ;;  %4446 = vrot.lane.b32.xlu0 %v9013_v18, %s10762_s26 }
 0x640   : > { %v4415_v46 = vpop.permute.xlu2 %4414  ;;  %5002 = vmatpush.msrb.mxu3 %v6133_v32  ;;  %v6078_v32 = vld [vmem:[%s10715_s5 + $0x1a8] sm:$0xff] }
 0x641   : > { %v4047_v53 = vpop.permute.xlu1 %4046  ;;  %v9473_v28 = vld [vmem:[#allocation4 + $0x8] sm:$0xff]  ;;  %v3809_v26 = vpop.permute.xlu0 %3808  ;;  %4428 = vst.msk [vmem:[#allocation4 + $0x20] sm:$0xff] %vm888_vm11, %v4415_v46  ;;  %v6131_v46 = vld [vmem:[%s10715_s5 + $0x328] sm:$0xff] }
 0x642   : > { %4059 = vst.msk [vmem:[#allocation4 + $0x30] sm:$0xff] %vm931_vm12, %v4047_v53  ;;  %4747 = vmatmul.f32.vlgmr.msra.gmra.mxu1 %v9473_v28  ;;  %v6116_v53 = vld [vmem:[%s10715_s5 + $0x2b0] sm:$0xff]  ;;  %5003 = vmatpush.msrb.mxu3 %v6132_v27 }
 0x643   : > { %3820 = vst.msk [vmem:[#allocation4 + $0x48] sm:$0xff] %vm587_vm4, %v3809_v26  ;;  %v6115_v26 = vld [vmem:[%s10715_s5 + $0x2a8] sm:$0xff]  ;;  %4971 = vmatpush.msrb.mxu2 %v6116_v53 }
 0x644   : > { %5004 = vmatpush.msrb.mxu3 %v6131_v46 }
 0x645   : > { %4972 = vmatpush.msrb.mxu2 %v6115_v26  ;;  %v6077_v26 = vld [vmem:[%s10715_s5 + $0x1a0] sm:$0xff] }
 0x646   : > { %4268 = vrot.lane.b32.xlu2 %v9013_v18, %s10763_s20 }
 0x647   : > { %3990 = vrot.lane.b32.xlu1 %v9013_v18, %s10764_s30  ;;  %4476 = vrot.lane.b32.xlu0 %v9013_v18, %s10762_s26 }
 0x648   : > { %v4445_v45 = vpop.permute.xlu2 %4444 }
 0x649   : > { %v4077_v37 = vpop.permute.xlu1 %4076  ;;  %v3839_v49 = vpop.permute.xlu0 %3838  ;;  %4458 = vst.msk [vmem:[#allocation4 + $0x20] sm:$0xff] %vm931_vm12, %v4445_v45  ;;  %v6130_v45 = vld [vmem:[%s10715_s5 + $0x320] sm:$0xff] }
 0x64a   : > { %4089 = vst.msk [vmem:[#allocation4 + $0x30] sm:$0xff] %vm974_vm13, %v4077_v37  ;;  %v6089_v37 = vld [vmem:[%s10715_s5 + $0x200] sm:$0xff]  ;;  %5005 = vmatpush.msrb.mxu3 %v6130_v45 }
 0x64b   : > { %3850 = vst.msk [vmem:[#allocation4 + $0x48] sm:$0xff] %vm630_vm5, %v3839_v49  ;;  %4867 = vmatpush.msrb.mxu0 %v6089_v37  ;;  %v6103_v37 = vld [vmem:[%s10715_s5 + $0x248] sm:$0xff]  ;;  %v6118_v45 = vld [vmem:[%s10715_s5 + $0x2c0] sm:$0xff] }
 0x64e   : > { %4020 = vrot.lane.b32.xlu2 %v9013_v18, %s10764_s30 }
 0x64f   : > { %4568 = vrot.lane.b32.xlu1 %v4555_v16, %s10745_s14  ;;  %4506 = vrot.lane.b32.xlu0 %v9001_v10, %s10762_s26 }
 0x650   : > { %v4475_v12 = vpop.permute.xlu2 %4474 }
 0x651   : > { %v4107_v8 = vpop.permute.xlu1 %4106  ;;  %v3869_v48 = vpop.permute.xlu0 %3868  ;;  %4488 = vst.msk [vmem:[#allocation4 + $0x20] sm:$0xff] %vm974_vm13, %v4475_v12  ;;  %v6088_v12 = vld [vmem:[%s10715_s5 + $0x1f8] sm:$0xff] }
 0x652   : > { %4119 = vst.msk [vmem:[#allocation4 + $0x30] sm:$0xff] %vm1017_vm14, %v4107_v8  ;;  %4868 = vmatpush.msrb.mxu0 %v6088_v12 }
 0x653   : > { %3880 = vst.msk [vmem:[#allocation4 + $0x48] sm:$0xff] %vm10832_vm6, %v3869_v48  ;;  %v6114_v48 = vld [vmem:[%s10715_s5 + $0x2a0] sm:$0xff] }
 0x654   : > { %4973 = vmatpush.msrb.mxu2 %v6114_v48 }
 0x656   : > { %4598 = vrot.lane.b32.xlu2 %v4555_v16, %s10745_s14 }
 0x657   : > { %4536 = vrot.lane.b32.xlu1 %v9001_v10, %s10762_s26  ;;  %4298 = vrot.lane.b32.xlu0 %v9013_v18, %s10763_s20 }
 0x658   : > { %v4267_v24 = vpop.permute.xlu2 %4266 }
 0x659   : > { %v4137_v38 = vpop.permute.xlu1 %4136  ;;  %v3899_v20 = vpop.permute.xlu0 %3898 }
 0x65a   : > { %4149 = vst.msk [vmem:[#allocation4 + $0x30] sm:$0xff] %vm1060_vm15, %v4137_v38  ;;  %v6129_v38 = vld [vmem:[%s10715_s5 + $0x318] sm:$0xff] }
 0x65b   : > { %3910 = vst.msk [vmem:[#allocation4 + $0x48] sm:$0xff] %vm716_vm7, %v3899_v20  ;;  %v6113_v20 = vld [vmem:[%s10715_s5 + $0x298] sm:$0xff]  ;;  %5006 = vmatpush.msrb.mxu3 %v6129_v38 }
 0x65c   : > { %4974 = vmatpush.msrb.mxu2 %v6113_v20  ;;  %v6174_v38 = vld [vmem:[%s10715_s5 + $0x458] sm:$0xff] }
 0x65e   : > { %4080 = vrot.lane.b32.xlu2 %v9039_v60, %s10762_s26 }
 0x65f   : > { %4328 = vrot.lane.b32.xlu1 %v9039_v60, %s10764_s30  ;;  %4050 = vrot.lane.b32.xlu0 %v9039_v60, %s10762_s26 }
 0x660   : > { %v3781_v51 = vpop.permute.xlu2 %3780 }
 0x661   : > { %v4207_v10 = vpop.permute.xlu1 %4206  ;;  %v9509_v6 = vld [vmem:[#allocation4 + $0x30] sm:$0xff]  ;;  %v3929_v19 = vpop.permute.xlu0 %3928 }
 0x662   : > { %4219 = vst.msk [vmem:[#allocation4 + $0x38] sm:$0xff] %vm587_vm4, %v4207_v10  ;;  %4721 = vmatmul.f32.gmra.mxu0 %v9509_v6  ;;  %4854 = vmatmul.f32.gmra.mxu3 %v9509_v6  ;;  %v6128_v10 = vld [vmem:[%s10715_s5 + $0x310] sm:$0xff] }
 0x663   : > { %3940 = vst.msk [vmem:[#allocation4 + $0x48] sm:$0xff] %vm759_vm8, %v3929_v19  ;;  %5007 = vmatpush.msrb.mxu3 %v6128_v10 }
 0x666   : > { %4388 = vrot.lane.b32.xlu2 %v4555_v16, %s10747_s21 }
 0x667   : > { %4110 = vrot.lane.b32.xlu1 %v4555_v16, %s10745_s14  ;;  %4358 = vrot.lane.b32.xlu0 %v9039_v60, %s10764_s30 }
 0x668   : > { %v4535_v2 = vpop.permute.xlu2 %4534 }
 0x669   : > { %v4237_v30 = vpop.permute.xlu1 %4236  ;;  %v3959_v33 = vpop.permute.xlu0 %3958 }
 0x66a   : > { %4249 = vst.msk [vmem:[#allocation4 + $0x38] sm:$0xff] %vm630_vm5, %v4237_v30  ;;  %v6086_v30 = vld [vmem:[%s10715_s5 + $0x1e8] sm:$0xff] }
 0x66b   : > { %3970 = vst.msk [vmem:[#allocation4 + $0x48] sm:$0xff] %vm802_vm9, %v3959_v33 }
 0x66c   : > { %4279 = vst.msk [vmem:[#allocation4 + $0x38] sm:$0xff] %vm10832_vm6, %v4267_v24  ;;  %vm10833_vm6 = vcmask 130112   ;;  %v6087_v24 = vld [vmem:[%s10715_s5 + $0x1f0] sm:$0xff] }
 0x66d   : > { %4869 = vmatpush.msrb.mxu0 %v6087_v24  ;;  %v6173_v24 = vld [vmem:[%s10715_s5 + $0x450] sm:$0xff] }
 0x66e   : > { %4210 = vrot.lane.b32.xlu2 %v4555_v16, %s10829_s17 }
 0x66f   : > { %4418 = vrot.lane.b32.xlu1 %v4555_v16, %s10747_s21  ;;  %4140 = vrot.lane.b32.xlu0 %v4555_v16, %s10745_s14 }
 0x670   : > { %v4049_v40 = vpop.permute.xlu2 %4048  ;;  %4870 = vmatpush.msrb.mxu0 %v6086_v30  ;;  %v6171_v30 = vld [vmem:[%s10715_s5 + $0x440] sm:$0xff] }
 0x671   : > { %v3989_v5 = vpop.permute.xlu1 %3988  ;;  %v3751_v31 = vpop.permute.xlu0 %3750 }
 0x672   : > { %4000 = vst.msk [vmem:[#allocation4 + $0x48] sm:$0xff] %vm845_vm10, %v3989_v5  ;;  %v6127_v5 = vld [vmem:[%s10715_s5 + $0x308] sm:$0xff] }
 0x673   : > { %3761 = vst.msk [vmem:[#allocation4 + $0x60] sm:$0xff] %vm529_vm2, %v3751_v31  ;;  %5008 = vmatpush.msrb.mxu3 %v6127_v5 }
 0x674   : > { %3791 = vst.msk [vmem:[#allocation4 + $0x60] sm:$0xff] %vm544_vm3, %v3781_v51  ;;  %v4716_v51 = vpop.f32.mrf.mxu0 }
 0x676   : > { %4478 = vrot.lane.b32.xlu2 %v9029_v4, %s10762_s26 }
 0x677   : > { %4240 = vrot.lane.b32.xlu1 %v4555_v16, %s10829_s17  ;;  %4448 = vrot.lane.b32.xlu0 %v9029_v4, %s10762_s26 }
 0x678   : > { %v4079_v44 = vpop.permute.xlu2 %4078 }
 0x679   : > { %v4567_v57 = vpop.permute.xlu1 %4566  ;;  %v4505_v1 = vpop.permute.xlu0 %4504 }
 0x67a   : > { %4579 = vst.msk [vmem:[#allocation4 + $0x40] sm:$0xff] %vm499_vm0, %v4567_v57  ;;  %v6085_v57 = vld [vmem:[%s10715_s5 + $0x1e0] sm:$0xff] }
 0x67b   : > { %4518 = vst.msk [vmem:[#allocation4 + $0x20] sm:$0xff] %vm1017_vm14, %v4505_v1  ;;  %4871 = vmatpush.msrb.mxu0 %v6085_v57  ;;  %v6168_v57 = vld [vmem:[%s10715_s5 + $0x428] sm:$0xff] }
 0x67c   : > { %4548 = vst.msk [vmem:[#allocation4 + $0x20] sm:$0xff] %vm1060_vm15, %v4535_v2  ;;  %v6112_v2 = vld [vmem:[%s10715_s5 + $0x290] sm:$0xff] }
 0x67d   : > { %4975 = vmatpush.msrb.mxu2 %v6112_v2  ;;  %v6095_v2 = vld [vmem:[%s10715_s5 + $0x230] sm:$0xff] }
 0x67e   : > { %4570 = vrot.lane.b32.xlu2 %v4556_v22, %s10745_s14 }
 0x67f   : > { %4508 = vrot.lane.b32.xlu1 %v9039_v60, %s10762_s26  ;;  %4270 = vrot.lane.b32.xlu0 %v9029_v4, %s10763_s20 }
 0x680   : > { %v4109_v41 = vpop.permute.xlu2 %4108 }
 0x681   : > { %v4297_v7 = vpop.permute.xlu1 %4296  ;;  %v4019_v17 = vpop.permute.xlu0 %4018 }
 0x682   : > { %4309 = vst.msk [vmem:[#allocation4 + $0x38] sm:$0xff] %vm716_vm7, %v4297_v7 }
 0x683   : > { %4030 = vst.msk [vmem:[#allocation4 + $0x48] sm:$0xff] %vm888_vm11, %v4019_v17  ;;  %v9543_v25 = vld [vmem:[#allocation4 + $0x20] sm:$0xff]  ;;  %v6084_v17 = vld [vmem:[%s10715_s5 + $0x1d8] sm:$0xff] }
 0x684   : > { %4060 = vst.msk [vmem:[#allocation4 + $0x48] sm:$0xff] %vm931_vm12, %v4049_v40  ;;  %4750 = vmatmul.f32.gmra.mxu1 %v9543_v25  ;;  %v4780_v40 = vpop.f32.mrf.mxu2  ;;  %4872 = vmatpush.msrb.mxu0 %v6084_v17 }
 0x685   : > { %4090 = vst.msk [vmem:[#allocation4 + $0x48] sm:$0xff] %vm974_vm13, %v4079_v44  ;;  %v6111_v44 = vld [vmem:[%s10715_s5 + $0x288] sm:$0xff] }
 0x686   : > { %4120 = vst.msk [vmem:[#allocation4 + $0x48] sm:$0xff] %vm1017_vm14, %v4109_v41  ;;  %4600 = vrot.lane.b32.xlu2 %v4556_v22, %s10745_s14  ;;  %v6126_v41 = vld [vmem:[%s10715_s5 + $0x300] sm:$0xff]  ;;  %4976 = vmatpush.msrb.mxu2 %v6111_v44  ;;  %s10882_s14 = sld [smem:[#allocation49_spill]] }
 0x687   : > { %4538 = vrot.lane.b32.xlu1 %v9039_v60, %s10762_s26  ;;  %4300 = vrot.lane.b32.xlu0 %v9029_v4, %s10763_s20 }
 0x688   : > { %v4139_v61 = vpop.permute.xlu2 %4138  ;;  %5009 = vmatpush.msrb.mxu3 %v6126_v41  ;;  %v6094_v41 = vld [vmem:[%s10715_s5 + $0x228] sm:$0xff] }
 0x689   : > { %v3811_v54 = vpop.permute.xlu1 %3810  ;;  %v4597_v15 = vpop.permute.xlu0 %4596  ;;  %4150 = vst.msk [vmem:[#allocation4 + $0x48] sm:$0xff] %vm1060_vm15, %v4139_v61  ;;  %v6125_v61 = vld [vmem:[%s10715_s5 + $0x2f8] sm:$0xff] }
 0x68a   : > { %3821 = vst.msk [vmem:[#allocation4 + $0x60] sm:$0xff] %vm587_vm4, %v3811_v54  ;;  %v6110_v54 = vld [vmem:[%s10715_s5 + $0x280] sm:$0xff]  ;;  %5010 = vmatpush.msrb.mxu3 %v6125_v61  ;;  %v6165_v61 = vld [vmem:[%s10715_s5 + $0x410] sm:$0xff] }
 0x68b   : > { %4609 = vst.msk [vmem:[#allocation4 + $0x40] sm:$0xff] %vm10833_vm6, %v4597_v15  ;;  %vm10834_vm6 = vcmask 458112   ;;  %4977 = vmatpush.msrb.mxu2 %v6110_v54  ;;  %v6083_v15 = vld [vmem:[%s10715_s5 + $0x1d0] sm:$0xff] }
 0x68c   : > { %4619 = vst.msk [vmem:[#allocation4 + $0x40] sm:$0xff] %vm529_vm2, %v9013_v18  ;;  %4873 = vmatpush.msrb.mxu0 %v6083_v15  ;;  %v6164_v15 = vld [vmem:[%s10715_s5 + $0x408] sm:$0xff] }
 0x68d   : > { %4629 = vst.msk [vmem:[#allocation4 + $0x40] sm:$0xff] %vm544_vm3, %v9013_v18 }
 0x68e   : > { %4390 = vrot.lane.b32.xlu2 %v4556_v22, %s10747_s21 }
 0x68f   : > { %4360 = vrot.lane.b32.xlu1 %v4316_v11, %s10764_s30  ;;  %4330 = vrot.lane.b32.xlu0 %v4316_v11, %s10764_s30 }
 0x690   : > { %v4209_v34 = vpop.permute.xlu2 %4208  ;;  %v9565_v21 = vld [vmem:[#allocation4 + $0x48] sm:$0xff] }
 0x691   : > { %v3841_v60 = vpop.permute.xlu1 %3840  ;;  %v4327_v39 = vpop.permute.xlu0 %4326  ;;  %4220 = vst.msk [vmem:[#allocation4 + $0x50] sm:$0xff] %vm587_vm4, %v4209_v34  ;;  %4724 = vmatmul.f32.gmra.mxu0 %v9565_v21  ;;  %4857 = vmatmul.f32.gmra.mxu3 %v9565_v21  ;;  %v6108_v34 = vld [vmem:[%s10715_s5 + $0x270] sm:$0xff] }
 0x692   : > { %3851 = vst.msk [vmem:[#allocation4 + $0x60] sm:$0xff] %vm630_vm5, %v3841_v60  ;;  %v6082_v60 = vld [vmem:[%s10715_s5 + $0x1c8] sm:$0xff] }
 0x693   : > { %4339 = vst.msk [vmem:[#allocation4 + $0x38] sm:$0xff] %vm759_vm8, %v4327_v39  ;;  %4874 = vmatpush.msrb.mxu0 %v6082_v60  ;;  %v6137_v60 = vld [vmem:[%s10715_s5 + $0x358] sm:$0xff] }
 0x694   : > { %v9571_v18 = vld [vmem:[#allocation4 + $0x40] sm:$0xff] }
 0x695   : > { %6058 = vmatmul.msk.f32.gmra.mxu2 %vm10744_vm1, %v9571_v18  ;;  %vm10835_vm1 = vmmov %vm10834_vm6 }
 0x696   : > { %4480 = vrot.lane.b32.xlu2 %v9575_v9, %s10762_s26 }
 0x697   : > { %4450 = vrot.lane.b32.xlu1 %v9575_v9, %s10762_s26  ;;  %4420 = vrot.lane.b32.xlu0 %v4556_v22, %s10747_s21  ;;  %s5804_s21 = sshll.u32 %s5800_s29, 4  ;;  %s5805_s21 = int_to_ptr.hbm [resolvable:$true] %s5804_s21 }
 0x698   : > { %v4239_v35 = vpop.permute.xlu2 %4238 }
 0x699   : > { %v3871_v3 = vpop.permute.xlu1 %3870  ;;  %v4357_v13 = vpop.permute.xlu0 %4356  ;;  %4250 = vst.msk [vmem:[#allocation4 + $0x50] sm:$0xff] %vm630_vm5, %v4239_v35 }
 0x69a   : > { %3881 = vst.msk [vmem:[#allocation4 + $0x60] sm:$0xff] %vm10834_vm6, %v3871_v3  ;;  %v6123_v3 = vld [vmem:[%s10715_s5 + $0x2e8] sm:$0xff]  ;;  %vm10837_vm6 = vcmask 261120  }
 0x69b   : > { %4369 = vst.msk [vmem:[#allocation4 + $0x38] sm:$0xff] %vm802_vm9, %v4357_v13 }
 0x69f   : > { %4540 = vrot.lane.b32.xlu1 %v4316_v11, %s10762_s26  ;;  %4510 = vrot.lane.b32.xlu0 %v4316_v11, %s10762_s26  ;;  %v6124_v11 = vld [vmem:[%s10715_s5 + $0x2f0] sm:$0xff] }
 0x6a0   : > { %v4269_v42 = vpop.permute.xlu2 %4268  ;;  %5011 = vmatpush.msrb.mxu3 %v6124_v11 }
 0x6a1   : > { %v3901_v14 = vpop.permute.xlu1 %3900  ;;  %v4387_v52 = vpop.permute.xlu0 %4386  ;;  %4280 = vst.msk [vmem:[#allocation4 + $0x50] sm:$0xff] %vm10835_vm1, %v4269_v42  ;;  %vm10836_vm1 = vcmask 130112   ;;  %v6107_v42 = vld [vmem:[%s10715_s5 + $0x268] sm:$0xff] }
 0x6a2   : > { %3911 = vst.msk [vmem:[#allocation4 + $0x60] sm:$0xff] %vm716_vm7, %v3901_v14  ;;  %v6081_v14 = vld [vmem:[%s10715_s5 + $0x1c0] sm:$0xff]  ;;  %5012 = vmatpush.msrb.mxu3 %v6123_v3  ;;  %v6136_v3 = vld [vmem:[%s10715_s5 + $0x350] sm:$0xff] }
 0x6a3   : > { %4399 = vst.msk [vmem:[#allocation4 + $0x38] sm:$0xff] %vm845_vm10, %v4387_v52  ;;  %v6122_v52 = vld [vmem:[%s10715_s5 + $0x2e0] sm:$0xff]  ;;  %4875 = vmatpush.msrb.mxu0 %v6081_v14  ;;  %v4719_v14 = vpop.f32.mrf.mxu0 }
 0x6a4   : > { %5013 = vmatpush.msrb.mxu3 %v6122_v52 }
 0x6a8   : > { %v4021_v29 = vpop.permute.xlu2 %4020 }
 0x6a9   : > { %v3931_v63 = vpop.permute.xlu1 %3930  ;;  %v4417_v62 = vpop.permute.xlu0 %4416 }
 0x6aa   : > { %3941 = vst.msk [vmem:[#allocation4 + $0x60] sm:$0xff] %vm759_vm8, %v3931_v63 }
 0x6ab   : > { %4429 = vst.msk [vmem:[#allocation4 + $0x38] sm:$0xff] %vm888_vm11, %v4417_v62  ;;  %v6106_v62 = vld [vmem:[%s10715_s5 + $0x260] sm:$0xff] }
 0x6b0   : > { %v9592_v58 = vpop.permute.xlu2 %4598 }
 0x6b1   : > { %v3961_v0 = vpop.permute.xlu1 %3960  ;;  %v4447_v47 = vpop.permute.xlu0 %4446 }
 0x6b2   : > { %3971 = vst.msk [vmem:[#allocation4 + $0x60] sm:$0xff] %vm802_vm9, %v3961_v0  ;;  %v6121_v0 = vld [vmem:[%s10715_s5 + $0x2d8] sm:$0xff] }
 0x6b3   : > { %4459 = vst.msk [vmem:[#allocation4 + $0x38] sm:$0xff] %vm931_vm12, %v4447_v47  ;;  %v6105_v47 = vld [vmem:[%s10715_s5 + $0x258] sm:$0xff]  ;;  %5014 = vmatpush.msrb.mxu3 %v6121_v0 }
 0x6b5   : > { %5015 = vmatpush.msrb.mxu3 %v6120_v50 }
 0x6b7   : > { %5016 = vmatpush.msrb.mxu3 %v6119_v43  ;;  %v6178_v43 = vld [vmem:[%s10715_s5 + $0x478] sm:$0xff] }
 0x6b8   : > { %v9629_v16 = vpop.permute.xlu2 %4080 }
 0x6b9   : > { %v3991_v49 = vpop.permute.xlu1 %3990  ;;  %v4477_v8 = vpop.permute.xlu0 %4476  ;;  %5017 = vmatpush.msrb.mxu3 %v6118_v45  ;;  %v6176_v45 = vld [vmem:[%s10715_s5 + $0x468] sm:$0xff] }
 0x6ba   : > { %4001 = vst.msk [vmem:[#allocation4 + $0x60] sm:$0xff] %vm845_vm10, %v3991_v49  ;;  %v6102_v49 = vld [vmem:[%s10715_s5 + $0x240] sm:$0xff] }
 0x6bb   : > { %4031 = vst.msk [vmem:[#allocation4 + $0x60] sm:$0xff] %vm888_vm11, %v4021_v29  ;;  %v6080_v29 = vld [vmem:[%s10715_s5 + $0x1b8] sm:$0xff]  ;;  %6186 = vmatpush.msra.mxu3 %v6137_v60 }
 0x6bc   : > { %4489 = vst.msk [vmem:[#allocation4 + $0x38] sm:$0xff] %vm974_vm13, %v4477_v8  ;;  %4876 = vmatpush.msrb.mxu0 %v6080_v29 }
 0x6bd   : > { %6187 = vmatpush.msra.mxu3 %v6136_v3 }
 0x6bf   : > { %v4748_v19 = vpop.f32.mrf.mxu1 }
 0x6c0   : > { %v4749_v33 = vadd.f32 %v4748_v19, %v4716_v51  ;;  %v9670_v7 = vpop.permute.xlu2 %4388  ;;  %v6172_v19 = vld [vmem:[%s10715_s5 + $0x448] sm:$0xff] }
 0x6c1   : > { %v4569_v31 = vpop.permute.xlu1 %4568  ;;  %v4507_v22 = vpop.permute.xlu0 %4506 }
 0x6c2   : > { %v9667_v1 = vadd.f32 %v4780_v40, %v4749_v33  ;;  %4580 = vst.msk [vmem:[#allocation4 + $0x58] sm:$0xff] %vm499_vm0, %v4569_v31  ;;  %v6170_v33 = vld [vmem:[%s10715_s5 + $0x438] sm:$0xff]  ;;  %v4783_v50 = vpop.f32.mrf.mxu2 }
 0x6c3   : > { %4519 = vst.msk [vmem:[#allocation4 + $0x38] sm:$0xff] %vm1017_vm14, %v4507_v22  ;;  %v6167_v22 = vld [vmem:[%s10715_s5 + $0x420] sm:$0xff] }
 0x6c4   : > { %4610 = vst.msk [vmem:[#allocation4 + $0x58] sm:$0xff] %vm10836_vm1, %v9592_v58  ;;  %v6079_v58 = vld [vmem:[%s10715_s5 + $0x1b0] sm:$0xff] }
 0x6c5   : > { %4620 = vst.msk [vmem:[#allocation4 + $0x58] sm:$0xff] %vm529_vm2, %v9029_v4  ;;  %4877 = vmatpush.msrb.mxu0 %v6079_v58 }
 0x6c6   : > { %4630 = vst.msk [vmem:[#allocation4 + $0x58] sm:$0xff] %vm544_vm3, %v9029_v4  ;;  %v6109_v4 = vld [vmem:[%s10715_s5 + $0x278] sm:$0xff] }
 0x6c7   : > { %4978 = vmatpush.msrb.mxu2 %v6109_v4  ;;  %4878 = vmatpush.msrb.mxu0 %v6078_v32  ;;  %v6163_v4 = vld [vmem:[%s10715_s5 + $0x400] sm:$0xff] }
 0x6c8   : > { %v4211_v13 = vpop.permute.xlu2 %4210 }
 0x6c9   : > { %v4537_v39 = vpop.permute.xlu1 %4536  ;;  %v4299_v35 = vpop.permute.xlu0 %4298  ;;  %4979 = vmatpush.msrb.mxu2 %v6108_v34  ;;  %4221 = vst.msk [vmem:[#allocation4 + $0x68] sm:$0xff] %vm587_vm4, %v4211_v13  ;;  %4879 = vmatpush.msrb.mxu0 %v6077_v26  ;;  %v6135_v13 = vld [vmem:[%s10715_s5 + $0x348] sm:$0xff] }
 0x6ca   : > { %4549 = vst.msk [vmem:[#allocation4 + $0x38] sm:$0xff] %vm1060_vm15, %v4537_v39  ;;  %v6162_v39 = vld [vmem:[%s10715_s5 + $0x3f8] sm:$0xff]  ;;  %6188 = vmatpush.msra.mxu3 %v6135_v13  ;;  %v6156_v26 = vld [vmem:[%s10715_s5 + $0x3c8] sm:$0xff] }
 0x6cb   : > { %4310 = vst.msk [vmem:[#allocation4 + $0x50] sm:$0xff] %vm716_vm7, %v4299_v35  ;;  %4980 = vmatpush.msrb.mxu2 %v6107_v42  ;;  %5046 = vmatpush.msra.mxu0 %v6137_v60  ;;  %v6161_v35 = vld [vmem:[%s10715_s5 + $0x3f0] sm:$0xff]  ;;  %v6134_v42 = vld [vmem:[%s10715_s5 + $0x340] sm:$0xff] }
 0x6cc   : > { %6189 = vmatpush.msra.mxu3 %v6134_v42 }
 0x6cd   : > { %v9721_v63 = vld [vmem:[#allocation4 + $0x58] sm:$0xff]  ;;  %4981 = vmatpush.msrb.mxu2 %v6106_v62  ;;  %5047 = vmatpush.msra.mxu0 %v6136_v3 }
 0x6ce   : > { %6059 = vmatmul.msk.f32.gmra.mxu2 %vm10837_vm6, %v9721_v63 }
 0x6cf   : > { %4982 = vmatpush.msrb.mxu2 %v6105_v47  ;;  %5048 = vmatpush.msra.mxu0 %v6135_v13 }
 0x6d0   : > { %v4479_v46 = vpop.permute.xlu2 %4478 }
 0x6d1   : > { %v4329_v56 = vpop.permute.xlu1 %4328  ;;  %v9749_v27 = vld [vmem:[#allocation4 + $0x38] sm:$0xff]  ;;  %v4051_v53 = vpop.permute.xlu0 %4050  ;;  %4983 = vmatpush.msrb.mxu2 %v6104_v55  ;;  %5049 = vmatpush.msra.mxu0 %v6134_v42 }
 0x6d2   : > { %4340 = vst.msk [vmem:[#allocation4 + $0x50] sm:$0xff] %vm759_vm8, %v4329_v56  ;;  %4753 = vmatmul.f32.gmra.mxu1 %v9749_v27  ;;  %v6159_v55 = vld [vmem:[%s10715_s5 + $0x3e0] sm:$0xff]  ;;  %v6158_v56 = vld [vmem:[%s10715_s5 + $0x3d8] sm:$0xff] }
 0x6d3   : > { %4061 = vst.msk [vmem:[#allocation4 + $0x60] sm:$0xff] %vm931_vm12, %v4051_v53  ;;  %4984 = vmatpush.msrb.mxu2 %v6103_v37  ;;  %v6157_v53 = vld [vmem:[%s10715_s5 + $0x3d0] sm:$0xff] }
 0x6d4   : > { %4091 = vst.msk [vmem:[#allocation4 + $0x60] sm:$0xff] %vm974_vm13, %v9629_v16  ;;  %v6096_v16 = vld [vmem:[%s10715_s5 + $0x238] sm:$0xff] }
 0x6d5   : > { %4985 = vmatpush.msrb.mxu2 %v6102_v49  ;;  %4908 = vmatpush.msrb.mxu1 %v6096_v16  ;;  %v6154_v16 = vld [vmem:[%s10715_s5 + $0x3b8] sm:$0xff] }
 0x6d7   : > { %5140 = vmatpush.msra.mxu2 %v6174_v38  ;;  %4909 = vmatpush.msrb.mxu1 %v6095_v2  ;;  %v6153_v38 = vld [vmem:[%s10715_s5 + $0x3b0] sm:$0xff] }
 0x6d8   : > { %v4571_v48 = vpop.permute.xlu2 %4570 }
 0x6d9   : > { %v4111_v8 = vpop.permute.xlu1 %4110  ;;  %v4359_v12 = vpop.permute.xlu0 %4358  ;;  %4581 = vst.msk [vmem:[#allocation4 + $0x70] sm:$0xff] %vm499_vm0, %v4571_v48  ;;  %5141 = vmatpush.msra.mxu2 %v6173_v24  ;;  %vm10838_vm0 = vmmov %vm10836_vm1  ;;  %4910 = vmatpush.msrb.mxu1 %v6094_v41  ;;  %v6155_v48 = vld [vmem:[%s10715_s5 + $0x3c0] sm:$0xff]  ;;  %v6152_v24 = vld [vmem:[%s10715_s5 + $0x3a8] sm:$0xff] }
 0x6da   : > { %4121 = vst.msk [vmem:[#allocation4 + $0x60] sm:$0xff] %vm1017_vm14, %v4111_v8 }
 0x6db   : > { %4370 = vst.msk [vmem:[#allocation4 + $0x50] sm:$0xff] %vm802_vm9, %v4359_v12  ;;  %5142 = vmatpush.msra.mxu2 %v6172_v19  ;;  %v6175_v12 = vld [vmem:[%s10715_s5 + $0x460] sm:$0xff]  ;;  %v6150_v19 = vld [vmem:[%s10715_s5 + $0x398] sm:$0xff] }
 0x6dc   : > { %4400 = vst.msk [vmem:[#allocation4 + $0x50] sm:$0xff] %vm845_vm10, %v9670_v7  ;;  %v6166_v7 = vld [vmem:[%s10715_s5 + $0x418] sm:$0xff] }
 0x6dd   : > { %5143 = vmatpush.msra.mxu2 %v6171_v30  ;;  %v6149_v30 = vld [vmem:[%s10715_s5 + $0x390] sm:$0xff] }
 0x6df   : > { %5144 = vmatpush.msra.mxu2 %v6170_v33  ;;  %v6148_v33 = vld [vmem:[%s10715_s5 + $0x388] sm:$0xff] }
 0x6e0   : > { %v4601_v10 = vpop.permute.xlu2 %4600 }
 0x6e1   : > { %v4419_v20 = vpop.permute.xlu1 %4418  ;;  %v4141_v51 = vpop.permute.xlu0 %4140  ;;  %4611 = vst.msk [vmem:[#allocation4 + $0x70] sm:$0xff] %vm10838_vm0, %v4601_v10 }
 0x6e2   : > { %4430 = vst.msk [vmem:[#allocation4 + $0x50] sm:$0xff] %vm888_vm11, %v4419_v20 }
 0x6e3   : > { %4621 = vst.msk [vmem:[#allocation4 + $0x70] sm:$0xff] %vm529_vm2, %v9575_v9  ;;  %vm10839_vm2 = vmmov %vm10837_vm6 }
 0x6e4   : > { %4631 = vst.msk [vmem:[#allocation4 + $0x70] sm:$0xff] %vm544_vm3, %v9575_v9  ;;  %v6169_v9 = vld [vmem:[%s10715_s5 + $0x430] sm:$0xff]  ;;  %vm10840_vm3 = vcmask 458112   ;;  %vm10841_vm4 = vmmov %vm10839_vm2 }
 0x6e5   : > { %4151 = vst.msk [vmem:[#allocation4 + $0x60] sm:$0xff] %vm1060_vm15, %v4141_v51  ;;  %5145 = vmatpush.msra.mxu2 %v6169_v9  ;;  %v6151_v51 = vld [vmem:[%s10715_s5 + $0x3a0] sm:$0xff]  ;;  %vm10852_vm1 = vmmov %vm10839_vm2 }
 0x6e6   : > { %v6147_v9 = vld [vmem:[%s10715_s5 + $0x380] sm:$0xff]  ;;  %vm10853_vm6 = vmmov %vm10852_vm1 }
 0x6e7   : > { %5146 = vmatpush.msra.mxu2 %v6168_v57  ;;  %v6144_v57 = vld [vmem:[%s10715_s5 + $0x368] sm:$0xff]  ;;  %vm10854_vm0 = vmmov %vm10852_vm1 }
 0x6e8   : > { %v4391_v0 = vpop.permute.xlu2 %4390 }
 0x6e9   : > { %v4241_v5 = vpop.permute.xlu1 %4240  ;;  %v4449_v40 = vpop.permute.xlu0 %4448  ;;  %5147 = vmatpush.msra.mxu2 %v6167_v22  ;;  %v6143_v22 = vld [vmem:[%s10715_s5 + $0x360] sm:$0xff] }
 0x6ea   : > { %4251 = vst.msk [vmem:[#allocation4 + $0x68] sm:$0xff] %vm630_vm5, %v4241_v5  ;;  %v6146_v5 = vld [vmem:[%s10715_s5 + $0x378] sm:$0xff]  ;;  %vm10842_vm5 = vmmov %vm10839_vm2 }
 0x6eb   : > { %4460 = vst.msk [vmem:[#allocation4 + $0x50] sm:$0xff] %vm931_vm12, %v4449_v40  ;;  %v9810_v31 = vld [vmem:[#allocation4 + $0x70] sm:$0xff]  ;;  %5148 = vmatpush.msra.mxu2 %v6166_v7 }
 0x6ec   : > { %4490 = vst.msk [vmem:[#allocation4 + $0x50] sm:$0xff] %vm974_vm13, %v4479_v46  ;;  %v9815_v44 = vld [vmem:[#allocation4 + $0x60] sm:$0xff]  ;;  %6060 = vmatmul.msk.f32.gmra.mxu2 %vm10839_vm2, %v9810_v31  ;;  %v6177_v46 = vld [vmem:[%s10715_s5 + $0x470] sm:$0xff]  ;;  %v6267_v40 = vld [vmem:[#allocation4 + $0x10] sm:$0xff] }
 0x6ed   : > { %4727 = vmatmul.f32.gmra.mxu0 %v9815_v44  ;;  %4860 = vmatmul.f32.gmra.mxu3 %v9815_v44 }
 0x6ee   : > { %5149 = vmatpush.msra.mxu2 %v6165_v61 }
 0x6f0   : > { %5150 = vmatpush.msra.mxu2 %v6164_v15  ;;  %v4481_v8 = vpop.permute.xlu2 %4480 }
 0x6f1   : > { %v4509_v17 = vpop.permute.xlu1 %4508  ;;  %v4271_v54 = vpop.permute.xlu0 %4270 }
 0x6f2   : > { %4520 = vst.msk [vmem:[#allocation4 + $0x50] sm:$0xff] %vm1017_vm14, %v4509_v17  ;;  %5151 = vmatpush.msra.mxu2 %v6163_v4 }
 0x6f3   : > { %4281 = vst.msk [vmem:[#allocation4 + $0x68] sm:$0xff] %vm10840_vm3, %v4271_v54  ;;  %v6269_v54 = vld [vmem:[#allocation4 + $0x18] sm:$0xff] }
 0x6f4   : > { %4986 = vmatmul.f32.vlgmr.msrb.gmra.mxu2 %v9276_v23  ;;  %v6093_v23 = vld [vmem:[%s10715_s5 + $0x220] sm:$0xff] }
 0x6f5   : > { %4880 = vmatmul.f32.vlgmr.msrb.gmra.mxu0 %v9473_v28  ;;  %5018 = vmatmul.f32.vlgmr.msrb.gmra.mxu3 %v9473_v28 }
 0x6f6   : > { %4911 = vmatpush.msrb.mxu1 %v6093_v23  ;;  %5152 = vmatpush.msra.mxu2 %v6162_v39 }
 0x6f7   : > { %5184 = vmatpush.msrb.mxu3 %v6178_v43 }
 0x6f8   : > { %5153 = vmatpush.msra.mxu2 %v6161_v35  ;;  %5108 = vmatpush.msra.mxu1 %v6158_v56 }
 0x6f9   : > { %v4539_v11 = vpop.permute.xlu1 %4538  ;;  %v4301_v34 = vpop.permute.xlu0 %4300  ;;  %5185 = vmatpush.msrb.mxu3 %v6177_v46 }
 0x6fa   : > { %4550 = vst.msk [vmem:[#allocation4 + $0x50] sm:$0xff] %vm1060_vm15, %v4539_v11  ;;  %5109 = vmatpush.msra.mxu1 %v6157_v53 }
 0x6fb   : > { %4311 = vst.msk [vmem:[#allocation4 + $0x68] sm:$0xff] %vm716_vm7, %v4301_v34  ;;  %5186 = vmatpush.msrb.mxu3 %v6176_v45  ;;  %vm10843_vm7 = vmmov %vm10839_vm2 }
 0x6fc   : > { %4989 = vmatmul.f32.gmra.mxu2 %v9401_v59  ;;  %v6160_v59 = vld [vmem:[%s10715_s5 + $0x3e8] sm:$0xff]  ;;  %5110 = vmatpush.msra.mxu1 %v6156_v26 }
 0x6fd   : > { %4883 = vmatmul.f32.gmra.mxu0 %v9543_v25  ;;  %5021 = vmatmul.f32.gmra.mxu3 %v9543_v25 }
 0x6fe   : > { %5154 = vmatpush.msra.mxu2 %v6160_v59  ;;  %5111 = vmatpush.msra.mxu1 %v6155_v48 }
 0x6ff   : > { %5187 = vmatpush.msrb.mxu3 %v6175_v12 }
 0x700   : > { %5155 = vmatpush.msra.mxu2 %v6159_v55  ;;  %5112 = vmatpush.msra.mxu1 %v6154_v16 }
 0x701   : > { %v4751_v52 = vpop.f32.mrf.mxu1  ;;  %v4361_v29 = vpop.permute.xlu1 %4360  ;;  %v9873_v62 = vld [vmem:[#allocation4 + $0x50] sm:$0xff] }
 0x702   : > { %v4752_v58 = vadd.f32 %v4751_v52, %v4719_v14  ;;  %v4331_v47 = vpop.permute.xlu0 %4330  ;;  %4756 = vmatmul.f32.gmra.mxu1 %v9873_v62 }
 0x703   : > { %4341 = vst.msk [vmem:[#allocation4 + $0x68] sm:$0xff] %vm759_vm8, %v4331_v47  ;;  %5113 = vmatpush.msra.mxu1 %v6153_v38  ;;  %vm10844_vm8 = vmmov %vm10839_vm2 }
 0x704   : > { %v9877_v32 = vadd.f32 %v4783_v50, %v4752_v58  ;;  %4371 = vst.msk [vmem:[#allocation4 + $0x68] sm:$0xff] %vm802_vm9, %v4361_v29  ;;  %4992 = vmatmul.f32.gmra.mxu2 %v9509_v6  ;;  %vm10845_vm9 = vmmov %vm10839_vm2 }
 0x705   : > { %4401 = vst.msk [vmem:[#allocation4 + $0x68] sm:$0xff] %vm845_vm10, %v4391_v0  ;;  %4886 = vmatmul.f32.gmra.mxu0 %v9749_v27  ;;  %5024 = vmatmul.f32.gmra.mxu3 %v9749_v27  ;;  %vm10846_vm10 = vmmov %vm10839_vm2 }
 0x706   : > { %5114 = vmatpush.msra.mxu1 %v6152_v24 }
 0x708   : > { %5115 = vmatpush.msra.mxu1 %v6151_v51 }
 0x709   : > { %v4451_v37 = vpop.permute.xlu1 %4450 }
 0x70a   : > { %v4421_v49 = vpop.permute.xlu0 %4420  ;;  %5116 = vmatpush.msra.mxu1 %v6150_v19 }
 0x70b   : > { %4431 = vst.msk [vmem:[#allocation4 + $0x68] sm:$0xff] %vm888_vm11, %v4421_v49  ;;  %vm10847_vm11 = vmmov %vm10839_vm2 }
 0x70c   : > { %4461 = vst.msk [vmem:[#allocation4 + $0x68] sm:$0xff] %vm931_vm12, %v4451_v37  ;;  %4995 = vmatmul.f32.gmra.mxu2 %v9565_v21  ;;  %5117 = vmatpush.msra.mxu1 %v6149_v30  ;;  %vm10848_vm12 = vmmov %vm10839_vm2 }
 0x70d   : > { %4491 = vst.msk [vmem:[#allocation4 + $0x68] sm:$0xff] %vm974_vm13, %v4481_v8  ;;  %4889 = vmatmul.f32.gmra.mxu0 %v9873_v62  ;;  %5027 = vmatmul.f32.gmra.mxu3 %v9873_v62  ;;  %vm10849_vm13 = vmmov %vm10839_vm2 }
 0x70e   : > { %5118 = vmatpush.msra.mxu1 %v6148_v33 }
 0x710   : > { %5119 = vmatpush.msra.mxu1 %v6147_v9 }
 0x711   : > { %v4541_v20 = vpop.permute.xlu1 %4540 }
 0x712   : > { %v4511_v10 = vpop.permute.xlu0 %4510  ;;  %5120 = vmatpush.msra.mxu1 %v6146_v5 }
 0x713   : > { %4521 = vst.msk [vmem:[#allocation4 + $0x68] sm:$0xff] %vm1017_vm14, %v4511_v10  ;;  %vm10850_vm14 = vmmov %vm10839_vm2 }
 0x714   : > { %4551 = vst.msk [vmem:[#allocation4 + $0x68] sm:$0xff] %vm1060_vm15, %v4541_v20  ;;  %4998 = vmatmul.f32.gmra.mxu2 %v9815_v44  ;;  %vm10851_vm15 = vmmov %vm10839_vm2 }
 0x715   : > { %vm10855_vm2 = vmmov %vm10854_vm0 }
 0x718   : > { %v4786_v41 = vpop.f32.mrf.mxu2 }
 0x71b   : > { %v4645_v2 = vld [vmem:[#allocation4 + $0x68] sm:$0xff] }
 0x71c   : > { %4759 = vmatmul.f32.gmra.mxu1 %v4645_v2  ;;  %4892 = vmatmul.f32.gmra.mxu0 %v4645_v2 }
 0x71d   : > { %5030 = vmatmul.f32.gmra.mxu3 %v4645_v2  ;;  %5156 = vmatmul.f32.vlgmr.msra.gmra.mxu2 %v9473_v28  ;;  %v6145_v28 = vld [vmem:[%s10715_s5 + $0x370] sm:$0xff] }
 0x71e   : > { %5121 = vmatpush.msra.mxu1 %v6145_v28 }
 0x720   : > { %5122 = vmatpush.msra.mxu1 %v6144_v57 }
 0x722   : > { %5123 = vmatpush.msra.mxu1 %v6143_v22 }
 0x724   : > { %6097 = vmatmul.msk.f32.vlgmr.msrb.gmra.mxu1 %vm10841_vm4, %v6267_v40  ;;  %6138 = vmatmul.msk.f32.vlgmr.msra.gmra.mxu0 %vm10842_vm5, %v6267_v40 }
 0x725   : > { %6142 = vmatmul.msk.f32.vlgmr.msra.gmra.mxu3 %vm10843_vm7, %v9810_v31  ;;  %5159 = vmatmul.f32.gmra.mxu2 %v9543_v25  ;;  %v6268_v25 = vld [vmem:[#allocation4] sm:$0xff] }
 0x72c   : > { %6098 = vmatmul.msk.f32.gmra.mxu1 %vm10844_vm8, %v9462_v36  ;;  %6139 = vmatmul.msk.f32.gmra.mxu0 %vm10845_vm9, %v9462_v36 }
 0x72d   : > { %6179 = vmatmul.msk.f32.vlgmr.msrb.gmra.mxu3 %vm10846_vm10, %v6267_v40  ;;  %5162 = vmatmul.f32.gmra.mxu2 %v9749_v27 }
 0x734   : > { %6099 = vmatmul.msk.f32.gmra.mxu1 %vm10847_vm11, %v9571_v18  ;;  %6140 = vmatmul.msk.f32.gmra.mxu0 %vm10848_vm12, %v9571_v18 }
 0x735   : > { %6180 = vmatmul.msk.f32.gmra.mxu3 %vm10849_vm13, %v9462_v36  ;;  %5165 = vmatmul.f32.gmra.mxu2 %v9873_v62  ;;  %v4722_v36 = vpop.f32.mrf.mxu0 }
 0x73c   : > { %6100 = vmatmul.msk.f32.gmra.mxu1 %vm10850_vm14, %v9721_v63  ;;  %6141 = vmatmul.msk.f32.gmra.mxu0 %vm10851_vm15, %v9721_v63 }
 0x73d   : > { %6181 = vmatmul.msk.f32.gmra.mxu3 %vm10852_vm1, %v9571_v18  ;;  %5168 = vmatmul.f32.gmra.mxu2 %v4645_v2  ;;  %v4849_v18 = vpop.f32.mrf.mxu3  ;;  %v4725_v4 = vpop.f32.mrf.mxu0 }
 0x744   : > { %6101 = vmatmul.msk.f32.gmra.mxu1 %vm10853_vm6, %v9810_v31 }
 0x745   : > { %6182 = vmatmul.msk.f32.gmra.mxu3 %vm10854_vm0, %v9721_v63  ;;  %v4852_v61 = vpop.f32.mrf.mxu3 }
 0x74c   : > { %5124 = vmatmul.f32.vlgmr.msra.gmra.mxu1 %v6268_v25 }
 0x74d   : > { %6183 = vmatmul.msk.f32.gmra.mxu3 %vm10855_vm2, %v9810_v31  ;;  %v9992_v63 = vpop.f32.mrf.mxu3 }
 0x74f   : > { %v4754_v27 = vpop.f32.mrf.mxu1 }
 0x750   : > { %v4755_v7 = vadd.f32 %v4754_v27, %v4722_v36 }
 0x751   : > { %v4789_v31 = vpop.f32.mrf.mxu2 }
 0x752   : > { %v9987_v17 = vadd.f32 %v4786_v41, %v4755_v7  ;;  %v10020_v7 = vld [vmem:[%s10716_s6] ss:$0 sm:$0xff] }
 0x754   : > { %5127 = vmatmul.f32.gmra.mxu1 %v6269_v54 }
 0x755   : > { %v4858_v15 = vpop.f32.mrf.mxu3 }
 0x75c   : > { %5130 = vmatmul.f32.gmra.mxu1 %v9509_v6 }
 0x764   : > { %5133 = vmatmul.f32.gmra.mxu1 %v9565_v21 }
 0x76a   : > { %v4728_v3 = vpop.f32.mrf.mxu0 }
 0x76c   : > { %5136 = vmatmul.f32.gmra.mxu1 %v9815_v44 }
 0x76f   : > { %v4792_v39 = vpop.f32.mrf.mxu2 }
 0x770   : > { %v4861_v11 = vpop.f32.mrf.mxu3 }
 0x772   : > { %v4881_v13 = vpop.f32.mrf.mxu0 }
 0x773   : > { %v4882_v20 = vadd.f32 %v4881_v13, %v4849_v18 }
 0x777   : > { %v4987_v6 = vpop.f32.mrf.mxu2 }
 0x778   : > { %v5019_v35 = vpop.f32.mrf.mxu3 }
 0x779   : > { %v5020_v2 = vadd.f32 %v5019_v35, %v4987_v6 }
 0x77a   : > { %v4884_v44 = vpop.f32.mrf.mxu0 }
 0x77b   : > { %v4885_v5 = vadd.f32 %v4884_v44, %v4852_v61  ;;  %v10027_v61 = vld [vmem:[%s10717_s7] ss:$0 sm:$0xff] }
 0x77f   : > { %v4757_v60 = vpop.f32.mrf.mxu1  ;;  %v4990_v21 = vpop.f32.mrf.mxu2 }
 0x780   : > { %v4758_v23 = vadd.f32 %v4757_v60, %v4725_v4  ;;  %v5022_v14 = vpop.f32.mrf.mxu3 }
 0x781   : > { %v5023_v18 = vadd.f32 %v5022_v14, %v4990_v21 }
 0x782   : > { %v9994_v34 = vadd.f32 %v4789_v31, %v4758_v23  ;;  %v4887_v58 = vpop.f32.mrf.mxu0  ;;  %v10033_v23 = vld [vmem:[%s10718_s8] ss:$0 sm:$0xff] }
 0x783   : > { %v4888_v31 = vadd.f32 %v4887_v58, %v9992_v63 }
 0x787   : > { %v4993_v0 = vpop.f32.mrf.mxu2 }
 0x788   : > { %v5025_v29 = vpop.f32.mrf.mxu3 }
 0x78a   : > { %v4890_v56 = vpop.f32.mrf.mxu0 }
 0x78b   : > { %v4891_v37 = vadd.f32 %v4890_v56, %v4858_v15 }
 0x78f   : > { %v10000_v55 = vpop.f32.mrf.mxu2 }
 0x790   : > { %v9998_v47 = vpop.f32.mrf.mxu3 }
 0x797   : > { %v10004_v46 = vpop.f32.mrf.mxu2 }
 0x799   : > { %v4760_v59 = vpop.f32.mrf.mxu1  ;;  %v4893_v26 = vpop.f32.mrf.mxu0 }
 0x79a   : > { %v4761_v42 = vadd.f32 %v4760_v59, %v4728_v3  ;;  %v4894_v48 = vadd.f32 %v4893_v26, %v4861_v11  ;;  %v5241_v3 = vlaneseq }
 0x79c   : > { %v9996_v52 = vadd.f32 %v4792_v39, %v4761_v42  ;;  %vm10040_vm3 = vcmp.lt.s32.totalorder %v5241_v3, 16  ;;  %vm5253_vm4 = vcmp.ge.s32.totalorder %v5241_v3, 16  ;;  %vm5254_vm5 = vcmp.lt.s32.totalorder %v5241_v3, 32 }
 0x79d   : > { %vm10122_vm7 = vmand %vm5253_vm4, %vm5254_vm5  ;;  %vm5263_vm8 = vcmp.ge.s32.totalorder %v5241_v3, 32  ;;  %vm5264_vm9 = vcmp.lt.s32.totalorder %v5241_v3, 48  ;;  %vm5273_vm11 = vcmp.ge.s32.totalorder %v5241_v3, 48  ;;  %vm5274_vm12 = vcmp.lt.s32.totalorder %v5241_v3, 64 }
 0x79e   : > { %vm10171_vm10 = vmand %vm5263_vm8, %vm5264_vm9  ;;  %vm5283_vm14 = vcmp.ge.s32.totalorder %v5241_v3, 64  ;;  %vm5284_vm15 = vcmp.lt.s32.totalorder %v5241_v3, 80  ;;  %vm10315_vm6 = vcmp.ge.s32.totalorder %v5241_v3, 80  ;;  %vm10320_vm0 = vcmp.lt.s32.totalorder %v5241_v3, 96 }
 0x79f   : > { %vm10224_vm13 = vmand %vm5273_vm11, %vm5274_vm12  ;;  %vm5304_vm4 = vcmp.lt.s32.totalorder %v5241_v3, 112  ;;  %vm10500_vm8 = vcmp.lt.s32.totalorder %v5241_v3, 128 }
 0x7a0   : > { %v10002_v43 = vpop.f32.mrf.mxu3  ;;  %v5157_v16 = vpop.f32.mrf.mxu2  ;;  %vm10259_vm1 = vmand %vm5283_vm14, %vm5284_vm15 }
 0x7a1   : > { %v4913_v62 = vpop.f32.mrf.mxu1  ;;  %v5051_v38 = vpop.f32.mrf.mxu0  ;;  %vm10352_vm2 = vmand %vm10315_vm6, %vm10320_vm0 }
 0x7a2   : > { %v4914_v19 = vadd.f32 %v4913_v62, %v4882_v20  ;;  %v5052_v40 = vadd.f32 %v5051_v38, %v5020_v2  ;;  %v5026_v62 = vadd.f32 %v5025_v29, %v4993_v0  ;;  %v5029_v20 = vadd.f32 %v9998_v47, %v10000_v55 }
 0x7a4   : > { %v4928_v33 = vmax.f32 %v9667_v1, %v4914_v19 }
 0x7a6   : > { %v5066_v25 = vmax.f32 %v4928_v33, %v5052_v40 }
 0x7a8   : > { %v10006_v45 = vpop.f32.mrf.mxu3  ;;  %v5160_v57 = vpop.f32.mrf.mxu2 }
 0x7a9   : > { %v4916_v50 = vpop.f32.mrf.mxu1  ;;  %v5054_v22 = vpop.f32.mrf.mxu0 }
 0x7aa   : > { %v4917_v36 = vadd.f32 %v4916_v50, %v4885_v5  ;;  %v5055_v11 = vadd.f32 %v5054_v22, %v5023_v18 }
 0x7ac   : > { %v4929_v15 = vmax.f32 %v9877_v32, %v4917_v36 }
 0x7ae   : > { %v5067_v32 = vmax.f32 %v4929_v15, %v5055_v11 }
 0x7b0   : > { %v5189_v51 = vpop.f32.mrf.mxu3  ;;  %v5163_v14 = vpop.f32.mrf.mxu2 }
 0x7b1   : > { %v4919_v53 = vpop.f32.mrf.mxu1  ;;  %v5057_v21 = vpop.f32.mrf.mxu0 }
 0x7b2   : > { %v4920_v35 = vadd.f32 %v4919_v53, %v4888_v31  ;;  %v5058_v53 = vadd.f32 %v5057_v21, %v5026_v62 }
 0x7b4   : > { %v4930_v58 = vmax.f32 %v9987_v17, %v4920_v35 }
 0x7b8   : > { %v5192_v41 = vpop.f32.mrf.mxu3  ;;  %v5166_v0 = vpop.f32.mrf.mxu2 }
 0x7b9   : > { %v4922_v49 = vpop.f32.mrf.mxu1  ;;  %v5060_v38 = vpop.f32.mrf.mxu0 }
 0x7ba   : > { %v10008_v8 = vadd.f32 %v4922_v49, %v4891_v37  ;;  %v5068_v49 = vmax.f32 %v4930_v58, %v5058_v53  ;;  %v5061_v33 = vadd.f32 %v5060_v38, %v5029_v20 }
 0x7bc   : > { %v4931_v12 = vmax.f32 %v9994_v34, %v10008_v8 }
 0x7be   : > { %v5069_v40 = vmax.f32 %v4931_v12, %v5061_v33 }
 0x7c0   : > { %v5195_v44 = vpop.f32.mrf.mxu3 }
 0x7c1   : > { %v4925_v24 = vpop.f32.mrf.mxu1 }
 0x7c2   : > { %v10012_v10 = vadd.f32 %v4925_v24, %v4894_v48 }
 0x7c4   : > { %v4932_v30 = vmax.f32 %v9996_v52, %v10012_v10 }
 0x7c8   : > { %v5198_v19 = vpop.f32.mrf.mxu3 }
 0x7c9   : > { %v5125_v9 = vpop.f32.mrf.mxu1 }
 0x7ca   : > { %v5158_v28 = vadd.f32 %v5157_v16, %v5125_v9 }
 0x7cc   : > { %v5190_v27 = vadd.f32 %v5189_v51, %v5158_v28 }
 0x7ce   : > { %v5204_v54 = vmax.f32 %v5066_v25, %v5190_v27  ;;  %v5032_v25 = vadd.f32 %v10002_v43, %v10004_v46  ;;  %v5169_v27 = vpop.f32.mrf.mxu2 }
 0x7d0   : > { %v5213_v1 = vadd.f32 %v10020_v7, %v5204_v54  ;;  %v5064_v34 = vadd.f32 %v10006_v45, %v5032_v25  ;;  %v5201_v54 = vpop.f32.mrf.mxu3 }
 0x7d1   : > { %v5128_v4 = vpop.f32.mrf.mxu1 }
 0x7d2   : > { %v5218_v60 = vmax.f32 %v5213_v1, 0.0  ;;  %v5161_v39 = vadd.f32 %v5160_v57, %v5128_v4  ;;  %v5070_v18 = vmax.f32 %v4932_v30, %v5064_v34 }
 0x7d4   : > { %v5227_v6 = vmul.f32 %v10027_v61, %v5218_v60  ;;  %v5193_v13 = vadd.f32 %v5192_v41, %v5161_v39 }
 0x7d6   : > { %v10037_v59 = vadd.f32 %v10033_v23, %v5227_v6  ;;  %v5205_v63 = vmax.f32 %v5067_v32, %v5193_v13  ;;  %v5552_v6 = vld [vmem:[%s10719_s9 + $0xf0] sm:$0xff] }
 0x7d8   : > { %5247 = vst [vmem:[#allocation1] sm:$0xff] %v10037_v59  ;;  %v5214_v50 = vadd.f32 %v10020_v7, %v5205_v63 }
 0x7d9   : > { %v5131_v56 = vpop.f32.mrf.mxu1  ;;  %5245 = vst.msk [vmem:[#allocation5] sm:$0x1] %vm10040_vm3, %v10037_v59 }
 0x7da   : > { %v5219_v26 = vmax.f32 %v5214_v50, 0.0  ;;  %v5164_v37 = vadd.f32 %v5163_v14, %v5131_v56 }
 0x7dc   : > { %v5228_v48 = vmul.f32 %v10027_v61, %v5219_v26  ;;  %v5196_v16 = vadd.f32 %v5195_v44, %v5164_v37 }
 0x7de   : > { %v10052_v29 = vadd.f32 %v10033_v23, %v5228_v48  ;;  %v5206_v17 = vmax.f32 %v5068_v49, %v5196_v16 }
 0x7df   : > { %v5249_v24 = vld [vmem:[#allocation1 + $0x1] ss:$9 sm:$0xff] }
 0x7e0   : > { %5257 = vst [vmem:[#allocation1] sm:$0xff] %v10037_v59  ;;  %v5215_v51 = vadd.f32 %v10020_v7, %v5206_v17  ;;  %5250 = vrot.lane.b32.xlu2 %v5249_v24, %s10829_s17  ;;  %v5522_v24 = vld [vmem:[%s10719_s9] sm:$0xff] }
 0x7e1   : > { %v5134_v2 = vpop.f32.mrf.mxu1  ;;  %5317 = vst.msk [vmem:[#allocation5 + $0x1] sm:$0x1] %vm10040_vm3, %v10052_v29 }
 0x7e2   : > { %v5220_v9 = vmax.f32 %v5215_v51, 0.0  ;;  %v5167_v5 = vadd.f32 %v5166_v0, %v5134_v2 }
 0x7e4   : > { %v5229_v47 = vmul.f32 %v10027_v61, %v5220_v9  ;;  %v5199_v55 = vadd.f32 %v5198_v19, %v5167_v5 }
 0x7e6   : > { %v10067_v28 = vadd.f32 %v10033_v23, %v5229_v47  ;;  %v5207_v57 = vmax.f32 %v5069_v40, %v5199_v55 }
 0x7e7   : > { %v5259_v22 = vld [vmem:[#allocation1 + $0x2] ss:$9 sm:$0xff] }
 0x7e8   : > { %5267 = vst [vmem:[#allocation1] sm:$0xff] %v10037_v59  ;;  %v5216_v36 = vadd.f32 %v10020_v7, %v5207_v57 }
 0x7e9   : > { %v5137_v41 = vpop.f32.mrf.mxu1  ;;  %5368 = vst.msk [vmem:[#allocation5 + $0x2] sm:$0x1] %vm10040_vm3, %v10067_v28 }
 0x7ea   : > { %v5221_v8 = vmax.f32 %v5216_v36, 0.0  ;;  %v5170_v12 = vadd.f32 %v5169_v27, %v5137_v41  ;;  %v5537_v36 = vld [vmem:[%s10719_s9 + $0x78] sm:$0xff]  ;;  %v5536_v27 = vld [vmem:[%s10719_s9 + $0x70] sm:$0xff] }
 0x7eb   : > { %5614 = vmatpush.msrb.mxu0 %v5537_v36  ;;  %v5598_v36 = vld [vmem:[%s10719_s9 + $0x260] sm:$0xff] }
 0x7ec   : > { %v5230_v43 = vmul.f32 %v10027_v61, %v5221_v8  ;;  %v5202_v46 = vadd.f32 %v5201_v54, %v5170_v12  ;;  %v5535_v8 = vld [vmem:[%s10719_s9 + $0x68] sm:$0xff]  ;;  %v5534_v12 = vld [vmem:[%s10719_s9 + $0x60] sm:$0xff]  ;;  %v5533_v54 = vld [vmem:[%s10719_s9 + $0x58] sm:$0xff] }
 0x7ed   : > { %5615 = vmatpush.msrb.mxu0 %v5536_v27  ;;  %v5545_v27 = vld [vmem:[%s10719_s9 + $0xb8] sm:$0xff] }
 0x7ee   : > { %v10082_v15 = vadd.f32 %v10033_v23, %v5230_v43  ;;  %v5208_v1 = vmax.f32 %v5070_v18, %v5202_v46  ;;  %v5532_v43 = vld [vmem:[%s10719_s9 + $0x50] sm:$0xff] }
 0x7ef   : > { %v10084_v31 = vld [vmem:[#allocation1 + $0x3] ss:$9 sm:$0xff]  ;;  %5616 = vmatpush.msrb.mxu0 %v5535_v8 }
 0x7f0   : > { %5277 = vst [vmem:[#allocation1] sm:$0xff] %v10037_v59  ;;  %v5217_v45 = vadd.f32 %v10020_v7, %v5208_v1  ;;  %v5544_v8 = vld [vmem:[%s10719_s9 + $0xb0] sm:$0xff] }
 0x7f1   : > { %5419 = vst.msk [vmem:[#allocation5 + $0x3] sm:$0x1] %vm10040_vm3, %v10082_v15  ;;  %5617 = vmatpush.msrb.mxu0 %v5534_v12  ;;  %v5597_v12 = vld [vmem:[%s10719_s9 + $0x258] sm:$0xff] }
 0x7f2   : > { %v5222_v4 = vmax.f32 %v5217_v45, 0.0  ;;  %v5530_v45 = vld [vmem:[%s10719_s9 + $0x40] sm:$0xff] }
 0x7f3   : > { %5618 = vmatpush.msrb.mxu0 %v5533_v54  ;;  %v5575_v54 = vld [vmem:[%s10719_s9 + $0x1a8] sm:$0xff] }
 0x7f4   : > { %v5231_v52 = vmul.f32 %v10027_v61, %v5222_v4  ;;  %v5569_v4 = vld [vmem:[%s10719_s9 + $0x178] sm:$0xff] }
 0x7f5   : > { %5619 = vmatpush.msrb.mxu0 %v5532_v43  ;;  %5654 = vmatpush.msrb.mxu2 %v5569_v4  ;;  %v5558_v43 = vld [vmem:[%s10719_s9 + $0x120] sm:$0xff] }
 0x7f6   : > { %v10093_v10 = vadd.f32 %v10033_v23, %v5231_v52  ;;  %v5585_v52 = vld [vmem:[%s10719_s9 + $0x1f8] sm:$0xff] }
 0x7f7   : > { %v10095_v30 = vld [vmem:[#allocation1 + $0x4] ss:$9 sm:$0xff]  ;;  %5674 = vmatpush.msra.mxu3 %v5585_v52 }
 0x7f8   : > { %5287 = vst [vmem:[#allocation1] sm:$0xff] %v10037_v59  ;;  %v5557_v52 = vld [vmem:[%s10719_s9 + $0x118] sm:$0xff] }
 0x7f9   : > { %5470 = vst.msk [vmem:[#allocation5 + $0x4] sm:$0x1] %vm10040_vm3, %v10093_v10  ;;  %vm5303_vm3 = vcmp.ge.s32.totalorder %v5241_v3, 96 }
 0x7fa   : > { %vm10457_vm5 = vmand %vm5303_vm3, %vm5304_vm4 }
 0x7ff   : > { %v10101_v11 = vld [vmem:[#allocation1 + $0x5] ss:$9 sm:$0xff] }
 0x800   : > { %5297 = vst [vmem:[#allocation1] sm:$0xff] %v10037_v59 }
 0x807   : > { %v10104_v7 = vld [vmem:[#allocation1 + $0x6] ss:$9 sm:$0xff] }
 0x808   : > { %5307 = vst [vmem:[#allocation1] sm:$0xff] %v10037_v59 }
 0x80f   : > { %v10107_v61 = vld [vmem:[#allocation1 + $0x7] ss:$9 sm:$0xff] }
 0x810   : > { %5319 = vst [vmem:[#allocation1] sm:$0xff] %v10052_v29 }
 0x817   : > { %v5321_v60 = vld [vmem:[#allocation1 + $0x1] ss:$9 sm:$0xff] }
 0x818   : > { %5326 = vst [vmem:[#allocation1] sm:$0xff] %v10052_v29  ;;  %5322 = vrot.lane.b32.xlu0 %v5321_v60, %s10829_s17  ;;  %v5528_v60 = vld [vmem:[%s10719_s9 + $0x30] sm:$0xff] }
 0x81f   : > { %v5328_v23 = vld [vmem:[#allocation1 + $0x2] ss:$9 sm:$0xff] }
 0x820   : > { %5333 = vst [vmem:[#allocation1] sm:$0xff] %v10052_v29 }
 0x827   : > { %v5335_v39 = vld [vmem:[#allocation1 + $0x3] ss:$9 sm:$0xff] }
 0x828   : > { %5340 = vst [vmem:[#allocation1] sm:$0xff] %v10052_v29 }
 0x82f   : > { %v10114_v32 = vld [vmem:[#allocation1 + $0x4] ss:$9 sm:$0xff] }
 0x830   : > { %5347 = vst [vmem:[#allocation1] sm:$0xff] %v10052_v29 }
 0x837   : > { %v10119_v35 = vld [vmem:[#allocation1 + $0x5] ss:$9 sm:$0xff] }
 0x838   : > { %5354 = vst [vmem:[#allocation1] sm:$0xff] %v10052_v29 }
 0x83a   : > { %v5251_v13 = vpop.permute.xlu2 %5250 }
 0x83b   : > { %5256 = vst.msk [vmem:[#allocation5] sm:$0x1] %vm10122_vm7, %v5251_v13  ;;  %v5583_v13 = vld [vmem:[%s10719_s9 + $0x1e8] sm:$0xff] }
 0x83f   : > { %v10128_v14 = vld [vmem:[#allocation1 + $0x6] ss:$9 sm:$0xff] }
 0x840   : > { %5361 = vst [vmem:[#allocation1] sm:$0xff] %v10052_v29 }
 0x847   : > { %v10131_v21 = vld [vmem:[#allocation1 + $0x7] ss:$9 sm:$0xff] }
 0x848   : > { %5370 = vst [vmem:[#allocation1] sm:$0xff] %v10067_v28 }
 0x84f   : > { %v5372_v59 = vld [vmem:[#allocation1 + $0x1] ss:$9 sm:$0xff] }
 0x850   : > { %5373 = vrot.lane.b32.xlu1 %v5372_v59, %s10829_s17  ;;  %5377 = vst [vmem:[#allocation1] sm:$0xff] %v10067_v28  ;;  %v5526_v59 = vld [vmem:[%s10719_s9 + $0x20] sm:$0xff] }
 0x857   : > { %v5379_v63 = vld [vmem:[#allocation1 + $0x2] ss:$9 sm:$0xff] }
 0x858   : > { %5384 = vst [vmem:[#allocation1] sm:$0xff] %v10067_v28  ;;  %5260 = vrot.lane.b32.xlu1 %v5259_v22, %s10763_s20 }
 0x85f   : > { %v5386_v42 = vld [vmem:[#allocation1 + $0x3] ss:$9 sm:$0xff] }
 0x860   : > { %5391 = vst [vmem:[#allocation1] sm:$0xff] %v10067_v28 }
 0x867   : > { %v5393_v44 = vld [vmem:[#allocation1 + $0x4] ss:$9 sm:$0xff] }
 0x868   : > { %5398 = vst [vmem:[#allocation1] sm:$0xff] %v10067_v28 }
 0x86f   : > { %v10140_v62 = vld [vmem:[#allocation1 + $0x5] ss:$9 sm:$0xff] }
 0x870   : > { %5405 = vst [vmem:[#allocation1] sm:$0xff] %v10067_v28 }
 0x877   : > { %v10143_v58 = vld [vmem:[#allocation1 + $0x6] ss:$9 sm:$0xff] }
 0x878   : > { %5412 = vst [vmem:[#allocation1] sm:$0xff] %v10067_v28 }
 0x87f   : > { %v10146_v50 = vld [vmem:[#allocation1 + $0x7] ss:$9 sm:$0xff] }
 0x880   : > { %5421 = vst [vmem:[#allocation1] sm:$0xff] %v10082_v15 }
 0x887   : > { %v5423_v56 = vld [vmem:[#allocation1 + $0x1] ss:$9 sm:$0xff] }
 0x888   : > { %5424 = vrot.lane.b32.xlu2 %v5423_v56, %s10829_s17  ;;  %5428 = vst [vmem:[#allocation1] sm:$0xff] %v10082_v15  ;;  %v5581_v56 = vld [vmem:[%s10719_s9 + $0x1d8] sm:$0xff] }
 0x88a   : > { %v5323_v53 = vpop.permute.xlu0 %5322 }
 0x88b   : > { %5325 = vst.msk [vmem:[#allocation5 + $0x1] sm:$0x1] %vm10122_vm7, %v5323_v53  ;;  %v5590_v53 = vld [vmem:[%s10719_s9 + $0x220] sm:$0xff] }
 0x88f   : > { %v5430_v26 = vld [vmem:[#allocation1 + $0x2] ss:$9 sm:$0xff] }
 0x890   : > { %5329 = vrot.lane.b32.xlu2 %v5328_v23, %s10763_s20  ;;  %5431 = vrot.lane.b32.xlu1 %v5430_v26, %s10763_s20  ;;  %5435 = vst [vmem:[#allocation1] sm:$0xff] %v10082_v15  ;;  %v5524_v26 = vld [vmem:[%s10719_s9 + $0x10] sm:$0xff] }
 0x897   : > { %v5437_v37 = vld [vmem:[#allocation1 + $0x3] ss:$9 sm:$0xff] }
 0x898   : > { %5442 = vst [vmem:[#allocation1] sm:$0xff] %v10082_v15  ;;  %5336 = vrot.lane.b32.xlu1 %v5335_v39, %s10830_s0 }
 0x89f   : > { %v5444_v49 = vld [vmem:[#allocation1 + $0x4] ss:$9 sm:$0xff] }
 0x8a0   : > { %5449 = vst [vmem:[#allocation1] sm:$0xff] %v10082_v15 }
 0x8a7   : > { %v5451_v48 = vld [vmem:[#allocation1 + $0x5] ss:$9 sm:$0xff] }
 0x8a8   : > { %5456 = vst [vmem:[#allocation1] sm:$0xff] %v10082_v15 }
 0x8af   : > { %v5458_v16 = vld [vmem:[#allocation1 + $0x6] ss:$9 sm:$0xff] }
 0x8b0   : > { %5463 = vst [vmem:[#allocation1] sm:$0xff] %v10082_v15  ;;  %v5596_v15 = vld [vmem:[%s10719_s9 + $0x250] sm:$0xff] }
 0x8b7   : > { %v5465_v29 = vld [vmem:[#allocation1 + $0x7] ss:$9 sm:$0xff] }
 0x8b8   : > { %5472 = vst [vmem:[#allocation1] sm:$0xff] %v10093_v10 }
 0x8bf   : > { %v5474_v17 = vld [vmem:[#allocation1 + $0x1] ss:$9 sm:$0xff] }
 0x8c0   : > { %5475 = vrot.lane.b32.xlu0 %v5474_v17, %s10829_s17  ;;  %5479 = vst [vmem:[#allocation1] sm:$0xff] %v10093_v10  ;;  %v5549_v17 = vld [vmem:[%s10719_s9 + $0xd8] sm:$0xff] }
 0x8c2   : > { %v5374_v0 = vpop.permute.xlu1 %5373 }
 0x8c3   : > { %5376 = vst.msk [vmem:[#allocation5 + $0x2] sm:$0x1] %vm10122_vm7, %v5374_v0  ;;  %v5563_v0 = vld [vmem:[%s10719_s9 + $0x148] sm:$0xff] }
 0x8c7   : > { %v5481_v38 = vld [vmem:[#allocation1 + $0x2] ss:$9 sm:$0xff] }
 0x8c8   : > { %5380 = vrot.lane.b32.xlu0 %v5379_v63, %s10763_s20  ;;  %5482 = vrot.lane.b32.xlu2 %v5481_v38, %s10763_s20  ;;  %5486 = vst [vmem:[#allocation1] sm:$0xff] %v10093_v10  ;;  %s10862_s20 = smov 80   ;;  %v5566_v63 = vld [vmem:[%s10719_s9 + $0x160] sm:$0xff]  ;;  %v5580_v38 = vld [vmem:[%s10719_s9 + $0x1d0] sm:$0xff] }
 0x8ca   : > { %v5261_v20 = vpop.permute.xlu1 %5260 }
 0x8cb   : > { %5266 = vst.msk [vmem:[#allocation5] sm:$0x1] %vm10171_vm10, %v5261_v20  ;;  %v5548_v20 = vld [vmem:[%s10719_s9 + $0xd0] sm:$0xff] }
 0x8cf   : > { %v5488_v51 = vld [vmem:[#allocation1 + $0x3] ss:$9 sm:$0xff] }
 0x8d0   : > { %5270 = vrot.lane.b32.xlu0 %v10084_v31, %s10830_s0  ;;  %5387 = vrot.lane.b32.xlu2 %v5386_v42, %s10830_s0  ;;  %5493 = vst [vmem:[#allocation1] sm:$0xff] %v10093_v10  ;;  %v5531_v31 = vld [vmem:[%s10719_s9 + $0x48] sm:$0xff] }
 0x8d1   : > { %5489 = vrot.lane.b32.xlu1 %v5488_v51, %s10830_s0  ;;  %5620 = vmatpush.msrb.mxu0 %v5531_v31  ;;  %v5551_v42 = vld [vmem:[%s10719_s9 + $0xe8] sm:$0xff] }
 0x8d2   : > { %v5579_v51 = vld [vmem:[%s10719_s9 + $0x1c8] sm:$0xff] }
 0x8d3   : > { %5621 = vmatpush.msrb.mxu0 %v5530_v45  ;;  %v5595_v45 = vld [vmem:[%s10719_s9 + $0x248] sm:$0xff] }
 0x8d7   : > { %v5495_v19 = vld [vmem:[#allocation1 + $0x4] ss:$9 sm:$0xff] }
 0x8d8   : > { %5438 = vrot.lane.b32.xlu0 %v5437_v37, %s10830_s0  ;;  %5280 = vrot.lane.b32.xlu2 %v10095_v30, %s10764_s30  ;;  %5500 = vst [vmem:[#allocation1] sm:$0xff] %v10093_v10  ;;  %v5529_v30 = vld [vmem:[%s10719_s9 + $0x38] sm:$0xff]  ;;  %v5564_v37 = vld [vmem:[%s10719_s9 + $0x150] sm:$0xff]  ;;  %s6290_s0 = scalar_lea.hbm %s10725_s15, 2 }
 0x8d9   : > { %5394 = vrot.lane.b32.xlu1 %v5393_v44, %s10764_s30  ;;  %5622 = vmatpush.msrb.mxu0 %v5529_v30  ;;  %v5525_v44 = vld [vmem:[%s10719_s9 + $0x18] sm:$0xff]  ;;  %v5542_v30 = vld [vmem:[%s10719_s9 + $0xa0] sm:$0xff] }
 0x8db   : > { %5623 = vmatpush.msrb.mxu0 %v5528_v60  ;;  %v5556_v60 = vld [vmem:[%s10719_s9 + $0x110] sm:$0xff] }
 0x8df   : > { %v5502_v2 = vld [vmem:[#allocation1 + $0x5] ss:$9 sm:$0xff] }
 0x8e0   : > { %5343 = vrot.lane.b32.xlu0 %v10114_v32, %s10764_s30  ;;  %5445 = vrot.lane.b32.xlu2 %v5444_v49, %s10764_s30  ;;  %5507 = vst [vmem:[#allocation1] sm:$0xff] %v10093_v10 }
 0x8e1   : > { %5290 = vrot.lane.b32.xlu1 %v10101_v11, %s10862_s20  ;;  %v5553_v11 = vld [vmem:[%s10719_s9 + $0xf8] sm:$0xff] }
 0x8e2   : > { %v5425_v33 = vpop.permute.xlu2 %5424  ;;  %5634 = vmatpush.msrb.mxu1 %v5553_v11  ;;  %v5594_v11 = vld [vmem:[%s10719_s9 + $0x240] sm:$0xff] }
 0x8e3   : > { %5427 = vst.msk [vmem:[#allocation5 + $0x3] sm:$0x1] %vm10122_vm7, %v5425_v33  ;;  %v5547_v33 = vld [vmem:[%s10719_s9 + $0xc8] sm:$0xff] }
 0x8e4   : > { %5635 = vmatpush.msrb.mxu1 %v5552_v6  ;;  %v5555_v6 = vld [vmem:[%s10719_s9 + $0x108] sm:$0xff] }
 0x8e6   : > { %5636 = vmatpush.msrb.mxu1 %v5551_v42  ;;  %v5754_v42 = vld [vmem:[%s10723_s13 + $0x8] sm:$0xff] }
 0x8e7   : > { %v5509_v9 = vld [vmem:[#allocation1 + $0x6] ss:$9 sm:$0xff] }
 0x8e8   : > { %5350 = vrot.lane.b32.xlu2 %v10119_v35, %s10862_s20  ;;  %5496 = vrot.lane.b32.xlu0 %v5495_v19, %s10764_s30  ;;  %5514 = vst [vmem:[#allocation1] sm:$0xff] %v10093_v10  ;;  %s10863_s30 = smov 112   ;;  %v5568_v10 = vld [vmem:[%s10719_s9 + $0x170] sm:$0xff]  ;;  %v5527_v35 = vld [vmem:[%s10719_s9 + $0x28] sm:$0xff] }
 0x8e9   : > { %5452 = vrot.lane.b32.xlu1 %v5451_v48, %s10862_s20  ;;  %5655 = vmatpush.msrb.mxu2 %v5568_v10  ;;  %v5601_v19 = vld [vmem:[%s10719_s9 + $0x278] sm:$0xff]  ;;  %v5574_v10 = vld [vmem:[%s10719_s9 + $0x1a0] sm:$0xff] }
 0x8ea   : > { %v5330_v5 = vpop.permute.xlu2 %5329  ;;  %5624 = vmatpush.msrb.mxu0 %v5527_v35  ;;  %v5540_v35 = vld [vmem:[%s10719_s9 + $0x90] sm:$0xff] }
 0x8eb   : > { %5332 = vst.msk [vmem:[#allocation5 + $0x1] sm:$0x1] %vm10171_vm10, %v5330_v5  ;;  %v5561_v5 = vld [vmem:[%s10719_s9 + $0x138] sm:$0xff] }
 0x8ec   : > { %5625 = vmatpush.msrb.mxu0 %v5526_v59  ;;  %v5554_v59 = vld [vmem:[%s10719_s9 + $0x100] sm:$0xff] }
 0x8ee   : > { %5626 = vmatpush.msrb.mxu0 %v5525_v44  ;;  %v5570_v44 = vld [vmem:[%s10719_s9 + $0x180] sm:$0xff] }
 0x8ef   : > { %v5516_v28 = vld [vmem:[#allocation1 + $0x7] ss:$9 sm:$0xff] }
 0x8f0   : > { %5401 = vrot.lane.b32.xlu0 %v10140_v62, %s10862_s20  ;;  %5503 = vrot.lane.b32.xlu2 %v5502_v2, %s10862_s20  ;;  %v5565_v62 = vld [vmem:[%s10719_s9 + $0x158] sm:$0xff]  ;;  %v5562_v2 = vld [vmem:[%s10719_s9 + $0x140] sm:$0xff]  ;;  %s5792_s20 = scalar_lea.sflag [#allocation7], %s485_s24 }
 0x8f1   : > { %5357 = vrot.lane.b32.xlu1 %v10128_v14, %s10762_s26  ;;  %5627 = vmatpush.msrb.mxu0 %v5524_v26  ;;  %v5592_v14 = vld [vmem:[%s10719_s9 + $0x230] sm:$0xff]  ;;  %v5589_v26 = vld [vmem:[%s10719_s9 + $0x218] sm:$0xff] }
 0x8f8   : > { %5300 = vrot.lane.b32.xlu0 %v10104_v7, %s10762_s26  ;;  %5408 = vrot.lane.b32.xlu2 %v10143_v58, %s10762_s26  ;;  %v5567_v7 = vld [vmem:[%s10719_s9 + $0x168] sm:$0xff]  ;;  %v5582_v58 = vld [vmem:[%s10719_s9 + $0x1e0] sm:$0xff] }
 0x8f9   : > { %5510 = vrot.lane.b32.xlu1 %v5509_v9, %s10762_s26  ;;  %5656 = vmatpush.msrb.mxu2 %v5567_v7  ;;  %v5600_v9 = vld [vmem:[%s10719_s9 + $0x270] sm:$0xff]  ;;  %v5573_v7 = vld [vmem:[%s10719_s9 + $0x198] sm:$0xff] }
 0x8fb   : > { %5657 = vmatpush.msrb.mxu2 %v5566_v63 }
 0x8fd   : > { %5658 = vmatpush.msrb.mxu2 %v5565_v62 }
 0x8ff   : > { %5659 = vmatpush.msrb.mxu2 %v5564_v37  ;;  %v5588_v37 = vld [vmem:[%s10719_s9 + $0x210] sm:$0xff] }
 0x900   : > { %5459 = vrot.lane.b32.xlu0 %v5458_v16, %s10762_s26  ;;  %5310 = vrot.lane.b32.xlu2 %v10107_v61, %s10863_s30  ;;  %v5584_v61 = vld [vmem:[%s10719_s9 + $0x1f0] sm:$0xff] }
 0x901   : > { %5415 = vrot.lane.b32.xlu1 %v10146_v50, %s10863_s30  ;;  %5675 = vmatpush.msra.mxu3 %v5584_v61  ;;  %v5550_v50 = vld [vmem:[%s10719_s9 + $0xe0] sm:$0xff]  ;;  %v5541_v61 = vld [vmem:[%s10719_s9 + $0x98] sm:$0xff] }
 0x902   : > { %v5432_v40 = vpop.permute.xlu1 %5431  ;;  %5637 = vmatpush.msrb.mxu1 %v5550_v50  ;;  %5660 = vmatpush.msrb.mxu2 %v5563_v0  ;;  %v5538_v50 = vld [vmem:[%s10719_s9 + $0x80] sm:$0xff]  ;;  %v5730_v0 = vld [vmem:[%s10721_s11 + $0x78] sm:$0xff] }
 0x903   : > { %5434 = vst.msk [vmem:[#allocation5 + $0x3] sm:$0x1] %vm10171_vm10, %v5432_v40  ;;  %5676 = vmatpush.msra.mxu3 %v5583_v13  ;;  %v5578_v40 = vld [vmem:[%s10719_s9 + $0x1c0] sm:$0xff]  ;;  %v5572_v13 = vld [vmem:[%s10719_s9 + $0x190] sm:$0xff] }
 0x904   : > { %5638 = vmatpush.msrb.mxu1 %v5549_v17  ;;  %5661 = vmatpush.msrb.mxu2 %v5562_v2  ;;  %v5586_v17 = vld [vmem:[%s10719_s9 + $0x200] sm:$0xff]  ;;  %v5725_v2 = vld [vmem:[%s10721_s11 + $0x50] sm:$0xff] }
 0x905   : > { %5677 = vmatpush.msra.mxu3 %v5582_v58  ;;  %v5591_v58 = vld [vmem:[%s10719_s9 + $0x228] sm:$0xff] }
 0x906   : > { %5639 = vmatpush.msrb.mxu1 %v5548_v20  ;;  %5662 = vmatpush.msrb.mxu2 %v5561_v5  ;;  %v5727_v20 = vld [vmem:[%s10721_s11 + $0x60] sm:$0xff] }
 0x907   : > { %5678 = vmatpush.msra.mxu3 %v5581_v56 }
 0x908   : > { %5364 = vrot.lane.b32.xlu0 %v10131_v21, %s10863_s30  ;;  %5466 = vrot.lane.b32.xlu2 %v5465_v29, %s10863_s30  ;;  %v5523_v29 = vld [vmem:[%s10719_s9 + $0x8] sm:$0xff] }
 0x909   : > { %5628 = vmatpush.msrb.mxu0 %v5523_v29  ;;  %5679 = vmatpush.msra.mxu3 %v5580_v38  ;;  %v5539_v21 = vld [vmem:[%s10719_s9 + $0x88] sm:$0xff]  ;;  %v5729_v38 = vld [vmem:[%s10721_s11 + $0x70] sm:$0xff] }
 0x90a   : > { %v5337_v55 = vpop.permute.xlu1 %5336  ;;  %5640 = vmatpush.msrb.mxu1 %v5547_v33  ;;  %v5724_v33 = vld [vmem:[%s10721_s11 + $0x48] sm:$0xff] }
 0x90b   : > { %5339 = vst.msk [vmem:[#allocation5 + $0x1] sm:$0x1] %vm10224_vm13, %v5337_v55  ;;  %5629 = vmatpush.msrb.mxu0 %v5522_v24  ;;  %5680 = vmatpush.msra.mxu3 %v5579_v51  ;;  %v5599_v55 = vld [vmem:[%s10719_s9 + $0x268] sm:$0xff] }
 0x90c   : > { %v5728_v24 = vld [vmem:[%s10721_s11 + $0x68] sm:$0xff] }
 0x90d   : > { %5694 = vmatpush.msra.mxu0 %v5601_v19  ;;  %5681 = vmatpush.msra.mxu3 %v5578_v40  ;;  %v5726_v19 = vld [vmem:[%s10721_s11 + $0x58] sm:$0xff] }
 0x90f   : > { %5695 = vmatpush.msra.mxu0 %v5600_v9  ;;  %v5723_v9 = vld [vmem:[%s10721_s11 + $0x40] sm:$0xff] }
 0x910   : > { %5517 = vrot.lane.b32.xlu0 %v5516_v28, %s10863_s30  ;;  %s6284_s30 = sshra.s32 %s5805_s21, 4  ;;  %s6285_s30 = int_to_ptr.hbm [resolvable:$true] %s6284_s30 }
 0x911   : > { %5696 = vmatpush.msra.mxu0 %v5599_v55  ;;  %s6286_s26 = scalar_lea.hbm %s6285_s30, 1  ;;  %p6291_p0 = scmp.lt.s32.totalorder %s6285_s30, %s10725_s15 }
 0x912   : > { %p6287_p11 = scmp.ne.s32.totalorder %s6285_s30, %s6286_s26  ;;  %p6292_p1 = scmp.lt.s32.totalorder %s6290_s0, %s6286_s26 }
 0x913   : > { %5697 = vmatpush.msra.mxu0 %v5598_v36  ;;  %v5721_v36 = vld [vmem:[%s10721_s11 + $0x30] sm:$0xff] }
 0x914   : > { %p6288_p12 = pnand %p6287_p11, %p6460_p5  ;;  %p6293_p2 = por %p6292_p1, %p6291_p0 }
 0x915   : > { %5698 = vmatpush.msra.mxu0 %v5597_v12  ;;  %v5716_v12 = vld [vmem:[%s10721_s11 + $0x8] sm:$0xff] }
 0x916   : > { %p6289_p13 = pneg %p6288_p12 }
 0x917   : > { %5699 = vmatpush.msra.mxu0 %v5596_v15  ;;  %v5765_v15 = vld [vmem:[%s10723_s13 + $0x60] sm:$0xff] }
 0x918   : > { %p6294_p3 = pnand %p6293_p2, %p6289_p13 }
 0x919   : > { %5700 = vmatpush.msra.mxu0 %v5595_v45  ;;  %v5762_v45 = vld [vmem:[%s10723_s13 + $0x48] sm:$0xff] }
 0x91b   : > { %5701 = vmatpush.msra.mxu0 %v5594_v11  ;;  %v5759_v11 = vld [vmem:[%s10723_s13 + $0x30] sm:$0xff] }
 0x922   : > { %v5483_v57 = vpop.permute.xlu2 %5482 }
 0x92a   : > { %v5388_v22 = vpop.permute.xlu2 %5387 }
 0x932   : > { %v5476_v25 = vpop.permute.xlu0 %5475  ;;  %v5281_v41 = vpop.permute.xlu2 %5280 }
 0x933   : > { %5478 = vst.msk [vmem:[#allocation5 + $0x4] sm:$0x1] %vm10122_vm7, %v5476_v25  ;;  %v5560_v25 = vld [vmem:[%s10719_s9 + $0x130] sm:$0xff]  ;;  %vm10495_vm7 = vcmp.ge.s32.totalorder %v5241_v3, 112  ;;  %v5571_v3 = vld [vmem:[%s10719_s9 + $0x188] sm:$0xff] }
 0x934   : > { %5485 = vst.msk [vmem:[#allocation5 + $0x4] sm:$0x1] %vm10171_vm10, %v5483_v57  ;;  %v5546_v57 = vld [vmem:[%s10719_s9 + $0xc0] sm:$0xff]  ;;  %5663 = vmatpush.msrb.mxu2 %v5560_v25  ;;  %vm10529_vm9 = vmand %vm10495_vm7, %vm10500_vm8  ;;  %v5722_v25 = vld [vmem:[%s10721_s11 + $0x38] sm:$0xff] }
 0x935   : > { %5641 = vmatpush.msrb.mxu1 %v5546_v57 }
 0x937   : > { %5642 = vmatpush.msrb.mxu1 %v5545_v27  ;;  %v5720_v27 = vld [vmem:[%s10721_s11 + $0x28] sm:$0xff] }
 0x939   : > { %5643 = vmatpush.msrb.mxu1 %v5544_v8  ;;  %v5717_v8 = vld [vmem:[%s10721_s11 + $0x10] sm:$0xff] }
 0x93a   : > { %v5381_v34 = vpop.permute.xlu0 %5380  ;;  %v5446_v18 = vpop.permute.xlu2 %5445 }
 0x93b   : > { %5383 = vst.msk [vmem:[#allocation5 + $0x2] sm:$0x1] %vm10171_vm10, %v5381_v34  ;;  %v5576_v34 = vld [vmem:[%s10719_s9 + $0x1b0] sm:$0xff] }
 0x93c   : > { %5390 = vst.msk [vmem:[#allocation5 + $0x2] sm:$0x1] %vm10224_vm13, %v5388_v22  ;;  %v5577_v22 = vld [vmem:[%s10719_s9 + $0x1b8] sm:$0xff] }
 0x93d   : > { %5682 = vmatpush.msra.mxu3 %v5577_v22 }
 0x93f   : > { %5683 = vmatpush.msra.mxu3 %v5576_v34  ;;  %v5718_v34 = vld [vmem:[%s10721_s11 + $0x18] sm:$0xff] }
 0x941   : > { %5684 = vmatpush.msra.mxu3 %v5575_v54  ;;  %v5715_v54 = vld [vmem:[%s10721_s11] sm:$0xff] }
 0x942   : > { %v5271_v46 = vpop.permute.xlu0 %5270  ;;  %v5351_v39 = vpop.permute.xlu2 %5350 }
 0x943   : > { %5276 = vst.msk [vmem:[#allocation5] sm:$0x1] %vm10224_vm13, %v5271_v46  ;;  %v5490_v1 = vpop.permute.xlu1 %5489  ;;  %v5543_v46 = vld [vmem:[%s10719_s9 + $0xa8] sm:$0xff]  ;;  %5685 = vmatpush.msra.mxu3 %v5574_v10  ;;  %v5602_v10 = vld [vmem:[%s10720_s10] sm:$0x1] }
 0x944   : > { %5492 = vst.msk [vmem:[#allocation5 + $0x4] sm:$0x1] %vm10224_vm13, %v5490_v1  ;;  %5644 = vmatpush.msrb.mxu1 %v5543_v46  ;;  %v5766_v46 = vld [vmem:[%s10723_s13 + $0x68] sm:$0xff]  ;;  %v5764_v1 = vld [vmem:[%s10723_s13 + $0x58] sm:$0xff] }
 0x945   : > { %5286 = vst.msk [vmem:[#allocation5] sm:$0x1] %vm10259_vm1, %v5281_v41  ;;  %v5559_v41 = vld [vmem:[%s10719_s9 + $0x128] sm:$0xff]  ;;  %5686 = vmatpush.msra.mxu3 %v5573_v7 }
 0x946   : > { %5664 = vmatpush.msrb.mxu2 %v5559_v41  ;;  %5645 = vmatpush.msrb.mxu1 %v5542_v30  ;;  %v5719_v41 = vld [vmem:[%s10721_s11 + $0x20] sm:$0xff] }
 0x947   : > { %5687 = vmatpush.msra.mxu3 %v5572_v13 }
 0x948   : > { %5665 = vmatpush.msrb.mxu2 %v5558_v43  ;;  %5646 = vmatpush.msrb.mxu1 %v5541_v61  ;;  %v5767_v43 = vld [vmem:[%s10723_s13 + $0x70] sm:$0xff]  ;;  %v5758_v61 = vld [vmem:[%s10723_s13 + $0x28] sm:$0xff] }
 0x949   : > { %5688 = vmatpush.msra.mxu3 %v5571_v3 }
 0x94a   : > { %v5439_v23 = vpop.permute.xlu0 %5438  ;;  %v5504_v16 = vpop.permute.xlu2 %5503  ;;  %5666 = vmatpush.msrb.mxu2 %v5557_v52  ;;  %5647 = vmatpush.msrb.mxu1 %v5540_v35  ;;  %v5760_v52 = vld [vmem:[%s10723_s13 + $0x38] sm:$0xff] }
 0x94b   : > { %5441 = vst.msk [vmem:[#allocation5 + $0x3] sm:$0x1] %vm10224_vm13, %v5439_v23  ;;  %v5395_v32 = vpop.permute.xlu1 %5394  ;;  %v5593_v23 = vld [vmem:[%s10719_s9 + $0x238] sm:$0xff]  ;;  %5689 = vmatpush.msra.mxu3 %v5570_v44  ;;  %v5753_v44 = vld [vmem:[%s10723_s13] sm:$0xff] }
 0x94c   : > { %5397 = vst.msk [vmem:[#allocation5 + $0x2] sm:$0x1] %vm10259_vm1, %v5395_v32  ;;  %5667 = vmatpush.msrb.mxu2 %v5556_v60  ;;  %5702 = vmatpush.msra.mxu0 %v5593_v23  ;;  %v5757_v60 = vld [vmem:[%s10723_s13 + $0x20] sm:$0xff]  ;;  %v5756_v32 = vld [vmem:[%s10723_s13 + $0x18] sm:$0xff] }
 0x94d   : > { %5448 = vst.msk [vmem:[#allocation5 + $0x3] sm:$0x1] %vm10259_vm1, %v5446_v18  ;;  %5648 = vmatpush.msrb.mxu1 %v5539_v21 }
 0x94e   : > { %5668 = vmatpush.msrb.mxu2 %v5555_v6  ;;  %5703 = vmatpush.msra.mxu0 %v5592_v14 }
 0x94f   : > { %5649 = vmatpush.msrb.mxu1 %v5538_v50 }
 0x950   : > { %5669 = vmatpush.msrb.mxu2 %v5554_v59  ;;  %5704 = vmatpush.msra.mxu0 %v5591_v58 }
 0x951   : > { %5732 = vmatpush.msra.mxu1 %v5730_v0 }
 0x952   : > { %v5344_v49 = vpop.permute.xlu0 %5343  ;;  %v5409_v18 = vpop.permute.xlu2 %5408  ;;  %5705 = vmatpush.msra.mxu0 %v5590_v53  ;;  %v5769_v53 = vld [vmem:[%s10882_s14] sm:$0x1] }
 0x953   : > { %5346 = vst.msk [vmem:[#allocation5 + $0x1] sm:$0x1] %vm10259_vm1, %v5344_v49  ;;  %v5291_v48 = vpop.permute.xlu1 %5290  ;;  %5733 = vmatpush.msra.mxu1 %v5729_v38 }
 0x954   : > { %5296 = vst.msk [vmem:[#allocation5] sm:$0x1] %vm10352_vm2, %v5291_v48  ;;  %5706 = vmatpush.msra.mxu0 %v5589_v26  ;;  %v5587_v48 = vld [vmem:[%s10719_s9 + $0x208] sm:$0xff] }
 0x955   : > { %5353 = vst.msk [vmem:[#allocation5 + $0x1] sm:$0x1] %vm10352_vm2, %v5351_v39  ;;  %5734 = vmatpush.msra.mxu1 %v5728_v24 }
 0x956   : > { %5707 = vmatpush.msra.mxu0 %v5588_v37 }
 0x957   : > { %5735 = vmatpush.msra.mxu1 %v5727_v20 }
 0x958   : > { %5708 = vmatpush.msra.mxu0 %v5587_v48 }
 0x959   : > { %5736 = vmatpush.msra.mxu1 %v5726_v19 }
 0x95a   : > { %v5497_v47 = vpop.permute.xlu0 %5496  ;;  %v5311_v63 = vpop.permute.xlu2 %5310  ;;  %5709 = vmatpush.msra.mxu0 %v5586_v17 }
 0x95b   : > { %v5453_v28 = vpop.permute.xlu1 %5452  ;;  %5499 = vst.msk [vmem:[#allocation5 + $0x4] sm:$0x1] %vm10259_vm1, %v5497_v47  ;;  %5737 = vmatpush.msra.mxu1 %v5725_v2 }
 0x95c   : > { %5455 = vst.msk [vmem:[#allocation5 + $0x3] sm:$0x1] %vm10352_vm2, %v5453_v28 }
 0x95d   : > { %5506 = vst.msk [vmem:[#allocation5 + $0x4] sm:$0x1] %vm10352_vm2, %v5504_v16  ;;  %5738 = vmatpush.msra.mxu1 %v5724_v33 }
 0x95f   : > { %5739 = vmatpush.msra.mxu1 %v5723_v9 }
 0x961   : > { %5740 = vmatpush.msra.mxu1 %v5722_v25 }
 0x962   : > { %v5402_v31 = vpop.permute.xlu0 %5401  ;;  %v5467_v16 = vpop.permute.xlu2 %5466 }
 0x963   : > { %v5358_v4 = vpop.permute.xlu1 %5357  ;;  %5404 = vst.msk [vmem:[#allocation5 + $0x2] sm:$0x1] %vm10352_vm2, %v5402_v31  ;;  %5741 = vmatpush.msra.mxu1 %v5721_v36  ;;  %v5763_v31 = vld [vmem:[%s10723_s13 + $0x50] sm:$0xff] }
 0x964   : > { %5360 = vst.msk [vmem:[#allocation5 + $0x1] sm:$0x1] %vm10457_vm5, %v5358_v4  ;;  %v5761_v4 = vld [vmem:[%s10723_s13 + $0x40] sm:$0xff] }
 0x965   : > { %5411 = vst.msk [vmem:[#allocation5 + $0x2] sm:$0x1] %vm10457_vm5, %v5409_v18  ;;  %5742 = vmatpush.msra.mxu1 %v5720_v27  ;;  %v5768_v18 = vld [vmem:[%s10723_s13 + $0x78] sm:$0xff] }
 0x966   : > { %5770 = vmatpush.msra.mxu2 %v5768_v18 }
 0x967   : > { %5743 = vmatpush.msra.mxu1 %v5719_v41 }
 0x968   : > { %5771 = vmatpush.msra.mxu2 %v5767_v43 }
 0x969   : > { %5744 = vmatpush.msra.mxu1 %v5718_v34 }
 0x96a   : > { %v5301_v62 = vpop.permute.xlu0 %5300  ;;  %5772 = vmatpush.msra.mxu2 %v5766_v46 }
 0x96b   : > { %5306 = vst.msk [vmem:[#allocation5] sm:$0x1] %vm10457_vm5, %v5301_v62  ;;  %v5511_v56 = vpop.permute.xlu1 %5510  ;;  %5745 = vmatpush.msra.mxu1 %v5717_v8  ;;  %v5731_v62 = vld [vmem:[%s10722_s12] sm:$0x1] }
 0x96c   : > { %5316 = vst.msk [vmem:[#allocation5] sm:$0x1] %vm10529_vm9, %v5311_v63  ;;  %5773 = vmatpush.msra.mxu2 %v5765_v15  ;;  %v5755_v63 = vld [vmem:[%s10723_s13 + $0x10] sm:$0xff] }
 0x96d   : > { %5513 = vst.msk [vmem:[#allocation5 + $0x4] sm:$0x1] %vm10457_vm5, %v5511_v56  ;;  %5746 = vmatpush.msra.mxu1 %v5716_v12 }
 0x96e   : > { %5774 = vmatpush.msra.mxu2 %v5764_v1 }
 0x96f   : > { %5747 = vmatpush.msra.mxu1 %v5715_v54 }
 0x970   : > { %5775 = vmatpush.msra.mxu2 %v5763_v31 }
 0x972   : > { %v5460_v49 = vpop.permute.xlu0 %5459  ;;  %5776 = vmatpush.msra.mxu2 %v5762_v45 }
 0x973   : > { %5462 = vst.msk [vmem:[#allocation5 + $0x3] sm:$0x1] %vm10457_vm5, %v5460_v49  ;;  %v5416_v29 = vpop.permute.xlu1 %5415 }
 0x974   : > { %5469 = vst.msk [vmem:[#allocation5 + $0x3] sm:$0x1] %vm10529_vm9, %v5467_v16  ;;  %5777 = vmatpush.msra.mxu2 %v5761_v4 }
 0x975   : > { %5418 = vst.msk [vmem:[#allocation5 + $0x2] sm:$0x1] %vm10529_vm9, %v5416_v29 }
 0x976   : > { %5778 = vmatpush.msra.mxu2 %v5760_v52 }
 0x978   : > { %5779 = vmatpush.msra.mxu2 %v5759_v11 }
 0x97a   : > { %v5365_v51 = vpop.permute.xlu0 %5364  ;;  %5780 = vmatpush.msra.mxu2 %v5758_v61 }
 0x97b   : > { %5367 = vst.msk [vmem:[#allocation5 + $0x1] sm:$0x1] %vm10529_vm9, %v5365_v51 }
 0x97c   : > { %5781 = vmatpush.msra.mxu2 %v5757_v60 }
 0x97e   : > { %5782 = vmatpush.msra.mxu2 %v5756_v32 }
 0x980   : > { %5783 = vmatpush.msra.mxu2 %v5755_v63 }
 0x982   : > { %v5518_v5 = vpop.permute.xlu0 %5517  ;;  %5784 = vmatpush.msra.mxu2 %v5754_v42 }
 0x983   : > { %5520 = vst.msk [vmem:[#allocation5 + $0x4] sm:$0x1] %vm10529_vm9, %v5518_v5 }
 0x984   : > { %5785 = vmatpush.msra.mxu2 %v5753_v44 }
 0x98a   : > { %v5521_v40 = vld [vmem:[#allocation5] sm:$0x1f] }
 0x98b   : > { %v5604_v47 = vperm.slane %v5521_v40, 0  ;;  %v5605_v55 = vperm.slane %v5521_v40, 1  ;;  %v5606_v28 = vperm.slane %v5521_v40, 2  ;;  %v5607_v57 = vperm.slane %v5521_v40, 3 }
 0x98c   : > { %v5608_v22 = vperm.slane %v5521_v40, 4 }
 0x98d   : > { %5630 = vmatmul.f32.vlgmr.msrb.gmra.mxu0 %v5604_v47  ;;  %5650 = vmatmul.f32.vlgmr.msrb.gmra.mxu1 %v5605_v55 }
 0x98e   : > { %5670 = vmatmul.f32.vlgmr.msrb.gmra.mxu2 %v5606_v28  ;;  %5690 = vmatmul.f32.vlgmr.msra.gmra.mxu3 %v5607_v57 }
 0x995   : > { %5710 = vmatmul.f32.vlgmr.msra.gmra.mxu0 %v5608_v22 }
 0xa0a   : > { %v5631_v30 = vpop.f32.mrf.mxu0  ;;  %v5651_v23 = vpop.f32.mrf.mxu1 }
 0xa0b   : > { %v5632_v7 = vadd.f32 %v5631_v30, %v5602_v10 }
 0xa0d   : > { %v5652_v39 = vadd.f32 %v5651_v23, %v5632_v7 }
 0xa11   : > { %v5671_v35 = vpop.f32.mrf.mxu2  ;;  %v5691_v13 = vpop.f32.mrf.mxu3 }
 0xa12   : > { %v5672_v6 = vadd.f32 %v5671_v35, %v5652_v39  ;;  %v5711_v14 = vpop.f32.mrf.mxu0 }
 0xa14   : > { %v5692_v3 = vadd.f32 %v5691_v13, %v5672_v6 }
 0xa16   : > { %v5712_v21 = vadd.f32 %v5711_v14, %v5692_v3 }
 0xa18   : > { %v5714_v59 = vmax.f32 %v5712_v21, 0.0 }
 0xa1a   : > { %5748 = vmatmul.f32.vlgmr.msra.gmra.mxu1 %v5714_v59 }
 0xa97   : > { %v5749_v58 = vpop.f32.mrf.mxu1 }
 0xa98   : > { %v5750_v50 = vadd.f32 %v5749_v58, %v5731_v62 }
 0xa9a   : > { %v5752_v56 = vmax.f32 %v5750_v50, 0.0 }
 0xa9c   : > { %5786 = vmatmul.f32.vlgmr.msra.gmra.mxu2 %v5752_v56 }
 0xb1f   : > { %v5787_v26 = vpop.f32.mrf.mxu2 }
 0xb20   : > { %v5788_v37 = vadd.f32 %v5787_v26, %v5769_v53 }
 0xb22   : > { %5790 = vst [vmem:[%s486_s18] sm:$0x1] %v5788_v37 }
 0xb23   : > { %6297 = shalt.err (!%p6294_p3)
}
 0xb24   : > { %6191 = dma.vmem_to_hbm [thread:$0]  (%p6460_p5), %s5803_s1, 16, %s5805_s21, %s5792_s20  }
 0xb25 PF: > { %s10883_s24 = sld [smem:[#allocation11_spill]] }
 0xb26   : > { %s10884_s29 = sld [smem:[#allocation9_spill]] }
 0xb2b   : > { %p6197_p4 = scmp.ge.s32.totalorder %s10883_s24, 2 }
 0xb2c   : > { %s5816_s16 = sand.u32 1, %s10884_s29  }
 0xb2d   : > { %p6194_p7 = pnand %p6197_p4, %p6464_p6  ;;  %s5817_s14 = scalar_lea.sflag [#allocation7], %s5816_s16 }
 0xb2f   : > { %p6195_p8 = pneg %p6194_p7 }
 0xb31   : > { %6315 = dma.done.wait (%p6195_p8), %s5817_s14, 16  }
 0xb32   : > { %6317 = vsyncadd (%p6195_p8), %s5817_s14, 4294967280  ;;  %s10886_s21 = sld [smem:[#allocation12_spill]]  ;;  %s10889_s18 = smov %s6324_s19 }
 0xb33   : > { %s10887_s30 = sld [smem:[#allocation10_spill]] }
 0xb34   : > { %s10888_s20 = sld [smem:[#allocation13_spill]] }
 0xb38   : > { %p25_p9 = scmp.ge.s32.totalorder %s10886_s21, 4  }
 0xb39   : > { %s10890_s19 = smov %s10887_s30 }
 0xb3a   :  { %27 = sbr.rel (!%p25_p9) target bundleno = 7 (0x7), region = 156 }
 0xb3f   :  { %5822 = vsyncpa [#allocation7], 1 }
 0xb40   :  { %5824 = vsyncpa [#allocation7 + $0x1], 1 }

</bundles_post_ra>
